<compile_context>
chip_gen: v7x
topology: tpu7x:2x2x1
jax: 0.10.0
libtpu: 0.0.40
codegen_flags: <defaults>
</compile_context>

<pallas_src>
import functools

import numpy as np

import jax
import jax.numpy as jnp
from jax.experimental import pallas as pl
from jax.experimental.pallas import tpu as pltpu


def _round_up(v, m):
  return ((v + m - 1) // m) * m


# Tap order matches the packed-weight layout: index = (dd+1)*9 + (dh+1)*3 + (dw+1).
_TAPS = [(dd, dh, dw) for dd in (-1, 0, 1) for dh in (-1, 0, 1) for dw in (-1, 0, 1)]


def _border_predicates(D, H, W):
  """(8, D*H*W) f32; rows 0..5 = [d>=1, d<=D-2, h>=1, h<=H-2, w>=1, w<=W-2].

  The per-tap pad-1 halo mask factorizes as a product of <=3 of these rows,
  so only 6 S-length rows (not 27) ever leave HBM."""
  s = np.arange(D * H * W)
  d, h, w = s // (H * W), (s // W) % H, s % W
  rows = np.zeros((8, D * H * W), np.float32)
  rows[0] = d >= 1
  rows[1] = d <= D - 2
  rows[2] = h >= 1
  rows[3] = h <= H - 2
  rows[4] = w >= 1
  rows[5] = w <= W - 2
  return rows


def _pack_weights(w1, w2, cp, dtype):
  """Both conv weights coalesced into one (2*27, Cp, Cp) block.

  Page index = conv*27 + tap (tap order = _TAPS); each page is W_t[co, ci]
  zero-padded to (Cp, Cp) so padded input/activation rows contribute nothing."""
  def pack(w):
    co, ci = int(w.shape[0]), int(w.shape[1])
    wt = jnp.transpose(w.astype(jnp.float32), (2, 3, 4, 0, 1)).reshape(27, co, ci)
    return jnp.pad(wt, ((0, 0), (0, cp - co), (0, cp - ci)))
  return jnp.concatenate([pack(w1), pack(w2)], axis=0).astype(dtype)


# ------------------------------ Pallas kernel ------------------------------- #

def _double_conv3d_kernel(x_ref, w_ref, b_ref, m_ref, o_ref, xpad_ref,
                          *, D, H, W, Cin, Cout, batch_tile, mxu_dtype):
  """Fused conv3d(3^3, p=1) -> conv3d(3^3, p=1) for `batch_tile` volumes.

  x_ref  : (batch_tile, Cin, S)  unpadded input, spatial flattened to S=D*H*W
  w_ref  : (54, Cp, Cp)          per-tap weights, [conv*27 + tap] pages
  b_ref  : (Cp, 2)               column 0 = bias1, column 1 = bias2
  m_ref  : (8, S)                6 factored boundary predicates (pad-1 halo)
  o_ref  : (batch_tile, Cout, S) output
  xpad   : (Cp, S)               VMEM scratch for the channel-padded input
  """
  S = D * H * W
  HW = H * W

  # Hoisted boundary predicates (shared by every tap, both convs, all batches).
  d_pred = {-1: m_ref[0:1, :], 0: None, 1: m_ref[1:2, :]}
  h_pred = {-1: m_ref[2:3, :], 0: None, 1: m_ref[3:4, :]}
  w_pred = {-1: m_ref[4:5, :], 0: None, 1: m_ref[5:6, :]}

  def conv3d(x, conv_idx):
    """x: (Cp, S) f32, padded rows are zero.  Returns (Cp, S) f32 (+ bias)."""
    acc = None
    for t, (dd, dh, dw) in enumerate(_TAPS):
      off = dd * HW + dh * W + dw
      # Single XLU lane rotation brings tap (dd,dh,dw) under the output position.
      xs = x if off == 0 else pltpu.roll(x, shift=(-off) % S, axis=1)
      # pad-1 halo: zero taps whose shifted coordinate leaves the volume
      # (also kills the roll wrap-around).  Product of <=3 factored predicates.
      mask = None
      for p in (d_pred[dd], h_pred[dh], w_pred[dw]):
        if p is not None:
          mask = p if mask is None else mask * p
      if mask is not None:
        xs = xs * mask                                   # (Cp,S) * (1,S)
      # Per-tap accumulated matmul; tap never touches VMEM (no im2col slab).
      contrib = jnp.dot(w_ref[conv_idx * 27 + t], xs.astype(mxu_dtype),
                        preferred_element_type=jnp.float32)
      acc = contrib if acc is None else acc + contrib
    return acc + b_ref[:, conv_idx:conv_idx + 1]         # bias (lane broadcast)

  # Zero the channel-pad rows once; rows Cin..Cp stay zero for every batch.
  xpad_ref[...] = jnp.zeros_like(xpad_ref)
  for b in range(batch_tile):
    xpad_ref[0:Cin, :] = x_ref[b]          # in-kernel channel pad (no HBM pad)
    y1 = conv3d(xpad_ref[...], 0)          # conv1 + bias1 (stays in vregs/VMEM)
    y2 = conv3d(y1, 1)                     # conv2 + bias2
    o_ref[b] = y2[0:Cout, :].astype(o_ref.dtype)


# --------------------------------- wrapper ----------------------------------- #

@functools.partial(jax.jit, static_argnames=("batch_tile", "mxu_dtype"))
def double_conv_forward(x, w1, b1, w2, b2, *, batch_tile=None,
                        mxu_dtype=jnp.float32):
  """DoubleConv forward: Conv3d(3, p=1, s=1) -> Conv3d(3, p=1, s=1); NCDHW in/out.

  batch_tile: batch elements per grid step.  None/N => one grid step (best on
    single-TC v5e/v6e); 1 => grid=(N,) "parallel" for v7x megacore.
  mxu_dtype:  MXU operand dtype.  float32 matches the PyTorch module; bfloat16
    is the native fast path on v6e/v7x (accumulation always f32).
  """
  N, Cin, D, H, W = x.shape
  Cout = w1.shape[0]
  S = D * H * W
  Cp = max(_round_up(Cin, 8), _round_up(Cout, 8))
  if batch_tile is None:
    batch_tile = N
  assert N % batch_tile == 0, (N, batch_tile)

  x_flat = x.astype(jnp.float32).reshape(N, Cin, S)      # free reshape, no pad
  w_all = _pack_weights(w1, w2, Cp, mxu_dtype)           # (54, Cp, Cp)
  b_all = jnp.stack([jnp.pad(b1.astype(jnp.float32), (0, Cp - Cout)),
                     jnp.pad(b2.astype(jnp.float32), (0, Cp - Cout))], axis=1)
  preds = jnp.asarray(_border_predicates(D, H, W))       # (8, S)

  flops = int(2 * 27 * S * N * (Cout * Cin + Cout * Cout))
  bytes_accessed = int(x_flat.size * 4 + N * Cout * S * 4
                       + w_all.size * jnp.dtype(mxu_dtype).itemsize
                       + b_all.size * 4 + preds.size * 4)

  kernel = functools.partial(
      _double_conv3d_kernel, D=D, H=H, W=W, Cin=Cin, Cout=Cout,
      batch_tile=batch_tile, mxu_dtype=mxu_dtype)

  out_flat = pl.pallas_call(
      kernel,
      out_shape=jax.ShapeDtypeStruct((N, Cout, S), jnp.float32),
      grid=(N // batch_tile,),
      in_specs=[
          pl.BlockSpec((batch_tile, Cin, S), lambda i: (i, 0, 0)),
          pl.BlockSpec((2 * 27, Cp, Cp), lambda i: (0, 0, 0)),
          pl.BlockSpec((Cp, 2), lambda i: (0, 0)),
          pl.BlockSpec((8, S), lambda i: (0, 0)),
      ],
      out_specs=pl.BlockSpec((batch_tile, Cout, S), lambda i: (i, 0, 0)),
      scratch_shapes=[pltpu.VMEM((Cp, S), jnp.float32)],
      compiler_params=pltpu.CompilerParams(
          dimension_semantics=("parallel",)),
      cost_estimate=pl.CostEstimate(flops=flops, transcendentals=0,
                                    bytes_accessed=bytes_accessed),
  )(x_flat, w_all, b_all, preds)

  return out_flat.reshape(N, Cout, D, H, W)


# ----------------------------- pure-JAX reference ---------------------------- #

def double_conv_reference(x, w1, b1, w2, b2):
  def conv(inp, w, b):
    y = jax.lax.conv_general_dilated(
        inp.astype(jnp.float32), w.astype(jnp.float32),
        window_strides=(1, 1, 1), padding=((1, 1), (1, 1), (1, 1)),
        dimension_numbers=("NCDHW", "OIDHW", "NCDHW"))
    return y + b.reshape(1, -1, 1, 1, 1)
  return conv(conv(x, w1, b1), w2, b2)


# ------------------------------------ main ----------------------------------- #

if __name__ == "__main__":
  key = jax.random.PRNGKey(0)
  k_x, k_w1, k_b1, k_w2, k_b2 = jax.random.split(key, 5)

  N, Cin, Cout, D, H, W = 2, 4, 8, 8, 8, 8

  x = jax.random.normal(k_x, (N, Cin, D, H, W), dtype=jnp.float32)
  w1 = jax.random.normal(k_w1, (Cout, Cin, 3, 3, 3), dtype=jnp.float32) * 0.1
  b1 = jax.random.normal(k_b1, (Cout,), dtype=jnp.float32) * 0.1
  w2 = jax.random.normal(k_w2, (Cout, Cout, 3, 3, 3), dtype=jnp.float32) * 0.1
  b2 = jax.random.normal(k_b2, (Cout,), dtype=jnp.float32) * 0.1

  ref = jax.block_until_ready(double_conv_reference(x, w1, b1, w2, b2))

  # Default path: whole batch in one grid step (v5e/v6e single-TC friendly).
  out = jax.block_until_ready(double_conv_forward(x, w1, b1, w2, b2))
  assert out.shape == (N, Cout, D, H, W), out.shape
  if not jnp.allclose(out, ref, rtol=1e-4, atol=2e-4):
    max_err = float(jnp.max(jnp.abs(out - ref)))
    raise AssertionError(f"Pallas DoubleConv mismatch, max_abs_err={max_err}")

  # v7x megacore path: one batch element per (parallel) grid step.
  out_mc = jax.block_until_ready(
      double_conv_forward(x, w1, b1, w2, b2, batch_tile=1))
  if not jnp.allclose(out_mc, ref, rtol=1e-4, atol=2e-4):
    max_err = float(jnp.max(jnp.abs(out_mc - ref)))
    raise AssertionError(f"Pallas DoubleConv (batch_tile=1) mismatch, "
                         f"max_abs_err={max_err}")

  print("KERNEL_OK")
</pallas_src>

<mosaic_0001>
module attributes {stable_mosaic.version = 11 : i64} {
  func.func @_double_conv3d_kernel(%arg0: i32, %arg1: memref<2x4x512xf32, #tpu.memory_space<vmem>>, %arg2: memref<54x8x8xf32, #tpu.memory_space<vmem>>, %arg3: memref<8x2xf32, #tpu.memory_space<vmem>>, %arg4: memref<8x512xf32, #tpu.memory_space<vmem>>, %arg5: memref<2x8x512xf32, #tpu.memory_space<vmem>>, %arg6: memref<8x512xf32, #tpu.memory_space<vmem>>) attributes {dimension_semantics = [#tpu.dimension_semantics<parallel>], iteration_bounds = array<i64: 1>, scalar_prefetch = 0 : i64, scratch_operands = 1 : i64, tpu.core_type = #tpu.core_type<tc>, window_params = [{transform_indices = @transform_0, window_bounds = array<i64: 2, 4, 512>}, {pipeline_mode = #tpu.pipeline_mode<synchronous>, transform_indices = @transform_1, window_bounds = array<i64: 54, 8, 8>}, {pipeline_mode = #tpu.pipeline_mode<synchronous>, transform_indices = @transform_2, window_bounds = array<i64: 8, 2>}, {pipeline_mode = #tpu.pipeline_mode<synchronous>, transform_indices = @transform_3, window_bounds = array<i64: 8, 512>}, {transform_indices = @transform_4, window_bounds = array<i64: 2, 8, 512>}]} {
    %c0 = arith.constant 0 : index
    %c0_0 = arith.constant 0 : index
    %0 = vector.load %arg4[%c0, %c0_0] : memref<8x512xf32, #tpu.memory_space<vmem>>, vector<1x512xf32>
    %c1 = arith.constant 1 : index
    %c0_1 = arith.constant 0 : index
    %1 = vector.load %arg4[%c1, %c0_1] : memref<8x512xf32, #tpu.memory_space<vmem>>, vector<1x512xf32>
    %c2 = arith.constant 2 : index
    %c0_2 = arith.constant 0 : index
    %2 = vector.load %arg4[%c2, %c0_2] : memref<8x512xf32, #tpu.memory_space<vmem>>, vector<1x512xf32>
    %c3 = arith.constant 3 : index
    %c0_3 = arith.constant 0 : index
    %3 = vector.load %arg4[%c3, %c0_3] : memref<8x512xf32, #tpu.memory_space<vmem>>, vector<1x512xf32>
    %c4 = arith.constant 4 : index
    %c0_4 = arith.constant 0 : index
    %4 = vector.load %arg4[%c4, %c0_4] : memref<8x512xf32, #tpu.memory_space<vmem>>, vector<1x512xf32>
    %c5 = arith.constant 5 : index
    %c0_5 = arith.constant 0 : index
    %5 = vector.load %arg4[%c5, %c0_5] : memref<8x512xf32, #tpu.memory_space<vmem>>, vector<1x512xf32>
    %cst = arith.constant 0.000000e+00 : f32
    %6 = vector.broadcast %cst : f32 to vector<8x512xf32>
    %c0_6 = arith.constant 0 : index
    %c0_7 = arith.constant 0 : index
    %7 = vector.load %arg6[%c0_6, %c0_7] : memref<8x512xf32, #tpu.memory_space<vmem>>, vector<8x512xf32>
    tpu.vector_store %arg6[%c0_6, %c0_7], %6 {strides = array<i32>} : memref<8x512xf32, #tpu.memory_space<vmem>>, vector<8x512xf32>,
    %c0_8 = arith.constant 0 : index
    %c0_9 = arith.constant 0 : index
    %c0_10 = arith.constant 0 : index
    %8 = vector.load %arg1[%c0_8, %c0_9, %c0_10] : memref<2x4x512xf32, #tpu.memory_space<vmem>>, vector<1x4x512xf32>
    %9 = vector.shape_cast %8 : vector<1x4x512xf32> to vector<4x512xf32>
    %c0_11 = arith.constant 0 : index
    %c0_12 = arith.constant 0 : index
    %10 = vector.load %arg6[%c0_11, %c0_12] : memref<8x512xf32, #tpu.memory_space<vmem>>, vector<4x512xf32>
    tpu.vector_store %arg6[%c0_11, %c0_12], %9 {strides = array<i32>} : memref<8x512xf32, #tpu.memory_space<vmem>>, vector<4x512xf32>,
    %c0_13 = arith.constant 0 : index
    %c0_14 = arith.constant 0 : index
    %11 = vector.load %arg6[%c0_13, %c0_14] : memref<8x512xf32, #tpu.memory_space<vmem>>, vector<8x512xf32>
    %c73_i32 = arith.constant 73 : i32
    %12 = tpu.dynamic_rotate %11 by %c73_i32 dim 1 : vector<8x512xf32>, i32 -> vector<8x512xf32>
    %13 = arith.mulf %0, %2 : vector<1x512xf32>
    %14 = arith.mulf %13, %4 : vector<1x512xf32>
    %15 = vector.broadcast %14 : vector<1x512xf32> to vector<8x512xf32>
    %16 = arith.mulf %12, %15 : vector<8x512xf32>
    %c0_15 = arith.constant 0 : index
    %c0_16 = arith.constant 0 : index
    %c0_17 = arith.constant 0 : index
    %17 = vector.load %arg2[%c0_15, %c0_16, %c0_17] : memref<54x8x8xf32, #tpu.memory_space<vmem>>, vector<1x8x8xf32>
    %18 = vector.shape_cast %17 : vector<1x8x8xf32> to vector<8x8xf32>
    %cst_18 = arith.constant dense<0.000000e+00> : vector<8x512xf32>
    %19 = tpu.matmul %18, %16, %cst_18 {dimension_numbers = #tpu.dot_dimension_numbers<[1], [0], [0], [1], [0, 0, 1, 1], [], []>} : vector<8x8xf32>, vector<8x512xf32>, vector<8x512xf32> -> vector<8x512xf32>
    %c72_i32 = arith.constant 72 : i32
    %20 = tpu.dynamic_rotate %11 by %c72_i32 dim 1 : vector<8x512xf32>, i32 -> vector<8x512xf32>
    %21 = arith.mulf %0, %2 : vector<1x512xf32>
    %22 = vector.broadcast %21 : vector<1x512xf32> to vector<8x512xf32>
    %23 = arith.mulf %20, %22 : vector<8x512xf32>
    %c1_19 = arith.constant 1 : index
    %c0_20 = arith.constant 0 : index
    %c0_21 = arith.constant 0 : index
    %24 = vector.load %arg2[%c1_19, %c0_20, %c0_21] : memref<54x8x8xf32, #tpu.memory_space<vmem>>, vector<1x8x8xf32>
    %25 = vector.shape_cast %24 : vector<1x8x8xf32> to vector<8x8xf32>
    %cst_22 = arith.constant dense<0.000000e+00> : vector<8x512xf32>
    %26 = tpu.matmul %25, %23, %cst_22 {dimension_numbers = #tpu.dot_dimension_numbers<[1], [0], [0], [1], [0, 0, 1, 1], [], []>} : vector<8x8xf32>, vector<8x512xf32>, vector<8x512xf32> -> vector<8x512xf32>
    %27 = arith.addf %19, %26 : vector<8x512xf32>
    %c71_i32 = arith.constant 71 : i32
    %28 = tpu.dynamic_rotate %11 by %c71_i32 dim 1 : vector<8x512xf32>, i32 -> vector<8x512xf32>
    %29 = arith.mulf %0, %2 : vector<1x512xf32>
    %30 = arith.mulf %29, %5 : vector<1x512xf32>
    %31 = vector.broadcast %30 : vector<1x512xf32> to vector<8x512xf32>
    %32 = arith.mulf %28, %31 : vector<8x512xf32>
    %c2_23 = arith.constant 2 : index
    %c0_24 = arith.constant 0 : index
    %c0_25 = arith.constant 0 : index
    %33 = vector.load %arg2[%c2_23, %c0_24, %c0_25] : memref<54x8x8xf32, #tpu.memory_space<vmem>>, vector<1x8x8xf32>
    %34 = vector.shape_cast %33 : vector<1x8x8xf32> to vector<8x8xf32>
    %cst_26 = arith.constant dense<0.000000e+00> : vector<8x512xf32>
    %35 = tpu.matmul %34, %32, %cst_26 {dimension_numbers = #tpu.dot_dimension_numbers<[1], [0], [0], [1], [0, 0, 1, 1], [], []>} : vector<8x8xf32>, vector<8x512xf32>, vector<8x512xf32> -> vector<8x512xf32>
    %36 = arith.addf %27, %35 : vector<8x512xf32>
    %c65_i32 = arith.constant 65 : i32
    %37 = tpu.dynamic_rotate %11 by %c65_i32 dim 1 : vector<8x512xf32>, i32 -> vector<8x512xf32>
    %38 = arith.mulf %0, %4 : vector<1x512xf32>
    %39 = vector.broadcast %38 : vector<1x512xf32> to vector<8x512xf32>
    %40 = arith.mulf %37, %39 : vector<8x512xf32>
    %c3_27 = arith.constant 3 : index
    %c0_28 = arith.constant 0 : index
    %c0_29 = arith.constant 0 : index
    %41 = vector.load %arg2[%c3_27, %c0_28, %c0_29] : memref<54x8x8xf32, #tpu.memory_space<vmem>>, vector<1x8x8xf32>
    %42 = vector.shape_cast %41 : vector<1x8x8xf32> to vector<8x8xf32>
    %cst_30 = arith.constant dense<0.000000e+00> : vector<8x512xf32>
    %43 = tpu.matmul %42, %40, %cst_30 {dimension_numbers = #tpu.dot_dimension_numbers<[1], [0], [0], [1], [0, 0, 1, 1], [], []>} : vector<8x8xf32>, vector<8x512xf32>, vector<8x512xf32> -> vector<8x512xf32>
    %44 = arith.addf %36, %43 : vector<8x512xf32>
    %c64_i32 = arith.constant 64 : i32
    %45 = tpu.dynamic_rotate %11 by %c64_i32 dim 1 : vector<8x512xf32>, i32 -> vector<8x512xf32>
    %46 = vector.broadcast %0 : vector<1x512xf32> to vector<8x512xf32>
    %47 = arith.mulf %45, %46 : vector<8x512xf32>
    %c4_31 = arith.constant 4 : index
    %c0_32 = arith.constant 0 : index
    %c0_33 = arith.constant 0 : index
    %48 = vector.load %arg2[%c4_31, %c0_32, %c0_33] : memref<54x8x8xf32, #tpu.memory_space<vmem>>, vector<1x8x8xf32>
    %49 = vector.shape_cast %48 : vector<1x8x8xf32> to vector<8x8xf32>
    %cst_34 = arith.constant dense<0.000000e+00> : vector<8x512xf32>
    %50 = tpu.matmul %49, %47, %cst_34 {dimension_numbers = #tpu.dot_dimension_numbers<[1], [0], [0], [1], [0, 0, 1, 1], [], []>} : vector<8x8xf32>, vector<8x512xf32>, vector<8x512xf32> -> vector<8x512xf32>
    %51 = arith.addf %44, %50 : vector<8x512xf32>
    %c63_i32 = arith.constant 63 : i32
    %52 = tpu.dynamic_rotate %11 by %c63_i32 dim 1 : vector<8x512xf32>, i32 -> vector<8x512xf32>
    %53 = arith.mulf %0, %5 : vector<1x512xf32>
    %54 = vector.broadcast %53 : vector<1x512xf32> to vector<8x512xf32>
    %55 = arith.mulf %52, %54 : vector<8x512xf32>
    %c5_35 = arith.constant 5 : index
    %c0_36 = arith.constant 0 : index
    %c0_37 = arith.constant 0 : index
    %56 = vector.load %arg2[%c5_35, %c0_36, %c0_37] : memref<54x8x8xf32, #tpu.memory_space<vmem>>, vector<1x8x8xf32>
    %57 = vector.shape_cast %56 : vector<1x8x8xf32> to vector<8x8xf32>
    %cst_38 = arith.constant dense<0.000000e+00> : vector<8x512xf32>
    %58 = tpu.matmul %57, %55, %cst_38 {dimension_numbers = #tpu.dot_dimension_numbers<[1], [0], [0], [1], [0, 0, 1, 1], [], []>} : vector<8x8xf32>, vector<8x512xf32>, vector<8x512xf32> -> vector<8x512xf32>
    %59 = arith.addf %51, %58 : vector<8x512xf32>
    %c57_i32 = arith.constant 57 : i32
    %60 = tpu.dynamic_rotate %11 by %c57_i32 dim 1 : vector<8x512xf32>, i32 -> vector<8x512xf32>
    %61 = arith.mulf %0, %3 : vector<1x512xf32>
    %62 = arith.mulf %61, %4 : vector<1x512xf32>
    %63 = vector.broadcast %62 : vector<1x512xf32> to vector<8x512xf32>
    %64 = arith.mulf %60, %63 : vector<8x512xf32>
    %c6 = arith.constant 6 : index
    %c0_39 = arith.constant 0 : index
    %c0_40 = arith.constant 0 : index
    %65 = vector.load %arg2[%c6, %c0_39, %c0_40] : memref<54x8x8xf32, #tpu.memory_space<vmem>>, vector<1x8x8xf32>
    %66 = vector.shape_cast %65 : vector<1x8x8xf32> to vector<8x8xf32>
    %cst_41 = arith.constant dense<0.000000e+00> : vector<8x512xf32>
    %67 = tpu.matmul %66, %64, %cst_41 {dimension_numbers = #tpu.dot_dimension_numbers<[1], [0], [0], [1], [0, 0, 1, 1], [], []>} : vector<8x8xf32>, vector<8x512xf32>, vector<8x512xf32> -> vector<8x512xf32>
    %68 = arith.addf %59, %67 : vector<8x512xf32>
    %c56_i32 = arith.constant 56 : i32
    %69 = tpu.dynamic_rotate %11 by %c56_i32 dim 1 : vector<8x512xf32>, i32 -> vector<8x512xf32>
    %70 = arith.mulf %0, %3 : vector<1x512xf32>
    %71 = vector.broadcast %70 : vector<1x512xf32> to vector<8x512xf32>
    %72 = arith.mulf %69, %71 : vector<8x512xf32>
    %c7 = arith.constant 7 : index
    %c0_42 = arith.constant 0 : index
    %c0_43 = arith.constant 0 : index
    %73 = vector.load %arg2[%c7, %c0_42, %c0_43] : memref<54x8x8xf32, #tpu.memory_space<vmem>>, vector<1x8x8xf32>
    %74 = vector.shape_cast %73 : vector<1x8x8xf32> to vector<8x8xf32>
    %cst_44 = arith.constant dense<0.000000e+00> : vector<8x512xf32>
    %75 = tpu.matmul %74, %72, %cst_44 {dimension_numbers = #tpu.dot_dimension_numbers<[1], [0], [0], [1], [0, 0, 1, 1], [], []>} : vector<8x8xf32>, vector<8x512xf32>, vector<8x512xf32> -> vector<8x512xf32>
    %76 = arith.addf %68, %75 : vector<8x512xf32>
    %c55_i32 = arith.constant 55 : i32
    %77 = tpu.dynamic_rotate %11 by %c55_i32 dim 1 : vector<8x512xf32>, i32 -> vector<8x512xf32>
    %78 = arith.mulf %0, %3 : vector<1x512xf32>
    %79 = arith.mulf %78, %5 : vector<1x512xf32>
    %80 = vector.broadcast %79 : vector<1x512xf32> to vector<8x512xf32>
    %81 = arith.mulf %77, %80 : vector<8x512xf32>
    %c8 = arith.constant 8 : index
    %c0_45 = arith.constant 0 : index
    %c0_46 = arith.constant 0 : index
    %82 = vector.load %arg2[%c8, %c0_45, %c0_46] : memref<54x8x8xf32, #tpu.memory_space<vmem>>, vector<1x8x8xf32>
    %83 = vector.shape_cast %82 : vector<1x8x8xf32> to vector<8x8xf32>
    %cst_47 = arith.constant dense<0.000000e+00> : vector<8x512xf32>
    %84 = tpu.matmul %83, %81, %cst_47 {dimension_numbers = #tpu.dot_dimension_numbers<[1], [0], [0], [1], [0, 0, 1, 1], [], []>} : vector<8x8xf32>, vector<8x512xf32>, vector<8x512xf32> -> vector<8x512xf32>
    %85 = arith.addf %76, %84 : vector<8x512xf32>
    %c9_i32 = arith.constant 9 : i32
    %86 = tpu.dynamic_rotate %11 by %c9_i32 dim 1 : vector<8x512xf32>, i32 -> vector<8x512xf32>
    %87 = arith.mulf %2, %4 : vector<1x512xf32>
    %88 = vector.broadcast %87 : vector<1x512xf32> to vector<8x512xf32>
    %89 = arith.mulf %86, %88 : vector<8x512xf32>
    %c9 = arith.constant 9 : index
    %c0_48 = arith.constant 0 : index
    %c0_49 = arith.constant 0 : index
    %90 = vector.load %arg2[%c9, %c0_48, %c0_49] : memref<54x8x8xf32, #tpu.memory_space<vmem>>, vector<1x8x8xf32>
    %91 = vector.shape_cast %90 : vector<1x8x8xf32> to vector<8x8xf32>
    %cst_50 = arith.constant dense<0.000000e+00> : vector<8x512xf32>
    %92 = tpu.matmul %91, %89, %cst_50 {dimension_numbers = #tpu.dot_dimension_numbers<[1], [0], [0], [1], [0, 0, 1, 1], [], []>} : vector<8x8xf32>, vector<8x512xf32>, vector<8x512xf32> -> vector<8x512xf32>
    %93 = arith.addf %85, %92 : vector<8x512xf32>
    %c8_i32 = arith.constant 8 : i32
    %94 = tpu.dynamic_rotate %11 by %c8_i32 dim 1 : vector<8x512xf32>, i32 -> vector<8x512xf32>
    %95 = vector.broadcast %2 : vector<1x512xf32> to vector<8x512xf32>
    %96 = arith.mulf %94, %95 : vector<8x512xf32>
    %c10 = arith.constant 10 : index
    %c0_51 = arith.constant 0 : index
    %c0_52 = arith.constant 0 : index
    %97 = vector.load %arg2[%c10, %c0_51, %c0_52] : memref<54x8x8xf32, #tpu.memory_space<vmem>>, vector<1x8x8xf32>
    %98 = vector.shape_cast %97 : vector<1x8x8xf32> to vector<8x8xf32>
    %cst_53 = arith.constant dense<0.000000e+00> : vector<8x512xf32>
    %99 = tpu.matmul %98, %96, %cst_53 {dimension_numbers = #tpu.dot_dimension_numbers<[1], [0], [0], [1], [0, 0, 1, 1], [], []>} : vector<8x8xf32>, vector<8x512xf32>, vector<8x512xf32> -> vector<8x512xf32>
    %100 = arith.addf %93, %99 : vector<8x512xf32>
    %c7_i32 = arith.constant 7 : i32
    %101 = tpu.dynamic_rotate %11 by %c7_i32 dim 1 : vector<8x512xf32>, i32 -> vector<8x512xf32>
    %102 = arith.mulf %2, %5 : vector<1x512xf32>
    %103 = vector.broadcast %102 : vector<1x512xf32> to vector<8x512xf32>
    %104 = arith.mulf %101, %103 : vector<8x512xf32>
    %c11 = arith.constant 11 : index
    %c0_54 = arith.constant 0 : index
    %c0_55 = arith.constant 0 : index
    %105 = vector.load %arg2[%c11, %c0_54, %c0_55] : memref<54x8x8xf32, #tpu.memory_space<vmem>>, vector<1x8x8xf32>
    %106 = vector.shape_cast %105 : vector<1x8x8xf32> to vector<8x8xf32>
    %cst_56 = arith.constant dense<0.000000e+00> : vector<8x512xf32>
    %107 = tpu.matmul %106, %104, %cst_56 {dimension_numbers = #tpu.dot_dimension_numbers<[1], [0], [0], [1], [0, 0, 1, 1], [], []>} : vector<8x8xf32>, vector<8x512xf32>, vector<8x512xf32> -> vector<8x512xf32>
    %108 = arith.addf %100, %107 : vector<8x512xf32>
    %c1_i32 = arith.constant 1 : i32
    %109 = tpu.dynamic_rotate %11 by %c1_i32 dim 1 : vector<8x512xf32>, i32 -> vector<8x512xf32>
    %110 = vector.broadcast %4 : vector<1x512xf32> to vector<8x512xf32>
    %111 = arith.mulf %109, %110 : vector<8x512xf32>
    %c12 = arith.constant 12 : index
    %c0_57 = arith.constant 0 : index
    %c0_58 = arith.constant 0 : index
    %112 = vector.load %arg2[%c12, %c0_57, %c0_58] : memref<54x8x8xf32, #tpu.memory_space<vmem>>, vector<1x8x8xf32>
    %113 = vector.shape_cast %112 : vector<1x8x8xf32> to vector<8x8xf32>
    %cst_59 = arith.constant dense<0.000000e+00> : vector<8x512xf32>
    %114 = tpu.matmul %113, %111, %cst_59 {dimension_numbers = #tpu.dot_dimension_numbers<[1], [0], [0], [1], [0, 0, 1, 1], [], []>} : vector<8x8xf32>, vector<8x512xf32>, vector<8x512xf32> -> vector<8x512xf32>
    %115 = arith.addf %108, %114 : vector<8x512xf32>
    %c13 = arith.constant 13 : index
    %c0_60 = arith.constant 0 : index
    %c0_61 = arith.constant 0 : index
    %116 = vector.load %arg2[%c13, %c0_60, %c0_61] : memref<54x8x8xf32, #tpu.memory_space<vmem>>, vector<1x8x8xf32>
    %117 = vector.shape_cast %116 : vector<1x8x8xf32> to vector<8x8xf32>
    %cst_62 = arith.constant dense<0.000000e+00> : vector<8x512xf32>
    %118 = tpu.matmul %117, %11, %cst_62 {dimension_numbers = #tpu.dot_dimension_numbers<[1], [0], [0], [1], [0, 0, 1, 1], [], []>} : vector<8x8xf32>, vector<8x512xf32>, vector<8x512xf32> -> vector<8x512xf32>
    %119 = arith.addf %115, %118 : vector<8x512xf32>
    %c511_i32 = arith.constant 511 : i32
    %120 = tpu.dynamic_rotate %11 by %c511_i32 dim 1 : vector<8x512xf32>, i32 -> vector<8x512xf32>
    %121 = vector.broadcast %5 : vector<1x512xf32> to vector<8x512xf32>
    %122 = arith.mulf %120, %121 : vector<8x512xf32>
    %c14 = arith.constant 14 : index
    %c0_63 = arith.constant 0 : index
    %c0_64 = arith.constant 0 : index
    %123 = vector.load %arg2[%c14, %c0_63, %c0_64] : memref<54x8x8xf32, #tpu.memory_space<vmem>>, vector<1x8x8xf32>
    %124 = vector.shape_cast %123 : vector<1x8x8xf32> to vector<8x8xf32>
    %cst_65 = arith.constant dense<0.000000e+00> : vector<8x512xf32>
    %125 = tpu.matmul %124, %122, %cst_65 {dimension_numbers = #tpu.dot_dimension_numbers<[1], [0], [0], [1], [0, 0, 1, 1], [], []>} : vector<8x8xf32>, vector<8x512xf32>, vector<8x512xf32> -> vector<8x512xf32>
    %126 = arith.addf %119, %125 : vector<8x512xf32>
    %c505_i32 = arith.constant 505 : i32
    %127 = tpu.dynamic_rotate %11 by %c505_i32 dim 1 : vector<8x512xf32>, i32 -> vector<8x512xf32>
    %128 = arith.mulf %3, %4 : vector<1x512xf32>
    %129 = vector.broadcast %128 : vector<1x512xf32> to vector<8x512xf32>
    %130 = arith.mulf %127, %129 : vector<8x512xf32>
    %c15 = arith.constant 15 : index
    %c0_66 = arith.constant 0 : index
    %c0_67 = arith.constant 0 : index
    %131 = vector.load %arg2[%c15, %c0_66, %c0_67] : memref<54x8x8xf32, #tpu.memory_space<vmem>>, vector<1x8x8xf32>
    %132 = vector.shape_cast %131 : vector<1x8x8xf32> to vector<8x8xf32>
    %cst_68 = arith.constant dense<0.000000e+00> : vector<8x512xf32>
    %133 = tpu.matmul %132, %130, %cst_68 {dimension_numbers = #tpu.dot_dimension_numbers<[1], [0], [0], [1], [0, 0, 1, 1], [], []>} : vector<8x8xf32>, vector<8x512xf32>, vector<8x512xf32> -> vector<8x512xf32>
    %134 = arith.addf %126, %133 : vector<8x512xf32>
    %c504_i32 = arith.constant 504 : i32
    %135 = tpu.dynamic_rotate %11 by %c504_i32 dim 1 : vector<8x512xf32>, i32 -> vector<8x512xf32>
    %136 = vector.broadcast %3 : vector<1x512xf32> to vector<8x512xf32>
    %137 = arith.mulf %135, %136 : vector<8x512xf32>
    %c16 = arith.constant 16 : index
    %c0_69 = arith.constant 0 : index
    %c0_70 = arith.constant 0 : index
    %138 = vector.load %arg2[%c16, %c0_69, %c0_70] : memref<54x8x8xf32, #tpu.memory_space<vmem>>, vector<1x8x8xf32>
    %139 = vector.shape_cast %138 : vector<1x8x8xf32> to vector<8x8xf32>
    %cst_71 = arith.constant dense<0.000000e+00> : vector<8x512xf32>
    %140 = tpu.matmul %139, %137, %cst_71 {dimension_numbers = #tpu.dot_dimension_numbers<[1], [0], [0], [1], [0, 0, 1, 1], [], []>} : vector<8x8xf32>, vector<8x512xf32>, vector<8x512xf32> -> vector<8x512xf32>
    %141 = arith.addf %134, %140 : vector<8x512xf32>
    %c503_i32 = arith.constant 503 : i32
    %142 = tpu.dynamic_rotate %11 by %c503_i32 dim 1 : vector<8x512xf32>, i32 -> vector<8x512xf32>
    %143 = arith.mulf %3, %5 : vector<1x512xf32>
    %144 = vector.broadcast %143 : vector<1x512xf32> to vector<8x512xf32>
    %145 = arith.mulf %142, %144 : vector<8x512xf32>
    %c17 = arith.constant 17 : index
    %c0_72 = arith.constant 0 : index
    %c0_73 = arith.constant 0 : index
    %146 = vector.load %arg2[%c17, %c0_72, %c0_73] : memref<54x8x8xf32, #tpu.memory_space<vmem>>, vector<1x8x8xf32>
    %147 = vector.shape_cast %146 : vector<1x8x8xf32> to vector<8x8xf32>
    %cst_74 = arith.constant dense<0.000000e+00> : vector<8x512xf32>
    %148 = tpu.matmul %147, %145, %cst_74 {dimension_numbers = #tpu.dot_dimension_numbers<[1], [0], [0], [1], [0, 0, 1, 1], [], []>} : vector<8x8xf32>, vector<8x512xf32>, vector<8x512xf32> -> vector<8x512xf32>
    %149 = arith.addf %141, %148 : vector<8x512xf32>
    %c457_i32 = arith.constant 457 : i32
    %150 = tpu.dynamic_rotate %11 by %c457_i32 dim 1 : vector<8x512xf32>, i32 -> vector<8x512xf32>
    %151 = arith.mulf %1, %2 : vector<1x512xf32>
    %152 = arith.mulf %151, %4 : vector<1x512xf32>
    %153 = vector.broadcast %152 : vector<1x512xf32> to vector<8x512xf32>
    %154 = arith.mulf %150, %153 : vector<8x512xf32>
    %c18 = arith.constant 18 : index
    %c0_75 = arith.constant 0 : index
    %c0_76 = arith.constant 0 : index
    %155 = vector.load %arg2[%c18, %c0_75, %c0_76] : memref<54x8x8xf32, #tpu.memory_space<vmem>>, vector<1x8x8xf32>
    %156 = vector.shape_cast %155 : vector<1x8x8xf32> to vector<8x8xf32>
    %cst_77 = arith.constant dense<0.000000e+00> : vector<8x512xf32>
    %157 = tpu.matmul %156, %154, %cst_77 {dimension_numbers = #tpu.dot_dimension_numbers<[1], [0], [0], [1], [0, 0, 1, 1], [], []>} : vector<8x8xf32>, vector<8x512xf32>, vector<8x512xf32> -> vector<8x512xf32>
    %158 = arith.addf %149, %157 : vector<8x512xf32>
    %c456_i32 = arith.constant 456 : i32
    %159 = tpu.dynamic_rotate %11 by %c456_i32 dim 1 : vector<8x512xf32>, i32 -> vector<8x512xf32>
    %160 = arith.mulf %1, %2 : vector<1x512xf32>
    %161 = vector.broadcast %160 : vector<1x512xf32> to vector<8x512xf32>
    %162 = arith.mulf %159, %161 : vector<8x512xf32>
    %c19 = arith.constant 19 : index
    %c0_78 = arith.constant 0 : index
    %c0_79 = arith.constant 0 : index
    %163 = vector.load %arg2[%c19, %c0_78, %c0_79] : memref<54x8x8xf32, #tpu.memory_space<vmem>>, vector<1x8x8xf32>
    %164 = vector.shape_cast %163 : vector<1x8x8xf32> to vector<8x8xf32>
    %cst_80 = arith.constant dense<0.000000e+00> : vector<8x512xf32>
    %165 = tpu.matmul %164, %162, %cst_80 {dimension_numbers = #tpu.dot_dimension_numbers<[1], [0], [0], [1], [0, 0, 1, 1], [], []>} : vector<8x8xf32>, vector<8x512xf32>, vector<8x512xf32> -> vector<8x512xf32>
    %166 = arith.addf %158, %165 : vector<8x512xf32>
    %c455_i32 = arith.constant 455 : i32
    %167 = tpu.dynamic_rotate %11 by %c455_i32 dim 1 : vector<8x512xf32>, i32 -> vector<8x512xf32>
    %168 = arith.mulf %1, %2 : vector<1x512xf32>
    %169 = arith.mulf %168, %5 : vector<1x512xf32>
    %170 = vector.broadcast %169 : vector<1x512xf32> to vector<8x512xf32>
    %171 = arith.mulf %167, %170 : vector<8x512xf32>
    %c20 = arith.constant 20 : index
    %c0_81 = arith.constant 0 : index
    %c0_82 = arith.constant 0 : index
    %172 = vector.load %arg2[%c20, %c0_81, %c0_82] : memref<54x8x8xf32, #tpu.memory_space<vmem>>, vector<1x8x8xf32>
    %173 = vector.shape_cast %172 : vector<1x8x8xf32> to vector<8x8xf32>
    %cst_83 = arith.constant dense<0.000000e+00> : vector<8x512xf32>
    %174 = tpu.matmul %173, %171, %cst_83 {dimension_numbers = #tpu.dot_dimension_numbers<[1], [0], [0], [1], [0, 0, 1, 1], [], []>} : vector<8x8xf32>, vector<8x512xf32>, vector<8x512xf32> -> vector<8x512xf32>
    %175 = arith.addf %166, %174 : vector<8x512xf32>
    %c449_i32 = arith.constant 449 : i32
    %176 = tpu.dynamic_rotate %11 by %c449_i32 dim 1 : vector<8x512xf32>, i32 -> vector<8x512xf32>
    %177 = arith.mulf %1, %4 : vector<1x512xf32>
    %178 = vector.broadcast %177 : vector<1x512xf32> to vector<8x512xf32>
    %179 = arith.mulf %176, %178 : vector<8x512xf32>
    %c21 = arith.constant 21 : index
    %c0_84 = arith.constant 0 : index
    %c0_85 = arith.constant 0 : index
    %180 = vector.load %arg2[%c21, %c0_84, %c0_85] : memref<54x8x8xf32, #tpu.memory_space<vmem>>, vector<1x8x8xf32>
    %181 = vector.shape_cast %180 : vector<1x8x8xf32> to vector<8x8xf32>
    %cst_86 = arith.constant dense<0.000000e+00> : vector<8x512xf32>
    %182 = tpu.matmul %181, %179, %cst_86 {dimension_numbers = #tpu.dot_dimension_numbers<[1], [0], [0], [1], [0, 0, 1, 1], [], []>} : vector<8x8xf32>, vector<8x512xf32>, vector<8x512xf32> -> vector<8x512xf32>
    %183 = arith.addf %175, %182 : vector<8x512xf32>
    %c448_i32 = arith.constant 448 : i32
    %184 = tpu.dynamic_rotate %11 by %c448_i32 dim 1 : vector<8x512xf32>, i32 -> vector<8x512xf32>
    %185 = vector.broadcast %1 : vector<1x512xf32> to vector<8x512xf32>
    %186 = arith.mulf %184, %185 : vector<8x512xf32>
    %c22 = arith.constant 22 : index
    %c0_87 = arith.constant 0 : index
    %c0_88 = arith.constant 0 : index
    %187 = vector.load %arg2[%c22, %c0_87, %c0_88] : memref<54x8x8xf32, #tpu.memory_space<vmem>>, vector<1x8x8xf32>
    %188 = vector.shape_cast %187 : vector<1x8x8xf32> to vector<8x8xf32>
    %cst_89 = arith.constant dense<0.000000e+00> : vector<8x512xf32>
    %189 = tpu.matmul %188, %186, %cst_89 {dimension_numbers = #tpu.dot_dimension_numbers<[1], [0], [0], [1], [0, 0, 1, 1], [], []>} : vector<8x8xf32>, vector<8x512xf32>, vector<8x512xf32> -> vector<8x512xf32>
    %190 = arith.addf %183, %189 : vector<8x512xf32>
    %c447_i32 = arith.constant 447 : i32
    %191 = tpu.dynamic_rotate %11 by %c447_i32 dim 1 : vector<8x512xf32>, i32 -> vector<8x512xf32>
    %192 = arith.mulf %1, %5 : vector<1x512xf32>
    %193 = vector.broadcast %192 : vector<1x512xf32> to vector<8x512xf32>
    %194 = arith.mulf %191, %193 : vector<8x512xf32>
    %c23 = arith.constant 23 : index
    %c0_90 = arith.constant 0 : index
    %c0_91 = arith.constant 0 : index
    %195 = vector.load %arg2[%c23, %c0_90, %c0_91] : memref<54x8x8xf32, #tpu.memory_space<vmem>>, vector<1x8x8xf32>
    %196 = vector.shape_cast %195 : vector<1x8x8xf32> to vector<8x8xf32>
    %cst_92 = arith.constant dense<0.000000e+00> : vector<8x512xf32>
    %197 = tpu.matmul %196, %194, %cst_92 {dimension_numbers = #tpu.dot_dimension_numbers<[1], [0], [0], [1], [0, 0, 1, 1], [], []>} : vector<8x8xf32>, vector<8x512xf32>, vector<8x512xf32> -> vector<8x512xf32>
    %198 = arith.addf %190, %197 : vector<8x512xf32>
    %c441_i32 = arith.constant 441 : i32
    %199 = tpu.dynamic_rotate %11 by %c441_i32 dim 1 : vector<8x512xf32>, i32 -> vector<8x512xf32>
    %200 = arith.mulf %1, %3 : vector<1x512xf32>
    %201 = arith.mulf %200, %4 : vector<1x512xf32>
    %202 = vector.broadcast %201 : vector<1x512xf32> to vector<8x512xf32>
    %203 = arith.mulf %199, %202 : vector<8x512xf32>
    %c24 = arith.constant 24 : index
    %c0_93 = arith.constant 0 : index
    %c0_94 = arith.constant 0 : index
    %204 = vector.load %arg2[%c24, %c0_93, %c0_94] : memref<54x8x8xf32, #tpu.memory_space<vmem>>, vector<1x8x8xf32>
    %205 = vector.shape_cast %204 : vector<1x8x8xf32> to vector<8x8xf32>
    %cst_95 = arith.constant dense<0.000000e+00> : vector<8x512xf32>
    %206 = tpu.matmul %205, %203, %cst_95 {dimension_numbers = #tpu.dot_dimension_numbers<[1], [0], [0], [1], [0, 0, 1, 1], [], []>} : vector<8x8xf32>, vector<8x512xf32>, vector<8x512xf32> -> vector<8x512xf32>
    %207 = arith.addf %198, %206 : vector<8x512xf32>
    %c440_i32 = arith.constant 440 : i32
    %208 = tpu.dynamic_rotate %11 by %c440_i32 dim 1 : vector<8x512xf32>, i32 -> vector<8x512xf32>
    %209 = arith.mulf %1, %3 : vector<1x512xf32>
    %210 = vector.broadcast %209 : vector<1x512xf32> to vector<8x512xf32>
    %211 = arith.mulf %208, %210 : vector<8x512xf32>
    %c25 = arith.constant 25 : index
    %c0_96 = arith.constant 0 : index
    %c0_97 = arith.constant 0 : index
    %212 = vector.load %arg2[%c25, %c0_96, %c0_97] : memref<54x8x8xf32, #tpu.memory_space<vmem>>, vector<1x8x8xf32>
    %213 = vector.shape_cast %212 : vector<1x8x8xf32> to vector<8x8xf32>
    %cst_98 = arith.constant dense<0.000000e+00> : vector<8x512xf32>
    %214 = tpu.matmul %213, %211, %cst_98 {dimension_numbers = #tpu.dot_dimension_numbers<[1], [0], [0], [1], [0, 0, 1, 1], [], []>} : vector<8x8xf32>, vector<8x512xf32>, vector<8x512xf32> -> vector<8x512xf32>
    %215 = arith.addf %207, %214 : vector<8x512xf32>
    %c439_i32 = arith.constant 439 : i32
    %216 = tpu.dynamic_rotate %11 by %c439_i32 dim 1 : vector<8x512xf32>, i32 -> vector<8x512xf32>
    %217 = arith.mulf %1, %3 : vector<1x512xf32>
    %218 = arith.mulf %217, %5 : vector<1x512xf32>
    %219 = vector.broadcast %218 : vector<1x512xf32> to vector<8x512xf32>
    %220 = arith.mulf %216, %219 : vector<8x512xf32>
    %c26 = arith.constant 26 : index
    %c0_99 = arith.constant 0 : index
    %c0_100 = arith.constant 0 : index
    %221 = vector.load %arg2[%c26, %c0_99, %c0_100] : memref<54x8x8xf32, #tpu.memory_space<vmem>>, vector<1x8x8xf32>
    %222 = vector.shape_cast %221 : vector<1x8x8xf32> to vector<8x8xf32>
    %cst_101 = arith.constant dense<0.000000e+00> : vector<8x512xf32>
    %223 = tpu.matmul %222, %220, %cst_101 {dimension_numbers = #tpu.dot_dimension_numbers<[1], [0], [0], [1], [0, 0, 1, 1], [], []>} : vector<8x8xf32>, vector<8x512xf32>, vector<8x512xf32> -> vector<8x512xf32>
    %224 = arith.addf %215, %223 : vector<8x512xf32>
    %c0_102 = arith.constant 0 : index
    %c0_103 = arith.constant 0 : index
    %225 = vector.load %arg3[%c0_102, %c0_103] : memref<8x2xf32, #tpu.memory_space<vmem>>, vector<8x1xf32>
    %226 = vector.broadcast %225 : vector<8x1xf32> to vector<8x512xf32>
    %227 = arith.addf %224, %226 : vector<8x512xf32>
    %c73_i32_104 = arith.constant 73 : i32
    %228 = tpu.dynamic_rotate %227 by %c73_i32_104 dim 1 : vector<8x512xf32>, i32 -> vector<8x512xf32>
    %229 = arith.mulf %0, %2 : vector<1x512xf32>
    %230 = arith.mulf %229, %4 : vector<1x512xf32>
    %231 = vector.broadcast %230 : vector<1x512xf32> to vector<8x512xf32>
    %232 = arith.mulf %228, %231 : vector<8x512xf32>
    %c27 = arith.constant 27 : index
    %c0_105 = arith.constant 0 : index
    %c0_106 = arith.constant 0 : index
    %233 = vector.load %arg2[%c27, %c0_105, %c0_106] : memref<54x8x8xf32, #tpu.memory_space<vmem>>, vector<1x8x8xf32>
    %234 = vector.shape_cast %233 : vector<1x8x8xf32> to vector<8x8xf32>
    %cst_107 = arith.constant dense<0.000000e+00> : vector<8x512xf32>
    %235 = tpu.matmul %234, %232, %cst_107 {dimension_numbers = #tpu.dot_dimension_numbers<[1], [0], [0], [1], [0, 0, 1, 1], [], []>} : vector<8x8xf32>, vector<8x512xf32>, vector<8x512xf32> -> vector<8x512xf32>
    %c72_i32_108 = arith.constant 72 : i32
    %236 = tpu.dynamic_rotate %227 by %c72_i32_108 dim 1 : vector<8x512xf32>, i32 -> vector<8x512xf32>
    %237 = arith.mulf %0, %2 : vector<1x512xf32>
    %238 = vector.broadcast %237 : vector<1x512xf32> to vector<8x512xf32>
    %239 = arith.mulf %236, %238 : vector<8x512xf32>
    %c28 = arith.constant 28 : index
    %c0_109 = arith.constant 0 : index
    %c0_110 = arith.constant 0 : index
    %240 = vector.load %arg2[%c28, %c0_109, %c0_110] : memref<54x8x8xf32, #tpu.memory_space<vmem>>, vector<1x8x8xf32>
    %241 = vector.shape_cast %240 : vector<1x8x8xf32> to vector<8x8xf32>
    %cst_111 = arith.constant dense<0.000000e+00> : vector<8x512xf32>
    %242 = tpu.matmul %241, %239, %cst_111 {dimension_numbers = #tpu.dot_dimension_numbers<[1], [0], [0], [1], [0, 0, 1, 1], [], []>} : vector<8x8xf32>, vector<8x512xf32>, vector<8x512xf32> -> vector<8x512xf32>
    %243 = arith.addf %235, %242 : vector<8x512xf32>
    %c71_i32_112 = arith.constant 71 : i32
    %244 = tpu.dynamic_rotate %227 by %c71_i32_112 dim 1 : vector<8x512xf32>, i32 -> vector<8x512xf32>
    %245 = arith.mulf %0, %2 : vector<1x512xf32>
    %246 = arith.mulf %245, %5 : vector<1x512xf32>
    %247 = vector.broadcast %246 : vector<1x512xf32> to vector<8x512xf32>
    %248 = arith.mulf %244, %247 : vector<8x512xf32>
    %c29 = arith.constant 29 : index
    %c0_113 = arith.constant 0 : index
    %c0_114 = arith.constant 0 : index
    %249 = vector.load %arg2[%c29, %c0_113, %c0_114] : memref<54x8x8xf32, #tpu.memory_space<vmem>>, vector<1x8x8xf32>
    %250 = vector.shape_cast %249 : vector<1x8x8xf32> to vector<8x8xf32>
    %cst_115 = arith.constant dense<0.000000e+00> : vector<8x512xf32>
    %251 = tpu.matmul %250, %248, %cst_115 {dimension_numbers = #tpu.dot_dimension_numbers<[1], [0], [0], [1], [0, 0, 1, 1], [], []>} : vector<8x8xf32>, vector<8x512xf32>, vector<8x512xf32> -> vector<8x512xf32>
    %252 = arith.addf %243, %251 : vector<8x512xf32>
    %c65_i32_116 = arith.constant 65 : i32
    %253 = tpu.dynamic_rotate %227 by %c65_i32_116 dim 1 : vector<8x512xf32>, i32 -> vector<8x512xf32>
    %254 = arith.mulf %0, %4 : vector<1x512xf32>
    %255 = vector.broadcast %254 : vector<1x512xf32> to vector<8x512xf32>
    %256 = arith.mulf %253, %255 : vector<8x512xf32>
    %c30 = arith.constant 30 : index
    %c0_117 = arith.constant 0 : index
    %c0_118 = arith.constant 0 : index
    %257 = vector.load %arg2[%c30, %c0_117, %c0_118] : memref<54x8x8xf32, #tpu.memory_space<vmem>>, vector<1x8x8xf32>
    %258 = vector.shape_cast %257 : vector<1x8x8xf32> to vector<8x8xf32>
    %cst_119 = arith.constant dense<0.000000e+00> : vector<8x512xf32>
    %259 = tpu.matmul %258, %256, %cst_119 {dimension_numbers = #tpu.dot_dimension_numbers<[1], [0], [0], [1], [0, 0, 1, 1], [], []>} : vector<8x8xf32>, vector<8x512xf32>, vector<8x512xf32> -> vector<8x512xf32>
    %260 = arith.addf %252, %259 : vector<8x512xf32>
    %c64_i32_120 = arith.constant 64 : i32
    %261 = tpu.dynamic_rotate %227 by %c64_i32_120 dim 1 : vector<8x512xf32>, i32 -> vector<8x512xf32>
    %262 = vector.broadcast %0 : vector<1x512xf32> to vector<8x512xf32>
    %263 = arith.mulf %261, %262 : vector<8x512xf32>
    %c31 = arith.constant 31 : index
    %c0_121 = arith.constant 0 : index
    %c0_122 = arith.constant 0 : index
    %264 = vector.load %arg2[%c31, %c0_121, %c0_122] : memref<54x8x8xf32, #tpu.memory_space<vmem>>, vector<1x8x8xf32>
    %265 = vector.shape_cast %264 : vector<1x8x8xf32> to vector<8x8xf32>
    %cst_123 = arith.constant dense<0.000000e+00> : vector<8x512xf32>
    %266 = tpu.matmul %265, %263, %cst_123 {dimension_numbers = #tpu.dot_dimension_numbers<[1], [0], [0], [1], [0, 0, 1, 1], [], []>} : vector<8x8xf32>, vector<8x512xf32>, vector<8x512xf32> -> vector<8x512xf32>
    %267 = arith.addf %260, %266 : vector<8x512xf32>
    %c63_i32_124 = arith.constant 63 : i32
    %268 = tpu.dynamic_rotate %227 by %c63_i32_124 dim 1 : vector<8x512xf32>, i32 -> vector<8x512xf32>
    %269 = arith.mulf %0, %5 : vector<1x512xf32>
    %270 = vector.broadcast %269 : vector<1x512xf32> to vector<8x512xf32>
    %271 = arith.mulf %268, %270 : vector<8x512xf32>
    %c32 = arith.constant 32 : index
    %c0_125 = arith.constant 0 : index
    %c0_126 = arith.constant 0 : index
    %272 = vector.load %arg2[%c32, %c0_125, %c0_126] : memref<54x8x8xf32, #tpu.memory_space<vmem>>, vector<1x8x8xf32>
    %273 = vector.shape_cast %272 : vector<1x8x8xf32> to vector<8x8xf32>
    %cst_127 = arith.constant dense<0.000000e+00> : vector<8x512xf32>
    %274 = tpu.matmul %273, %271, %cst_127 {dimension_numbers = #tpu.dot_dimension_numbers<[1], [0], [0], [1], [0, 0, 1, 1], [], []>} : vector<8x8xf32>, vector<8x512xf32>, vector<8x512xf32> -> vector<8x512xf32>
    %275 = arith.addf %267, %274 : vector<8x512xf32>
    %c57_i32_128 = arith.constant 57 : i32
    %276 = tpu.dynamic_rotate %227 by %c57_i32_128 dim 1 : vector<8x512xf32>, i32 -> vector<8x512xf32>
    %277 = arith.mulf %0, %3 : vector<1x512xf32>
    %278 = arith.mulf %277, %4 : vector<1x512xf32>
    %279 = vector.broadcast %278 : vector<1x512xf32> to vector<8x512xf32>
    %280 = arith.mulf %276, %279 : vector<8x512xf32>
    %c33 = arith.constant 33 : index
    %c0_129 = arith.constant 0 : index
    %c0_130 = arith.constant 0 : index
    %281 = vector.load %arg2[%c33, %c0_129, %c0_130] : memref<54x8x8xf32, #tpu.memory_space<vmem>>, vector<1x8x8xf32>
    %282 = vector.shape_cast %281 : vector<1x8x8xf32> to vector<8x8xf32>
    %cst_131 = arith.constant dense<0.000000e+00> : vector<8x512xf32>
    %283 = tpu.matmul %282, %280, %cst_131 {dimension_numbers = #tpu.dot_dimension_numbers<[1], [0], [0], [1], [0, 0, 1, 1], [], []>} : vector<8x8xf32>, vector<8x512xf32>, vector<8x512xf32> -> vector<8x512xf32>
    %284 = arith.addf %275, %283 : vector<8x512xf32>
    %c56_i32_132 = arith.constant 56 : i32
    %285 = tpu.dynamic_rotate %227 by %c56_i32_132 dim 1 : vector<8x512xf32>, i32 -> vector<8x512xf32>
    %286 = arith.mulf %0, %3 : vector<1x512xf32>
    %287 = vector.broadcast %286 : vector<1x512xf32> to vector<8x512xf32>
    %288 = arith.mulf %285, %287 : vector<8x512xf32>
    %c34 = arith.constant 34 : index
    %c0_133 = arith.constant 0 : index
    %c0_134 = arith.constant 0 : index
    %289 = vector.load %arg2[%c34, %c0_133, %c0_134] : memref<54x8x8xf32, #tpu.memory_space<vmem>>, vector<1x8x8xf32>
    %290 = vector.shape_cast %289 : vector<1x8x8xf32> to vector<8x8xf32>
    %cst_135 = arith.constant dense<0.000000e+00> : vector<8x512xf32>
    %291 = tpu.matmul %290, %288, %cst_135 {dimension_numbers = #tpu.dot_dimension_numbers<[1], [0], [0], [1], [0, 0, 1, 1], [], []>} : vector<8x8xf32>, vector<8x512xf32>, vector<8x512xf32> -> vector<8x512xf32>
    %292 = arith.addf %284, %291 : vector<8x512xf32>
    %c55_i32_136 = arith.constant 55 : i32
    %293 = tpu.dynamic_rotate %227 by %c55_i32_136 dim 1 : vector<8x512xf32>, i32 -> vector<8x512xf32>
    %294 = arith.mulf %0, %3 : vector<1x512xf32>
    %295 = arith.mulf %294, %5 : vector<1x512xf32>
    %296 = vector.broadcast %295 : vector<1x512xf32> to vector<8x512xf32>
    %297 = arith.mulf %293, %296 : vector<8x512xf32>
    %c35 = arith.constant 35 : index
    %c0_137 = arith.constant 0 : index
    %c0_138 = arith.constant 0 : index
    %298 = vector.load %arg2[%c35, %c0_137, %c0_138] : memref<54x8x8xf32, #tpu.memory_space<vmem>>, vector<1x8x8xf32>
    %299 = vector.shape_cast %298 : vector<1x8x8xf32> to vector<8x8xf32>
    %cst_139 = arith.constant dense<0.000000e+00> : vector<8x512xf32>
    %300 = tpu.matmul %299, %297, %cst_139 {dimension_numbers = #tpu.dot_dimension_numbers<[1], [0], [0], [1], [0, 0, 1, 1], [], []>} : vector<8x8xf32>, vector<8x512xf32>, vector<8x512xf32> -> vector<8x512xf32>
    %301 = arith.addf %292, %300 : vector<8x512xf32>
    %c9_i32_140 = arith.constant 9 : i32
    %302 = tpu.dynamic_rotate %227 by %c9_i32_140 dim 1 : vector<8x512xf32>, i32 -> vector<8x512xf32>
    %303 = arith.mulf %2, %4 : vector<1x512xf32>
    %304 = vector.broadcast %303 : vector<1x512xf32> to vector<8x512xf32>
    %305 = arith.mulf %302, %304 : vector<8x512xf32>
    %c36 = arith.constant 36 : index
    %c0_141 = arith.constant 0 : index
    %c0_142 = arith.constant 0 : index
    %306 = vector.load %arg2[%c36, %c0_141, %c0_142] : memref<54x8x8xf32, #tpu.memory_space<vmem>>, vector<1x8x8xf32>
    %307 = vector.shape_cast %306 : vector<1x8x8xf32> to vector<8x8xf32>
    %cst_143 = arith.constant dense<0.000000e+00> : vector<8x512xf32>
    %308 = tpu.matmul %307, %305, %cst_143 {dimension_numbers = #tpu.dot_dimension_numbers<[1], [0], [0], [1], [0, 0, 1, 1], [], []>} : vector<8x8xf32>, vector<8x512xf32>, vector<8x512xf32> -> vector<8x512xf32>
    %309 = arith.addf %301, %308 : vector<8x512xf32>
    %c8_i32_144 = arith.constant 8 : i32
    %310 = tpu.dynamic_rotate %227 by %c8_i32_144 dim 1 : vector<8x512xf32>, i32 -> vector<8x512xf32>
    %311 = vector.broadcast %2 : vector<1x512xf32> to vector<8x512xf32>
    %312 = arith.mulf %310, %311 : vector<8x512xf32>
    %c37 = arith.constant 37 : index
    %c0_145 = arith.constant 0 : index
    %c0_146 = arith.constant 0 : index
    %313 = vector.load %arg2[%c37, %c0_145, %c0_146] : memref<54x8x8xf32, #tpu.memory_space<vmem>>, vector<1x8x8xf32>
    %314 = vector.shape_cast %313 : vector<1x8x8xf32> to vector<8x8xf32>
    %cst_147 = arith.constant dense<0.000000e+00> : vector<8x512xf32>
    %315 = tpu.matmul %314, %312, %cst_147 {dimension_numbers = #tpu.dot_dimension_numbers<[1], [0], [0], [1], [0, 0, 1, 1], [], []>} : vector<8x8xf32>, vector<8x512xf32>, vector<8x512xf32> -> vector<8x512xf32>
    %316 = arith.addf %309, %315 : vector<8x512xf32>
    %c7_i32_148 = arith.constant 7 : i32
    %317 = tpu.dynamic_rotate %227 by %c7_i32_148 dim 1 : vector<8x512xf32>, i32 -> vector<8x512xf32>
    %318 = arith.mulf %2, %5 : vector<1x512xf32>
    %319 = vector.broadcast %318 : vector<1x512xf32> to vector<8x512xf32>
    %320 = arith.mulf %317, %319 : vector<8x512xf32>
    %c38 = arith.constant 38 : index
    %c0_149 = arith.constant 0 : index
    %c0_150 = arith.constant 0 : index
    %321 = vector.load %arg2[%c38, %c0_149, %c0_150] : memref<54x8x8xf32, #tpu.memory_space<vmem>>, vector<1x8x8xf32>
    %322 = vector.shape_cast %321 : vector<1x8x8xf32> to vector<8x8xf32>
    %cst_151 = arith.constant dense<0.000000e+00> : vector<8x512xf32>
    %323 = tpu.matmul %322, %320, %cst_151 {dimension_numbers = #tpu.dot_dimension_numbers<[1], [0], [0], [1], [0, 0, 1, 1], [], []>} : vector<8x8xf32>, vector<8x512xf32>, vector<8x512xf32> -> vector<8x512xf32>
    %324 = arith.addf %316, %323 : vector<8x512xf32>
    %c1_i32_152 = arith.constant 1 : i32
    %325 = tpu.dynamic_rotate %227 by %c1_i32_152 dim 1 : vector<8x512xf32>, i32 -> vector<8x512xf32>
    %326 = vector.broadcast %4 : vector<1x512xf32> to vector<8x512xf32>
    %327 = arith.mulf %325, %326 : vector<8x512xf32>
    %c39 = arith.constant 39 : index
    %c0_153 = arith.constant 0 : index
    %c0_154 = arith.constant 0 : index
    %328 = vector.load %arg2[%c39, %c0_153, %c0_154] : memref<54x8x8xf32, #tpu.memory_space<vmem>>, vector<1x8x8xf32>
    %329 = vector.shape_cast %328 : vector<1x8x8xf32> to vector<8x8xf32>
    %cst_155 = arith.constant dense<0.000000e+00> : vector<8x512xf32>
    %330 = tpu.matmul %329, %327, %cst_155 {dimension_numbers = #tpu.dot_dimension_numbers<[1], [0], [0], [1], [0, 0, 1, 1], [], []>} : vector<8x8xf32>, vector<8x512xf32>, vector<8x512xf32> -> vector<8x512xf32>
    %331 = arith.addf %324, %330 : vector<8x512xf32>
    %c40 = arith.constant 40 : index
    %c0_156 = arith.constant 0 : index
    %c0_157 = arith.constant 0 : index
    %332 = vector.load %arg2[%c40, %c0_156, %c0_157] : memref<54x8x8xf32, #tpu.memory_space<vmem>>, vector<1x8x8xf32>
    %333 = vector.shape_cast %332 : vector<1x8x8xf32> to vector<8x8xf32>
    %cst_158 = arith.constant dense<0.000000e+00> : vector<8x512xf32>
    %334 = tpu.matmul %333, %227, %cst_158 {dimension_numbers = #tpu.dot_dimension_numbers<[1], [0], [0], [1], [0, 0, 1, 1], [], []>} : vector<8x8xf32>, vector<8x512xf32>, vector<8x512xf32> -> vector<8x512xf32>
    %335 = arith.addf %331, %334 : vector<8x512xf32>
    %c511_i32_159 = arith.constant 511 : i32
    %336 = tpu.dynamic_rotate %227 by %c511_i32_159 dim 1 : vector<8x512xf32>, i32 -> vector<8x512xf32>
    %337 = vector.broadcast %5 : vector<1x512xf32> to vector<8x512xf32>
    %338 = arith.mulf %336, %337 : vector<8x512xf32>
    %c41 = arith.constant 41 : index
    %c0_160 = arith.constant 0 : index
    %c0_161 = arith.constant 0 : index
    %339 = vector.load %arg2[%c41, %c0_160, %c0_161] : memref<54x8x8xf32, #tpu.memory_space<vmem>>, vector<1x8x8xf32>
    %340 = vector.shape_cast %339 : vector<1x8x8xf32> to vector<8x8xf32>
    %cst_162 = arith.constant dense<0.000000e+00> : vector<8x512xf32>
    %341 = tpu.matmul %340, %338, %cst_162 {dimension_numbers = #tpu.dot_dimension_numbers<[1], [0], [0], [1], [0, 0, 1, 1], [], []>} : vector<8x8xf32>, vector<8x512xf32>, vector<8x512xf32> -> vector<8x512xf32>
    %342 = arith.addf %335, %341 : vector<8x512xf32>
    %c505_i32_163 = arith.constant 505 : i32
    %343 = tpu.dynamic_rotate %227 by %c505_i32_163 dim 1 : vector<8x512xf32>, i32 -> vector<8x512xf32>
    %344 = arith.mulf %3, %4 : vector<1x512xf32>
    %345 = vector.broadcast %344 : vector<1x512xf32> to vector<8x512xf32>
    %346 = arith.mulf %343, %345 : vector<8x512xf32>
    %c42 = arith.constant 42 : index
    %c0_164 = arith.constant 0 : index
    %c0_165 = arith.constant 0 : index
    %347 = vector.load %arg2[%c42, %c0_164, %c0_165] : memref<54x8x8xf32, #tpu.memory_space<vmem>>, vector<1x8x8xf32>
    %348 = vector.shape_cast %347 : vector<1x8x8xf32> to vector<8x8xf32>
    %cst_166 = arith.constant dense<0.000000e+00> : vector<8x512xf32>
    %349 = tpu.matmul %348, %346, %cst_166 {dimension_numbers = #tpu.dot_dimension_numbers<[1], [0], [0], [1], [0, 0, 1, 1], [], []>} : vector<8x8xf32>, vector<8x512xf32>, vector<8x512xf32> -> vector<8x512xf32>
    %350 = arith.addf %342, %349 : vector<8x512xf32>
    %c504_i32_167 = arith.constant 504 : i32
    %351 = tpu.dynamic_rotate %227 by %c504_i32_167 dim 1 : vector<8x512xf32>, i32 -> vector<8x512xf32>
    %352 = vector.broadcast %3 : vector<1x512xf32> to vector<8x512xf32>
    %353 = arith.mulf %351, %352 : vector<8x512xf32>
    %c43 = arith.constant 43 : index
    %c0_168 = arith.constant 0 : index
    %c0_169 = arith.constant 0 : index
    %354 = vector.load %arg2[%c43, %c0_168, %c0_169] : memref<54x8x8xf32, #tpu.memory_space<vmem>>, vector<1x8x8xf32>
    %355 = vector.shape_cast %354 : vector<1x8x8xf32> to vector<8x8xf32>
    %cst_170 = arith.constant dense<0.000000e+00> : vector<8x512xf32>
    %356 = tpu.matmul %355, %353, %cst_170 {dimension_numbers = #tpu.dot_dimension_numbers<[1], [0], [0], [1], [0, 0, 1, 1], [], []>} : vector<8x8xf32>, vector<8x512xf32>, vector<8x512xf32> -> vector<8x512xf32>
    %357 = arith.addf %350, %356 : vector<8x512xf32>
    %c503_i32_171 = arith.constant 503 : i32
    %358 = tpu.dynamic_rotate %227 by %c503_i32_171 dim 1 : vector<8x512xf32>, i32 -> vector<8x512xf32>
    %359 = arith.mulf %3, %5 : vector<1x512xf32>
    %360 = vector.broadcast %359 : vector<1x512xf32> to vector<8x512xf32>
    %361 = arith.mulf %358, %360 : vector<8x512xf32>
    %c44 = arith.constant 44 : index
    %c0_172 = arith.constant 0 : index
    %c0_173 = arith.constant 0 : index
    %362 = vector.load %arg2[%c44, %c0_172, %c0_173] : memref<54x8x8xf32, #tpu.memory_space<vmem>>, vector<1x8x8xf32>
    %363 = vector.shape_cast %362 : vector<1x8x8xf32> to vector<8x8xf32>
    %cst_174 = arith.constant dense<0.000000e+00> : vector<8x512xf32>
    %364 = tpu.matmul %363, %361, %cst_174 {dimension_numbers = #tpu.dot_dimension_numbers<[1], [0], [0], [1], [0, 0, 1, 1], [], []>} : vector<8x8xf32>, vector<8x512xf32>, vector<8x512xf32> -> vector<8x512xf32>
    %365 = arith.addf %357, %364 : vector<8x512xf32>
    %c457_i32_175 = arith.constant 457 : i32
    %366 = tpu.dynamic_rotate %227 by %c457_i32_175 dim 1 : vector<8x512xf32>, i32 -> vector<8x512xf32>
    %367 = arith.mulf %1, %2 : vector<1x512xf32>
    %368 = arith.mulf %367, %4 : vector<1x512xf32>
    %369 = vector.broadcast %368 : vector<1x512xf32> to vector<8x512xf32>
    %370 = arith.mulf %366, %369 : vector<8x512xf32>
    %c45 = arith.constant 45 : index
    %c0_176 = arith.constant 0 : index
    %c0_177 = arith.constant 0 : index
    %371 = vector.load %arg2[%c45, %c0_176, %c0_177] : memref<54x8x8xf32, #tpu.memory_space<vmem>>, vector<1x8x8xf32>
    %372 = vector.shape_cast %371 : vector<1x8x8xf32> to vector<8x8xf32>
    %cst_178 = arith.constant dense<0.000000e+00> : vector<8x512xf32>
    %373 = tpu.matmul %372, %370, %cst_178 {dimension_numbers = #tpu.dot_dimension_numbers<[1], [0], [0], [1], [0, 0, 1, 1], [], []>} : vector<8x8xf32>, vector<8x512xf32>, vector<8x512xf32> -> vector<8x512xf32>
    %374 = arith.addf %365, %373 : vector<8x512xf32>
    %c456_i32_179 = arith.constant 456 : i32
    %375 = tpu.dynamic_rotate %227 by %c456_i32_179 dim 1 : vector<8x512xf32>, i32 -> vector<8x512xf32>
    %376 = arith.mulf %1, %2 : vector<1x512xf32>
    %377 = vector.broadcast %376 : vector<1x512xf32> to vector<8x512xf32>
    %378 = arith.mulf %375, %377 : vector<8x512xf32>
    %c46 = arith.constant 46 : index
    %c0_180 = arith.constant 0 : index
    %c0_181 = arith.constant 0 : index
    %379 = vector.load %arg2[%c46, %c0_180, %c0_181] : memref<54x8x8xf32, #tpu.memory_space<vmem>>, vector<1x8x8xf32>
    %380 = vector.shape_cast %379 : vector<1x8x8xf32> to vector<8x8xf32>
    %cst_182 = arith.constant dense<0.000000e+00> : vector<8x512xf32>
    %381 = tpu.matmul %380, %378, %cst_182 {dimension_numbers = #tpu.dot_dimension_numbers<[1], [0], [0], [1], [0, 0, 1, 1], [], []>} : vector<8x8xf32>, vector<8x512xf32>, vector<8x512xf32> -> vector<8x512xf32>
    %382 = arith.addf %374, %381 : vector<8x512xf32>
    %c455_i32_183 = arith.constant 455 : i32
    %383 = tpu.dynamic_rotate %227 by %c455_i32_183 dim 1 : vector<8x512xf32>, i32 -> vector<8x512xf32>
    %384 = arith.mulf %1, %2 : vector<1x512xf32>
    %385 = arith.mulf %384, %5 : vector<1x512xf32>
    %386 = vector.broadcast %385 : vector<1x512xf32> to vector<8x512xf32>
    %387 = arith.mulf %383, %386 : vector<8x512xf32>
    %c47 = arith.constant 47 : index
    %c0_184 = arith.constant 0 : index
    %c0_185 = arith.constant 0 : index
    %388 = vector.load %arg2[%c47, %c0_184, %c0_185] : memref<54x8x8xf32, #tpu.memory_space<vmem>>, vector<1x8x8xf32>
    %389 = vector.shape_cast %388 : vector<1x8x8xf32> to vector<8x8xf32>
    %cst_186 = arith.constant dense<0.000000e+00> : vector<8x512xf32>
    %390 = tpu.matmul %389, %387, %cst_186 {dimension_numbers = #tpu.dot_dimension_numbers<[1], [0], [0], [1], [0, 0, 1, 1], [], []>} : vector<8x8xf32>, vector<8x512xf32>, vector<8x512xf32> -> vector<8x512xf32>
    %391 = arith.addf %382, %390 : vector<8x512xf32>
    %c449_i32_187 = arith.constant 449 : i32
    %392 = tpu.dynamic_rotate %227 by %c449_i32_187 dim 1 : vector<8x512xf32>, i32 -> vector<8x512xf32>
    %393 = arith.mulf %1, %4 : vector<1x512xf32>
    %394 = vector.broadcast %393 : vector<1x512xf32> to vector<8x512xf32>
    %395 = arith.mulf %392, %394 : vector<8x512xf32>
    %c48 = arith.constant 48 : index
    %c0_188 = arith.constant 0 : index
    %c0_189 = arith.constant 0 : index
    %396 = vector.load %arg2[%c48, %c0_188, %c0_189] : memref<54x8x8xf32, #tpu.memory_space<vmem>>, vector<1x8x8xf32>
    %397 = vector.shape_cast %396 : vector<1x8x8xf32> to vector<8x8xf32>
    %cst_190 = arith.constant dense<0.000000e+00> : vector<8x512xf32>
    %398 = tpu.matmul %397, %395, %cst_190 {dimension_numbers = #tpu.dot_dimension_numbers<[1], [0], [0], [1], [0, 0, 1, 1], [], []>} : vector<8x8xf32>, vector<8x512xf32>, vector<8x512xf32> -> vector<8x512xf32>
    %399 = arith.addf %391, %398 : vector<8x512xf32>
    %c448_i32_191 = arith.constant 448 : i32
    %400 = tpu.dynamic_rotate %227 by %c448_i32_191 dim 1 : vector<8x512xf32>, i32 -> vector<8x512xf32>
    %401 = vector.broadcast %1 : vector<1x512xf32> to vector<8x512xf32>
    %402 = arith.mulf %400, %401 : vector<8x512xf32>
    %c49 = arith.constant 49 : index
    %c0_192 = arith.constant 0 : index
    %c0_193 = arith.constant 0 : index
    %403 = vector.load %arg2[%c49, %c0_192, %c0_193] : memref<54x8x8xf32, #tpu.memory_space<vmem>>, vector<1x8x8xf32>
    %404 = vector.shape_cast %403 : vector<1x8x8xf32> to vector<8x8xf32>
    %cst_194 = arith.constant dense<0.000000e+00> : vector<8x512xf32>
    %405 = tpu.matmul %404, %402, %cst_194 {dimension_numbers = #tpu.dot_dimension_numbers<[1], [0], [0], [1], [0, 0, 1, 1], [], []>} : vector<8x8xf32>, vector<8x512xf32>, vector<8x512xf32> -> vector<8x512xf32>
    %406 = arith.addf %399, %405 : vector<8x512xf32>
    %c447_i32_195 = arith.constant 447 : i32
    %407 = tpu.dynamic_rotate %227 by %c447_i32_195 dim 1 : vector<8x512xf32>, i32 -> vector<8x512xf32>
    %408 = arith.mulf %1, %5 : vector<1x512xf32>
    %409 = vector.broadcast %408 : vector<1x512xf32> to vector<8x512xf32>
    %410 = arith.mulf %407, %409 : vector<8x512xf32>
    %c50 = arith.constant 50 : index
    %c0_196 = arith.constant 0 : index
    %c0_197 = arith.constant 0 : index
    %411 = vector.load %arg2[%c50, %c0_196, %c0_197] : memref<54x8x8xf32, #tpu.memory_space<vmem>>, vector<1x8x8xf32>
    %412 = vector.shape_cast %411 : vector<1x8x8xf32> to vector<8x8xf32>
    %cst_198 = arith.constant dense<0.000000e+00> : vector<8x512xf32>
    %413 = tpu.matmul %412, %410, %cst_198 {dimension_numbers = #tpu.dot_dimension_numbers<[1], [0], [0], [1], [0, 0, 1, 1], [], []>} : vector<8x8xf32>, vector<8x512xf32>, vector<8x512xf32> -> vector<8x512xf32>
    %414 = arith.addf %406, %413 : vector<8x512xf32>
    %c441_i32_199 = arith.constant 441 : i32
    %415 = tpu.dynamic_rotate %227 by %c441_i32_199 dim 1 : vector<8x512xf32>, i32 -> vector<8x512xf32>
    %416 = arith.mulf %1, %3 : vector<1x512xf32>
    %417 = arith.mulf %416, %4 : vector<1x512xf32>
    %418 = vector.broadcast %417 : vector<1x512xf32> to vector<8x512xf32>
    %419 = arith.mulf %415, %418 : vector<8x512xf32>
    %c51 = arith.constant 51 : index
    %c0_200 = arith.constant 0 : index
    %c0_201 = arith.constant 0 : index
    %420 = vector.load %arg2[%c51, %c0_200, %c0_201] : memref<54x8x8xf32, #tpu.memory_space<vmem>>, vector<1x8x8xf32>
    %421 = vector.shape_cast %420 : vector<1x8x8xf32> to vector<8x8xf32>
    %cst_202 = arith.constant dense<0.000000e+00> : vector<8x512xf32>
    %422 = tpu.matmul %421, %419, %cst_202 {dimension_numbers = #tpu.dot_dimension_numbers<[1], [0], [0], [1], [0, 0, 1, 1], [], []>} : vector<8x8xf32>, vector<8x512xf32>, vector<8x512xf32> -> vector<8x512xf32>
    %423 = arith.addf %414, %422 : vector<8x512xf32>
    %c440_i32_203 = arith.constant 440 : i32
    %424 = tpu.dynamic_rotate %227 by %c440_i32_203 dim 1 : vector<8x512xf32>, i32 -> vector<8x512xf32>
    %425 = arith.mulf %1, %3 : vector<1x512xf32>
    %426 = vector.broadcast %425 : vector<1x512xf32> to vector<8x512xf32>
    %427 = arith.mulf %424, %426 : vector<8x512xf32>
    %c52 = arith.constant 52 : index
    %c0_204 = arith.constant 0 : index
    %c0_205 = arith.constant 0 : index
    %428 = vector.load %arg2[%c52, %c0_204, %c0_205] : memref<54x8x8xf32, #tpu.memory_space<vmem>>, vector<1x8x8xf32>
    %429 = vector.shape_cast %428 : vector<1x8x8xf32> to vector<8x8xf32>
    %cst_206 = arith.constant dense<0.000000e+00> : vector<8x512xf32>
    %430 = tpu.matmul %429, %427, %cst_206 {dimension_numbers = #tpu.dot_dimension_numbers<[1], [0], [0], [1], [0, 0, 1, 1], [], []>} : vector<8x8xf32>, vector<8x512xf32>, vector<8x512xf32> -> vector<8x512xf32>
    %431 = arith.addf %423, %430 : vector<8x512xf32>
    %c439_i32_207 = arith.constant 439 : i32
    %432 = tpu.dynamic_rotate %227 by %c439_i32_207 dim 1 : vector<8x512xf32>, i32 -> vector<8x512xf32>
    %433 = arith.mulf %1, %3 : vector<1x512xf32>
    %434 = arith.mulf %433, %5 : vector<1x512xf32>
    %435 = vector.broadcast %434 : vector<1x512xf32> to vector<8x512xf32>
    %436 = arith.mulf %432, %435 : vector<8x512xf32>
    %c53 = arith.constant 53 : index
    %c0_208 = arith.constant 0 : index
    %c0_209 = arith.constant 0 : index
    %437 = vector.load %arg2[%c53, %c0_208, %c0_209] : memref<54x8x8xf32, #tpu.memory_space<vmem>>, vector<1x8x8xf32>
    %438 = vector.shape_cast %437 : vector<1x8x8xf32> to vector<8x8xf32>
    %cst_210 = arith.constant dense<0.000000e+00> : vector<8x512xf32>
    %439 = tpu.matmul %438, %436, %cst_210 {dimension_numbers = #tpu.dot_dimension_numbers<[1], [0], [0], [1], [0, 0, 1, 1], [], []>} : vector<8x8xf32>, vector<8x512xf32>, vector<8x512xf32> -> vector<8x512xf32>
    %440 = arith.addf %431, %439 : vector<8x512xf32>
    %c0_211 = arith.constant 0 : index
    %c1_212 = arith.constant 1 : index
    %441 = vector.load %arg3[%c0_211, %c1_212] : memref<8x2xf32, #tpu.memory_space<vmem>>, vector<8x1xf32>
    %442 = vector.broadcast %441 : vector<8x1xf32> to vector<8x512xf32>
    %443 = arith.addf %440, %442 : vector<8x512xf32>
    %c0_213 = arith.constant 0 : index
    %c0_214 = arith.constant 0 : index
    %c0_215 = arith.constant 0 : index
    %444 = vector.load %arg5[%c0_213, %c0_214, %c0_215] : memref<2x8x512xf32, #tpu.memory_space<vmem>>, vector<1x8x512xf32>
    %445 = vector.shape_cast %444 : vector<1x8x512xf32> to vector<8x512xf32>
    %446 = vector.shape_cast %443 : vector<8x512xf32> to vector<1x8x512xf32>
    tpu.vector_store %arg5[%c0_213, %c0_214, %c0_215], %446 {strides = array<i32>} : memref<2x8x512xf32, #tpu.memory_space<vmem>>, vector<1x8x512xf32>,
    %c1_216 = arith.constant 1 : index
    %c0_217 = arith.constant 0 : index
    %c0_218 = arith.constant 0 : index
    %447 = vector.load %arg1[%c1_216, %c0_217, %c0_218] : memref<2x4x512xf32, #tpu.memory_space<vmem>>, vector<1x4x512xf32>
    %448 = vector.shape_cast %447 : vector<1x4x512xf32> to vector<4x512xf32>
    %c0_219 = arith.constant 0 : index
    %c0_220 = arith.constant 0 : index
    %449 = vector.load %arg6[%c0_219, %c0_220] : memref<8x512xf32, #tpu.memory_space<vmem>>, vector<4x512xf32>
    tpu.vector_store %arg6[%c0_219, %c0_220], %448 {strides = array<i32>} : memref<8x512xf32, #tpu.memory_space<vmem>>, vector<4x512xf32>,
    %c0_221 = arith.constant 0 : index
    %c0_222 = arith.constant 0 : index
    %450 = vector.load %arg6[%c0_221, %c0_222] : memref<8x512xf32, #tpu.memory_space<vmem>>, vector<8x512xf32>
    %c73_i32_223 = arith.constant 73 : i32
    %451 = tpu.dynamic_rotate %450 by %c73_i32_223 dim 1 : vector<8x512xf32>, i32 -> vector<8x512xf32>
    %452 = arith.mulf %0, %2 : vector<1x512xf32>
    %453 = arith.mulf %452, %4 : vector<1x512xf32>
    %454 = vector.broadcast %453 : vector<1x512xf32> to vector<8x512xf32>
    %455 = arith.mulf %451, %454 : vector<8x512xf32>
    %c0_224 = arith.constant 0 : index
    %c0_225 = arith.constant 0 : index
    %c0_226 = arith.constant 0 : index
    %456 = vector.load %arg2[%c0_224, %c0_225, %c0_226] : memref<54x8x8xf32, #tpu.memory_space<vmem>>, vector<1x8x8xf32>
    %457 = vector.shape_cast %456 : vector<1x8x8xf32> to vector<8x8xf32>
    %cst_227 = arith.constant dense<0.000000e+00> : vector<8x512xf32>
    %458 = tpu.matmul %457, %455, %cst_227 {dimension_numbers = #tpu.dot_dimension_numbers<[1], [0], [0], [1], [0, 0, 1, 1], [], []>} : vector<8x8xf32>, vector<8x512xf32>, vector<8x512xf32> -> vector<8x512xf32>
    %c72_i32_228 = arith.constant 72 : i32
    %459 = tpu.dynamic_rotate %450 by %c72_i32_228 dim 1 : vector<8x512xf32>, i32 -> vector<8x512xf32>
    %460 = arith.mulf %0, %2 : vector<1x512xf32>
    %461 = vector.broadcast %460 : vector<1x512xf32> to vector<8x512xf32>
    %462 = arith.mulf %459, %461 : vector<8x512xf32>
    %c1_229 = arith.constant 1 : index
    %c0_230 = arith.constant 0 : index
    %c0_231 = arith.constant 0 : index
    %463 = vector.load %arg2[%c1_229, %c0_230, %c0_231] : memref<54x8x8xf32, #tpu.memory_space<vmem>>, vector<1x8x8xf32>
    %464 = vector.shape_cast %463 : vector<1x8x8xf32> to vector<8x8xf32>
    %cst_232 = arith.constant dense<0.000000e+00> : vector<8x512xf32>
    %465 = tpu.matmul %464, %462, %cst_232 {dimension_numbers = #tpu.dot_dimension_numbers<[1], [0], [0], [1], [0, 0, 1, 1], [], []>} : vector<8x8xf32>, vector<8x512xf32>, vector<8x512xf32> -> vector<8x512xf32>
    %466 = arith.addf %458, %465 : vector<8x512xf32>
    %c71_i32_233 = arith.constant 71 : i32
    %467 = tpu.dynamic_rotate %450 by %c71_i32_233 dim 1 : vector<8x512xf32>, i32 -> vector<8x512xf32>
    %468 = arith.mulf %0, %2 : vector<1x512xf32>
    %469 = arith.mulf %468, %5 : vector<1x512xf32>
    %470 = vector.broadcast %469 : vector<1x512xf32> to vector<8x512xf32>
    %471 = arith.mulf %467, %470 : vector<8x512xf32>
    %c2_234 = arith.constant 2 : index
    %c0_235 = arith.constant 0 : index
    %c0_236 = arith.constant 0 : index
    %472 = vector.load %arg2[%c2_234, %c0_235, %c0_236] : memref<54x8x8xf32, #tpu.memory_space<vmem>>, vector<1x8x8xf32>
    %473 = vector.shape_cast %472 : vector<1x8x8xf32> to vector<8x8xf32>
    %cst_237 = arith.constant dense<0.000000e+00> : vector<8x512xf32>
    %474 = tpu.matmul %473, %471, %cst_237 {dimension_numbers = #tpu.dot_dimension_numbers<[1], [0], [0], [1], [0, 0, 1, 1], [], []>} : vector<8x8xf32>, vector<8x512xf32>, vector<8x512xf32> -> vector<8x512xf32>
    %475 = arith.addf %466, %474 : vector<8x512xf32>
    %c65_i32_238 = arith.constant 65 : i32
    %476 = tpu.dynamic_rotate %450 by %c65_i32_238 dim 1 : vector<8x512xf32>, i32 -> vector<8x512xf32>
    %477 = arith.mulf %0, %4 : vector<1x512xf32>
    %478 = vector.broadcast %477 : vector<1x512xf32> to vector<8x512xf32>
    %479 = arith.mulf %476, %478 : vector<8x512xf32>
    %c3_239 = arith.constant 3 : index
    %c0_240 = arith.constant 0 : index
    %c0_241 = arith.constant 0 : index
    %480 = vector.load %arg2[%c3_239, %c0_240, %c0_241] : memref<54x8x8xf32, #tpu.memory_space<vmem>>, vector<1x8x8xf32>
    %481 = vector.shape_cast %480 : vector<1x8x8xf32> to vector<8x8xf32>
    %cst_242 = arith.constant dense<0.000000e+00> : vector<8x512xf32>
    %482 = tpu.matmul %481, %479, %cst_242 {dimension_numbers = #tpu.dot_dimension_numbers<[1], [0], [0], [1], [0, 0, 1, 1], [], []>} : vector<8x8xf32>, vector<8x512xf32>, vector<8x512xf32> -> vector<8x512xf32>
    %483 = arith.addf %475, %482 : vector<8x512xf32>
    %c64_i32_243 = arith.constant 64 : i32
    %484 = tpu.dynamic_rotate %450 by %c64_i32_243 dim 1 : vector<8x512xf32>, i32 -> vector<8x512xf32>
    %485 = vector.broadcast %0 : vector<1x512xf32> to vector<8x512xf32>
    %486 = arith.mulf %484, %485 : vector<8x512xf32>
    %c4_244 = arith.constant 4 : index
    %c0_245 = arith.constant 0 : index
    %c0_246 = arith.constant 0 : index
    %487 = vector.load %arg2[%c4_244, %c0_245, %c0_246] : memref<54x8x8xf32, #tpu.memory_space<vmem>>, vector<1x8x8xf32>
    %488 = vector.shape_cast %487 : vector<1x8x8xf32> to vector<8x8xf32>
    %cst_247 = arith.constant dense<0.000000e+00> : vector<8x512xf32>
    %489 = tpu.matmul %488, %486, %cst_247 {dimension_numbers = #tpu.dot_dimension_numbers<[1], [0], [0], [1], [0, 0, 1, 1], [], []>} : vector<8x8xf32>, vector<8x512xf32>, vector<8x512xf32> -> vector<8x512xf32>
    %490 = arith.addf %483, %489 : vector<8x512xf32>
    %c63_i32_248 = arith.constant 63 : i32
    %491 = tpu.dynamic_rotate %450 by %c63_i32_248 dim 1 : vector<8x512xf32>, i32 -> vector<8x512xf32>
    %492 = arith.mulf %0, %5 : vector<1x512xf32>
    %493 = vector.broadcast %492 : vector<1x512xf32> to vector<8x512xf32>
    %494 = arith.mulf %491, %493 : vector<8x512xf32>
    %c5_249 = arith.constant 5 : index
    %c0_250 = arith.constant 0 : index
    %c0_251 = arith.constant 0 : index
    %495 = vector.load %arg2[%c5_249, %c0_250, %c0_251] : memref<54x8x8xf32, #tpu.memory_space<vmem>>, vector<1x8x8xf32>
    %496 = vector.shape_cast %495 : vector<1x8x8xf32> to vector<8x8xf32>
    %cst_252 = arith.constant dense<0.000000e+00> : vector<8x512xf32>
    %497 = tpu.matmul %496, %494, %cst_252 {dimension_numbers = #tpu.dot_dimension_numbers<[1], [0], [0], [1], [0, 0, 1, 1], [], []>} : vector<8x8xf32>, vector<8x512xf32>, vector<8x512xf32> -> vector<8x512xf32>
    %498 = arith.addf %490, %497 : vector<8x512xf32>
    %c57_i32_253 = arith.constant 57 : i32
    %499 = tpu.dynamic_rotate %450 by %c57_i32_253 dim 1 : vector<8x512xf32>, i32 -> vector<8x512xf32>
    %500 = arith.mulf %0, %3 : vector<1x512xf32>
    %501 = arith.mulf %500, %4 : vector<1x512xf32>
    %502 = vector.broadcast %501 : vector<1x512xf32> to vector<8x512xf32>
    %503 = arith.mulf %499, %502 : vector<8x512xf32>
    %c6_254 = arith.constant 6 : index
    %c0_255 = arith.constant 0 : index
    %c0_256 = arith.constant 0 : index
    %504 = vector.load %arg2[%c6_254, %c0_255, %c0_256] : memref<54x8x8xf32, #tpu.memory_space<vmem>>, vector<1x8x8xf32>
    %505 = vector.shape_cast %504 : vector<1x8x8xf32> to vector<8x8xf32>
    %cst_257 = arith.constant dense<0.000000e+00> : vector<8x512xf32>
    %506 = tpu.matmul %505, %503, %cst_257 {dimension_numbers = #tpu.dot_dimension_numbers<[1], [0], [0], [1], [0, 0, 1, 1], [], []>} : vector<8x8xf32>, vector<8x512xf32>, vector<8x512xf32> -> vector<8x512xf32>
    %507 = arith.addf %498, %506 : vector<8x512xf32>
    %c56_i32_258 = arith.constant 56 : i32
    %508 = tpu.dynamic_rotate %450 by %c56_i32_258 dim 1 : vector<8x512xf32>, i32 -> vector<8x512xf32>
    %509 = arith.mulf %0, %3 : vector<1x512xf32>
    %510 = vector.broadcast %509 : vector<1x512xf32> to vector<8x512xf32>
    %511 = arith.mulf %508, %510 : vector<8x512xf32>
    %c7_259 = arith.constant 7 : index
    %c0_260 = arith.constant 0 : index
    %c0_261 = arith.constant 0 : index
    %512 = vector.load %arg2[%c7_259, %c0_260, %c0_261] : memref<54x8x8xf32, #tpu.memory_space<vmem>>, vector<1x8x8xf32>
    %513 = vector.shape_cast %512 : vector<1x8x8xf32> to vector<8x8xf32>
    %cst_262 = arith.constant dense<0.000000e+00> : vector<8x512xf32>
    %514 = tpu.matmul %513, %511, %cst_262 {dimension_numbers = #tpu.dot_dimension_numbers<[1], [0], [0], [1], [0, 0, 1, 1], [], []>} : vector<8x8xf32>, vector<8x512xf32>, vector<8x512xf32> -> vector<8x512xf32>
    %515 = arith.addf %507, %514 : vector<8x512xf32>
    %c55_i32_263 = arith.constant 55 : i32
    %516 = tpu.dynamic_rotate %450 by %c55_i32_263 dim 1 : vector<8x512xf32>, i32 -> vector<8x512xf32>
    %517 = arith.mulf %0, %3 : vector<1x512xf32>
    %518 = arith.mulf %517, %5 : vector<1x512xf32>
    %519 = vector.broadcast %518 : vector<1x512xf32> to vector<8x512xf32>
    %520 = arith.mulf %516, %519 : vector<8x512xf32>
    %c8_264 = arith.constant 8 : index
    %c0_265 = arith.constant 0 : index
    %c0_266 = arith.constant 0 : index
    %521 = vector.load %arg2[%c8_264, %c0_265, %c0_266] : memref<54x8x8xf32, #tpu.memory_space<vmem>>, vector<1x8x8xf32>
    %522 = vector.shape_cast %521 : vector<1x8x8xf32> to vector<8x8xf32>
    %cst_267 = arith.constant dense<0.000000e+00> : vector<8x512xf32>
    %523 = tpu.matmul %522, %520, %cst_267 {dimension_numbers = #tpu.dot_dimension_numbers<[1], [0], [0], [1], [0, 0, 1, 1], [], []>} : vector<8x8xf32>, vector<8x512xf32>, vector<8x512xf32> -> vector<8x512xf32>
    %524 = arith.addf %515, %523 : vector<8x512xf32>
    %c9_i32_268 = arith.constant 9 : i32
    %525 = tpu.dynamic_rotate %450 by %c9_i32_268 dim 1 : vector<8x512xf32>, i32 -> vector<8x512xf32>
    %526 = arith.mulf %2, %4 : vector<1x512xf32>
    %527 = vector.broadcast %526 : vector<1x512xf32> to vector<8x512xf32>
    %528 = arith.mulf %525, %527 : vector<8x512xf32>
    %c9_269 = arith.constant 9 : index
    %c0_270 = arith.constant 0 : index
    %c0_271 = arith.constant 0 : index
    %529 = vector.load %arg2[%c9_269, %c0_270, %c0_271] : memref<54x8x8xf32, #tpu.memory_space<vmem>>, vector<1x8x8xf32>
    %530 = vector.shape_cast %529 : vector<1x8x8xf32> to vector<8x8xf32>
    %cst_272 = arith.constant dense<0.000000e+00> : vector<8x512xf32>
    %531 = tpu.matmul %530, %528, %cst_272 {dimension_numbers = #tpu.dot_dimension_numbers<[1], [0], [0], [1], [0, 0, 1, 1], [], []>} : vector<8x8xf32>, vector<8x512xf32>, vector<8x512xf32> -> vector<8x512xf32>
    %532 = arith.addf %524, %531 : vector<8x512xf32>
    %c8_i32_273 = arith.constant 8 : i32
    %533 = tpu.dynamic_rotate %450 by %c8_i32_273 dim 1 : vector<8x512xf32>, i32 -> vector<8x512xf32>
    %534 = vector.broadcast %2 : vector<1x512xf32> to vector<8x512xf32>
    %535 = arith.mulf %533, %534 : vector<8x512xf32>
    %c10_274 = arith.constant 10 : index
    %c0_275 = arith.constant 0 : index
    %c0_276 = arith.constant 0 : index
    %536 = vector.load %arg2[%c10_274, %c0_275, %c0_276] : memref<54x8x8xf32, #tpu.memory_space<vmem>>, vector<1x8x8xf32>
    %537 = vector.shape_cast %536 : vector<1x8x8xf32> to vector<8x8xf32>
    %cst_277 = arith.constant dense<0.000000e+00> : vector<8x512xf32>
    %538 = tpu.matmul %537, %535, %cst_277 {dimension_numbers = #tpu.dot_dimension_numbers<[1], [0], [0], [1], [0, 0, 1, 1], [], []>} : vector<8x8xf32>, vector<8x512xf32>, vector<8x512xf32> -> vector<8x512xf32>
    %539 = arith.addf %532, %538 : vector<8x512xf32>
    %c7_i32_278 = arith.constant 7 : i32
    %540 = tpu.dynamic_rotate %450 by %c7_i32_278 dim 1 : vector<8x512xf32>, i32 -> vector<8x512xf32>
    %541 = arith.mulf %2, %5 : vector<1x512xf32>
    %542 = vector.broadcast %541 : vector<1x512xf32> to vector<8x512xf32>
    %543 = arith.mulf %540, %542 : vector<8x512xf32>
    %c11_279 = arith.constant 11 : index
    %c0_280 = arith.constant 0 : index
    %c0_281 = arith.constant 0 : index
    %544 = vector.load %arg2[%c11_279, %c0_280, %c0_281] : memref<54x8x8xf32, #tpu.memory_space<vmem>>, vector<1x8x8xf32>
    %545 = vector.shape_cast %544 : vector<1x8x8xf32> to vector<8x8xf32>
    %cst_282 = arith.constant dense<0.000000e+00> : vector<8x512xf32>
    %546 = tpu.matmul %545, %543, %cst_282 {dimension_numbers = #tpu.dot_dimension_numbers<[1], [0], [0], [1], [0, 0, 1, 1], [], []>} : vector<8x8xf32>, vector<8x512xf32>, vector<8x512xf32> -> vector<8x512xf32>
    %547 = arith.addf %539, %546 : vector<8x512xf32>
    %c1_i32_283 = arith.constant 1 : i32
    %548 = tpu.dynamic_rotate %450 by %c1_i32_283 dim 1 : vector<8x512xf32>, i32 -> vector<8x512xf32>
    %549 = vector.broadcast %4 : vector<1x512xf32> to vector<8x512xf32>
    %550 = arith.mulf %548, %549 : vector<8x512xf32>
    %c12_284 = arith.constant 12 : index
    %c0_285 = arith.constant 0 : index
    %c0_286 = arith.constant 0 : index
    %551 = vector.load %arg2[%c12_284, %c0_285, %c0_286] : memref<54x8x8xf32, #tpu.memory_space<vmem>>, vector<1x8x8xf32>
    %552 = vector.shape_cast %551 : vector<1x8x8xf32> to vector<8x8xf32>
    %cst_287 = arith.constant dense<0.000000e+00> : vector<8x512xf32>
    %553 = tpu.matmul %552, %550, %cst_287 {dimension_numbers = #tpu.dot_dimension_numbers<[1], [0], [0], [1], [0, 0, 1, 1], [], []>} : vector<8x8xf32>, vector<8x512xf32>, vector<8x512xf32> -> vector<8x512xf32>
    %554 = arith.addf %547, %553 : vector<8x512xf32>
    %c13_288 = arith.constant 13 : index
    %c0_289 = arith.constant 0 : index
    %c0_290 = arith.constant 0 : index
    %555 = vector.load %arg2[%c13_288, %c0_289, %c0_290] : memref<54x8x8xf32, #tpu.memory_space<vmem>>, vector<1x8x8xf32>
    %556 = vector.shape_cast %555 : vector<1x8x8xf32> to vector<8x8xf32>
    %cst_291 = arith.constant dense<0.000000e+00> : vector<8x512xf32>
    %557 = tpu.matmul %556, %450, %cst_291 {dimension_numbers = #tpu.dot_dimension_numbers<[1], [0], [0], [1], [0, 0, 1, 1], [], []>} : vector<8x8xf32>, vector<8x512xf32>, vector<8x512xf32> -> vector<8x512xf32>
    %558 = arith.addf %554, %557 : vector<8x512xf32>
    %c511_i32_292 = arith.constant 511 : i32
    %559 = tpu.dynamic_rotate %450 by %c511_i32_292 dim 1 : vector<8x512xf32>, i32 -> vector<8x512xf32>
    %560 = vector.broadcast %5 : vector<1x512xf32> to vector<8x512xf32>
    %561 = arith.mulf %559, %560 : vector<8x512xf32>
    %c14_293 = arith.constant 14 : index
    %c0_294 = arith.constant 0 : index
    %c0_295 = arith.constant 0 : index
    %562 = vector.load %arg2[%c14_293, %c0_294, %c0_295] : memref<54x8x8xf32, #tpu.memory_space<vmem>>, vector<1x8x8xf32>
    %563 = vector.shape_cast %562 : vector<1x8x8xf32> to vector<8x8xf32>
    %cst_296 = arith.constant dense<0.000000e+00> : vector<8x512xf32>
    %564 = tpu.matmul %563, %561, %cst_296 {dimension_numbers = #tpu.dot_dimension_numbers<[1], [0], [0], [1], [0, 0, 1, 1], [], []>} : vector<8x8xf32>, vector<8x512xf32>, vector<8x512xf32> -> vector<8x512xf32>
    %565 = arith.addf %558, %564 : vector<8x512xf32>
    %c505_i32_297 = arith.constant 505 : i32
    %566 = tpu.dynamic_rotate %450 by %c505_i32_297 dim 1 : vector<8x512xf32>, i32 -> vector<8x512xf32>
    %567 = arith.mulf %3, %4 : vector<1x512xf32>
    %568 = vector.broadcast %567 : vector<1x512xf32> to vector<8x512xf32>
    %569 = arith.mulf %566, %568 : vector<8x512xf32>
    %c15_298 = arith.constant 15 : index
    %c0_299 = arith.constant 0 : index
    %c0_300 = arith.constant 0 : index
    %570 = vector.load %arg2[%c15_298, %c0_299, %c0_300] : memref<54x8x8xf32, #tpu.memory_space<vmem>>, vector<1x8x8xf32>
    %571 = vector.shape_cast %570 : vector<1x8x8xf32> to vector<8x8xf32>
    %cst_301 = arith.constant dense<0.000000e+00> : vector<8x512xf32>
    %572 = tpu.matmul %571, %569, %cst_301 {dimension_numbers = #tpu.dot_dimension_numbers<[1], [0], [0], [1], [0, 0, 1, 1], [], []>} : vector<8x8xf32>, vector<8x512xf32>, vector<8x512xf32> -> vector<8x512xf32>
    %573 = arith.addf %565, %572 : vector<8x512xf32>
    %c504_i32_302 = arith.constant 504 : i32
    %574 = tpu.dynamic_rotate %450 by %c504_i32_302 dim 1 : vector<8x512xf32>, i32 -> vector<8x512xf32>
    %575 = vector.broadcast %3 : vector<1x512xf32> to vector<8x512xf32>
    %576 = arith.mulf %574, %575 : vector<8x512xf32>
    %c16_303 = arith.constant 16 : index
    %c0_304 = arith.constant 0 : index
    %c0_305 = arith.constant 0 : index
    %577 = vector.load %arg2[%c16_303, %c0_304, %c0_305] : memref<54x8x8xf32, #tpu.memory_space<vmem>>, vector<1x8x8xf32>
    %578 = vector.shape_cast %577 : vector<1x8x8xf32> to vector<8x8xf32>
    %cst_306 = arith.constant dense<0.000000e+00> : vector<8x512xf32>
    %579 = tpu.matmul %578, %576, %cst_306 {dimension_numbers = #tpu.dot_dimension_numbers<[1], [0], [0], [1], [0, 0, 1, 1], [], []>} : vector<8x8xf32>, vector<8x512xf32>, vector<8x512xf32> -> vector<8x512xf32>
    %580 = arith.addf %573, %579 : vector<8x512xf32>
    %c503_i32_307 = arith.constant 503 : i32
    %581 = tpu.dynamic_rotate %450 by %c503_i32_307 dim 1 : vector<8x512xf32>, i32 -> vector<8x512xf32>
    %582 = arith.mulf %3, %5 : vector<1x512xf32>
    %583 = vector.broadcast %582 : vector<1x512xf32> to vector<8x512xf32>
    %584 = arith.mulf %581, %583 : vector<8x512xf32>
    %c17_308 = arith.constant 17 : index
    %c0_309 = arith.constant 0 : index
    %c0_310 = arith.constant 0 : index
    %585 = vector.load %arg2[%c17_308, %c0_309, %c0_310] : memref<54x8x8xf32, #tpu.memory_space<vmem>>, vector<1x8x8xf32>
    %586 = vector.shape_cast %585 : vector<1x8x8xf32> to vector<8x8xf32>
    %cst_311 = arith.constant dense<0.000000e+00> : vector<8x512xf32>
    %587 = tpu.matmul %586, %584, %cst_311 {dimension_numbers = #tpu.dot_dimension_numbers<[1], [0], [0], [1], [0, 0, 1, 1], [], []>} : vector<8x8xf32>, vector<8x512xf32>, vector<8x512xf32> -> vector<8x512xf32>
    %588 = arith.addf %580, %587 : vector<8x512xf32>
    %c457_i32_312 = arith.constant 457 : i32
    %589 = tpu.dynamic_rotate %450 by %c457_i32_312 dim 1 : vector<8x512xf32>, i32 -> vector<8x512xf32>
    %590 = arith.mulf %1, %2 : vector<1x512xf32>
    %591 = arith.mulf %590, %4 : vector<1x512xf32>
    %592 = vector.broadcast %591 : vector<1x512xf32> to vector<8x512xf32>
    %593 = arith.mulf %589, %592 : vector<8x512xf32>
    %c18_313 = arith.constant 18 : index
    %c0_314 = arith.constant 0 : index
    %c0_315 = arith.constant 0 : index
    %594 = vector.load %arg2[%c18_313, %c0_314, %c0_315] : memref<54x8x8xf32, #tpu.memory_space<vmem>>, vector<1x8x8xf32>
    %595 = vector.shape_cast %594 : vector<1x8x8xf32> to vector<8x8xf32>
    %cst_316 = arith.constant dense<0.000000e+00> : vector<8x512xf32>
    %596 = tpu.matmul %595, %593, %cst_316 {dimension_numbers = #tpu.dot_dimension_numbers<[1], [0], [0], [1], [0, 0, 1, 1], [], []>} : vector<8x8xf32>, vector<8x512xf32>, vector<8x512xf32> -> vector<8x512xf32>
    %597 = arith.addf %588, %596 : vector<8x512xf32>
    %c456_i32_317 = arith.constant 456 : i32
    %598 = tpu.dynamic_rotate %450 by %c456_i32_317 dim 1 : vector<8x512xf32>, i32 -> vector<8x512xf32>
    %599 = arith.mulf %1, %2 : vector<1x512xf32>
    %600 = vector.broadcast %599 : vector<1x512xf32> to vector<8x512xf32>
    %601 = arith.mulf %598, %600 : vector<8x512xf32>
    %c19_318 = arith.constant 19 : index
    %c0_319 = arith.constant 0 : index
    %c0_320 = arith.constant 0 : index
    %602 = vector.load %arg2[%c19_318, %c0_319, %c0_320] : memref<54x8x8xf32, #tpu.memory_space<vmem>>, vector<1x8x8xf32>
    %603 = vector.shape_cast %602 : vector<1x8x8xf32> to vector<8x8xf32>
    %cst_321 = arith.constant dense<0.000000e+00> : vector<8x512xf32>
    %604 = tpu.matmul %603, %601, %cst_321 {dimension_numbers = #tpu.dot_dimension_numbers<[1], [0], [0], [1], [0, 0, 1, 1], [], []>} : vector<8x8xf32>, vector<8x512xf32>, vector<8x512xf32> -> vector<8x512xf32>
    %605 = arith.addf %597, %604 : vector<8x512xf32>
    %c455_i32_322 = arith.constant 455 : i32
    %606 = tpu.dynamic_rotate %450 by %c455_i32_322 dim 1 : vector<8x512xf32>, i32 -> vector<8x512xf32>
    %607 = arith.mulf %1, %2 : vector<1x512xf32>
    %608 = arith.mulf %607, %5 : vector<1x512xf32>
    %609 = vector.broadcast %608 : vector<1x512xf32> to vector<8x512xf32>
    %610 = arith.mulf %606, %609 : vector<8x512xf32>
    %c20_323 = arith.constant 20 : index
    %c0_324 = arith.constant 0 : index
    %c0_325 = arith.constant 0 : index
    %611 = vector.load %arg2[%c20_323, %c0_324, %c0_325] : memref<54x8x8xf32, #tpu.memory_space<vmem>>, vector<1x8x8xf32>
    %612 = vector.shape_cast %611 : vector<1x8x8xf32> to vector<8x8xf32>
    %cst_326 = arith.constant dense<0.000000e+00> : vector<8x512xf32>
    %613 = tpu.matmul %612, %610, %cst_326 {dimension_numbers = #tpu.dot_dimension_numbers<[1], [0], [0], [1], [0, 0, 1, 1], [], []>} : vector<8x8xf32>, vector<8x512xf32>, vector<8x512xf32> -> vector<8x512xf32>
    %614 = arith.addf %605, %613 : vector<8x512xf32>
    %c449_i32_327 = arith.constant 449 : i32
    %615 = tpu.dynamic_rotate %450 by %c449_i32_327 dim 1 : vector<8x512xf32>, i32 -> vector<8x512xf32>
    %616 = arith.mulf %1, %4 : vector<1x512xf32>
    %617 = vector.broadcast %616 : vector<1x512xf32> to vector<8x512xf32>
    %618 = arith.mulf %615, %617 : vector<8x512xf32>
    %c21_328 = arith.constant 21 : index
    %c0_329 = arith.constant 0 : index
    %c0_330 = arith.constant 0 : index
    %619 = vector.load %arg2[%c21_328, %c0_329, %c0_330] : memref<54x8x8xf32, #tpu.memory_space<vmem>>, vector<1x8x8xf32>
    %620 = vector.shape_cast %619 : vector<1x8x8xf32> to vector<8x8xf32>
    %cst_331 = arith.constant dense<0.000000e+00> : vector<8x512xf32>
    %621 = tpu.matmul %620, %618, %cst_331 {dimension_numbers = #tpu.dot_dimension_numbers<[1], [0], [0], [1], [0, 0, 1, 1], [], []>} : vector<8x8xf32>, vector<8x512xf32>, vector<8x512xf32> -> vector<8x512xf32>
    %622 = arith.addf %614, %621 : vector<8x512xf32>
    %c448_i32_332 = arith.constant 448 : i32
    %623 = tpu.dynamic_rotate %450 by %c448_i32_332 dim 1 : vector<8x512xf32>, i32 -> vector<8x512xf32>
    %624 = vector.broadcast %1 : vector<1x512xf32> to vector<8x512xf32>
    %625 = arith.mulf %623, %624 : vector<8x512xf32>
    %c22_333 = arith.constant 22 : index
    %c0_334 = arith.constant 0 : index
    %c0_335 = arith.constant 0 : index
    %626 = vector.load %arg2[%c22_333, %c0_334, %c0_335] : memref<54x8x8xf32, #tpu.memory_space<vmem>>, vector<1x8x8xf32>
    %627 = vector.shape_cast %626 : vector<1x8x8xf32> to vector<8x8xf32>
    %cst_336 = arith.constant dense<0.000000e+00> : vector<8x512xf32>
    %628 = tpu.matmul %627, %625, %cst_336 {dimension_numbers = #tpu.dot_dimension_numbers<[1], [0], [0], [1], [0, 0, 1, 1], [], []>} : vector<8x8xf32>, vector<8x512xf32>, vector<8x512xf32> -> vector<8x512xf32>
    %629 = arith.addf %622, %628 : vector<8x512xf32>
    %c447_i32_337 = arith.constant 447 : i32
    %630 = tpu.dynamic_rotate %450 by %c447_i32_337 dim 1 : vector<8x512xf32>, i32 -> vector<8x512xf32>
    %631 = arith.mulf %1, %5 : vector<1x512xf32>
    %632 = vector.broadcast %631 : vector<1x512xf32> to vector<8x512xf32>
    %633 = arith.mulf %630, %632 : vector<8x512xf32>
    %c23_338 = arith.constant 23 : index
    %c0_339 = arith.constant 0 : index
    %c0_340 = arith.constant 0 : index
    %634 = vector.load %arg2[%c23_338, %c0_339, %c0_340] : memref<54x8x8xf32, #tpu.memory_space<vmem>>, vector<1x8x8xf32>
    %635 = vector.shape_cast %634 : vector<1x8x8xf32> to vector<8x8xf32>
    %cst_341 = arith.constant dense<0.000000e+00> : vector<8x512xf32>
    %636 = tpu.matmul %635, %633, %cst_341 {dimension_numbers = #tpu.dot_dimension_numbers<[1], [0], [0], [1], [0, 0, 1, 1], [], []>} : vector<8x8xf32>, vector<8x512xf32>, vector<8x512xf32> -> vector<8x512xf32>
    %637 = arith.addf %629, %636 : vector<8x512xf32>
    %c441_i32_342 = arith.constant 441 : i32
    %638 = tpu.dynamic_rotate %450 by %c441_i32_342 dim 1 : vector<8x512xf32>, i32 -> vector<8x512xf32>
    %639 = arith.mulf %1, %3 : vector<1x512xf32>
    %640 = arith.mulf %639, %4 : vector<1x512xf32>
    %641 = vector.broadcast %640 : vector<1x512xf32> to vector<8x512xf32>
    %642 = arith.mulf %638, %641 : vector<8x512xf32>
    %c24_343 = arith.constant 24 : index
    %c0_344 = arith.constant 0 : index
    %c0_345 = arith.constant 0 : index
    %643 = vector.load %arg2[%c24_343, %c0_344, %c0_345] : memref<54x8x8xf32, #tpu.memory_space<vmem>>, vector<1x8x8xf32>
    %644 = vector.shape_cast %643 : vector<1x8x8xf32> to vector<8x8xf32>
    %cst_346 = arith.constant dense<0.000000e+00> : vector<8x512xf32>
    %645 = tpu.matmul %644, %642, %cst_346 {dimension_numbers = #tpu.dot_dimension_numbers<[1], [0], [0], [1], [0, 0, 1, 1], [], []>} : vector<8x8xf32>, vector<8x512xf32>, vector<8x512xf32> -> vector<8x512xf32>
    %646 = arith.addf %637, %645 : vector<8x512xf32>
    %c440_i32_347 = arith.constant 440 : i32
    %647 = tpu.dynamic_rotate %450 by %c440_i32_347 dim 1 : vector<8x512xf32>, i32 -> vector<8x512xf32>
    %648 = arith.mulf %1, %3 : vector<1x512xf32>
    %649 = vector.broadcast %648 : vector<1x512xf32> to vector<8x512xf32>
    %650 = arith.mulf %647, %649 : vector<8x512xf32>
    %c25_348 = arith.constant 25 : index
    %c0_349 = arith.constant 0 : index
    %c0_350 = arith.constant 0 : index
    %651 = vector.load %arg2[%c25_348, %c0_349, %c0_350] : memref<54x8x8xf32, #tpu.memory_space<vmem>>, vector<1x8x8xf32>
    %652 = vector.shape_cast %651 : vector<1x8x8xf32> to vector<8x8xf32>
    %cst_351 = arith.constant dense<0.000000e+00> : vector<8x512xf32>
    %653 = tpu.matmul %652, %650, %cst_351 {dimension_numbers = #tpu.dot_dimension_numbers<[1], [0], [0], [1], [0, 0, 1, 1], [], []>} : vector<8x8xf32>, vector<8x512xf32>, vector<8x512xf32> -> vector<8x512xf32>
    %654 = arith.addf %646, %653 : vector<8x512xf32>
    %c439_i32_352 = arith.constant 439 : i32
    %655 = tpu.dynamic_rotate %450 by %c439_i32_352 dim 1 : vector<8x512xf32>, i32 -> vector<8x512xf32>
    %656 = arith.mulf %1, %3 : vector<1x512xf32>
    %657 = arith.mulf %656, %5 : vector<1x512xf32>
    %658 = vector.broadcast %657 : vector<1x512xf32> to vector<8x512xf32>
    %659 = arith.mulf %655, %658 : vector<8x512xf32>
    %c26_353 = arith.constant 26 : index
    %c0_354 = arith.constant 0 : index
    %c0_355 = arith.constant 0 : index
    %660 = vector.load %arg2[%c26_353, %c0_354, %c0_355] : memref<54x8x8xf32, #tpu.memory_space<vmem>>, vector<1x8x8xf32>
    %661 = vector.shape_cast %660 : vector<1x8x8xf32> to vector<8x8xf32>
    %cst_356 = arith.constant dense<0.000000e+00> : vector<8x512xf32>
    %662 = tpu.matmul %661, %659, %cst_356 {dimension_numbers = #tpu.dot_dimension_numbers<[1], [0], [0], [1], [0, 0, 1, 1], [], []>} : vector<8x8xf32>, vector<8x512xf32>, vector<8x512xf32> -> vector<8x512xf32>
    %663 = arith.addf %654, %662 : vector<8x512xf32>
    %c0_357 = arith.constant 0 : index
    %c0_358 = arith.constant 0 : index
    %664 = vector.load %arg3[%c0_357, %c0_358] : memref<8x2xf32, #tpu.memory_space<vmem>>, vector<8x1xf32>
    %665 = vector.broadcast %664 : vector<8x1xf32> to vector<8x512xf32>
    %666 = arith.addf %663, %665 : vector<8x512xf32>
    %c73_i32_359 = arith.constant 73 : i32
    %667 = tpu.dynamic_rotate %666 by %c73_i32_359 dim 1 : vector<8x512xf32>, i32 -> vector<8x512xf32>
    %668 = arith.mulf %0, %2 : vector<1x512xf32>
    %669 = arith.mulf %668, %4 : vector<1x512xf32>
    %670 = vector.broadcast %669 : vector<1x512xf32> to vector<8x512xf32>
    %671 = arith.mulf %667, %670 : vector<8x512xf32>
    %c27_360 = arith.constant 27 : index
    %c0_361 = arith.constant 0 : index
    %c0_362 = arith.constant 0 : index
    %672 = vector.load %arg2[%c27_360, %c0_361, %c0_362] : memref<54x8x8xf32, #tpu.memory_space<vmem>>, vector<1x8x8xf32>
    %673 = vector.shape_cast %672 : vector<1x8x8xf32> to vector<8x8xf32>
    %cst_363 = arith.constant dense<0.000000e+00> : vector<8x512xf32>
    %674 = tpu.matmul %673, %671, %cst_363 {dimension_numbers = #tpu.dot_dimension_numbers<[1], [0], [0], [1], [0, 0, 1, 1], [], []>} : vector<8x8xf32>, vector<8x512xf32>, vector<8x512xf32> -> vector<8x512xf32>
    %c72_i32_364 = arith.constant 72 : i32
    %675 = tpu.dynamic_rotate %666 by %c72_i32_364 dim 1 : vector<8x512xf32>, i32 -> vector<8x512xf32>
    %676 = arith.mulf %0, %2 : vector<1x512xf32>
    %677 = vector.broadcast %676 : vector<1x512xf32> to vector<8x512xf32>
    %678 = arith.mulf %675, %677 : vector<8x512xf32>
    %c28_365 = arith.constant 28 : index
    %c0_366 = arith.constant 0 : index
    %c0_367 = arith.constant 0 : index
    %679 = vector.load %arg2[%c28_365, %c0_366, %c0_367] : memref<54x8x8xf32, #tpu.memory_space<vmem>>, vector<1x8x8xf32>
    %680 = vector.shape_cast %679 : vector<1x8x8xf32> to vector<8x8xf32>
    %cst_368 = arith.constant dense<0.000000e+00> : vector<8x512xf32>
    %681 = tpu.matmul %680, %678, %cst_368 {dimension_numbers = #tpu.dot_dimension_numbers<[1], [0], [0], [1], [0, 0, 1, 1], [], []>} : vector<8x8xf32>, vector<8x512xf32>, vector<8x512xf32> -> vector<8x512xf32>
    %682 = arith.addf %674, %681 : vector<8x512xf32>
    %c71_i32_369 = arith.constant 71 : i32
    %683 = tpu.dynamic_rotate %666 by %c71_i32_369 dim 1 : vector<8x512xf32>, i32 -> vector<8x512xf32>
    %684 = arith.mulf %0, %2 : vector<1x512xf32>
    %685 = arith.mulf %684, %5 : vector<1x512xf32>
    %686 = vector.broadcast %685 : vector<1x512xf32> to vector<8x512xf32>
    %687 = arith.mulf %683, %686 : vector<8x512xf32>
    %c29_370 = arith.constant 29 : index
    %c0_371 = arith.constant 0 : index
    %c0_372 = arith.constant 0 : index
    %688 = vector.load %arg2[%c29_370, %c0_371, %c0_372] : memref<54x8x8xf32, #tpu.memory_space<vmem>>, vector<1x8x8xf32>
    %689 = vector.shape_cast %688 : vector<1x8x8xf32> to vector<8x8xf32>
    %cst_373 = arith.constant dense<0.000000e+00> : vector<8x512xf32>
    %690 = tpu.matmul %689, %687, %cst_373 {dimension_numbers = #tpu.dot_dimension_numbers<[1], [0], [0], [1], [0, 0, 1, 1], [], []>} : vector<8x8xf32>, vector<8x512xf32>, vector<8x512xf32> -> vector<8x512xf32>
    %691 = arith.addf %682, %690 : vector<8x512xf32>
    %c65_i32_374 = arith.constant 65 : i32
    %692 = tpu.dynamic_rotate %666 by %c65_i32_374 dim 1 : vector<8x512xf32>, i32 -> vector<8x512xf32>
    %693 = arith.mulf %0, %4 : vector<1x512xf32>
    %694 = vector.broadcast %693 : vector<1x512xf32> to vector<8x512xf32>
    %695 = arith.mulf %692, %694 : vector<8x512xf32>
    %c30_375 = arith.constant 30 : index
    %c0_376 = arith.constant 0 : index
    %c0_377 = arith.constant 0 : index
    %696 = vector.load %arg2[%c30_375, %c0_376, %c0_377] : memref<54x8x8xf32, #tpu.memory_space<vmem>>, vector<1x8x8xf32>
    %697 = vector.shape_cast %696 : vector<1x8x8xf32> to vector<8x8xf32>
    %cst_378 = arith.constant dense<0.000000e+00> : vector<8x512xf32>
    %698 = tpu.matmul %697, %695, %cst_378 {dimension_numbers = #tpu.dot_dimension_numbers<[1], [0], [0], [1], [0, 0, 1, 1], [], []>} : vector<8x8xf32>, vector<8x512xf32>, vector<8x512xf32> -> vector<8x512xf32>
    %699 = arith.addf %691, %698 : vector<8x512xf32>
    %c64_i32_379 = arith.constant 64 : i32
    %700 = tpu.dynamic_rotate %666 by %c64_i32_379 dim 1 : vector<8x512xf32>, i32 -> vector<8x512xf32>
    %701 = vector.broadcast %0 : vector<1x512xf32> to vector<8x512xf32>
    %702 = arith.mulf %700, %701 : vector<8x512xf32>
    %c31_380 = arith.constant 31 : index
    %c0_381 = arith.constant 0 : index
    %c0_382 = arith.constant 0 : index
    %703 = vector.load %arg2[%c31_380, %c0_381, %c0_382] : memref<54x8x8xf32, #tpu.memory_space<vmem>>, vector<1x8x8xf32>
    %704 = vector.shape_cast %703 : vector<1x8x8xf32> to vector<8x8xf32>
    %cst_383 = arith.constant dense<0.000000e+00> : vector<8x512xf32>
    %705 = tpu.matmul %704, %702, %cst_383 {dimension_numbers = #tpu.dot_dimension_numbers<[1], [0], [0], [1], [0, 0, 1, 1], [], []>} : vector<8x8xf32>, vector<8x512xf32>, vector<8x512xf32> -> vector<8x512xf32>
    %706 = arith.addf %699, %705 : vector<8x512xf32>
    %c63_i32_384 = arith.constant 63 : i32
    %707 = tpu.dynamic_rotate %666 by %c63_i32_384 dim 1 : vector<8x512xf32>, i32 -> vector<8x512xf32>
    %708 = arith.mulf %0, %5 : vector<1x512xf32>
    %709 = vector.broadcast %708 : vector<1x512xf32> to vector<8x512xf32>
    %710 = arith.mulf %707, %709 : vector<8x512xf32>
    %c32_385 = arith.constant 32 : index
    %c0_386 = arith.constant 0 : index
    %c0_387 = arith.constant 0 : index
    %711 = vector.load %arg2[%c32_385, %c0_386, %c0_387] : memref<54x8x8xf32, #tpu.memory_space<vmem>>, vector<1x8x8xf32>
    %712 = vector.shape_cast %711 : vector<1x8x8xf32> to vector<8x8xf32>
    %cst_388 = arith.constant dense<0.000000e+00> : vector<8x512xf32>
    %713 = tpu.matmul %712, %710, %cst_388 {dimension_numbers = #tpu.dot_dimension_numbers<[1], [0], [0], [1], [0, 0, 1, 1], [], []>} : vector<8x8xf32>, vector<8x512xf32>, vector<8x512xf32> -> vector<8x512xf32>
    %714 = arith.addf %706, %713 : vector<8x512xf32>
    %c57_i32_389 = arith.constant 57 : i32
    %715 = tpu.dynamic_rotate %666 by %c57_i32_389 dim 1 : vector<8x512xf32>, i32 -> vector<8x512xf32>
    %716 = arith.mulf %0, %3 : vector<1x512xf32>
    %717 = arith.mulf %716, %4 : vector<1x512xf32>
    %718 = vector.broadcast %717 : vector<1x512xf32> to vector<8x512xf32>
    %719 = arith.mulf %715, %718 : vector<8x512xf32>
    %c33_390 = arith.constant 33 : index
    %c0_391 = arith.constant 0 : index
    %c0_392 = arith.constant 0 : index
    %720 = vector.load %arg2[%c33_390, %c0_391, %c0_392] : memref<54x8x8xf32, #tpu.memory_space<vmem>>, vector<1x8x8xf32>
    %721 = vector.shape_cast %720 : vector<1x8x8xf32> to vector<8x8xf32>
    %cst_393 = arith.constant dense<0.000000e+00> : vector<8x512xf32>
    %722 = tpu.matmul %721, %719, %cst_393 {dimension_numbers = #tpu.dot_dimension_numbers<[1], [0], [0], [1], [0, 0, 1, 1], [], []>} : vector<8x8xf32>, vector<8x512xf32>, vector<8x512xf32> -> vector<8x512xf32>
    %723 = arith.addf %714, %722 : vector<8x512xf32>
    %c56_i32_394 = arith.constant 56 : i32
    %724 = tpu.dynamic_rotate %666 by %c56_i32_394 dim 1 : vector<8x512xf32>, i32 -> vector<8x512xf32>
    %725 = arith.mulf %0, %3 : vector<1x512xf32>
    %726 = vector.broadcast %725 : vector<1x512xf32> to vector<8x512xf32>
    %727 = arith.mulf %724, %726 : vector<8x512xf32>
    %c34_395 = arith.constant 34 : index
    %c0_396 = arith.constant 0 : index
    %c0_397 = arith.constant 0 : index
    %728 = vector.load %arg2[%c34_395, %c0_396, %c0_397] : memref<54x8x8xf32, #tpu.memory_space<vmem>>, vector<1x8x8xf32>
    %729 = vector.shape_cast %728 : vector<1x8x8xf32> to vector<8x8xf32>
    %cst_398 = arith.constant dense<0.000000e+00> : vector<8x512xf32>
    %730 = tpu.matmul %729, %727, %cst_398 {dimension_numbers = #tpu.dot_dimension_numbers<[1], [0], [0], [1], [0, 0, 1, 1], [], []>} : vector<8x8xf32>, vector<8x512xf32>, vector<8x512xf32> -> vector<8x512xf32>
    %731 = arith.addf %723, %730 : vector<8x512xf32>
    %c55_i32_399 = arith.constant 55 : i32
    %732 = tpu.dynamic_rotate %666 by %c55_i32_399 dim 1 : vector<8x512xf32>, i32 -> vector<8x512xf32>
    %733 = arith.mulf %0, %3 : vector<1x512xf32>
    %734 = arith.mulf %733, %5 : vector<1x512xf32>
    %735 = vector.broadcast %734 : vector<1x512xf32> to vector<8x512xf32>
    %736 = arith.mulf %732, %735 : vector<8x512xf32>
    %c35_400 = arith.constant 35 : index
    %c0_401 = arith.constant 0 : index
    %c0_402 = arith.constant 0 : index
    %737 = vector.load %arg2[%c35_400, %c0_401, %c0_402] : memref<54x8x8xf32, #tpu.memory_space<vmem>>, vector<1x8x8xf32>
    %738 = vector.shape_cast %737 : vector<1x8x8xf32> to vector<8x8xf32>
    %cst_403 = arith.constant dense<0.000000e+00> : vector<8x512xf32>
    %739 = tpu.matmul %738, %736, %cst_403 {dimension_numbers = #tpu.dot_dimension_numbers<[1], [0], [0], [1], [0, 0, 1, 1], [], []>} : vector<8x8xf32>, vector<8x512xf32>, vector<8x512xf32> -> vector<8x512xf32>
    %740 = arith.addf %731, %739 : vector<8x512xf32>
    %c9_i32_404 = arith.constant 9 : i32
    %741 = tpu.dynamic_rotate %666 by %c9_i32_404 dim 1 : vector<8x512xf32>, i32 -> vector<8x512xf32>
    %742 = arith.mulf %2, %4 : vector<1x512xf32>
    %743 = vector.broadcast %742 : vector<1x512xf32> to vector<8x512xf32>
    %744 = arith.mulf %741, %743 : vector<8x512xf32>
    %c36_405 = arith.constant 36 : index
    %c0_406 = arith.constant 0 : index
    %c0_407 = arith.constant 0 : index
    %745 = vector.load %arg2[%c36_405, %c0_406, %c0_407] : memref<54x8x8xf32, #tpu.memory_space<vmem>>, vector<1x8x8xf32>
    %746 = vector.shape_cast %745 : vector<1x8x8xf32> to vector<8x8xf32>
    %cst_408 = arith.constant dense<0.000000e+00> : vector<8x512xf32>
    %747 = tpu.matmul %746, %744, %cst_408 {dimension_numbers = #tpu.dot_dimension_numbers<[1], [0], [0], [1], [0, 0, 1, 1], [], []>} : vector<8x8xf32>, vector<8x512xf32>, vector<8x512xf32> -> vector<8x512xf32>
    %748 = arith.addf %740, %747 : vector<8x512xf32>
    %c8_i32_409 = arith.constant 8 : i32
    %749 = tpu.dynamic_rotate %666 by %c8_i32_409 dim 1 : vector<8x512xf32>, i32 -> vector<8x512xf32>
    %750 = vector.broadcast %2 : vector<1x512xf32> to vector<8x512xf32>
    %751 = arith.mulf %749, %750 : vector<8x512xf32>
    %c37_410 = arith.constant 37 : index
    %c0_411 = arith.constant 0 : index
    %c0_412 = arith.constant 0 : index
    %752 = vector.load %arg2[%c37_410, %c0_411, %c0_412] : memref<54x8x8xf32, #tpu.memory_space<vmem>>, vector<1x8x8xf32>
    %753 = vector.shape_cast %752 : vector<1x8x8xf32> to vector<8x8xf32>
    %cst_413 = arith.constant dense<0.000000e+00> : vector<8x512xf32>
    %754 = tpu.matmul %753, %751, %cst_413 {dimension_numbers = #tpu.dot_dimension_numbers<[1], [0], [0], [1], [0, 0, 1, 1], [], []>} : vector<8x8xf32>, vector<8x512xf32>, vector<8x512xf32> -> vector<8x512xf32>
    %755 = arith.addf %748, %754 : vector<8x512xf32>
    %c7_i32_414 = arith.constant 7 : i32
    %756 = tpu.dynamic_rotate %666 by %c7_i32_414 dim 1 : vector<8x512xf32>, i32 -> vector<8x512xf32>
    %757 = arith.mulf %2, %5 : vector<1x512xf32>
    %758 = vector.broadcast %757 : vector<1x512xf32> to vector<8x512xf32>
    %759 = arith.mulf %756, %758 : vector<8x512xf32>
    %c38_415 = arith.constant 38 : index
    %c0_416 = arith.constant 0 : index
    %c0_417 = arith.constant 0 : index
    %760 = vector.load %arg2[%c38_415, %c0_416, %c0_417] : memref<54x8x8xf32, #tpu.memory_space<vmem>>, vector<1x8x8xf32>
    %761 = vector.shape_cast %760 : vector<1x8x8xf32> to vector<8x8xf32>
    %cst_418 = arith.constant dense<0.000000e+00> : vector<8x512xf32>
    %762 = tpu.matmul %761, %759, %cst_418 {dimension_numbers = #tpu.dot_dimension_numbers<[1], [0], [0], [1], [0, 0, 1, 1], [], []>} : vector<8x8xf32>, vector<8x512xf32>, vector<8x512xf32> -> vector<8x512xf32>
    %763 = arith.addf %755, %762 : vector<8x512xf32>
    %c1_i32_419 = arith.constant 1 : i32
    %764 = tpu.dynamic_rotate %666 by %c1_i32_419 dim 1 : vector<8x512xf32>, i32 -> vector<8x512xf32>
    %765 = vector.broadcast %4 : vector<1x512xf32> to vector<8x512xf32>
    %766 = arith.mulf %764, %765 : vector<8x512xf32>
    %c39_420 = arith.constant 39 : index
    %c0_421 = arith.constant 0 : index
    %c0_422 = arith.constant 0 : index
    %767 = vector.load %arg2[%c39_420, %c0_421, %c0_422] : memref<54x8x8xf32, #tpu.memory_space<vmem>>, vector<1x8x8xf32>
    %768 = vector.shape_cast %767 : vector<1x8x8xf32> to vector<8x8xf32>
    %cst_423 = arith.constant dense<0.000000e+00> : vector<8x512xf32>
    %769 = tpu.matmul %768, %766, %cst_423 {dimension_numbers = #tpu.dot_dimension_numbers<[1], [0], [0], [1], [0, 0, 1, 1], [], []>} : vector<8x8xf32>, vector<8x512xf32>, vector<8x512xf32> -> vector<8x512xf32>
    %770 = arith.addf %763, %769 : vector<8x512xf32>
    %c40_424 = arith.constant 40 : index
    %c0_425 = arith.constant 0 : index
    %c0_426 = arith.constant 0 : index
    %771 = vector.load %arg2[%c40_424, %c0_425, %c0_426] : memref<54x8x8xf32, #tpu.memory_space<vmem>>, vector<1x8x8xf32>
    %772 = vector.shape_cast %771 : vector<1x8x8xf32> to vector<8x8xf32>
    %cst_427 = arith.constant dense<0.000000e+00> : vector<8x512xf32>
    %773 = tpu.matmul %772, %666, %cst_427 {dimension_numbers = #tpu.dot_dimension_numbers<[1], [0], [0], [1], [0, 0, 1, 1], [], []>} : vector<8x8xf32>, vector<8x512xf32>, vector<8x512xf32> -> vector<8x512xf32>
    %774 = arith.addf %770, %773 : vector<8x512xf32>
    %c511_i32_428 = arith.constant 511 : i32
    %775 = tpu.dynamic_rotate %666 by %c511_i32_428 dim 1 : vector<8x512xf32>, i32 -> vector<8x512xf32>
    %776 = vector.broadcast %5 : vector<1x512xf32> to vector<8x512xf32>
    %777 = arith.mulf %775, %776 : vector<8x512xf32>
    %c41_429 = arith.constant 41 : index
    %c0_430 = arith.constant 0 : index
    %c0_431 = arith.constant 0 : index
    %778 = vector.load %arg2[%c41_429, %c0_430, %c0_431] : memref<54x8x8xf32, #tpu.memory_space<vmem>>, vector<1x8x8xf32>
    %779 = vector.shape_cast %778 : vector<1x8x8xf32> to vector<8x8xf32>
    %cst_432 = arith.constant dense<0.000000e+00> : vector<8x512xf32>
    %780 = tpu.matmul %779, %777, %cst_432 {dimension_numbers = #tpu.dot_dimension_numbers<[1], [0], [0], [1], [0, 0, 1, 1], [], []>} : vector<8x8xf32>, vector<8x512xf32>, vector<8x512xf32> -> vector<8x512xf32>
    %781 = arith.addf %774, %780 : vector<8x512xf32>
    %c505_i32_433 = arith.constant 505 : i32
    %782 = tpu.dynamic_rotate %666 by %c505_i32_433 dim 1 : vector<8x512xf32>, i32 -> vector<8x512xf32>
    %783 = arith.mulf %3, %4 : vector<1x512xf32>
    %784 = vector.broadcast %783 : vector<1x512xf32> to vector<8x512xf32>
    %785 = arith.mulf %782, %784 : vector<8x512xf32>
    %c42_434 = arith.constant 42 : index
    %c0_435 = arith.constant 0 : index
    %c0_436 = arith.constant 0 : index
    %786 = vector.load %arg2[%c42_434, %c0_435, %c0_436] : memref<54x8x8xf32, #tpu.memory_space<vmem>>, vector<1x8x8xf32>
    %787 = vector.shape_cast %786 : vector<1x8x8xf32> to vector<8x8xf32>
    %cst_437 = arith.constant dense<0.000000e+00> : vector<8x512xf32>
    %788 = tpu.matmul %787, %785, %cst_437 {dimension_numbers = #tpu.dot_dimension_numbers<[1], [0], [0], [1], [0, 0, 1, 1], [], []>} : vector<8x8xf32>, vector<8x512xf32>, vector<8x512xf32> -> vector<8x512xf32>
    %789 = arith.addf %781, %788 : vector<8x512xf32>
    %c504_i32_438 = arith.constant 504 : i32
    %790 = tpu.dynamic_rotate %666 by %c504_i32_438 dim 1 : vector<8x512xf32>, i32 -> vector<8x512xf32>
    %791 = vector.broadcast %3 : vector<1x512xf32> to vector<8x512xf32>
    %792 = arith.mulf %790, %791 : vector<8x512xf32>
    %c43_439 = arith.constant 43 : index
    %c0_440 = arith.constant 0 : index
    %c0_441 = arith.constant 0 : index
    %793 = vector.load %arg2[%c43_439, %c0_440, %c0_441] : memref<54x8x8xf32, #tpu.memory_space<vmem>>, vector<1x8x8xf32>
    %794 = vector.shape_cast %793 : vector<1x8x8xf32> to vector<8x8xf32>
    %cst_442 = arith.constant dense<0.000000e+00> : vector<8x512xf32>
    %795 = tpu.matmul %794, %792, %cst_442 {dimension_numbers = #tpu.dot_dimension_numbers<[1], [0], [0], [1], [0, 0, 1, 1], [], []>} : vector<8x8xf32>, vector<8x512xf32>, vector<8x512xf32> -> vector<8x512xf32>
    %796 = arith.addf %789, %795 : vector<8x512xf32>
    %c503_i32_443 = arith.constant 503 : i32
    %797 = tpu.dynamic_rotate %666 by %c503_i32_443 dim 1 : vector<8x512xf32>, i32 -> vector<8x512xf32>
    %798 = arith.mulf %3, %5 : vector<1x512xf32>
    %799 = vector.broadcast %798 : vector<1x512xf32> to vector<8x512xf32>
    %800 = arith.mulf %797, %799 : vector<8x512xf32>
    %c44_444 = arith.constant 44 : index
    %c0_445 = arith.constant 0 : index
    %c0_446 = arith.constant 0 : index
    %801 = vector.load %arg2[%c44_444, %c0_445, %c0_446] : memref<54x8x8xf32, #tpu.memory_space<vmem>>, vector<1x8x8xf32>
    %802 = vector.shape_cast %801 : vector<1x8x8xf32> to vector<8x8xf32>
    %cst_447 = arith.constant dense<0.000000e+00> : vector<8x512xf32>
    %803 = tpu.matmul %802, %800, %cst_447 {dimension_numbers = #tpu.dot_dimension_numbers<[1], [0], [0], [1], [0, 0, 1, 1], [], []>} : vector<8x8xf32>, vector<8x512xf32>, vector<8x512xf32> -> vector<8x512xf32>
    %804 = arith.addf %796, %803 : vector<8x512xf32>
    %c457_i32_448 = arith.constant 457 : i32
    %805 = tpu.dynamic_rotate %666 by %c457_i32_448 dim 1 : vector<8x512xf32>, i32 -> vector<8x512xf32>
    %806 = arith.mulf %1, %2 : vector<1x512xf32>
    %807 = arith.mulf %806, %4 : vector<1x512xf32>
    %808 = vector.broadcast %807 : vector<1x512xf32> to vector<8x512xf32>
    %809 = arith.mulf %805, %808 : vector<8x512xf32>
    %c45_449 = arith.constant 45 : index
    %c0_450 = arith.constant 0 : index
    %c0_451 = arith.constant 0 : index
    %810 = vector.load %arg2[%c45_449, %c0_450, %c0_451] : memref<54x8x8xf32, #tpu.memory_space<vmem>>, vector<1x8x8xf32>
    %811 = vector.shape_cast %810 : vector<1x8x8xf32> to vector<8x8xf32>
    %cst_452 = arith.constant dense<0.000000e+00> : vector<8x512xf32>
    %812 = tpu.matmul %811, %809, %cst_452 {dimension_numbers = #tpu.dot_dimension_numbers<[1], [0], [0], [1], [0, 0, 1, 1], [], []>} : vector<8x8xf32>, vector<8x512xf32>, vector<8x512xf32> -> vector<8x512xf32>
    %813 = arith.addf %804, %812 : vector<8x512xf32>
    %c456_i32_453 = arith.constant 456 : i32
    %814 = tpu.dynamic_rotate %666 by %c456_i32_453 dim 1 : vector<8x512xf32>, i32 -> vector<8x512xf32>
    %815 = arith.mulf %1, %2 : vector<1x512xf32>
    %816 = vector.broadcast %815 : vector<1x512xf32> to vector<8x512xf32>
    %817 = arith.mulf %814, %816 : vector<8x512xf32>
    %c46_454 = arith.constant 46 : index
    %c0_455 = arith.constant 0 : index
    %c0_456 = arith.constant 0 : index
    %818 = vector.load %arg2[%c46_454, %c0_455, %c0_456] : memref<54x8x8xf32, #tpu.memory_space<vmem>>, vector<1x8x8xf32>
    %819 = vector.shape_cast %818 : vector<1x8x8xf32> to vector<8x8xf32>
    %cst_457 = arith.constant dense<0.000000e+00> : vector<8x512xf32>
    %820 = tpu.matmul %819, %817, %cst_457 {dimension_numbers = #tpu.dot_dimension_numbers<[1], [0], [0], [1], [0, 0, 1, 1], [], []>} : vector<8x8xf32>, vector<8x512xf32>, vector<8x512xf32> -> vector<8x512xf32>
    %821 = arith.addf %813, %820 : vector<8x512xf32>
    %c455_i32_458 = arith.constant 455 : i32
    %822 = tpu.dynamic_rotate %666 by %c455_i32_458 dim 1 : vector<8x512xf32>, i32 -> vector<8x512xf32>
    %823 = arith.mulf %1, %2 : vector<1x512xf32>
    %824 = arith.mulf %823, %5 : vector<1x512xf32>
    %825 = vector.broadcast %824 : vector<1x512xf32> to vector<8x512xf32>
    %826 = arith.mulf %822, %825 : vector<8x512xf32>
    %c47_459 = arith.constant 47 : index
    %c0_460 = arith.constant 0 : index
    %c0_461 = arith.constant 0 : index
    %827 = vector.load %arg2[%c47_459, %c0_460, %c0_461] : memref<54x8x8xf32, #tpu.memory_space<vmem>>, vector<1x8x8xf32>
    %828 = vector.shape_cast %827 : vector<1x8x8xf32> to vector<8x8xf32>
    %cst_462 = arith.constant dense<0.000000e+00> : vector<8x512xf32>
    %829 = tpu.matmul %828, %826, %cst_462 {dimension_numbers = #tpu.dot_dimension_numbers<[1], [0], [0], [1], [0, 0, 1, 1], [], []>} : vector<8x8xf32>, vector<8x512xf32>, vector<8x512xf32> -> vector<8x512xf32>
    %830 = arith.addf %821, %829 : vector<8x512xf32>
    %c449_i32_463 = arith.constant 449 : i32
    %831 = tpu.dynamic_rotate %666 by %c449_i32_463 dim 1 : vector<8x512xf32>, i32 -> vector<8x512xf32>
    %832 = arith.mulf %1, %4 : vector<1x512xf32>
    %833 = vector.broadcast %832 : vector<1x512xf32> to vector<8x512xf32>
    %834 = arith.mulf %831, %833 : vector<8x512xf32>
    %c48_464 = arith.constant 48 : index
    %c0_465 = arith.constant 0 : index
    %c0_466 = arith.constant 0 : index
    %835 = vector.load %arg2[%c48_464, %c0_465, %c0_466] : memref<54x8x8xf32, #tpu.memory_space<vmem>>, vector<1x8x8xf32>
    %836 = vector.shape_cast %835 : vector<1x8x8xf32> to vector<8x8xf32>
    %cst_467 = arith.constant dense<0.000000e+00> : vector<8x512xf32>
    %837 = tpu.matmul %836, %834, %cst_467 {dimension_numbers = #tpu.dot_dimension_numbers<[1], [0], [0], [1], [0, 0, 1, 1], [], []>} : vector<8x8xf32>, vector<8x512xf32>, vector<8x512xf32> -> vector<8x512xf32>
    %838 = arith.addf %830, %837 : vector<8x512xf32>
    %c448_i32_468 = arith.constant 448 : i32
    %839 = tpu.dynamic_rotate %666 by %c448_i32_468 dim 1 : vector<8x512xf32>, i32 -> vector<8x512xf32>
    %840 = vector.broadcast %1 : vector<1x512xf32> to vector<8x512xf32>
    %841 = arith.mulf %839, %840 : vector<8x512xf32>
    %c49_469 = arith.constant 49 : index
    %c0_470 = arith.constant 0 : index
    %c0_471 = arith.constant 0 : index
    %842 = vector.load %arg2[%c49_469, %c0_470, %c0_471] : memref<54x8x8xf32, #tpu.memory_space<vmem>>, vector<1x8x8xf32>
    %843 = vector.shape_cast %842 : vector<1x8x8xf32> to vector<8x8xf32>
    %cst_472 = arith.constant dense<0.000000e+00> : vector<8x512xf32>
    %844 = tpu.matmul %843, %841, %cst_472 {dimension_numbers = #tpu.dot_dimension_numbers<[1], [0], [0], [1], [0, 0, 1, 1], [], []>} : vector<8x8xf32>, vector<8x512xf32>, vector<8x512xf32> -> vector<8x512xf32>
    %845 = arith.addf %838, %844 : vector<8x512xf32>
    %c447_i32_473 = arith.constant 447 : i32
    %846 = tpu.dynamic_rotate %666 by %c447_i32_473 dim 1 : vector<8x512xf32>, i32 -> vector<8x512xf32>
    %847 = arith.mulf %1, %5 : vector<1x512xf32>
    %848 = vector.broadcast %847 : vector<1x512xf32> to vector<8x512xf32>
    %849 = arith.mulf %846, %848 : vector<8x512xf32>
    %c50_474 = arith.constant 50 : index
    %c0_475 = arith.constant 0 : index
    %c0_476 = arith.constant 0 : index
    %850 = vector.load %arg2[%c50_474, %c0_475, %c0_476] : memref<54x8x8xf32, #tpu.memory_space<vmem>>, vector<1x8x8xf32>
    %851 = vector.shape_cast %850 : vector<1x8x8xf32> to vector<8x8xf32>
    %cst_477 = arith.constant dense<0.000000e+00> : vector<8x512xf32>
    %852 = tpu.matmul %851, %849, %cst_477 {dimension_numbers = #tpu.dot_dimension_numbers<[1], [0], [0], [1], [0, 0, 1, 1], [], []>} : vector<8x8xf32>, vector<8x512xf32>, vector<8x512xf32> -> vector<8x512xf32>
    %853 = arith.addf %845, %852 : vector<8x512xf32>
    %c441_i32_478 = arith.constant 441 : i32
    %854 = tpu.dynamic_rotate %666 by %c441_i32_478 dim 1 : vector<8x512xf32>, i32 -> vector<8x512xf32>
    %855 = arith.mulf %1, %3 : vector<1x512xf32>
    %856 = arith.mulf %855, %4 : vector<1x512xf32>
    %857 = vector.broadcast %856 : vector<1x512xf32> to vector<8x512xf32>
    %858 = arith.mulf %854, %857 : vector<8x512xf32>
    %c51_479 = arith.constant 51 : index
    %c0_480 = arith.constant 0 : index
    %c0_481 = arith.constant 0 : index
    %859 = vector.load %arg2[%c51_479, %c0_480, %c0_481] : memref<54x8x8xf32, #tpu.memory_space<vmem>>, vector<1x8x8xf32>
    %860 = vector.shape_cast %859 : vector<1x8x8xf32> to vector<8x8xf32>
    %cst_482 = arith.constant dense<0.000000e+00> : vector<8x512xf32>
    %861 = tpu.matmul %860, %858, %cst_482 {dimension_numbers = #tpu.dot_dimension_numbers<[1], [0], [0], [1], [0, 0, 1, 1], [], []>} : vector<8x8xf32>, vector<8x512xf32>, vector<8x512xf32> -> vector<8x512xf32>
    %862 = arith.addf %853, %861 : vector<8x512xf32>
    %c440_i32_483 = arith.constant 440 : i32
    %863 = tpu.dynamic_rotate %666 by %c440_i32_483 dim 1 : vector<8x512xf32>, i32 -> vector<8x512xf32>
    %864 = arith.mulf %1, %3 : vector<1x512xf32>
    %865 = vector.broadcast %864 : vector<1x512xf32> to vector<8x512xf32>
    %866 = arith.mulf %863, %865 : vector<8x512xf32>
    %c52_484 = arith.constant 52 : index
    %c0_485 = arith.constant 0 : index
    %c0_486 = arith.constant 0 : index
    %867 = vector.load %arg2[%c52_484, %c0_485, %c0_486] : memref<54x8x8xf32, #tpu.memory_space<vmem>>, vector<1x8x8xf32>
    %868 = vector.shape_cast %867 : vector<1x8x8xf32> to vector<8x8xf32>
    %cst_487 = arith.constant dense<0.000000e+00> : vector<8x512xf32>
    %869 = tpu.matmul %868, %866, %cst_487 {dimension_numbers = #tpu.dot_dimension_numbers<[1], [0], [0], [1], [0, 0, 1, 1], [], []>} : vector<8x8xf32>, vector<8x512xf32>, vector<8x512xf32> -> vector<8x512xf32>
    %870 = arith.addf %862, %869 : vector<8x512xf32>
    %c439_i32_488 = arith.constant 439 : i32
    %871 = tpu.dynamic_rotate %666 by %c439_i32_488 dim 1 : vector<8x512xf32>, i32 -> vector<8x512xf32>
    %872 = arith.mulf %1, %3 : vector<1x512xf32>
    %873 = arith.mulf %872, %5 : vector<1x512xf32>
    %874 = vector.broadcast %873 : vector<1x512xf32> to vector<8x512xf32>
    %875 = arith.mulf %871, %874 : vector<8x512xf32>
    %c53_489 = arith.constant 53 : index
    %c0_490 = arith.constant 0 : index
    %c0_491 = arith.constant 0 : index
    %876 = vector.load %arg2[%c53_489, %c0_490, %c0_491] : memref<54x8x8xf32, #tpu.memory_space<vmem>>, vector<1x8x8xf32>
    %877 = vector.shape_cast %876 : vector<1x8x8xf32> to vector<8x8xf32>
    %cst_492 = arith.constant dense<0.000000e+00> : vector<8x512xf32>
    %878 = tpu.matmul %877, %875, %cst_492 {dimension_numbers = #tpu.dot_dimension_numbers<[1], [0], [0], [1], [0, 0, 1, 1], [], []>} : vector<8x8xf32>, vector<8x512xf32>, vector<8x512xf32> -> vector<8x512xf32>
    %879 = arith.addf %870, %878 : vector<8x512xf32>
    %c0_493 = arith.constant 0 : index
    %c1_494 = arith.constant 1 : index
    %880 = vector.load %arg3[%c0_493, %c1_494] : memref<8x2xf32, #tpu.memory_space<vmem>>, vector<8x1xf32>
    %881 = vector.broadcast %880 : vector<8x1xf32> to vector<8x512xf32>
    %882 = arith.addf %879, %881 : vector<8x512xf32>
    %c1_495 = arith.constant 1 : index
    %c0_496 = arith.constant 0 : index
    %c0_497 = arith.constant 0 : index
    %883 = vector.load %arg5[%c1_495, %c0_496, %c0_497] : memref<2x8x512xf32, #tpu.memory_space<vmem>>, vector<1x8x512xf32>
    %884 = vector.shape_cast %883 : vector<1x8x512xf32> to vector<8x512xf32>
    %885 = vector.shape_cast %882 : vector<8x512xf32> to vector<1x8x512xf32>
    tpu.vector_store %arg5[%c1_495, %c0_496, %c0_497], %885 {strides = array<i32>} : memref<2x8x512xf32, #tpu.memory_space<vmem>>, vector<1x8x512xf32>,
    return
  }
  func.func @transform_0(%arg0: i32) -> (i32, i32, i32) {
    %c0_i32 = arith.constant 0 : i32
    %c0_i32_0 = arith.constant 0 : i32
    %c0_i32_1 = arith.constant 0 : i32
    return %arg0, %c0_i32, %c0_i32_0 : i32, i32, i32
  }
  func.func @transform_1(%arg0: i32) -> (i32, i32, i32) {
    %c0_i32 = arith.constant 0 : i32
    %c0_i32_0 = arith.constant 0 : i32
    %c0_i32_1 = arith.constant 0 : i32
    %c0_i32_2 = arith.constant 0 : i32
    return %c0_i32, %c0_i32_0, %c0_i32_1 : i32, i32, i32
  }
  func.func @transform_2(%arg0: i32) -> (i32, i32) {
    %c0_i32 = arith.constant 0 : i32
    %c0_i32_0 = arith.constant 0 : i32
    %c0_i32_1 = arith.constant 0 : i32
    return %c0_i32, %c0_i32_0 : i32, i32
  }
  func.func @transform_3(%arg0: i32) -> (i32, i32) {
    %c0_i32 = arith.constant 0 : i32
    %c0_i32_0 = arith.constant 0 : i32
    %c0_i32_1 = arith.constant 0 : i32
    return %c0_i32, %c0_i32_0 : i32, i32
  }
  func.func @transform_4(%arg0: i32) -> (i32, i32, i32) {
    %c0_i32 = arith.constant 0 : i32
    %c0_i32_0 = arith.constant 0 : i32
    %c0_i32_1 = arith.constant 0 : i32
    return %arg0, %c0_i32, %c0_i32_0 : i32, i32, i32
  }
}

</mosaic_0001>

<bundles_post_ra>
// kernel: double_conv_forward.1
= control target key start
LH: loop header
LB: loop body
LE: loop exit
PB: predicated region body
PF: predicated region fallthrough
CT: control target
= control target key end

     0   :  { %v22546_v0 = vmov 0.0   ;;  %s18938_s19 = smov 72   ;;  %s18939_s20 = smov 73   ;;  %v56_v9 = vlaneseq  ;;  %vm131_vm2 = vcmask 64512   ;;  %s22541_s0 = inlined_call_operand.vmem [shape: f32[2,4,512], index: 0, kind: input, shape index: {}]   ;;  %s22542_s3 = inlined_call_operand.vmem [shape: f32[8,512], index: 3, kind: input, shape index: {}]   ;;  %s22543_s1 = inlined_call_operand.vmem [shape: f32[54,8,8], index: 1, kind: input, shape index: {}]   ;;  %s22544_s2 = inlined_call_operand.vmem [shape: f32[8,2], index: 2, kind: input, shape index: {}]   ;;  %s22545_s4 = inlined_call_operand.vmem [shape: f32[2,8,512], index: 4, kind: output, shape index: {}]  }
   0x1   :  { %30 = vst [vmem:[#allocation2 + $0x10] sm:$0xff] %v22546_v0  ;;  %v33_v1 = vld [vmem:[%s22541_s0 + $0x8] sm:$0xff]  ;;  %28 = vst [vmem:[#allocation2] sm:$0xff] %v22546_v0  ;;  %v32_v2 = vld [vmem:[%s22541_s0] sm:$0xff]  ;;  %199 = vmatprep.mubr.f32.mxu0 %v22546_v0  ;;  %270 = vmatprep.mubr.f32.mxu1 %v22546_v0  ;;  %s18940_s21 = smov 71   ;;  %s18941_s22 = smov 65  }
   0x2   :  { %29 = vst [vmem:[#allocation2 + $0x8] sm:$0xff] %v22546_v0  ;;  %31 = vst [vmem:[#allocation2 + $0x18] sm:$0xff] %v22546_v0  ;;  %v37_v3 = vcombine.high %v33_v1, %v33_v1  ;;  %v36_v4 = vcombine.high %v32_v2, %v32_v2  ;;  %s18942_s23 = smov 64   ;;  %s18943_s24 = smov 63   ;;  %v67_v11 = vshrl.u32 %v56_v9, 7  ;;  %v19128_v13 = vand.u32 127, %v56_v9 }
   0x3   :  { %42 = vst [vmem:[#allocation2 + $0x10] sm:$0xf] %v33_v1  ;;  %40 = vst [vmem:[#allocation2] sm:$0xf] %v32_v2  ;;  %s18944_s25 = smov 57   ;;  %s18945_s26 = smov 56  }
   0x4   :  { %43 = vst [vmem:[#allocation2 + $0x18] sm:$0xf] %v37_v3  ;;  %41 = vst [vmem:[#allocation2 + $0x8] sm:$0xf] %v36_v4  ;;  %s18946_s27 = smov 55   ;;  %s18947_s28 = smov 9  }
   0x5   :  { %s18948_s29 = smov 8   ;;  %s18949_s30 = smov 7   ;;  %v19117_v10 = vld [vmem:[%s22542_s3] ss:$8 sm:$0xf]  ;;  %v19132_v15 = vsub.s32 1, %v67_v11 }
   0x6   :  { %s18950_s5 = smov 1   ;;  %s18951_s6 = smov 127   ;;  %v19122_v12 = vld [vmem:[%s22542_s3 + $0x2] ss:$8 sm:$0xf]  ;;  %v19134_v16 = vsub.s32 3, %v67_v11 }
   0x7   :  { %s18952_s11 = smov 121   ;;  %v63_v14 = vmul.f32 %v19122_v12, %v19117_v10  ;;  %v19136_v17 = vsub.s32 0, %v67_v11  ;;  %v19138_v18 = vsub.s32 2, %v67_v11  ;;  %v19143_v19 = vld [vmem:[%s22542_s3 + $0x4] ss:$8 sm:$0xf] }
   0x8   :  { %vm99_vm0 = vcmp.lt.s32.totalorder %v19128_v13, 72  ;;  %s18953_s14 = smov 120   ;;  %vm58_vm1 = vcmp.lt.s32.totalorder %v19128_v13, 73  ;;  %v18158_v38 = vld [vmem:[%s22543_s1 + $0x8] sm:$0xff]  ;;  %vm430_vm3 = vcmp.lt.s32.totalorder %v19128_v13, 71  ;;  %s18954_s7 = smov 119   ;;  %v625_v2 = vmul.f32 %v19143_v19, %v19117_v10 }
   0x9   :  { %v19151_v22 = vrot.slane %v63_v14, %v19134_v16  ;;  %v19154_v23 = vrot.slane %v63_v14, %v19132_v15  ;;  %v64_v24 = vmul.f32 %v19143_v19, %v63_v14  ;;  %v19158_v25 = vrot.slane %v63_v14, %v19136_v17  ;;  %v19201_v39 = vld [vmem:[%s22542_s3 + $0x5] ss:$8 sm:$0xf] }
   0xa   :  { %v18994_v5 = vld [vmem:[#allocation2 + $0x10] sm:$0xff]  ;;  %v18996_v6 = vld [vmem:[#allocation2] sm:$0xff]  ;;  %v19161_v26 = vrot.slane %v63_v14, %v19138_v18  ;;  %v435_v47 = vmul.f32 %v19201_v39, %v63_v14  ;;  %vm620_vm4 = vcmp.lt.s32.totalorder %v19128_v13, 65  ;;  %vm810_vm5 = vcmp.lt.s32.totalorder %v19128_v13, 64 }
   0xb   :  { %95 = vrot.lane.b32.xlu1 %v18994_v5, %s18938_s19  ;;  %91 = vrot.lane.b32.xlu0 %v18996_v6, %s18938_s19  ;;  %v19002_v7 = vld [vmem:[#allocation2 + $0x18] sm:$0xff]  ;;  %v19004_v8 = vld [vmem:[#allocation2 + $0x8] sm:$0xff]  ;;  %22806 = vst [vmem:[#allocation3_spill] sm:$0xff] %v19151_v22  ;;  %22807 = vst [vmem:[#allocation4_spill] sm:$0xff] %v19154_v23  ;;  %v19189_v35 = vrot.slane %v64_v24, %v19132_v15  ;;  %v19208_v43 = vrot.slane %v64_v24, %v19136_v17  ;;  %vm999_vm6 = vcmp.lt.s32.totalorder %v19128_v13, 63 }
   0xc   :  { %22808 = vst [vmem:[#allocation5_spill] sm:$0xff] %v19158_v25  ;;  %22809 = vst [vmem:[#allocation6_spill] sm:$0xff] %v19161_v26  ;;  %v19211_v44 = vrot.slane %v64_v24, %v19138_v18  ;;  %v19218_v46 = vrot.slane %v64_v24, %v19134_v16  ;;  %v19247_v56 = vrot.slane %v435_v47, %v19132_v15  ;;  %v90_v57 = vld [vmem:[%s22543_s1] sm:$0xff]  ;;  %vm1189_vm7 = vcmp.lt.s32.totalorder %v19128_v13, 57 }
   0xd   :  { %22810 = vst [vmem:[#allocation7_spill] sm:$0xff] %v19189_v35  ;;  %22811 = vst [vmem:[#allocation8_spill] sm:$0xff] %v19208_v43  ;;  %v19261_v61 = vrot.slane %v435_v47, %v19136_v17  ;;  %v19264_v62 = vrot.slane %v435_v47, %v19138_v18  ;;  %v19271_v1 = vrot.slane %v435_v47, %v19134_v16  ;;  %vm1380_vm8 = vcmp.lt.s32.totalorder %v19128_v13, 56 }
   0xe   :  { %22812 = vst [vmem:[#allocation9_spill] sm:$0xff] %v19211_v44  ;;  %22813 = vst [vmem:[#allocation10_spill] sm:$0xff] %v19218_v46  ;;  %vm1569_vm9 = vcmp.lt.s32.totalorder %v19128_v13, 55  ;;  %vm1759_vm10 = vcmp.lt.s32.totalorder %v19128_v13, 9  ;;  %vm1949_vm11 = vcmp.lt.s32.totalorder %v19128_v13, 8  ;;  %vm22738_vm12 = vcmp.lt.s32.totalorder %v19128_v13, 7 }
   0xf   :  { %97 = vrot.lane.b32.xlu1 %v19002_v7, %s18938_s19  ;;  %93 = vrot.lane.b32.xlu0 %v19004_v8, %s18938_s19  ;;  %22814 = vst [vmem:[#allocation11_spill] sm:$0xff] %v19247_v56  ;;  %22815 = vst [vmem:[#allocation12_spill] sm:$0xff] %v19261_v61  ;;  %vm22737_vm13 = vcmp.lt.s32.totalorder %v19128_v13, 1  ;;  %vm22658_vm14 = vcmp.lt.s32.totalorder %v19128_v13, 127  ;;  %vm22739_vm15 = vcmp.lt.s32.totalorder %v19128_v13, 121 }
  0x10   :  { %22816 = vst [vmem:[#allocation13_spill] sm:$0xff] %v19264_v62  ;;  %22817 = vst [vmem:[#allocation14_spill] sm:$0xff] %v19271_v1 }
  0x13   :  { %50 = vrot.lane.b32.xlu1 %v19004_v8, %s18939_s20  ;;  %48 = vrot.lane.b32.xlu0 %v18996_v6, %s18939_s20 }
  0x17   :  { %54 = vrot.lane.b32.xlu1 %v19002_v7, %s18939_s20  ;;  %52 = vrot.lane.b32.xlu0 %v18994_v5, %s18939_s20 }
  0x1b   :  { %424 = vrot.lane.b32.xlu1 %v19004_v8, %s18940_s21  ;;  %422 = vrot.lane.b32.xlu0 %v18996_v6, %s18940_s21 }
  0x1f   :  { %428 = vrot.lane.b32.xlu1 %v19002_v7, %s18940_s21  ;;  %426 = vrot.lane.b32.xlu0 %v18994_v5, %s18940_s21 }
  0x23   :  { %614 = vrot.lane.b32.xlu1 %v19004_v8, %s18941_s22  ;;  %612 = vrot.lane.b32.xlu0 %v18996_v6, %s18941_s22 }
  0x27   :  { %618 = vrot.lane.b32.xlu1 %v19002_v7, %s18941_s22  ;;  %616 = vrot.lane.b32.xlu0 %v18994_v5, %s18941_s22 }
  0x2b   :  { %804 = vrot.lane.b32.xlu1 %v19004_v8, %s18942_s23  ;;  %802 = vrot.lane.b32.xlu0 %v18996_v6, %s18942_s23 }
  0x2f   :  { %808 = vrot.lane.b32.xlu1 %v19002_v7, %s18942_s23  ;;  %806 = vrot.lane.b32.xlu0 %v18994_v5, %s18942_s23 }
  0x33   :  { %993 = vrot.lane.b32.xlu1 %v19004_v8, %s18943_s24  ;;  %991 = vrot.lane.b32.xlu0 %v18996_v6, %s18943_s24 }
  0x37   :  { %997 = vrot.lane.b32.xlu1 %v19002_v7, %s18943_s24  ;;  %995 = vrot.lane.b32.xlu0 %v18994_v5, %s18943_s24 }
  0x3b   :  { %1183 = vrot.lane.b32.xlu1 %v19004_v8, %s18944_s25  ;;  %1181 = vrot.lane.b32.xlu0 %v18996_v6, %s18944_s25 }
  0x3f   :  { %1187 = vrot.lane.b32.xlu1 %v19002_v7, %s18944_s25  ;;  %1185 = vrot.lane.b32.xlu0 %v18994_v5, %s18944_s25 }
  0x43   :  { %1374 = vrot.lane.b32.xlu1 %v19004_v8, %s18945_s26  ;;  %1372 = vrot.lane.b32.xlu0 %v18996_v6, %s18945_s26 }
  0x47   :  { %1378 = vrot.lane.b32.xlu1 %v19002_v7, %s18945_s26  ;;  %1376 = vrot.lane.b32.xlu0 %v18994_v5, %s18945_s26 }
  0x4b   :  { %1563 = vrot.lane.b32.xlu1 %v19004_v8, %s18946_s27  ;;  %1561 = vrot.lane.b32.xlu0 %v18996_v6, %s18946_s27 }
  0x4f   :  { %1567 = vrot.lane.b32.xlu1 %v19002_v7, %s18946_s27  ;;  %1565 = vrot.lane.b32.xlu0 %v18994_v5, %s18946_s27 }
  0x53   :  { %1753 = vrot.lane.b32.xlu1 %v19004_v8, %s18947_s28  ;;  %1751 = vrot.lane.b32.xlu0 %v18996_v6, %s18947_s28 }
  0x57   :  { %1757 = vrot.lane.b32.xlu1 %v19002_v7, %s18947_s28  ;;  %1755 = vrot.lane.b32.xlu0 %v18994_v5, %s18947_s28 }
  0x5b   :  { %1943 = vrot.lane.b32.xlu1 %v19004_v8, %s18948_s29  ;;  %1941 = vrot.lane.b32.xlu0 %v18996_v6, %s18948_s29 }
  0x5f   :  { %1947 = vrot.lane.b32.xlu1 %v19002_v7, %s18948_s29  ;;  %1945 = vrot.lane.b32.xlu0 %v18994_v5, %s18948_s29 }
  0x63   :  { %2132 = vrot.lane.b32.xlu1 %v19004_v8, %s18949_s30  ;;  %2130 = vrot.lane.b32.xlu0 %v18996_v6, %s18949_s30 }
  0x67   :  { %2136 = vrot.lane.b32.xlu1 %v19002_v7, %s18949_s30  ;;  %2134 = vrot.lane.b32.xlu0 %v18994_v5, %s18949_s30 }
  0x6b   :  { %2322 = vrot.lane.b32.xlu1 %v19004_v8, %s18950_s5  ;;  %2320 = vrot.lane.b32.xlu0 %v18996_v6, %s18950_s5 }
  0x6f   :  { %2326 = vrot.lane.b32.xlu1 %v19002_v7, %s18950_s5  ;;  %2324 = vrot.lane.b32.xlu0 %v18994_v5, %s18950_s5 }
  0x73   :  { %2662 = vrot.lane.b32.xlu1 %v19004_v8, %s18951_s6  ;;  %2660 = vrot.lane.b32.xlu0 %v18996_v6, %s18951_s6 }
  0x77   :  { %2666 = vrot.lane.b32.xlu1 %v19002_v7, %s18951_s6  ;;  %2664 = vrot.lane.b32.xlu0 %v18994_v5, %s18951_s6 }
  0x7b   :  { %2851 = vrot.lane.b32.xlu1 %v19004_v8, %s18952_s11  ;;  %2849 = vrot.lane.b32.xlu0 %v18996_v6, %s18952_s11 }
  0x7d   :  { %v96_v20 = vpop.permute.xlu1 %95  ;;  %v92_v21 = vpop.permute.xlu0 %91 }
  0x7f   :  { %2855 = vrot.lane.b32.xlu1 %v19002_v7, %s18952_s11  ;;  %2853 = vrot.lane.b32.xlu0 %v18994_v5, %s18952_s11 }
  0x81   :  { %v98_v27 = vpop.permute.xlu1 %97  ;;  %v94_v28 = vpop.permute.xlu0 %93 }
  0x82   :  { %v19165_v29 = vsel %vm99_vm0, %v96_v20, %v98_v27  ;;  %v19169_v30 = vsel %vm99_vm0, %v92_v21, %v94_v28  ;;  %v19173_v31 = vsel %vm99_vm0, %v98_v27, %v92_v21  ;;  %v19177_v32 = vsel %vm99_vm0, %v94_v28, %v96_v20  ;;  %v18163_v28 = vld [vmem:[%s22543_s1 + $0x10] sm:$0xff] }
  0x83   :  { %3041 = vrot.lane.b32.xlu1 %v19004_v8, %s18953_s14  ;;  %3039 = vrot.lane.b32.xlu0 %v18996_v6, %s18953_s14  ;;  %v128_v33 = vmul.f32 %v19151_v22, %v19165_v29  ;;  %v126_v34 = vmul.f32 %v19154_v23, %v19169_v30  ;;  %v125_v36 = vmul.f32 %v19158_v25, %v19173_v31 }
  0x84   :  { %v127_v37 = vmul.f32 %v19161_v26, %v19177_v32  ;;  %v19301_v27 = vrot.slane %v625_v2, %v19132_v15 }
  0x85   :  { %206 = vmatprep.subr.mxu1 %v128_v33  ;;  %v51_v40 = vpop.permute.xlu1 %50  ;;  %135 = vmatprep.subr.mxu0 %v126_v34  ;;  %v49_v41 = vpop.permute.xlu0 %48 }
  0x86   :  { %v19205_v42 = vsel %vm58_vm1, %v49_v41, %v51_v40  ;;  %136 = vmatpush1.msra.mxu0 %v125_v36  ;;  %207 = vmatpush1.msra.mxu1 %v127_v37  ;;  %22818 = vst [vmem:[#allocation15_spill] sm:$0xff] %v19301_v27  ;;  %v19311_v37 = vrot.slane %v625_v2, %v19136_v17 }
  0x87   :  { %18159 = vmatmul.mubr.msk.f32.vlgmr.msra.gmra.mrb[0].mxu0 %vm131_vm2, %v18158_v38  ;;  %18160 = vmatmul.mubr.msk.f32.vlgmr.msra.gmra.mrb[0].mxu1 %vm131_vm2, %v18158_v38  ;;  %v87_v45 = vmul.f32 %v19189_v35, %v19205_v42  ;;  %v19316_v38 = vrot.slane %v625_v2, %v19138_v18 }
  0x88   :  { %3045 = vrot.lane.b32.xlu1 %v19002_v7, %s18953_s14  ;;  %3043 = vrot.lane.b32.xlu0 %v18994_v5, %s18953_s14  ;;  %22819 = vst [vmem:[#allocation16_spill] sm:$0xff] %v19311_v37 }
  0x89   :  { %v55_v48 = vpop.permute.xlu1 %54  ;;  %v53_v49 = vpop.permute.xlu0 %52  ;;  %280 = vmatprep.subr.mxu0 %v87_v45  ;;  %344 = vmatprep.mubr.f32.mxu0 %v22546_v0  ;;  %22820 = vst [vmem:[#allocation17_spill] sm:$0xff] %v19316_v38 }
  0x8a   :  { %v19228_v50 = vsel %vm58_vm1, %v55_v48, %v49_v41  ;;  %v19232_v51 = vsel %vm58_vm1, %v53_v49, %v55_v48  ;;  %v19236_v52 = vsel %vm58_vm1, %v51_v40, %v53_v49  ;;  %415 = vmatprep.mubr.f32.mxu1 %v22546_v0  ;;  %v19321_v41 = vrot.slane %v625_v2, %v19134_v16 }
  0x8b   :  { %v86_v53 = vmul.f32 %v19208_v43, %v19228_v50  ;;  %v88_v54 = vmul.f32 %v19211_v44, %v19236_v52  ;;  %v89_v55 = vmul.f32 %v19218_v46, %v19232_v51  ;;  %v1764_v46 = vmul.f32 %v19143_v19, %v19122_v12 }
  0x8c   :  { %3230 = vrot.lane.b32.xlu1 %v19004_v8, %s18954_s7  ;;  %3228 = vrot.lane.b32.xlu0 %v18996_v6, %s18954_s7  ;;  %22821 = vst [vmem:[#allocation18_spill] sm:$0xff] %v19321_v41 }
  0x8d   :  { %v425_v58 = vpop.permute.xlu1 %424  ;;  %281 = vmatpush1.msra.mxu0 %v86_v53  ;;  %351 = vmatprep.subr.mxu1 %v89_v55  ;;  %v423_v59 = vpop.permute.xlu0 %422  ;;  %v19590_v26 = vrot.slane %v1764_v46, %v19132_v15 }
  0x8e   :  { %v19258_v60 = vsel %vm430_vm3, %v423_v59, %v425_v58  ;;  %352 = vmatpush1.msra.mxu1 %v88_v54 }
  0x8f   :  { %18161 = vmatmul.mubr.msk.f32.vlgmr.msra.gmra.mrb[0].mxu0 %vm131_vm2, %v90_v57  ;;  %18162 = vmatmul.mubr.msk.f32.vlgmr.msra.gmra.mrb[0].mxu1 %vm131_vm2, %v90_v57  ;;  %v458_v63 = vmul.f32 %v19247_v56, %v19258_v60  ;;  %22845 = vst [vmem:[#allocation41_spill] sm:$0xff] %v19590_v26 }
  0x90   :  { %3234 = vrot.lane.b32.xlu1 %v19002_v7, %s18954_s7  ;;  %3232 = vrot.lane.b32.xlu0 %v18994_v5, %s18954_s7 }
  0x91   :  { %v429_v3 = vpop.permute.xlu1 %428  ;;  %v427_v4 = vpop.permute.xlu0 %426  ;;  %466 = vmatprep.subr.mxu0 %v458_v63  ;;  %530 = vmatprep.mubr.f32.mxu0 %v22546_v0 }
  0x92   :  { %v19282_v9 = vsel %vm430_vm3, %v429_v3, %v423_v59  ;;  %v19286_v11 = vsel %vm430_vm3, %v427_v4, %v429_v3  ;;  %v19290_v14 = vsel %vm430_vm3, %v425_v58, %v427_v4  ;;  %601 = vmatprep.mubr.f32.mxu1 %v22546_v0  ;;  %v19346_v58 = vrot.slane %v19117_v10, %v19132_v15  ;;  %v18166_v59 = vld [vmem:[%s22543_s1 + $0x18] sm:$0xff] }
  0x93   :  { %v457_v20 = vmul.f32 %v19261_v61, %v19282_v9  ;;  %v459_v21 = vmul.f32 %v19264_v62, %v19290_v14  ;;  %v460_v24 = vmul.f32 %v19271_v1, %v19286_v11  ;;  %v19357_v4 = vrot.slane %v19117_v10, %v19136_v17 }
  0x94   :  { %22822 = vst [vmem:[#allocation19_spill] sm:$0xff] %v19346_v58 }
  0x95   :  { %v615_v33 = vpop.permute.xlu1 %614  ;;  %467 = vmatpush1.msra.mxu0 %v457_v20  ;;  %537 = vmatprep.subr.mxu1 %v460_v24  ;;  %v613_v34 = vpop.permute.xlu0 %612  ;;  %22823 = vst [vmem:[#allocation20_spill] sm:$0xff] %v19357_v4  ;;  %v1004_v20 = vmul.f32 %v19201_v39, %v19117_v10 }
  0x96   :  { %v19308_v36 = vsel %vm620_vm4, %v613_v34, %v615_v33  ;;  %538 = vmatpush1.msra.mxu1 %v459_v21  ;;  %v19365_v21 = vrot.slane %v19117_v10, %v19138_v18 }
  0x97   :  { %18164 = vmatmul.mubr.msk.f32.vlgmr.msra.gmra.mrb[0].mxu0 %vm131_vm2, %v18163_v28  ;;  %18165 = vmatmul.mubr.msk.f32.vlgmr.msra.gmra.mrb[0].mxu1 %vm131_vm2, %v18163_v28  ;;  %v648_v40 = vmul.f32 %v19301_v27, %v19308_v36  ;;  %v19371_v28 = vrot.slane %v19117_v10, %v19134_v16 }
  0x98   :  { %720 = vmatprep.mubr.f32.mxu0 %v22546_v0  ;;  %791 = vmatprep.mubr.f32.mxu1 %v22546_v0  ;;  %22824 = vst [vmem:[#allocation21_spill] sm:$0xff] %v19365_v21 }
  0x99   :  { %v619_v45 = vpop.permute.xlu1 %618  ;;  %v617_v47 = vpop.permute.xlu0 %616  ;;  %656 = vmatprep.subr.mxu0 %v648_v40  ;;  %22825 = vst [vmem:[#allocation22_spill] sm:$0xff] %v19371_v28 }
  0x9a   :  { %v19327_v48 = vsel %vm620_vm4, %v619_v45, %v613_v34  ;;  %v19331_v49 = vsel %vm620_vm4, %v617_v47, %v619_v45  ;;  %v19335_v53 = vsel %vm620_vm4, %v615_v33, %v617_v47  ;;  %v19378_v33 = vld [vmem:[%s22542_s3 + $0x3] ss:$8 sm:$0xf] }
  0x9b   :  { %v647_v54 = vmul.f32 %v19311_v37, %v19327_v48  ;;  %v649_v55 = vmul.f32 %v19316_v38, %v19335_v53  ;;  %v650_v57 = vmul.f32 %v19321_v41, %v19331_v49 }
  0x9d   :  { %v805_v63 = vpop.permute.xlu1 %804  ;;  %657 = vmatpush1.msra.mxu0 %v647_v54  ;;  %727 = vmatprep.subr.mxu1 %v650_v57  ;;  %v803_v2 = vpop.permute.xlu0 %802 }
  0x9e   :  { %v19353_v3 = vsel %vm810_vm5, %v803_v2, %v805_v63  ;;  %728 = vmatpush1.msra.mxu1 %v649_v55  ;;  %v19394_v55 = vrot.slane %v1004_v20, %v19132_v15 }
  0x9f   :  { %18167 = vmatmul.mubr.msk.f32.vlgmr.msra.gmra.mrb[0].mxu0 %vm131_vm2, %v18166_v59  ;;  %18168 = vmatmul.mubr.msk.f32.vlgmr.msra.gmra.mrb[0].mxu1 %vm131_vm2, %v18166_v59  ;;  %v837_v24 = vmul.f32 %v19346_v58, %v19353_v3 }
  0xa0   :  { %909 = vmatprep.mubr.f32.mxu0 %v22546_v0  ;;  %980 = vmatprep.mubr.f32.mxu1 %v22546_v0  ;;  %22826 = vst [vmem:[#allocation23_spill] sm:$0xff] %v19394_v55 }
  0xa1   :  { %v809_v34 = vpop.permute.xlu1 %808  ;;  %v807_v40 = vpop.permute.xlu0 %806  ;;  %845 = vmatprep.subr.mxu0 %v837_v24  ;;  %v19404_v24 = vmul.f32 %v19378_v33, %v19117_v10 }
  0xa2   :  { %v19383_v45 = vsel %vm810_vm5, %v809_v34, %v803_v2  ;;  %v19387_v47 = vsel %vm810_vm5, %v807_v40, %v809_v34  ;;  %v19391_v54 = vsel %vm810_vm5, %v805_v63, %v807_v40  ;;  %v18169_v63 = vld [vmem:[%s22543_s1 + $0x20] sm:$0xff] }
  0xa3   :  { %v836_v57 = vmul.f32 %v19357_v4, %v19383_v45  ;;  %v838_v59 = vmul.f32 %v19365_v21, %v19391_v54  ;;  %v839_v2 = vmul.f32 %v19371_v28, %v19387_v47  ;;  %v19414_v21 = vrot.slane %v1004_v20, %v19136_v17 }
  0xa4   :  { %v19417_v28 = vrot.slane %v1004_v20, %v19138_v18  ;;  %v19495_v62 = vrot.slane %v19404_v24, %v19132_v15 }
  0xa5   :  { %v994_v34 = vpop.permute.xlu1 %993  ;;  %846 = vmatpush1.msra.mxu0 %v836_v57  ;;  %916 = vmatprep.subr.mxu1 %v839_v2  ;;  %v992_v40 = vpop.permute.xlu0 %991  ;;  %22827 = vst [vmem:[#allocation24_spill] sm:$0xff] %v19414_v21  ;;  %v19424_v57 = vrot.slane %v1004_v20, %v19134_v16  ;;  %v1195_v2 = vmul.f32 %v19143_v19, %v19404_v24 }
  0xa6   :  { %v19411_v0 = vsel %vm999_vm6, %v992_v40, %v994_v34  ;;  %917 = vmatpush1.msra.mxu1 %v838_v59  ;;  %22828 = vst [vmem:[#allocation25_spill] sm:$0xff] %v19417_v28  ;;  %v22830_v59 = vmov 0.0   ;;  %22835 = vst [vmem:[#allocation31_spill] sm:$0xff] %v19495_v62 }
  0xa7   :  { %18170 = vmatmul.mubr.msk.f32.vlgmr.msra.gmra.mrb[0].mxu0 %vm131_vm2, %v18169_v63  ;;  %18171 = vmatmul.mubr.msk.f32.vlgmr.msra.gmra.mrb[0].mxu1 %vm131_vm2, %v18169_v63  ;;  %v1027_v10 = vmul.f32 %v19394_v55, %v19411_v0  ;;  %22829 = vst [vmem:[#allocation26_spill] sm:$0xff] %v19424_v57  ;;  %v19450_v41 = vrot.slane %v1195_v2, %v19132_v15 }
  0xa8   :  { %1099 = vmatprep.mubr.f32.mxu0 %v22830_v59  ;;  %1170 = vmatprep.mubr.f32.mxu1 %v22830_v59 }
  0xa9   :  { %v998_v4 = vpop.permute.xlu1 %997  ;;  %v996_v58 = vpop.permute.xlu0 %995  ;;  %1035 = vmatprep.subr.mxu0 %v1027_v10  ;;  %22831 = vst [vmem:[#allocation27_spill] sm:$0xff] %v19450_v41 }
  0xaa   :  { %v19432_v38 = vsel %vm999_vm6, %v998_v4, %v992_v40  ;;  %v19436_v63 = vsel %vm999_vm6, %v996_v58, %v998_v4  ;;  %v19440_v20 = vsel %vm999_vm6, %v994_v34, %v996_v58  ;;  %v18172_v4 = vld [vmem:[%s22543_s1 + $0x28] sm:$0xff] }
  0xab   :  { %v1026_v55 = vmul.f32 %v19414_v21, %v19432_v38  ;;  %v1028_v10 = vmul.f32 %v19417_v28, %v19440_v20  ;;  %v1029_v40 = vmul.f32 %v19424_v57, %v19436_v63  ;;  %v19460_v28 = vrot.slane %v1195_v2, %v19136_v17 }
  0xac   :  { %v19465_v57 = vrot.slane %v1195_v2, %v19138_v18 }
  0xad   :  { %v1184_v58 = vpop.permute.xlu1 %1183  ;;  %1036 = vmatpush1.msra.mxu0 %v1026_v55  ;;  %1106 = vmatprep.subr.mxu1 %v1029_v40  ;;  %v1182_v34 = vpop.permute.xlu0 %1181  ;;  %22832 = vst [vmem:[#allocation28_spill] sm:$0xff] %v19460_v28  ;;  %v19470_v40 = vrot.slane %v1195_v2, %v19134_v16 }
  0xae   :  { %v19457_v21 = vsel %vm1189_vm7, %v1182_v34, %v1184_v58  ;;  %1107 = vmatpush1.msra.mxu1 %v1028_v10  ;;  %22833 = vst [vmem:[#allocation29_spill] sm:$0xff] %v19465_v57 }
  0xaf   :  { %18173 = vmatmul.mubr.msk.f32.vlgmr.msra.gmra.mrb[0].mxu0 %vm131_vm2, %v18172_v4  ;;  %18174 = vmatmul.mubr.msk.f32.vlgmr.msra.gmra.mrb[0].mxu1 %vm131_vm2, %v18172_v4  ;;  %v1218_v55 = vmul.f32 %v19450_v41, %v19457_v21  ;;  %22834 = vst [vmem:[#allocation30_spill] sm:$0xff] %v19470_v40 }
  0xb0   :  { %1290 = vmatprep.mubr.f32.mxu0 %v22830_v59  ;;  %1361 = vmatprep.mubr.f32.mxu1 %v22830_v59 }
  0xb1   :  { %v1188_v10 = vpop.permute.xlu1 %1187  ;;  %v1186_v37 = vpop.permute.xlu0 %1185  ;;  %1226 = vmatprep.subr.mxu0 %v1218_v55 }
  0xb2   :  { %v19476_v27 = vsel %vm1189_vm7, %v1188_v10, %v1182_v34  ;;  %v19480_v4 = vsel %vm1189_vm7, %v1186_v37, %v1188_v10  ;;  %v19484_v41 = vsel %vm1189_vm7, %v1184_v58, %v1186_v37  ;;  %v18175_v37 = vld [vmem:[%s22543_s1 + $0x30] sm:$0xff] }
  0xb3   :  { %v1217_v2 = vmul.f32 %v19460_v28, %v19476_v27  ;;  %v1219_v55 = vmul.f32 %v19465_v57, %v19484_v41  ;;  %v1220_v34 = vmul.f32 %v19470_v40, %v19480_v4  ;;  %v19506_v57 = vrot.slane %v19404_v24, %v19136_v17 }
  0xb4   :  { %v19510_v40 = vrot.slane %v19404_v24, %v19138_v18 }
  0xb5   :  { %v1375_v58 = vpop.permute.xlu1 %1374  ;;  %1227 = vmatpush1.msra.mxu0 %v1217_v2  ;;  %1297 = vmatprep.subr.mxu1 %v1220_v34  ;;  %v1373_v10 = vpop.permute.xlu0 %1372  ;;  %22836 = vst [vmem:[#allocation32_spill] sm:$0xff] %v19506_v57  ;;  %v19518_v34 = vrot.slane %v19404_v24, %v19134_v16 }
  0xb6   :  { %v19502_v28 = vsel %vm1380_vm8, %v1373_v10, %v1375_v58  ;;  %1298 = vmatpush1.msra.mxu1 %v1219_v55  ;;  %22837 = vst [vmem:[#allocation33_spill] sm:$0xff] %v19510_v40  ;;  %v1574_v55 = vmul.f32 %v19201_v39, %v19404_v24 }
  0xb7   :  { %18176 = vmatmul.mubr.msk.f32.vlgmr.msra.gmra.mrb[0].mxu0 %vm131_vm2, %v18175_v37  ;;  %18177 = vmatmul.mubr.msk.f32.vlgmr.msra.gmra.mrb[0].mxu1 %vm131_vm2, %v18175_v37  ;;  %v1407_v2 = vmul.f32 %v19495_v62, %v19502_v28  ;;  %22838 = vst [vmem:[#allocation34_spill] sm:$0xff] %v19518_v34 }
  0xb8   :  { %1479 = vmatprep.mubr.f32.mxu0 %v22830_v59  ;;  %1550 = vmatprep.mubr.f32.mxu1 %v22830_v59  ;;  %v19544_v44 = vrot.slane %v1574_v55, %v19132_v15 }
  0xb9   :  { %v1379_v1 = vpop.permute.xlu1 %1378  ;;  %v1377_v61 = vpop.permute.xlu0 %1376  ;;  %1415 = vmatprep.subr.mxu0 %v1407_v2 }
  0xba   :  { %v19526_v37 = vsel %vm1380_vm8, %v1379_v1, %v1373_v10  ;;  %v19530_v62 = vsel %vm1380_vm8, %v1377_v61, %v1379_v1  ;;  %v19534_v56 = vsel %vm1380_vm8, %v1375_v58, %v1377_v61  ;;  %22839 = vst [vmem:[#allocation35_spill] sm:$0xff] %v19544_v44  ;;  %v18178_v1 = vld [vmem:[%s22543_s1 + $0x38] sm:$0xff] }
  0xbb   :  { %v1406_v24 = vmul.f32 %v19506_v57, %v19526_v37  ;;  %v1408_v2 = vmul.f32 %v19510_v40, %v19534_v56  ;;  %v1409_v10 = vmul.f32 %v19518_v34, %v19530_v62  ;;  %v19554_v40 = vrot.slane %v1574_v55, %v19136_v17 }
  0xbc   :  { %v19557_v34 = vrot.slane %v1574_v55, %v19138_v18 }
  0xbd   :  { %v1564_v61 = vpop.permute.xlu1 %1563  ;;  %1416 = vmatpush1.msra.mxu0 %v1406_v24  ;;  %1486 = vmatprep.subr.mxu1 %v1409_v10  ;;  %v1562_v58 = vpop.permute.xlu0 %1561  ;;  %22841 = vst [vmem:[#allocation37_spill] sm:$0xff] %v19554_v40  ;;  %v19564_v10 = vrot.slane %v1574_v55, %v19134_v16 }
  0xbe   :  { %v19551_v57 = vsel %vm1569_vm9, %v1562_v58, %v1564_v61  ;;  %1487 = vmatpush1.msra.mxu1 %v1408_v2  ;;  %22842 = vst [vmem:[#allocation38_spill] sm:$0xff] %v19557_v34 }
  0xbf   :  { %22840 = vst [vmem:[#allocation36_spill] sm:$0xff] %v19551_v57  ;;  %18179 = vmatmul.mubr.msk.f32.vlgmr.msra.gmra.mrb[0].mxu0 %vm131_vm2, %v18178_v1  ;;  %18180 = vmatmul.mubr.msk.f32.vlgmr.msra.gmra.mrb[0].mxu1 %vm131_vm2, %v18178_v1  ;;  %v1597_v24 = vmul.f32 %v19544_v44, %v19551_v57  ;;  %22843 = vst [vmem:[#allocation39_spill] sm:$0xff] %v19564_v10 }
  0xc0   :  { %1669 = vmatprep.mubr.f32.mxu0 %v22830_v59  ;;  %1740 = vmatprep.mubr.f32.mxu1 %v22830_v59 }
  0xc1   :  { %v1568_v2 = vpop.permute.xlu1 %1567  ;;  %v1566_v43 = vpop.permute.xlu0 %1565  ;;  %1605 = vmatprep.subr.mxu0 %v1597_v24 }
  0xc2   :  { %v19572_v35 = vsel %vm1569_vm9, %v1568_v2, %v1562_v58  ;;  %v19576_v1 = vsel %vm1569_vm9, %v1566_v43, %v1568_v2  ;;  %v19580_v55 = vsel %vm1569_vm9, %v1564_v61, %v1566_v43  ;;  %v18181_v2 = vld [vmem:[%s22543_s1 + $0x40] sm:$0xff] }
  0xc3   :  { %22844 = vst [vmem:[#allocation40_spill] sm:$0xff] %v19576_v1  ;;  %v1596_v44 = vmul.f32 %v19554_v40, %v19572_v35  ;;  %v1598_v24 = vmul.f32 %v19557_v34, %v19580_v55  ;;  %v1599_v58 = vmul.f32 %v19564_v10, %v19576_v1  ;;  %v19598_v34 = vrot.slane %v1764_v46, %v19136_v17 }
  0xc4   :  { %v19603_v10 = vrot.slane %v1764_v46, %v19138_v18 }
  0xc5   :  { %v1754_v43 = vpop.permute.xlu1 %1753  ;;  %1606 = vmatpush1.msra.mxu0 %v1596_v44  ;;  %1676 = vmatprep.subr.mxu1 %v1599_v58  ;;  %v1752_v61 = vpop.permute.xlu0 %1751  ;;  %22846 = vst [vmem:[#allocation42_spill] sm:$0xff] %v19598_v34  ;;  %v19607_v44 = vrot.slane %v1764_v46, %v19134_v16 }
  0xc6   :  { %v1762_v40 = vsel %vm1759_vm10, %v1752_v61, %v1754_v43  ;;  %1677 = vmatpush1.msra.mxu1 %v1598_v24  ;;  %22847 = vst [vmem:[#allocation43_spill] sm:$0xff] %v19603_v10 }
  0xc7   :  { %18182 = vmatmul.mubr.msk.f32.vlgmr.msra.gmra.mrb[0].mxu0 %vm131_vm2, %v18181_v2  ;;  %18183 = vmatmul.mubr.msk.f32.vlgmr.msra.gmra.mrb[0].mxu1 %vm131_vm2, %v18181_v2  ;;  %v1787_v22 = vmul.f32 %v19590_v26, %v1762_v40  ;;  %22848 = vst [vmem:[#allocation44_spill] sm:$0xff] %v19607_v44 }
  0xc8   :  { %1859 = vmatprep.mubr.f32.mxu0 %v22830_v59  ;;  %1930 = vmatprep.mubr.f32.mxu1 %v22830_v59 }
  0xc9   :  { %v1758_v24 = vpop.permute.xlu1 %1757  ;;  %v1756_v58 = vpop.permute.xlu0 %1755  ;;  %1795 = vmatprep.subr.mxu0 %v1787_v22  ;;  %v19623_v22 = vrot.slane %v19122_v12, %v19132_v15 }
  0xca   :  { %v1763_v25 = vsel %vm1759_vm10, %v1758_v24, %v1752_v61  ;;  %v1760_v2 = vsel %vm1759_vm10, %v1756_v58, %v1758_v24  ;;  %v1761_v23 = vsel %vm1759_vm10, %v1754_v43, %v1756_v58  ;;  %v18184_v61 = vld [vmem:[%s22543_s1 + $0x48] sm:$0xff] }
  0xcb   :  { %v1786_v46 = vmul.f32 %v19598_v34, %v1763_v25  ;;  %v1788_v40 = vmul.f32 %v19603_v10, %v1761_v23  ;;  %v1789_v26 = vmul.f32 %v19607_v44, %v1760_v2  ;;  %22849 = vst [vmem:[#allocation45_spill] sm:$0xff] %v19623_v22  ;;  %v19632_v23 = vrot.slane %v19122_v12, %v19136_v17 }
  0xcc   :  { %v19636_v25 = vrot.slane %v19122_v12, %v19138_v18 }
  0xcd   :  { %v1944_v24 = vpop.permute.xlu1 %1943  ;;  %1796 = vmatpush1.msra.mxu0 %v1786_v46  ;;  %1866 = vmatprep.subr.mxu1 %v1789_v26  ;;  %v1942_v43 = vpop.permute.xlu0 %1941  ;;  %22850 = vst [vmem:[#allocation46_spill] sm:$0xff] %v19632_v23  ;;  %v19643_v26 = vrot.slane %v19122_v12, %v19134_v16  ;;  %v2143_v46 = vmul.f32 %v19201_v39, %v19122_v12 }
  0xce   :  { %v1952_v58 = vsel %vm1949_vm11, %v1942_v43, %v1944_v24  ;;  %1867 = vmatpush1.msra.mxu1 %v1788_v40  ;;  %22851 = vst [vmem:[#allocation47_spill] sm:$0xff] %v19636_v25 }
  0xcf   :  { %18185 = vmatmul.mubr.msk.f32.vlgmr.msra.gmra.mrb[0].mxu0 %vm131_vm2, %v18184_v61  ;;  %18186 = vmatmul.mubr.msk.f32.vlgmr.msra.gmra.mrb[0].mxu1 %vm131_vm2, %v18184_v61  ;;  %v1976_v2 = vmul.f32 %v19623_v22, %v1952_v58  ;;  %22852 = vst [vmem:[#allocation48_spill] sm:$0xff] %v19643_v26  ;;  %v19660_v57 = vrot.slane %v2143_v46, %v19132_v15 }
  0xd0   :  { %2048 = vmatprep.mubr.f32.mxu0 %v22830_v59  ;;  %2119 = vmatprep.mubr.f32.mxu1 %v22830_v59 }
  0xd1   :  { %v1948_v40 = vpop.permute.xlu1 %1947  ;;  %v1946_v10 = vpop.permute.xlu0 %1945  ;;  %1984 = vmatprep.subr.mxu0 %v1976_v2  ;;  %22853 = vst [vmem:[#allocation49_spill] sm:$0xff] %v19660_v57 }
  0xd2   :  { %v1953_v44 = vsel %vm1949_vm11, %v1948_v40, %v1942_v43  ;;  %v1950_v61 = vsel %vm1949_vm11, %v1946_v10, %v1948_v40  ;;  %v1951_v58 = vsel %vm1949_vm11, %v1944_v24, %v1946_v10  ;;  %v18187_v43 = vld [vmem:[%s22543_s1 + $0x50] sm:$0xff]  ;;  %v19673_v24 = vrot.slane %v2143_v46, %v19138_v18 }
  0xd3   :  { %v1975_v22 = vmul.f32 %v19632_v23, %v1953_v44  ;;  %v1977_v34 = vmul.f32 %v19636_v25, %v1951_v58  ;;  %v1978_v1 = vmul.f32 %v19643_v26, %v1950_v61  ;;  %v19668_v44 = vrot.slane %v2143_v46, %v19136_v17 }
  0xd4   :  { %22855 = vst [vmem:[#allocation51_spill] sm:$0xff] %v19673_v24 }
  0xd5   :  { %v2133_v2 = vpop.permute.xlu1 %2132  ;;  %1985 = vmatpush1.msra.mxu0 %v1975_v22  ;;  %2055 = vmatprep.subr.mxu1 %v1978_v1  ;;  %v2131_v40 = vpop.permute.xlu0 %2130  ;;  %22854 = vst [vmem:[#allocation50_spill] sm:$0xff] %v19668_v44  ;;  %v19677_v22 = vrot.slane %v2143_v46, %v19134_v16 }
  0xd6   :  { %v2141_v10 = vsel %vm22738_vm12, %v2131_v40, %v2133_v2  ;;  %2056 = vmatpush1.msra.mxu1 %v1977_v34  ;;  %v5010_v34 = vld [vmem:[%s22544_s2] sm:$0xff] }
  0xd7   :  { %18188 = vmatmul.mubr.msk.f32.vlgmr.msra.gmra.mrb[0].mxu0 %vm131_vm2, %v18187_v43  ;;  %18189 = vmatmul.mubr.msk.f32.vlgmr.msra.gmra.mrb[0].mxu1 %vm131_vm2, %v18187_v43  ;;  %v2166_v61 = vmul.f32 %v19660_v57, %v2141_v10  ;;  %22856 = vst [vmem:[#allocation52_spill] sm:$0xff] %v19677_v22  ;;  %v18955_v43 = vmov 0  }
  0xd8   :  { %2238 = vmatprep.mubr.f32.mxu0 %v22830_v59  ;;  %2309 = vmatprep.mubr.f32.mxu1 %v22830_v59 }
  0xd9   :  { %v2137_v1 = vpop.permute.xlu1 %2136  ;;  %v2135_v58 = vpop.permute.xlu0 %2134  ;;  %2174 = vmatprep.subr.mxu0 %v2166_v61  ;;  %18922 = vset.pattern.permute.xlu0 %v18955_v43  ;;  %v19696_v43 = vrot.slane %v19143_v19, %v19132_v15 }
  0xda   :  { %v2142_v25 = vsel %vm22738_vm12, %v2137_v1, %v2131_v40  ;;  %v2139_v46 = vsel %vm22738_vm12, %v2135_v58, %v2137_v1  ;;  %v2140_v10 = vsel %vm22738_vm12, %v2133_v2, %v2135_v58  ;;  %5013 = vperm.xlu0 %18922, %v5010_v34   ;;  %v18190_v40 = vld [vmem:[%s22543_s1 + $0x58] sm:$0xff]  ;;  %v19711_v58 = vrot.slane %v19143_v19, %v19138_v18 }
  0xdb   :  { %v2165_v57 = vmul.f32 %v19668_v44, %v2142_v25  ;;  %v2167_v26 = vmul.f32 %v19673_v24, %v2140_v10  ;;  %v2168_v61 = vmul.f32 %v19677_v22, %v2139_v46  ;;  %22857 = vst [vmem:[#allocation53_spill] sm:$0xff] %v19696_v43  ;;  %v19705_v25 = vrot.slane %v19143_v19, %v19136_v17  ;;  %v18193_v44 = vld [vmem:[%s22543_s1 + $0x60] sm:$0xff] }
  0xdc   :  { %22859 = vst [vmem:[#allocation55_spill] sm:$0xff] %v19711_v58  ;;  %v19716_v46 = vrot.slane %v19143_v19, %v19134_v16 }
  0xdd   :  { %v2323_v1 = vpop.permute.xlu1 %2322  ;;  %2175 = vmatpush1.msra.mxu0 %v2165_v57  ;;  %2245 = vmatprep.subr.mxu1 %v2168_v61  ;;  %v2321_v2 = vpop.permute.xlu0 %2320  ;;  %22858 = vst [vmem:[#allocation54_spill] sm:$0xff] %v19705_v25 }
  0xde   :  { %v2331_v34 = vsel %vm22737_vm13, %v2321_v2, %v2323_v1  ;;  %2246 = vmatpush1.msra.mxu1 %v2167_v26  ;;  %22860 = vst [vmem:[#allocation56_spill] sm:$0xff] %v19716_v46 }
  0xdf   :  { %18191 = vmatmul.mubr.msk.f32.vlgmr.msra.gmra.mrb[0].mxu0 %vm131_vm2, %v18190_v40  ;;  %18192 = vmatmul.mubr.msk.f32.vlgmr.msra.gmra.mrb[0].mxu1 %vm131_vm2, %v18190_v40  ;;  %v2355_v57 = vmul.f32 %v19696_v43, %v2331_v34 }
  0xe0   :  { %2427 = vmatprep.mubr.f32.mxu0 %v22830_v59  ;;  %2498 = vmatprep.mubr.f32.mxu1 %v22830_v59 }
  0xe1   :  { %v2327_v26 = vpop.permute.xlu1 %2326  ;;  %v2325_v10 = vpop.permute.xlu0 %2324  ;;  %2363 = vmatprep.subr.mxu0 %v2355_v57 }
  0xe2   :  { %v2332_v61 = vsel %vm22737_vm13, %v2327_v26, %v2321_v2  ;;  %v2329_v40 = vsel %vm22737_vm13, %v2325_v10, %v2327_v26  ;;  %v2330_v34 = vsel %vm22737_vm13, %v2323_v1, %v2325_v10  ;;  %v19738_v1 = vrot.slane %v19201_v39, %v19132_v15 }
  0xe3   :  { %v2354_v43 = vmul.f32 %v19705_v25, %v2332_v61  ;;  %v2356_v24 = vmul.f32 %v19711_v58, %v2330_v34  ;;  %v2357_v22 = vmul.f32 %v19716_v46, %v2329_v40  ;;  %v19742_v26 = vrot.slane %v19201_v39, %v19134_v16 }
  0xe4   :  { %22861 = vst [vmem:[#allocation57_spill] sm:$0xff] %v19738_v1 }
  0xe5   :  { %2364 = vmatpush1.msra.mxu0 %v2354_v43  ;;  %2434 = vmatprep.subr.mxu1 %v2357_v22  ;;  %v2663_v57 = vpop.permute.xlu1 %2662  ;;  %v2661_v2 = vpop.permute.xlu0 %2660  ;;  %22862 = vst [vmem:[#allocation58_spill] sm:$0xff] %v19742_v26  ;;  %v19746_v22 = vrot.slane %v19201_v39, %v19136_v17 }
  0xe6   :  { %2435 = vmatpush1.msra.mxu1 %v2356_v24  ;;  %2514 = vmatprep.subr.mxu0 %v19004_v8  ;;  %v19750_v24 = vrot.slane %v19201_v39, %v19138_v18  ;;  %v2671_v8 = vsel %vm22658_vm14, %v2661_v2, %v2663_v57 }
  0xe7   :  { %18194 = vmatmul.mubr.msk.f32.vlgmr.msra.gmra.mrb[0].mxu0 %vm131_vm2, %v18193_v44  ;;  %18195 = vmatmul.mubr.msk.f32.vlgmr.msra.gmra.mrb[0].mxu1 %vm131_vm2, %v18193_v44  ;;  %22863 = vst [vmem:[#allocation59_spill] sm:$0xff] %v19746_v22 }
  0xe8   :  { %22864 = vst [vmem:[#allocation60_spill] sm:$0xff] %v19750_v24  ;;  %2585 = vmatprep.subr.mxu1 %v19002_v7  ;;  %2515 = vmatpush1.msra.mxu0 %v18996_v6  ;;  %v2862_v6 = vmul.f32 %v19143_v19, %v19378_v33 }
  0xe9   :  { %v2667_v44 = vpop.permute.xlu1 %2666  ;;  %v2665_v43 = vpop.permute.xlu0 %2664  ;;  %2578 = vmatprep.mubr.f32.mxu0 %v22830_v59  ;;  %2586 = vmatpush1.msra.mxu1 %v18994_v5  ;;  %v2694_v5 = vmul.f32 %v19746_v22, %v2671_v8 }
  0xea   :  { %v2672_v10 = vsel %vm22658_vm14, %v2667_v44, %v2661_v2  ;;  %v2669_v61 = vsel %vm22658_vm14, %v2665_v43, %v2667_v44  ;;  %v2670_v7 = vsel %vm22658_vm14, %v2663_v57, %v2665_v43  ;;  %2649 = vmatprep.mubr.f32.mxu1 %v22830_v59  ;;  %v18196_v2 = vld [vmem:[%s22543_s1 + $0x68] sm:$0xff]  ;;  %v19778_v57 = vrot.slane %v2862_v6, %v19132_v15 }
  0xeb   :  { %v2695_v40 = vmul.f32 %v19738_v1, %v2670_v7  ;;  %v2697_v34 = vmul.f32 %v19742_v26, %v2672_v10  ;;  %v2696_v58 = vmul.f32 %v19750_v24, %v2669_v61  ;;  %v19781_v8 = vrot.slane %v2862_v6, %v19134_v16  ;;  %v18199_v26 = vld [vmem:[%s22543_s1 + $0x70] sm:$0xff] }
  0xec   :  { %22865 = vst [vmem:[#allocation61_spill] sm:$0xff] %v19778_v57  ;;  %v19784_v43 = vrot.slane %v2862_v6, %v19136_v17  ;;  %v19787_v10 = vrot.slane %v2862_v6, %v19138_v18  ;;  %vm22669_vm14 = vcmp.lt.s32.totalorder %v19128_v13, 120 }
  0xed   :  { %v2852_v44 = vpop.permute.xlu1 %2851  ;;  %v2850_v46 = vpop.permute.xlu0 %2849  ;;  %2703 = vmatprep.subr.mxu0 %v2695_v40  ;;  %2774 = vmatprep.subr.mxu1 %v2697_v34  ;;  %22866 = vst [vmem:[#allocation62_spill] sm:$0xff] %v19781_v8 }
  0xee   :  { %22867 = vst [vmem:[#allocation63_spill] sm:$0xff] %v19784_v43  ;;  %22868 = vst [vmem:[#allocation64_spill] sm:$0xff] %v19787_v10  ;;  %v2860_v61 = vsel %vm22739_vm15, %v2850_v46, %v2852_v44 }
  0xef   :  { %18197 = vmatmul.mubr.msk.f32.vlgmr.msra.gmra.mrb[0].mxu0 %vm131_vm2, %v18196_v2  ;;  %18198 = vmatmul.mubr.msk.f32.vlgmr.msra.gmra.mrb[0].mxu1 %vm131_vm2, %v18196_v2  ;;  %v2884_v24 = vmul.f32 %v19784_v43, %v2860_v61  ;;  %v19815_v61 = vrot.slane %v19378_v33, %v19138_v18 }
  0xf0   :  { %2704 = vmatpush1.msra.mxu0 %v2694_v5  ;;  %2775 = vmatpush1.msra.mxu1 %v2696_v58 }
  0xf1   :  { %v2856_v7 = vpop.permute.xlu1 %2855  ;;  %v2854_v40 = vpop.permute.xlu0 %2853  ;;  %2767 = vmatprep.mubr.f32.mxu0 %v22830_v59  ;;  %2838 = vmatprep.mubr.f32.mxu1 %v22830_v59  ;;  %22870 = vst [vmem:[#allocation66_spill] sm:$0xff] %v19815_v61 }
  0xf2   :  { %v2861_v34 = vsel %vm22739_vm15, %v2856_v7, %v2850_v46  ;;  %v2858_v2 = vsel %vm22739_vm15, %v2854_v40, %v2856_v7  ;;  %v2859_v6 = vsel %vm22739_vm15, %v2852_v44, %v2854_v40  ;;  %v19809_v44 = vrot.slane %v19378_v33, %v19136_v17 }
  0xf3   :  { %v2885_v58 = vmul.f32 %v19778_v57, %v2859_v6  ;;  %v2887_v5 = vmul.f32 %v19781_v8, %v2861_v34  ;;  %v2886_v22 = vmul.f32 %v19787_v10, %v2858_v2  ;;  %v19819_v7 = vrot.slane %v19378_v33, %v19132_v15  ;;  %v18202_v8 = vld [vmem:[%s22543_s1 + $0x78] sm:$0xff] }
  0xf4   :  { %22869 = vst [vmem:[#allocation65_spill] sm:$0xff] %v19809_v44  ;;  %v19823_v40 = vrot.slane %v19378_v33, %v19134_v16 }
  0xf5   :  { %v3042_v1 = vpop.permute.xlu1 %3041  ;;  %v3040_v46 = vpop.permute.xlu0 %3039  ;;  %2893 = vmatprep.subr.mxu0 %v2885_v58  ;;  %2964 = vmatprep.subr.mxu1 %v2887_v5  ;;  %22871 = vst [vmem:[#allocation67_spill] sm:$0xff] %v19819_v7  ;;  %v3241_v5 = vmul.f32 %v19201_v39, %v19378_v33 }
  0xf6   :  { %22872 = vst [vmem:[#allocation68_spill] sm:$0xff] %v19823_v40  ;;  %v3050_v34 = vsel %vm22669_vm14, %v3040_v46, %v3042_v1 }
  0xf7   :  { %18200 = vmatmul.mubr.msk.f32.vlgmr.msra.gmra.mrb[0].mxu0 %vm131_vm2, %v18199_v26  ;;  %18201 = vmatmul.mubr.msk.f32.vlgmr.msra.gmra.mrb[0].mxu1 %vm131_vm2, %v18199_v26  ;;  %v19832_v26 = vld [vmem:[%s22542_s3 + $0x1] ss:$8 sm:$0xf]  ;;  %v3073_v10 = vmul.f32 %v19809_v44, %v3050_v34 }
  0xf8   :  { %2894 = vmatpush1.msra.mxu0 %v2884_v24  ;;  %2965 = vmatpush1.msra.mxu1 %v2886_v22 }
  0xf9   :  { %2957 = vmatprep.mubr.f32.mxu0 %v22830_v59  ;;  %3028 = vmatprep.mubr.f32.mxu1 %v22830_v59 }
  0xfa   :  { %v3046_v22 = vpop.permute.xlu1 %3045  ;;  %v3044_v24 = vpop.permute.xlu0 %3043 }
  0xfb   :  { %v3051_v2 = vsel %vm22669_vm14, %v3046_v22, %v3040_v46  ;;  %v3048_v6 = vsel %vm22669_vm14, %v3044_v24, %v3046_v22  ;;  %v3049_v58 = vsel %vm22669_vm14, %v3042_v1, %v3044_v24  ;;  %v3418_v22 = vmul.f32 %v19122_v12, %v19832_v26 }
  0xfc   :  { %v3075_v43 = vmul.f32 %v19815_v61, %v3048_v6  ;;  %v3074_v57 = vmul.f32 %v19819_v7, %v3049_v58  ;;  %v3076_v46 = vmul.f32 %v19823_v40, %v3051_v2  ;;  %vm3236_vm14 = vcmp.lt.s32.totalorder %v19128_v13, 119 }
  0xfd   :  { %v3419_v34 = vmul.f32 %v19143_v19, %v3418_v22  ;;  %v19854_v24 = vrot.slane %v3241_v5, %v19136_v17  ;;  %v19859_v2 = vrot.slane %v3241_v5, %v19138_v18  ;;  %v19862_v12 = vrot.slane %v3241_v5, %v19132_v15 }
  0xfe   :  { %v3231_v25 = vpop.permute.xlu1 %3230  ;;  %v3229_v1 = vpop.permute.xlu0 %3228  ;;  %3082 = vmatprep.subr.mxu0 %v3074_v57  ;;  %3153 = vmatprep.subr.mxu1 %v3076_v46  ;;  %v19865_v57 = vrot.slane %v3241_v5, %v19134_v16 }
  0xff   :  { %18203 = vmatmul.mubr.msk.f32.vlgmr.msra.gmra.mrb[0].mxu0 %vm131_vm2, %v18202_v8  ;;  %18204 = vmatmul.mubr.msk.f32.vlgmr.msra.gmra.mrb[0].mxu1 %vm131_vm2, %v18202_v8  ;;  %v3239_v19 = vsel %vm3236_vm14, %v3229_v1, %v3231_v25  ;;  %v19881_v46 = vrot.slane %v3419_v34, %v19134_v16 }
 0x100   :  { %3083 = vmatpush1.msra.mxu0 %v3073_v10  ;;  %3154 = vmatpush1.msra.mxu1 %v3075_v43  ;;  %v19872_v10 = vrot.slane %v3419_v34, %v19132_v15  ;;  %v3263_v61 = vmul.f32 %v19854_v24, %v3239_v19 }
 0x101   :  { %3146 = vmatprep.mubr.f32.mxu0 %v22830_v59  ;;  %3217 = vmatprep.mubr.f32.mxu1 %v22830_v59  ;;  %v3444_v19 = vmul.f32 %v19881_v46, %v19228_v50  ;;  %v18208_v50 = vld [vmem:[%s22543_s1 + $0x88] sm:$0xff] }
 0x102   :  { %v3235_v6 = vpop.permute.xlu1 %3234  ;;  %v3233_v8 = vpop.permute.xlu0 %3232 }
 0x103   :  { %v3240_v43 = vsel %vm3236_vm14, %v3235_v6, %v3229_v1  ;;  %v3237_v58 = vsel %vm3236_vm14, %v3233_v8, %v3235_v6  ;;  %v3238_v5 = vsel %vm3236_vm14, %v3231_v25, %v3233_v8  ;;  %v18205_v1 = vld [vmem:[%s22543_s1 + $0x80] sm:$0xff]  ;;  %v3442_v25 = vmul.f32 %v19872_v10, %v19236_v52 }
 0x104   :  { %v3265_v44 = vmul.f32 %v19859_v2, %v3237_v58  ;;  %v3264_v40 = vmul.f32 %v19862_v12, %v3238_v5  ;;  %v3266_v7 = vmul.f32 %v19865_v57, %v3240_v43  ;;  %v19897_v6 = vrot.slane %v3419_v34, %v19136_v17 }
 0x105   :  { %v19908_v52 = vrot.slane %v3418_v22, %v19132_v15  ;;  %v3772_v43 = vmul.f32 %v19201_v39, %v3418_v22  ;;  %v18211_v39 = vld [vmem:[%s22543_s1 + $0x90] sm:$0xff] }
 0x106   :  { %3272 = vmatprep.subr.mxu0 %v3264_v40  ;;  %3343 = vmatprep.subr.mxu1 %v3266_v7  ;;  %v19900_v40 = vrot.slane %v3419_v34, %v19138_v18  ;;  %v19905_v7 = vrot.slane %v3418_v22, %v19134_v16 }
 0x107   :  { %18206 = vmatmul.mubr.msk.f32.vlgmr.msra.gmra.mrb[0].mxu0 %vm131_vm2, %v18205_v1  ;;  %18207 = vmatmul.mubr.msk.f32.vlgmr.msra.gmra.mrb[0].mxu1 %vm131_vm2, %v18205_v1  ;;  %v3618_v8 = vmul.f32 %v19908_v52, %v19177_v32  ;;  %v19936_v32 = vrot.slane %v3772_v43, %v19134_v16 }
 0x108   :  { %3273 = vmatpush1.msra.mxu0 %v3263_v61  ;;  %3344 = vmatpush1.msra.mxu1 %v3265_v44  ;;  %v3441_v44 = vmul.f32 %v19897_v6, %v19205_v42  ;;  %v3443_v61 = vmul.f32 %v19900_v40, %v19232_v51  ;;  %v3620_v34 = vmul.f32 %v19905_v7, %v19173_v31 }
 0x109   :  { %3450 = vmatprep.subr.mxu0 %v3442_v25  ;;  %3521 = vmatprep.subr.mxu1 %v3444_v19  ;;  %v19925_v42 = vrot.slane %v3418_v22, %v19138_v18  ;;  %v19928_v51 = vrot.slane %v3418_v22, %v19136_v17  ;;  %v19933_v31 = vrot.slane %v3772_v43, %v19132_v15  ;;  %v18929_v25 = vld [vmem:[%s22542_s3 + $0x4] ss:$8 sm:$0xf] }
 0x10a   :  { %3336 = vmatprep.mubr.f32.mxu0 %v22830_v59  ;;  %3407 = vmatprep.mubr.f32.mxu1 %v22830_v59  ;;  %22874 = vst [vmem:[#allocation70_spill] sm:$0xff] %v19936_v32  ;;  %v3797_v1 = vmul.f32 %v19936_v32, %v19282_v9  ;;  %v19959_v19 = vrot.slane %v3772_v43, %v19138_v18 }
 0x10b   :  { %22873 = vst [vmem:[#allocation69_spill] sm:$0xff] %v19925_v42  ;;  %v3619_v58 = vmul.f32 %v19925_v42, %v19165_v29  ;;  %v3617_v22 = vmul.f32 %v19928_v51, %v19169_v30  ;;  %v3795_v5 = vmul.f32 %v19933_v31, %v19290_v14  ;;  %v3949_v29 = vmul.f32 %v18929_v25, %v19832_v26 }
 0x10c   :  { %v19956_v30 = vrot.slane %v3772_v43, %v19136_v17  ;;  %22876 = vst [vmem:[#allocation72_spill] sm:$0xff] %v19959_v19 }
 0x10d   :  { %v19964_v9 = vrot.slane %v3949_v29, %v19132_v15  ;;  %v19967_v14 = vrot.slane %v3949_v29, %v19134_v16  ;;  %v19983_v43 = vrot.slane %v3949_v29, %v19136_v17 }
 0x10e   :  { %22875 = vst [vmem:[#allocation71_spill] sm:$0xff] %v19956_v30 }
 0x10f   :  { %18209 = vmatmul.mubr.msk.f32.vlgmr.msra.gmra.mrb[0].mxu0 %vm131_vm2, %v18208_v50  ;;  %18210 = vmatmul.mubr.msk.f32.vlgmr.msra.gmra.mrb[0].mxu1 %vm131_vm2, %v18208_v50  ;;  %22877 = vst [vmem:[#allocation73_spill] sm:$0xff] %v19964_v9  ;;  %22878 = vst [vmem:[#allocation74_spill] sm:$0xff] %v19967_v14  ;;  %v18214_v50 = vld [vmem:[%s22543_s1 + $0x98] sm:$0xff] }
 0x110   :  { %3451 = vmatpush1.msra.mxu0 %v3441_v44  ;;  %3522 = vmatpush1.msra.mxu1 %v3443_v61  ;;  %v3794_v44 = vmul.f32 %v19956_v30, %v19258_v60  ;;  %v3796_v61 = vmul.f32 %v19959_v19, %v19286_v11  ;;  %22879 = vst [vmem:[#allocation75_spill] sm:$0xff] %v19983_v43 }
 0x111   :  { %3626 = vmatprep.subr.mxu0 %v3618_v8  ;;  %3697 = vmatprep.subr.mxu1 %v3620_v34  ;;  %v3972_v34 = vmul.f32 %v19964_v9, %v19335_v53  ;;  %v3974_v8 = vmul.f32 %v19967_v14, %v19327_v48  ;;  %v19986_v60 = vrot.slane %v3949_v29, %v19138_v18  ;;  %v18217_v53 = vld [vmem:[%s22543_s1 + $0xa0] sm:$0xff] }
 0x112   :  { %3514 = vmatprep.mubr.f32.mxu0 %v22830_v59  ;;  %3585 = vmatprep.mubr.f32.mxu1 %v22830_v59  ;;  %v19992_v11 = vrot.slane %v19832_v26, %v19132_v15  ;;  %v19996_v48 = vrot.slane %v19832_v26, %v19134_v16 }
 0x113   :  { %22880 = vst [vmem:[#allocation76_spill] sm:$0xff] %v19986_v60 }
 0x114   :  { %22881 = vst [vmem:[#allocation77_spill] sm:$0xff] %v19992_v11  ;;  %22882 = vst [vmem:[#allocation78_spill] sm:$0xff] %v19996_v48 }
 0x117   :  { %18212 = vmatmul.mubr.msk.f32.vlgmr.msra.gmra.mrb[0].mxu0 %vm131_vm2, %v18211_v39  ;;  %18213 = vmatmul.mubr.msk.f32.vlgmr.msra.gmra.mrb[0].mxu1 %vm131_vm2, %v18211_v39  ;;  %v3971_v39 = vmul.f32 %v19983_v43, %v19308_v36 }
 0x118   :  { %3627 = vmatpush1.msra.mxu0 %v3617_v22  ;;  %3698 = vmatpush1.msra.mxu1 %v3619_v58  ;;  %v3973_v58 = vmul.f32 %v19986_v60, %v19331_v49  ;;  %v4148_v22 = vmul.f32 %v19992_v11, %v19391_v54  ;;  %v20017_v49 = vrot.slane %v19832_v26, %v19136_v17 }
 0x119   :  { %3803 = vmatprep.subr.mxu0 %v3795_v5  ;;  %3874 = vmatprep.subr.mxu1 %v3797_v1  ;;  %v4150_v5 = vmul.f32 %v19996_v48, %v19383_v45  ;;  %v18930_v1 = vld [vmem:[%s22542_s3 + $0x5] ss:$8 sm:$0xf]  ;;  %v20021_v54 = vrot.slane %v19832_v26, %v19138_v18 }
 0x11a   :  { %3690 = vmatprep.mubr.f32.mxu0 %v22830_v59  ;;  %3761 = vmatprep.mubr.f32.mxu1 %v22830_v59  ;;  %v4302_v36 = vmul.f32 %v18930_v1, %v19832_v26  ;;  %22883 = vst [vmem:[#allocation79_spill] sm:$0xff] %v20017_v49 }
 0x11b   :  { %22884 = vst [vmem:[#allocation80_spill] sm:$0xff] %v20021_v54 }
 0x11c   :  { %v20026_v45 = vrot.slane %v4302_v36, %v19132_v15  ;;  %v20029_v29 = vrot.slane %v4302_v36, %v19134_v16 }
 0x11e   :  { %22885 = vst [vmem:[#allocation81_spill] sm:$0xff] %v20026_v45  ;;  %22886 = vst [vmem:[#allocation82_spill] sm:$0xff] %v20029_v29 }
 0x11f   :  { %18215 = vmatmul.mubr.msk.f32.vlgmr.msra.gmra.mrb[0].mxu0 %vm131_vm2, %v18214_v50  ;;  %18216 = vmatmul.mubr.msk.f32.vlgmr.msra.gmra.mrb[0].mxu1 %vm131_vm2, %v18214_v50  ;;  %v18220_v50 = vld [vmem:[%s22543_s1 + $0xa8] sm:$0xff] }
 0x120   :  { %3804 = vmatpush1.msra.mxu0 %v3794_v44  ;;  %3875 = vmatpush1.msra.mxu1 %v3796_v61  ;;  %v4479_v44 = vmul.f32 %v19378_v33, %v19832_v26  ;;  %v4147_v61 = vmul.f32 %v20017_v49, %v19353_v3  ;;  %v20047_v3 = vrot.slane %v4302_v36, %v19136_v17  ;;  %v18253_v49 = vld [vmem:[%s22543_s1 + $0x100] sm:$0xff] }
 0x121   :  { %3980 = vmatprep.subr.mxu0 %v3972_v34  ;;  %4051 = vmatprep.subr.mxu1 %v3974_v8  ;;  %v4149_v34 = vmul.f32 %v20021_v54, %v19387_v47  ;;  %v4325_v8 = vmul.f32 %v20026_v45, %v19440_v20  ;;  %v20050_v33 = vrot.slane %v4302_v36, %v19138_v18  ;;  %v18223_v20 = vld [vmem:[%s22543_s1 + $0xb0] sm:$0xff]  ;;  %v18250_v45 = vld [vmem:[%s22543_s1 + $0xf8] sm:$0xff] }
 0x122   :  { %3867 = vmatprep.mubr.f32.mxu0 %v22830_v59  ;;  %3938 = vmatprep.mubr.f32.mxu1 %v22830_v59  ;;  %22887 = vst [vmem:[#allocation83_spill] sm:$0xff] %v20047_v3  ;;  %v4324_v26 = vmul.f32 %v20047_v3, %v19411_v0  ;;  %v22918_v3 = vld [vmem:[#allocation17_spill] sm:$0xff] }
 0x123   :  { %22888 = vst [vmem:[#allocation84_spill] sm:$0xff] %v20050_v33 }
 0x127   :  { %18218 = vmatmul.mubr.msk.f32.vlgmr.msra.gmra.mrb[0].mxu0 %vm131_vm2, %v18217_v53  ;;  %18219 = vmatmul.mubr.msk.f32.vlgmr.msra.gmra.mrb[0].mxu1 %vm131_vm2, %v18217_v53  ;;  %v4327_v53 = vmul.f32 %v20029_v29, %v19432_v38 }
 0x128   :  { %3981 = vmatpush1.msra.mxu0 %v3971_v39  ;;  %4052 = vmatpush1.msra.mxu1 %v3973_v58  ;;  %v4480_v39 = vmul.f32 %v18929_v25, %v4479_v44  ;;  %v4326_v25 = vmul.f32 %v20050_v33, %v19436_v63  ;;  %v20082_v63 = vrot.slane %v4479_v44, %v19132_v15 }
 0x129   :  { %4156 = vmatprep.subr.mxu0 %v4148_v22  ;;  %4227 = vmatprep.subr.mxu1 %v4150_v5 }
 0x12a   :  { %4044 = vmatprep.mubr.f32.mxu0 %v22830_v59  ;;  %4115 = vmatprep.mubr.f32.mxu1 %v22830_v59  ;;  %v20055_v47 = vrot.slane %v4480_v39, %v19132_v15  ;;  %v20058_v38 = vrot.slane %v4480_v39, %v19134_v16  ;;  %v20074_v5 = vrot.slane %v4480_v39, %v19136_v17 }
 0x12b   :  { %v20077_v0 = vrot.slane %v4480_v39, %v19138_v18  ;;  %22893 = vst [vmem:[#allocation89_spill] sm:$0xff] %v20082_v63 }
 0x12c   :  { %22889 = vst [vmem:[#allocation85_spill] sm:$0xff] %v20055_v47  ;;  %22890 = vst [vmem:[#allocation86_spill] sm:$0xff] %v20058_v38  ;;  %v4503_v58 = vmul.f32 %v20055_v47, %v19484_v41  ;;  %v4505_v22 = vmul.f32 %v20058_v38, %v19476_v27  ;;  %v20085_v41 = vrot.slane %v4479_v44, %v19134_v16  ;;  %v18226_v27 = vld [vmem:[%s22543_s1 + $0xb8] sm:$0xff]  ;;  %v18247_v47 = vld [vmem:[%s22543_s1 + $0xf0] sm:$0xff] }
 0x12d   :  { %22891 = vst [vmem:[#allocation87_spill] sm:$0xff] %v20074_v5  ;;  %22892 = vst [vmem:[#allocation88_spill] sm:$0xff] %v20077_v0  ;;  %v4502_v36 = vmul.f32 %v20074_v5, %v19457_v21  ;;  %v20101_v21 = vrot.slane %v4479_v44, %v19136_v17 }
 0x12e   :  { %22894 = vst [vmem:[#allocation90_spill] sm:$0xff] %v20085_v41 }
 0x12f   :  { %18221 = vmatmul.mubr.msk.f32.vlgmr.msra.gmra.mrb[0].mxu0 %vm131_vm2, %v18220_v50  ;;  %18222 = vmatmul.mubr.msk.f32.vlgmr.msra.gmra.mrb[0].mxu1 %vm131_vm2, %v18220_v50  ;;  %v4504_v50 = vmul.f32 %v20077_v0, %v19480_v4  ;;  %22895 = vst [vmem:[#allocation91_spill] sm:$0xff] %v20101_v21  ;;  %v20104_v4 = vrot.slane %v4479_v44, %v19138_v18  ;;  %v18244_v0 = vld [vmem:[%s22543_s1 + $0xe8] sm:$0xff] }
 0x130   :  { %4157 = vmatpush1.msra.mxu0 %v4147_v61  ;;  %4228 = vmatpush1.msra.mxu1 %v4149_v34  ;;  %v4679_v61 = vmul.f32 %v20082_v63, %v19534_v56  ;;  %v4681_v34 = vmul.f32 %v20085_v41, %v19526_v37 }
 0x131   :  { %4333 = vmatprep.subr.mxu0 %v4325_v8  ;;  %4404 = vmatprep.subr.mxu1 %v4327_v53  ;;  %v4833_v8 = vmul.f32 %v18930_v1, %v4479_v44  ;;  %22896 = vst [vmem:[#allocation92_spill] sm:$0xff] %v20104_v4  ;;  %v18229_v1 = vld [vmem:[%s22543_s1 + $0xc0] sm:$0xff]  ;;  %v4678_v53 = vmul.f32 %v20101_v21, %v19502_v28 }
 0x132   :  { %4220 = vmatprep.mubr.f32.mxu0 %v22830_v59  ;;  %4291 = vmatprep.mubr.f32.mxu1 %v22830_v59  ;;  %v4680_v44 = vmul.f32 %v20104_v4, %v19530_v62  ;;  %v18232_v62 = vld [vmem:[%s22543_s1 + $0xc8] sm:$0xff] }
 0x133   :  { %v20109_v56 = vrot.slane %v4833_v8, %v19132_v15  ;;  %v20112_v37 = vrot.slane %v4833_v8, %v19134_v16  ;;  %v20128_v39 = vrot.slane %v4833_v8, %v19136_v17  ;;  %v20131_v28 = vrot.slane %v4833_v8, %v19138_v18  ;;  %v18235_v17 = vld [vmem:[%s22543_s1 + $0xd0] sm:$0xff] }
 0x135   :  { %22897 = vst [vmem:[#allocation93_spill] sm:$0xff] %v20109_v56  ;;  %22898 = vst [vmem:[#allocation94_spill] sm:$0xff] %v20112_v37  ;;  %v4856_v15 = vmul.f32 %v20109_v56, %v19580_v55  ;;  %v4858_v16 = vmul.f32 %v20112_v37, %v19572_v35  ;;  %v22901_v55 = vld [vmem:[#allocation36_spill] sm:$0xff] }
 0x136   :  { %22899 = vst [vmem:[#allocation95_spill] sm:$0xff] %v20128_v39  ;;  %22900 = vst [vmem:[#allocation96_spill] sm:$0xff] %v20131_v28  ;;  %v4855_v35 = vmul.f32 %v20128_v39, %v22901_v55 }
 0x137   :  { %18224 = vmatmul.mubr.msk.f32.vlgmr.msra.gmra.mrb[0].mxu0 %vm131_vm2, %v18223_v20  ;;  %18225 = vmatmul.mubr.msk.f32.vlgmr.msra.gmra.mrb[0].mxu1 %vm131_vm2, %v18223_v20  ;;  %v22902_v20 = vld [vmem:[#allocation40_spill] sm:$0xff] }
 0x138   :  { %4334 = vmatpush1.msra.mxu0 %v4324_v26  ;;  %4405 = vmatpush1.msra.mxu1 %v4326_v25  ;;  %v4857_v26 = vmul.f32 %v20131_v28, %v22902_v20  ;;  %v22903_v20 = vld [vmem:[#allocation4_spill] sm:$0xff] }
 0x139   :  { %4511 = vmatprep.subr.mxu0 %v4503_v58  ;;  %4582 = vmatprep.subr.mxu1 %v4505_v22  ;;  %v18319_v22 = vld [vmem:[%s22541_s0 + $0x10] sm:$0xff] }
 0x13a   :  { %4397 = vmatprep.mubr.f32.mxu0 %v22830_v59  ;;  %4468 = vmatprep.mubr.f32.mxu1 %v22830_v59  ;;  %9418 = vst [vmem:[#allocation2] sm:$0xf] %v18319_v22 }
 0x13f   :  { %18227 = vmatmul.mubr.msk.f32.vlgmr.msra.gmra.mrb[0].mxu0 %vm131_vm2, %v18226_v27  ;;  %18228 = vmatmul.mubr.msk.f32.vlgmr.msra.gmra.mrb[0].mxu1 %vm131_vm2, %v18226_v27 }
 0x140   :  { %4512 = vmatpush1.msra.mxu0 %v4502_v36  ;;  %4583 = vmatpush1.msra.mxu1 %v4504_v50 }
 0x141   :  { %4687 = vmatprep.subr.mxu0 %v4679_v61  ;;  %4758 = vmatprep.subr.mxu1 %v4681_v34  ;;  %v18320_v34 = vld [vmem:[%s22541_s0 + $0x18] sm:$0xff] }
 0x142   :  { %4575 = vmatprep.mubr.f32.mxu0 %v22830_v59  ;;  %4646 = vmatprep.mubr.f32.mxu1 %v22830_v59  ;;  %9420 = vst [vmem:[#allocation2 + $0x10] sm:$0xf] %v18320_v34 }
 0x147   :  { %18230 = vmatmul.mubr.msk.f32.vlgmr.msra.gmra.mrb[0].mxu0 %vm131_vm2, %v18229_v1  ;;  %18231 = vmatmul.mubr.msk.f32.vlgmr.msra.gmra.mrb[0].mxu1 %vm131_vm2, %v18229_v1  ;;  %v9414_v1 = vcombine.high %v18319_v22, %v18319_v22 }
 0x148   :  { %4688 = vmatpush1.msra.mxu0 %v4678_v53  ;;  %4759 = vmatpush1.msra.mxu1 %v4680_v44  ;;  %v9415_v44 = vcombine.high %v18320_v34, %v18320_v34  ;;  %v22905_v34 = vld [vmem:[#allocation3_spill] sm:$0xff] }
 0x149   :  { %4864 = vmatprep.subr.mxu0 %v4856_v15  ;;  %4935 = vmatprep.subr.mxu1 %v4858_v16  ;;  %9419 = vst [vmem:[#allocation2 + $0x8] sm:$0xf] %v9414_v1 }
 0x14a   :  { %4751 = vmatprep.mubr.f32.mxu0 %v22830_v59  ;;  %4822 = vmatprep.mubr.f32.mxu1 %v22830_v59  ;;  %9421 = vst [vmem:[#allocation2 + $0x18] sm:$0xf] %v9415_v44  ;;  %v18239_v44 = vld [vmem:[%s22543_s1 + $0xe0] sm:$0xff] }
 0x14f   :  { %18233 = vmatmul.mubr.msk.f32.vlgmr.msra.gmra.mrb[0].mxu0 %vm131_vm2, %v18232_v62  ;;  %18234 = vmatmul.mubr.msk.f32.vlgmr.msra.gmra.mrb[0].mxu1 %vm131_vm2, %v18232_v62 }
 0x150   :  { %4865 = vmatpush1.msra.mxu0 %v4855_v35  ;;  %4936 = vmatpush1.msra.mxu1 %v4857_v26 }
 0x151   :  { %4928 = vmatprep.mubr.f32.mxu0 %v22830_v59  ;;  %4999 = vmatprep.mubr.f32.mxu1 %v22830_v59  ;;  %v20406_v63 = vld [vmem:[#allocation2 + $0x18] sm:$0xff] }
 0x157   :  { %18236 = vmatmul.mubr.msk.f32.vlgmr.msra.gmra.mrb[0].mxu0 %vm131_vm2, %v18235_v17  ;;  %18237 = vmatmul.mubr.msk.f32.vlgmr.msra.gmra.mrb[0].mxu1 %vm131_vm2, %v18235_v17 }
 0x158   :  { %5123 = vmatprep.mubr.f32.mxu0 %v22830_v59  ;;  %5194 = vmatprep.mubr.f32.mxu1 %v22830_v59 }
 0x159   :  { %v5014_v18 = vpop.permute.xlu0 %5013 }
 0x22a   :  { %v4930_v25 = vpop.f32.mrb[0].mxu0  ;;  %v5001_v58 = vpop.f32.mrb[0].mxu1 }
 0x22b   :  { %v20156_v27 = vadd.f32 %v5014_v18, %v4930_v25  ;;  %v20158_v36 = vadd.f32 %v5014_v18, %v5001_v58  ;;  %v4932_v50 = vpop.f32.mrb[1].mxu0  ;;  %v5003_v61 = vpop.f32.mrb[1].mxu1 }
 0x22c   :  { %v20167_v8 = vadd.f32 %v5014_v18, %v4932_v50  ;;  %v20173_v53 = vadd.f32 %v5014_v18, %v5003_v61  ;;  %v22904_v50 = vld [vmem:[#allocation5_spill] sm:$0xff] }
 0x22d   :  { %5042 = vrot.lane.b32.xlu0 %v20158_v36, %s18938_s19  ;;  %5038 = vrot.lane.b32.xlu1 %v20156_v27, %s18938_s19 }
 0x231   :  { %5020 = vrot.lane.b32.xlu0 %v20156_v27, %s18939_s20  ;;  %5040 = vrot.lane.b32.xlu1 %v20167_v8, %s18938_s19 }
 0x235   :  { %5024 = vrot.lane.b32.xlu0 %v20158_v36, %s18939_s20  ;;  %5044 = vrot.lane.b32.xlu1 %v20173_v53, %s18938_s19 }
 0x239   :  { %5346 = vrot.lane.b32.xlu0 %v20156_v27, %s18940_s21  ;;  %5022 = vrot.lane.b32.xlu1 %v20167_v8, %s18939_s20 }
 0x23d   :  { %5350 = vrot.lane.b32.xlu0 %v20158_v36, %s18940_s21  ;;  %5026 = vrot.lane.b32.xlu1 %v20173_v53, %s18939_s20 }
 0x241   :  { %5513 = vrot.lane.b32.xlu0 %v20156_v27, %s18941_s22  ;;  %5348 = vrot.lane.b32.xlu1 %v20167_v8, %s18940_s21 }
 0x245   :  { %5517 = vrot.lane.b32.xlu0 %v20158_v36, %s18941_s22  ;;  %5352 = vrot.lane.b32.xlu1 %v20173_v53, %s18940_s21 }
 0x249   :  { %5680 = vrot.lane.b32.xlu0 %v20156_v27, %s18942_s23  ;;  %5515 = vrot.lane.b32.xlu1 %v20167_v8, %s18941_s22 }
 0x24d   :  { %5684 = vrot.lane.b32.xlu0 %v20158_v36, %s18942_s23  ;;  %5519 = vrot.lane.b32.xlu1 %v20173_v53, %s18941_s22 }
 0x251   :  { %5847 = vrot.lane.b32.xlu0 %v20156_v27, %s18943_s24  ;;  %5682 = vrot.lane.b32.xlu1 %v20167_v8, %s18942_s23 }
 0x255   :  { %5851 = vrot.lane.b32.xlu0 %v20158_v36, %s18943_s24  ;;  %5686 = vrot.lane.b32.xlu1 %v20173_v53, %s18942_s23 }
 0x259   :  { %6014 = vrot.lane.b32.xlu0 %v20156_v27, %s18944_s25  ;;  %5849 = vrot.lane.b32.xlu1 %v20167_v8, %s18943_s24 }
 0x25d   :  { %6018 = vrot.lane.b32.xlu0 %v20158_v36, %s18944_s25  ;;  %5853 = vrot.lane.b32.xlu1 %v20173_v53, %s18943_s24 }
 0x261   :  { %6181 = vrot.lane.b32.xlu0 %v20156_v27, %s18945_s26  ;;  %6016 = vrot.lane.b32.xlu1 %v20167_v8, %s18944_s25 }
 0x265   :  { %6185 = vrot.lane.b32.xlu0 %v20158_v36, %s18945_s26  ;;  %6020 = vrot.lane.b32.xlu1 %v20173_v53, %s18944_s25 }
 0x269   :  { %6348 = vrot.lane.b32.xlu0 %v20156_v27, %s18946_s27  ;;  %6183 = vrot.lane.b32.xlu1 %v20167_v8, %s18945_s26 }
 0x26d   :  { %6352 = vrot.lane.b32.xlu0 %v20158_v36, %s18946_s27  ;;  %6187 = vrot.lane.b32.xlu1 %v20173_v53, %s18945_s26 }
 0x271   :  { %6515 = vrot.lane.b32.xlu0 %v20156_v27, %s18947_s28  ;;  %6350 = vrot.lane.b32.xlu1 %v20167_v8, %s18946_s27 }
 0x275   :  { %6519 = vrot.lane.b32.xlu0 %v20158_v36, %s18947_s28  ;;  %6354 = vrot.lane.b32.xlu1 %v20173_v53, %s18946_s27 }
 0x279   :  { %6682 = vrot.lane.b32.xlu0 %v20156_v27, %s18948_s29  ;;  %6517 = vrot.lane.b32.xlu1 %v20167_v8, %s18947_s28 }
 0x27d   :  { %6686 = vrot.lane.b32.xlu0 %v20158_v36, %s18948_s29  ;;  %6521 = vrot.lane.b32.xlu1 %v20173_v53, %s18947_s28 }
 0x281   :  { %6849 = vrot.lane.b32.xlu0 %v20156_v27, %s18949_s30  ;;  %6684 = vrot.lane.b32.xlu1 %v20167_v8, %s18948_s29 }
 0x285   :  { %6853 = vrot.lane.b32.xlu0 %v20158_v36, %s18949_s30  ;;  %6688 = vrot.lane.b32.xlu1 %v20173_v53, %s18948_s29 }
 0x289   :  { %7016 = vrot.lane.b32.xlu0 %v20156_v27, %s18950_s5  ;;  %6851 = vrot.lane.b32.xlu1 %v20167_v8, %s18949_s30 }
 0x28d   :  { %7020 = vrot.lane.b32.xlu0 %v20158_v36, %s18950_s5  ;;  %6855 = vrot.lane.b32.xlu1 %v20173_v53, %s18949_s30 }
 0x291   :  { %7334 = vrot.lane.b32.xlu0 %v20156_v27, %s18951_s6  ;;  %7018 = vrot.lane.b32.xlu1 %v20167_v8, %s18950_s5 }
 0x295   :  { %7338 = vrot.lane.b32.xlu0 %v20158_v36, %s18951_s6  ;;  %7022 = vrot.lane.b32.xlu1 %v20173_v53, %s18950_s5 }
 0x299   :  { %7501 = vrot.lane.b32.xlu0 %v20156_v27, %s18952_s11  ;;  %7336 = vrot.lane.b32.xlu1 %v20167_v8, %s18951_s6 }
 0x29d   :  { %7505 = vrot.lane.b32.xlu0 %v20158_v36, %s18952_s11  ;;  %7340 = vrot.lane.b32.xlu1 %v20173_v53, %s18951_s6 }
 0x29f   :  { %v5043_v15 = vpop.permute.xlu0 %5042  ;;  %v5039_v16 = vpop.permute.xlu1 %5038 }
 0x2a1   :  { %7668 = vrot.lane.b32.xlu0 %v20156_v27, %s18953_s14  ;;  %7503 = vrot.lane.b32.xlu1 %v20167_v8, %s18952_s11 }
 0x2a3   :  { %v5021_v62 = vpop.permute.xlu0 %5020  ;;  %v5041_v55 = vpop.permute.xlu1 %5040 }
 0x2a4   :  { %v20289_v35 = vsel %vm99_vm0, %v5039_v16, %v5041_v55  ;;  %v20299_v17 = vsel %vm99_vm0, %v5041_v55, %v5043_v15 }
 0x2a5   :  { %7672 = vrot.lane.b32.xlu0 %v20158_v36, %s18953_s14  ;;  %7507 = vrot.lane.b32.xlu1 %v20173_v53, %s18952_s11  ;;  %v5051_v26 = vmul.f32 %v20289_v35, %v22903_v20  ;;  %v22910_v20 = vld [vmem:[#allocation9_spill] sm:$0xff] }
 0x2a7   :  { %v5025_v18 = vpop.permute.xlu0 %5024  ;;  %5059 = vmatprep.subr.mxu0 %v5051_v26  ;;  %v5045_v25 = vpop.permute.xlu1 %5044 }
 0x2a8   :  { %v20303_v58 = vsel %vm99_vm0, %v5043_v15, %v5045_v25  ;;  %v20307_v22 = vsel %vm99_vm0, %v5045_v25, %v5039_v16  ;;  %v22906_v15 = vld [vmem:[#allocation6_spill] sm:$0xff] }
 0x2a9   :  { %v5050_v61 = vmul.f32 %v20307_v22, %v22904_v50  ;;  %7835 = vrot.lane.b32.xlu0 %v20156_v27, %s18954_s7  ;;  %7670 = vrot.lane.b32.xlu1 %v20167_v8, %s18953_s14  ;;  %v5053_v1 = vmul.f32 %v20303_v58, %v22905_v34  ;;  %v5052_v16 = vmul.f32 %v20299_v17, %v22906_v15  ;;  %v22907_v50 = vld [vmem:[#allocation7_spill] sm:$0xff] }
 0x2ab   :  { %v5347_v55 = vpop.permute.xlu0 %5346  ;;  %5060 = vmatpush1.msra.mxu0 %v5050_v61  ;;  %5130 = vmatprep.subr.mxu1 %v5053_v1  ;;  %v5023_v26 = vpop.permute.xlu1 %5022  ;;  %v20334_v61 = vld [vmem:[#allocation2] sm:$0xff] }
 0x2ac   :  { %v20324_v25 = vsel %vm58_vm1, %v5021_v62, %v5023_v26  ;;  %18240 = vmatmul.mubr.msk.f32.vlgmr.msra.gmra.mrb[2].mxu0 %vm131_vm2, %v18239_v44  ;;  %5131 = vmatpush1.msra.mxu1 %v5052_v16  ;;  %v20339_v1 = vsel %vm58_vm1, %v5023_v26, %v5025_v18 }
 0x2ad   :  { %7839 = vrot.lane.b32.xlu0 %v20158_v36, %s18954_s7  ;;  %7674 = vrot.lane.b32.xlu1 %v20173_v53, %s18953_s14  ;;  %v5033_v15 = vmul.f32 %v20324_v25, %v22907_v50  ;;  %v22908_v50 = vld [vmem:[#allocation8_spill] sm:$0xff] }
 0x2ae   :  { %18241 = vmatmul.mubr.msk.f32.vlgmr.msra.gmra.mrb[2].mxu1 %vm131_vm2, %v18239_v44  ;;  %5268 = vmatprep.mubr.f32.mxu0 %v22830_v59 }
 0x2af   :  { %v5351_v16 = vpop.permute.xlu0 %5350  ;;  %5204 = vmatprep.subr.mxu0 %v5033_v15  ;;  %v5027_v28 = vpop.permute.xlu1 %5026  ;;  %5339 = vmatprep.mubr.f32.mxu1 %v22830_v59  ;;  %v22909_v15 = vld [vmem:[#allocation10_spill] sm:$0xff] }
 0x2b0   :  { %v20344_v34 = vsel %vm58_vm1, %v5025_v18, %v5027_v28  ;;  %v20348_v44 = vsel %vm58_vm1, %v5027_v28, %v5021_v62  ;;  %v18238_v18 = vld [vmem:[%s22543_s1 + $0xd8] sm:$0xff]  ;;  %v5034_v28 = vmul.f32 %v20339_v1, %v22910_v20  ;;  %v20363_v62 = vld [vmem:[#allocation2 + $0x10] sm:$0xff]  ;;  %v22911_v20 = vld [vmem:[#allocation11_spill] sm:$0xff] }
 0x2b1   :  { %v5032_v39 = vmul.f32 %v20348_v44, %v22908_v50  ;;  %9443 = vrot.lane.b32.xlu0 %v20334_v61, %s18938_s19  ;;  %7837 = vrot.lane.b32.xlu1 %v20167_v8, %s18954_s7  ;;  %v5035_v26 = vmul.f32 %v20344_v34, %v22909_v15 }
 0x2b3   :  { %v5514_v37 = vpop.permute.xlu0 %5513  ;;  %5205 = vmatpush1.msra.mxu0 %v5032_v39  ;;  %5275 = vmatprep.subr.mxu1 %v5035_v26  ;;  %v5349_v50 = vpop.permute.xlu1 %5348  ;;  %v20378_v39 = vld [vmem:[#allocation2 + $0x8] sm:$0xff] }
 0x2b4   :  { %v20367_v4 = vsel %vm430_vm3, %v5347_v55, %v5349_v50  ;;  %18242 = vmatmul.mubr.msk.f32.vlgmr.msra.gmra.mrb[2].mxu0 %vm131_vm2, %v18238_v18  ;;  %5276 = vmatpush1.msra.mxu1 %v5034_v28  ;;  %v20382_v26 = vsel %vm430_vm3, %v5349_v50, %v5351_v16  ;;  %v22913_v50 = vld [vmem:[#allocation14_spill] sm:$0xff] }
 0x2b5   :  { %9447 = vrot.lane.b32.xlu0 %v20363_v62, %s18938_s19  ;;  %7841 = vrot.lane.b32.xlu1 %v20173_v53, %s18954_s7  ;;  %v5359_v15 = vmul.f32 %v20367_v4, %v22911_v20  ;;  %v22912_v20 = vld [vmem:[#allocation12_spill] sm:$0xff] }
 0x2b6   :  { %18243 = vmatmul.mubr.msk.f32.vlgmr.msra.gmra.mrb[2].mxu1 %vm131_vm2, %v18238_v18  ;;  %5431 = vmatprep.mubr.f32.mxu0 %v22830_v59 }
 0x2b7   :  { %v5518_v28 = vpop.permute.xlu0 %5517  ;;  %5367 = vmatprep.subr.mxu0 %v5359_v15  ;;  %v5353_v56 = vpop.permute.xlu1 %5352  ;;  %5502 = vmatprep.mubr.f32.mxu1 %v22830_v59 }
 0x2b8   :  { %v20387_v21 = vsel %vm430_vm3, %v5351_v16, %v5353_v56  ;;  %v20391_v18 = vsel %vm430_vm3, %v5353_v56, %v5347_v55  ;;  %v22914_v16 = vld [vmem:[#allocation13_spill] sm:$0xff] }
 0x2b9   :  { %v5358_v41 = vmul.f32 %v20391_v18, %v22912_v20  ;;  %9426 = vrot.lane.b32.xlu0 %v20334_v61, %s18939_s20  ;;  %v5361_v15 = vmul.f32 %v20387_v21, %v22913_v50  ;;  %9445 = vrot.lane.b32.xlu1 %v20378_v39, %s18938_s19  ;;  %v5360_v56 = vmul.f32 %v20382_v26, %v22914_v16  ;;  %v22915_v50 = vld [vmem:[#allocation15_spill] sm:$0xff] }
 0x2bb   :  { %v5681_v55 = vpop.permute.xlu0 %5680  ;;  %5368 = vmatpush1.msra.mxu0 %v5358_v41  ;;  %5438 = vmatprep.subr.mxu1 %v5361_v15  ;;  %v5516_v20 = vpop.permute.xlu1 %5515 }
 0x2bc   :  { %v20410_v5 = vsel %vm620_vm4, %v5514_v37, %v5516_v20  ;;  %18245 = vmatmul.mubr.msk.f32.vlgmr.msra.gmra.mrb[2].mxu0 %vm131_vm2, %v18244_v0  ;;  %5439 = vmatpush1.msra.mxu1 %v5360_v56  ;;  %v20423_v41 = vsel %vm620_vm4, %v5516_v20, %v5518_v28  ;;  %v22917_v20 = vld [vmem:[#allocation18_spill] sm:$0xff] }
 0x2bd   :  { %9430 = vrot.lane.b32.xlu0 %v20363_v62, %s18939_s20  ;;  %v5526_v38 = vmul.f32 %v20410_v5, %v22915_v50  ;;  %5598 = vmatprep.mubr.f32.mxu0 %v22830_v59 }
 0x2be   :  { %18246 = vmatmul.mubr.msk.f32.vlgmr.msra.gmra.mrb[2].mxu1 %vm131_vm2, %v18244_v0  ;;  %9449 = vrot.lane.b32.xlu1 %v20406_v63, %s18938_s19  ;;  %v22916_v0 = vld [vmem:[#allocation16_spill] sm:$0xff] }
 0x2bf   :  { %v5685_v15 = vpop.permute.xlu0 %5684  ;;  %5534 = vmatprep.subr.mxu0 %v5526_v38  ;;  %v5520_v56 = vpop.permute.xlu1 %5519  ;;  %5669 = vmatprep.mubr.f32.mxu1 %v22830_v59 }
 0x2c0   :  { %v20428_v16 = vsel %vm620_vm4, %v5518_v28, %v5520_v56  ;;  %v20432_v50 = vsel %vm620_vm4, %v5520_v56, %v5514_v37  ;;  %v5527_v28 = vmul.f32 %v20423_v41, %v22918_v3 }
 0x2c1   :  { %v5525_v33 = vmul.f32 %v20432_v50, %v22916_v0  ;;  %9750 = vrot.lane.b32.xlu0 %v20334_v61, %s18940_s21  ;;  %v5528_v38 = vmul.f32 %v20428_v16, %v22917_v20  ;;  %v22920_v20 = vld [vmem:[#allocation19_spill] sm:$0xff] }
 0x2c2   :  { %9428 = vrot.lane.b32.xlu1 %v20378_v39, %s18939_s20 }
 0x2c3   :  { %v5848_v37 = vpop.permute.xlu0 %5847  ;;  %5535 = vmatpush1.msra.mxu0 %v5525_v33  ;;  %5605 = vmatprep.subr.mxu1 %v5528_v38  ;;  %v5683_v56 = vpop.permute.xlu1 %5682 }
 0x2c4   :  { %v20449_v0 = vsel %vm810_vm5, %v5681_v55, %v5683_v56  ;;  %18248 = vmatmul.mubr.msk.f32.vlgmr.msra.gmra.mrb[2].mxu0 %vm131_vm2, %v18247_v47  ;;  %5606 = vmatpush1.msra.mxu1 %v5527_v28  ;;  %v20462_v33 = vsel %vm810_vm5, %v5683_v56, %v5685_v15  ;;  %v22924_v56 = vld [vmem:[#allocation22_spill] sm:$0xff] }
 0x2c5   :  { %22919 = vst [vmem:[#allocation36_spill] sm:$0xff] %v20449_v0  ;;  %9754 = vrot.lane.b32.xlu0 %v20363_v62, %s18940_s21  ;;  %v5693_v3 = vmul.f32 %v20449_v0, %v22920_v20  ;;  %5765 = vmatprep.mubr.f32.mxu0 %v22830_v59  ;;  %v22925_v0 = vld [vmem:[#allocation21_spill] sm:$0xff] }
 0x2c6   :  { %18249 = vmatmul.mubr.msk.f32.vlgmr.msra.gmra.mrb[2].mxu1 %vm131_vm2, %v18247_v47  ;;  %9432 = vrot.lane.b32.xlu1 %v20406_v63, %s18939_s20  ;;  %v22923_v47 = vld [vmem:[#allocation20_spill] sm:$0xff] }
 0x2c7   :  { %v5852_v38 = vpop.permute.xlu0 %5851  ;;  %5701 = vmatprep.subr.mxu0 %v5693_v3  ;;  %v5687_v28 = vpop.permute.xlu1 %5686  ;;  %5836 = vmatprep.mubr.f32.mxu1 %v22830_v59 }
 0x2c8   :  { %v20467_v29 = vsel %vm810_vm5, %v5685_v15, %v5687_v28  ;;  %v20471_v20 = vsel %vm810_vm5, %v5687_v28, %v5681_v55  ;;  %v5694_v15 = vmul.f32 %v20462_v33, %v22925_v0 }
 0x2c9   :  { %22921 = vst [vmem:[#allocation40_spill] sm:$0xff] %v20467_v29  ;;  %22922 = vst [vmem:[#allocation97_spill] sm:$0xff] %v20471_v20  ;;  %v5692_v54 = vmul.f32 %v20471_v20, %v22923_v47  ;;  %9916 = vrot.lane.b32.xlu0 %v20334_v61, %s18941_s22  ;;  %v5695_v3 = vmul.f32 %v20467_v29, %v22924_v56  ;;  %v22927_v56 = vld [vmem:[#allocation23_spill] sm:$0xff]  ;;  %v22933_v20 = vld [vmem:[#allocation25_spill] sm:$0xff] }
 0x2ca   :  { %9752 = vrot.lane.b32.xlu1 %v20378_v39, %s18940_s21 }
 0x2cb   :  { %v6015_v55 = vpop.permute.xlu0 %6014  ;;  %5702 = vmatpush1.msra.mxu0 %v5692_v54  ;;  %5772 = vmatprep.subr.mxu1 %v5695_v3  ;;  %v5850_v28 = vpop.permute.xlu1 %5849 }
 0x2cc   :  { %v20488_v47 = vsel %vm999_vm6, %v5848_v37, %v5850_v28  ;;  %18251 = vmatmul.mubr.msk.f32.vlgmr.msra.gmra.mrb[2].mxu0 %vm131_vm2, %v18250_v45  ;;  %5773 = vmatpush1.msra.mxu1 %v5694_v15  ;;  %v20501_v54 = vsel %vm999_vm6, %v5850_v28, %v5852_v38  ;;  %v22932_v28 = vld [vmem:[#allocation26_spill] sm:$0xff] }
 0x2cd   :  { %22926 = vst [vmem:[#allocation98_spill] sm:$0xff] %v20488_v47  ;;  %9920 = vrot.lane.b32.xlu0 %v20363_v62, %s18941_s22  ;;  %v5860_v0 = vmul.f32 %v20488_v47, %v22927_v56  ;;  %5932 = vmatprep.mubr.f32.mxu0 %v22830_v59  ;;  %22928 = vst [vmem:[#allocation99_spill] sm:$0xff] %v20501_v54 }
 0x2ce   :  { %18252 = vmatmul.mubr.msk.f32.vlgmr.msra.gmra.mrb[2].mxu1 %vm131_vm2, %v18250_v45  ;;  %9756 = vrot.lane.b32.xlu1 %v20406_v63, %s18940_s21  ;;  %v22931_v45 = vld [vmem:[#allocation24_spill] sm:$0xff] }
 0x2cf   :  { %v6019_v3 = vpop.permute.xlu0 %6018  ;;  %5868 = vmatprep.subr.mxu0 %v5860_v0  ;;  %v5854_v15 = vpop.permute.xlu1 %5853  ;;  %6003 = vmatprep.mubr.f32.mxu1 %v22830_v59 }
 0x2d0   :  { %v20506_v29 = vsel %vm999_vm6, %v5852_v38, %v5854_v15  ;;  %v20510_v56 = vsel %vm999_vm6, %v5854_v15, %v5848_v37  ;;  %v5861_v38 = vmul.f32 %v20501_v54, %v22933_v20  ;;  %v22941_v54 = vld [vmem:[#allocation29_spill] sm:$0xff] }
 0x2d1   :  { %22929 = vst [vmem:[#allocation100_spill] sm:$0xff] %v20506_v29  ;;  %22930 = vst [vmem:[#allocation101_spill] sm:$0xff] %v20510_v56  ;;  %v5859_v47 = vmul.f32 %v20510_v56, %v22931_v45  ;;  %10082 = vrot.lane.b32.xlu0 %v20334_v61, %s18942_s23  ;;  %v5862_v0 = vmul.f32 %v20506_v29, %v22932_v28  ;;  %v22935_v28 = vld [vmem:[#allocation27_spill] sm:$0xff]  ;;  %v18256_v56 = vld [vmem:[%s22543_s1 + $0x108] sm:$0xff] }
 0x2d2   :  { %9918 = vrot.lane.b32.xlu1 %v20378_v39, %s18941_s22 }
 0x2d3   :  { %v6182_v37 = vpop.permute.xlu0 %6181  ;;  %5869 = vmatpush1.msra.mxu0 %v5859_v47  ;;  %5939 = vmatprep.subr.mxu1 %v5862_v0  ;;  %v6017_v15 = vpop.permute.xlu1 %6016 }
 0x2d4   :  { %v20527_v45 = vsel %vm1189_vm7, %v6015_v55, %v6017_v15  ;;  %18254 = vmatmul.mubr.msk.f32.vlgmr.msra.gmra.mrb[2].mxu0 %vm131_vm2, %v18253_v49  ;;  %5940 = vmatpush1.msra.mxu1 %v5861_v38  ;;  %v20540_v47 = vsel %vm1189_vm7, %v6017_v15, %v6019_v3  ;;  %v22940_v15 = vld [vmem:[#allocation30_spill] sm:$0xff] }
 0x2d5   :  { %22934 = vst [vmem:[#allocation102_spill] sm:$0xff] %v20527_v45  ;;  %10086 = vrot.lane.b32.xlu0 %v20363_v62, %s18942_s23  ;;  %v6027_v20 = vmul.f32 %v20527_v45, %v22935_v28  ;;  %6099 = vmatprep.mubr.f32.mxu0 %v22830_v59  ;;  %22936 = vst [vmem:[#allocation103_spill] sm:$0xff] %v20540_v47 }
 0x2d6   :  { %18255 = vmatmul.mubr.msk.f32.vlgmr.msra.gmra.mrb[2].mxu1 %vm131_vm2, %v18253_v49  ;;  %9922 = vrot.lane.b32.xlu1 %v20406_v63, %s18941_s22  ;;  %v22939_v49 = vld [vmem:[#allocation28_spill] sm:$0xff] }
 0x2d7   :  { %v6186_v0 = vpop.permute.xlu0 %6185  ;;  %6035 = vmatprep.subr.mxu0 %v6027_v20  ;;  %v6021_v38 = vpop.permute.xlu1 %6020  ;;  %6170 = vmatprep.mubr.f32.mxu1 %v22830_v59 }
 0x2d8   :  { %v20545_v29 = vsel %vm1189_vm7, %v6019_v3, %v6021_v38  ;;  %v20549_v28 = vsel %vm1189_vm7, %v6021_v38, %v6015_v55  ;;  %v6028_v3 = vmul.f32 %v20540_v47, %v22941_v54  ;;  %v22949_v47 = vld [vmem:[#allocation33_spill] sm:$0xff] }
 0x2d9   :  { %22937 = vst [vmem:[#allocation104_spill] sm:$0xff] %v20545_v29  ;;  %22938 = vst [vmem:[#allocation105_spill] sm:$0xff] %v20549_v28  ;;  %v6026_v45 = vmul.f32 %v20549_v28, %v22939_v49  ;;  %10248 = vrot.lane.b32.xlu0 %v20334_v61, %s18943_s24  ;;  %v6029_v20 = vmul.f32 %v20545_v29, %v22940_v15  ;;  %v22943_v15 = vld [vmem:[#allocation31_spill] sm:$0xff]  ;;  %v18259_v28 = vld [vmem:[%s22543_s1 + $0x110] sm:$0xff] }
 0x2da   :  { %10084 = vrot.lane.b32.xlu1 %v20378_v39, %s18942_s23 }
 0x2db   :  { %v6349_v55 = vpop.permute.xlu0 %6348  ;;  %6036 = vmatpush1.msra.mxu0 %v6026_v45  ;;  %6106 = vmatprep.subr.mxu1 %v6029_v20  ;;  %v6184_v38 = vpop.permute.xlu1 %6183 }
 0x2dc   :  { %v20566_v49 = vsel %vm1380_vm8, %v6182_v37, %v6184_v38  ;;  %18257 = vmatmul.mubr.msk.f32.vlgmr.msra.gmra.mrb[2].mxu0 %vm131_vm2, %v18256_v56  ;;  %6107 = vmatpush1.msra.mxu1 %v6028_v3  ;;  %v20579_v45 = vsel %vm1380_vm8, %v6184_v38, %v6186_v0  ;;  %v22948_v38 = vld [vmem:[#allocation34_spill] sm:$0xff] }
 0x2dd   :  { %22942 = vst [vmem:[#allocation106_spill] sm:$0xff] %v20566_v49  ;;  %10252 = vrot.lane.b32.xlu0 %v20363_v62, %s18943_s24  ;;  %v6194_v54 = vmul.f32 %v20566_v49, %v22943_v15  ;;  %6266 = vmatprep.mubr.f32.mxu0 %v22830_v59  ;;  %22944 = vst [vmem:[#allocation107_spill] sm:$0xff] %v20579_v45 }
 0x2de   :  { %18258 = vmatmul.mubr.msk.f32.vlgmr.msra.gmra.mrb[2].mxu1 %vm131_vm2, %v18256_v56  ;;  %10088 = vrot.lane.b32.xlu1 %v20406_v63, %s18942_s23  ;;  %v22947_v56 = vld [vmem:[#allocation32_spill] sm:$0xff] }
 0x2df   :  { %v6353_v20 = vpop.permute.xlu0 %6352  ;;  %6202 = vmatprep.subr.mxu0 %v6194_v54  ;;  %v6188_v3 = vpop.permute.xlu1 %6187  ;;  %6337 = vmatprep.mubr.f32.mxu1 %v22830_v59 }
 0x2e0   :  { %v20584_v29 = vsel %vm1380_vm8, %v6186_v0, %v6188_v3  ;;  %v20588_v15 = vsel %vm1380_vm8, %v6188_v3, %v6182_v37  ;;  %v6195_v0 = vmul.f32 %v20579_v45, %v22949_v47  ;;  %v22957_v45 = vld [vmem:[#allocation38_spill] sm:$0xff] }
 0x2e1   :  { %22945 = vst [vmem:[#allocation108_spill] sm:$0xff] %v20584_v29  ;;  %22946 = vst [vmem:[#allocation109_spill] sm:$0xff] %v20588_v15  ;;  %v6193_v49 = vmul.f32 %v20588_v15, %v22947_v56  ;;  %10414 = vrot.lane.b32.xlu0 %v20334_v61, %s18944_s25  ;;  %v6196_v54 = vmul.f32 %v20584_v29, %v22948_v38  ;;  %v22951_v38 = vld [vmem:[#allocation35_spill] sm:$0xff]  ;;  %v18262_v15 = vld [vmem:[%s22543_s1 + $0x118] sm:$0xff] }
 0x2e2   :  { %10250 = vrot.lane.b32.xlu1 %v20378_v39, %s18943_s24 }
 0x2e3   :  { %v6516_v37 = vpop.permute.xlu0 %6515  ;;  %6203 = vmatpush1.msra.mxu0 %v6193_v49  ;;  %6273 = vmatprep.subr.mxu1 %v6196_v54  ;;  %v6351_v3 = vpop.permute.xlu1 %6350 }
 0x2e4   :  { %v20605_v56 = vsel %vm1569_vm9, %v6349_v55, %v6351_v3  ;;  %18260 = vmatmul.mubr.msk.f32.vlgmr.msra.gmra.mrb[2].mxu0 %vm131_vm2, %v18259_v28  ;;  %6274 = vmatpush1.msra.mxu1 %v6195_v0  ;;  %v20618_v49 = vsel %vm1569_vm9, %v6351_v3, %v6353_v20  ;;  %v22956_v3 = vld [vmem:[#allocation39_spill] sm:$0xff] }
 0x2e5   :  { %22950 = vst [vmem:[#allocation110_spill] sm:$0xff] %v20605_v56  ;;  %10418 = vrot.lane.b32.xlu0 %v20363_v62, %s18944_s25  ;;  %v6361_v47 = vmul.f32 %v20605_v56, %v22951_v38  ;;  %6433 = vmatprep.mubr.f32.mxu0 %v22830_v59  ;;  %22952 = vst [vmem:[#allocation111_spill] sm:$0xff] %v20618_v49 }
 0x2e6   :  { %18261 = vmatmul.mubr.msk.f32.vlgmr.msra.gmra.mrb[2].mxu1 %vm131_vm2, %v18259_v28  ;;  %10254 = vrot.lane.b32.xlu1 %v20406_v63, %s18943_s24  ;;  %v22955_v28 = vld [vmem:[#allocation37_spill] sm:$0xff] }
 0x2e7   :  { %v6520_v54 = vpop.permute.xlu0 %6519  ;;  %6369 = vmatprep.subr.mxu0 %v6361_v47  ;;  %v6355_v0 = vpop.permute.xlu1 %6354  ;;  %6504 = vmatprep.mubr.f32.mxu1 %v22830_v59 }
 0x2e8   :  { %v20623_v29 = vsel %vm1569_vm9, %v6353_v20, %v6355_v0  ;;  %v20627_v38 = vsel %vm1569_vm9, %v6355_v0, %v6349_v55  ;;  %v6362_v20 = vmul.f32 %v20618_v49, %v22957_v45 }
 0x2e9   :  { %22953 = vst [vmem:[#allocation112_spill] sm:$0xff] %v20623_v29  ;;  %22954 = vst [vmem:[#allocation113_spill] sm:$0xff] %v20627_v38  ;;  %v6360_v56 = vmul.f32 %v20627_v38, %v22955_v28  ;;  %10580 = vrot.lane.b32.xlu0 %v20334_v61, %s18945_s26  ;;  %v6363_v47 = vmul.f32 %v20623_v29, %v22956_v3  ;;  %v22958_v3 = vld [vmem:[#allocation41_spill] sm:$0xff] }
 0x2ea   :  { %10416 = vrot.lane.b32.xlu1 %v20378_v39, %s18944_s25 }
 0x2eb   :  { %v6683_v55 = vpop.permute.xlu0 %6682  ;;  %6370 = vmatpush1.msra.mxu0 %v6360_v56  ;;  %6440 = vmatprep.subr.mxu1 %v6363_v47  ;;  %v6518_v0 = vpop.permute.xlu1 %6517 }
 0x2ec   :  { %v6525_v28 = vsel %vm1759_vm10, %v6516_v37, %v6518_v0  ;;  %18263 = vmatmul.mubr.msk.f32.vlgmr.msra.gmra.mrb[2].mxu0 %vm131_vm2, %v18262_v15  ;;  %6441 = vmatpush1.msra.mxu1 %v6362_v20  ;;  %v6524_v56 = vsel %vm1759_vm10, %v6518_v0, %v6520_v54  ;;  %v22961_v0 = vld [vmem:[#allocation43_spill] sm:$0xff] }
 0x2ed   :  { %10584 = vrot.lane.b32.xlu0 %v20363_v62, %s18945_s26  ;;  %v6528_v29 = vmul.f32 %v6525_v28, %v22958_v3  ;;  %6600 = vmatprep.mubr.f32.mxu0 %v22830_v59  ;;  %v22959_v3 = vld [vmem:[#allocation42_spill] sm:$0xff]  ;;  %v6529_v48 = vmul.f32 %v6524_v56, %v22961_v0 }
 0x2ee   :  { %18264 = vmatmul.mubr.msk.f32.vlgmr.msra.gmra.mrb[2].mxu1 %vm131_vm2, %v18262_v15  ;;  %10420 = vrot.lane.b32.xlu1 %v20406_v63, %s18944_s25  ;;  %v22960_v15 = vld [vmem:[#allocation44_spill] sm:$0xff] }
 0x2ef   :  { %v6687_v47 = vpop.permute.xlu0 %6686  ;;  %6536 = vmatprep.subr.mxu0 %v6528_v29  ;;  %v6522_v45 = vpop.permute.xlu1 %6521  ;;  %6671 = vmatprep.mubr.f32.mxu1 %v22830_v59  ;;  %v18265_v29 = vld [vmem:[%s22543_s1 + $0x120] sm:$0xff] }
 0x2f0   :  { %v6523_v20 = vsel %vm1759_vm10, %v6520_v54, %v6522_v45  ;;  %v6526_v28 = vsel %vm1759_vm10, %v6522_v45, %v6516_v37 }
 0x2f1   :  { %v6527_v38 = vmul.f32 %v6526_v28, %v22959_v3  ;;  %10746 = vrot.lane.b32.xlu0 %v20334_v61, %s18946_s27  ;;  %v6530_v49 = vmul.f32 %v6523_v20, %v22960_v15  ;;  %v22962_v20 = vld [vmem:[#allocation45_spill] sm:$0xff] }
 0x2f2   :  { %10582 = vrot.lane.b32.xlu1 %v20378_v39, %s18945_s26 }
 0x2f3   :  { %v6850_v54 = vpop.permute.xlu0 %6849  ;;  %6537 = vmatpush1.msra.mxu0 %v6527_v38  ;;  %6607 = vmatprep.subr.mxu1 %v6530_v49  ;;  %v6685_v45 = vpop.permute.xlu1 %6684 }
 0x2f4   :  { %v6692_v37 = vsel %vm1949_vm11, %v6683_v55, %v6685_v45  ;;  %18266 = vmatmul.mubr.msk.f32.vlgmr.msra.gmra.mrb[2].mxu0 %vm131_vm2, %v18265_v29  ;;  %6608 = vmatpush1.msra.mxu1 %v6529_v48  ;;  %v6691_v38 = vsel %vm1949_vm11, %v6685_v45, %v6687_v47  ;;  %v18268_v45 = vld [vmem:[%s22543_s1 + $0x128] sm:$0xff] }
 0x2f5   :  { %10750 = vrot.lane.b32.xlu0 %v20363_v62, %s18946_s27  ;;  %v6695_v28 = vmul.f32 %v6692_v37, %v22962_v20  ;;  %6767 = vmatprep.mubr.f32.mxu0 %v22830_v59 }
 0x2f6   :  { %18267 = vmatmul.mubr.msk.f32.vlgmr.msra.gmra.mrb[2].mxu1 %vm131_vm2, %v18265_v29  ;;  %10586 = vrot.lane.b32.xlu1 %v20406_v63, %s18945_s26  ;;  %v22963_v29 = vld [vmem:[#allocation48_spill] sm:$0xff] }
 0x2f7   :  { %v6854_v49 = vpop.permute.xlu0 %6853  ;;  %6703 = vmatprep.subr.mxu0 %v6695_v28  ;;  %v6689_v56 = vpop.permute.xlu1 %6688  ;;  %6838 = vmatprep.mubr.f32.mxu1 %v22830_v59  ;;  %v22964_v28 = vld [vmem:[#allocation47_spill] sm:$0xff] }
 0x2f8   :  { %v6690_v48 = vsel %vm1949_vm11, %v6687_v47, %v6689_v56  ;;  %v6693_v37 = vsel %vm1949_vm11, %v6689_v56, %v6683_v55  ;;  %v6696_v3 = vmul.f32 %v6691_v38, %v22964_v28  ;;  %v22966_v28 = vld [vmem:[#allocation50_spill] sm:$0xff] }
 0x2f9   :  { %v6694_v0 = vmul.f32 %v6693_v37, %v19632_v23  ;;  %10912 = vrot.lane.b32.xlu0 %v20334_v61, %s18947_s28  ;;  %v6697_v20 = vmul.f32 %v6690_v48, %v22963_v29  ;;  %v22965_v48 = vld [vmem:[#allocation49_spill] sm:$0xff] }
 0x2fa   :  { %10748 = vrot.lane.b32.xlu1 %v20378_v39, %s18946_s27 }
 0x2fb   :  { %v7017_v47 = vpop.permute.xlu0 %7016  ;;  %6704 = vmatpush1.msra.mxu0 %v6694_v0  ;;  %6774 = vmatprep.subr.mxu1 %v6697_v20  ;;  %v6852_v55 = vpop.permute.xlu1 %6851 }
 0x2fc   :  { %v6859_v56 = vsel %vm22738_vm12, %v6850_v54, %v6852_v55  ;;  %18269 = vmatmul.mubr.msk.f32.vlgmr.msra.gmra.mrb[2].mxu0 %vm131_vm2, %v18268_v45  ;;  %6775 = vmatpush1.msra.mxu1 %v6696_v3  ;;  %v6858_v0 = vsel %vm22738_vm12, %v6852_v55, %v6854_v49  ;;  %v18271_v55 = vld [vmem:[%s22543_s1 + $0x130] sm:$0xff] }
 0x2fd   :  { %10916 = vrot.lane.b32.xlu0 %v20363_v62, %s18947_s28  ;;  %v6862_v37 = vmul.f32 %v6859_v56, %v22965_v48  ;;  %6934 = vmatprep.mubr.f32.mxu0 %v22830_v59 }
 0x2fe   :  { %18270 = vmatmul.mubr.msk.f32.vlgmr.msra.gmra.mrb[2].mxu1 %vm131_vm2, %v18268_v45  ;;  %10752 = vrot.lane.b32.xlu1 %v20406_v63, %s18946_s27  ;;  %v22967_v45 = vld [vmem:[#allocation52_spill] sm:$0xff] }
 0x2ff   :  { %v7021_v20 = vpop.permute.xlu0 %7020  ;;  %6870 = vmatprep.subr.mxu0 %v6862_v37  ;;  %v6856_v38 = vpop.permute.xlu1 %6855  ;;  %7005 = vmatprep.mubr.f32.mxu1 %v22830_v59  ;;  %v22968_v37 = vld [vmem:[#allocation51_spill] sm:$0xff] }
 0x300   :  { %v6857_v3 = vsel %vm22738_vm12, %v6854_v49, %v6856_v38  ;;  %v6860_v56 = vsel %vm22738_vm12, %v6856_v38, %v6850_v54  ;;  %v6863_v29 = vmul.f32 %v6858_v0, %v22968_v37  ;;  %v22970_v37 = vld [vmem:[#allocation54_spill] sm:$0xff] }
 0x301   :  { %v6861_v48 = vmul.f32 %v6860_v56, %v22966_v28  ;;  %11078 = vrot.lane.b32.xlu0 %v20334_v61, %s18948_s29  ;;  %v6864_v23 = vmul.f32 %v6857_v3, %v22967_v45  ;;  %v22969_v3 = vld [vmem:[#allocation53_spill] sm:$0xff] }
 0x302   :  { %10914 = vrot.lane.b32.xlu1 %v20378_v39, %s18947_s28 }
 0x303   :  { %v7335_v49 = vpop.permute.xlu0 %7334  ;;  %6871 = vmatpush1.msra.mxu0 %v6861_v48  ;;  %6941 = vmatprep.subr.mxu1 %v6864_v23  ;;  %v7019_v54 = vpop.permute.xlu1 %7018 }
 0x304   :  { %v7026_v38 = vsel %vm22737_vm13, %v7017_v47, %v7019_v54  ;;  %18272 = vmatmul.mubr.msk.f32.vlgmr.msra.gmra.mrb[2].mxu0 %vm131_vm2, %v18271_v55  ;;  %6942 = vmatpush1.msra.mxu1 %v6863_v29  ;;  %v7025_v23 = vsel %vm22737_vm13, %v7019_v54, %v7021_v20  ;;  %v18274_v54 = vld [vmem:[%s22543_s1 + $0x138] sm:$0xff] }
 0x305   :  { %11082 = vrot.lane.b32.xlu0 %v20363_v62, %s18948_s29  ;;  %v7029_v56 = vmul.f32 %v7026_v38, %v22969_v3  ;;  %7101 = vmatprep.mubr.f32.mxu0 %v22830_v59 }
 0x306   :  { %18273 = vmatmul.mubr.msk.f32.vlgmr.msra.gmra.mrb[2].mxu1 %vm131_vm2, %v18271_v55  ;;  %10918 = vrot.lane.b32.xlu1 %v20406_v63, %s18947_s28  ;;  %v22971_v55 = vld [vmem:[#allocation56_spill] sm:$0xff] }
 0x307   :  { %v7339_v48 = vpop.permute.xlu0 %7338  ;;  %7037 = vmatprep.subr.mxu0 %v7029_v56  ;;  %v7023_v0 = vpop.permute.xlu1 %7022  ;;  %7172 = vmatprep.mubr.f32.mxu1 %v22830_v59  ;;  %v22972_v56 = vld [vmem:[#allocation55_spill] sm:$0xff] }
 0x308   :  { %v7024_v29 = vsel %vm22737_vm13, %v7021_v20, %v7023_v0  ;;  %v7027_v38 = vsel %vm22737_vm13, %v7023_v0, %v7017_v47  ;;  %v7030_v45 = vmul.f32 %v7025_v23, %v22972_v56  ;;  %vm22973_vm13 = vcmp.lt.s32.totalorder %v19128_v13, 127 }
 0x309   :  { %v7028_v3 = vmul.f32 %v7027_v38, %v22970_v37  ;;  %11244 = vrot.lane.b32.xlu0 %v20334_v61, %s18949_s30  ;;  %v7031_v28 = vmul.f32 %v7024_v29, %v22971_v55  ;;  %v22974_v29 = vld [vmem:[#allocation57_spill] sm:$0xff]  ;;  %vm22975_vm12 = vmmov %vm22973_vm13 }
 0x30a   :  { %11080 = vrot.lane.b32.xlu1 %v20378_v39, %s18948_s29 }
 0x30b   :  { %v7502_v20 = vpop.permute.xlu0 %7501  ;;  %7038 = vmatpush1.msra.mxu0 %v7028_v3  ;;  %7108 = vmatprep.subr.mxu1 %v7031_v28  ;;  %v7337_v47 = vpop.permute.xlu1 %7336 }
 0x30c   :  { %v7343_v0 = vsel %vm22973_vm13, %v7337_v47, %v7339_v48  ;;  %18275 = vmatmul.mubr.msk.f32.vlgmr.msra.gmra.mrb[2].mxu0 %vm131_vm2, %v18274_v54  ;;  %7109 = vmatpush1.msra.mxu1 %v7030_v45  ;;  %v7344_v38 = vsel %vm22973_vm13, %v7335_v49, %v7337_v47  ;;  %v22976_v45 = vld [vmem:[#allocation58_spill] sm:$0xff]  ;;  %vm22977_vm13 = vmmov %vm22975_vm12 }
 0x30d   :  { %7188 = vmatprep.subr.mxu0 %v20167_v8  ;;  %11248 = vrot.lane.b32.xlu0 %v20363_v62, %s18949_s30  ;;  %v7347_v23 = vmul.f32 %v7343_v0, %v22974_v29 }
 0x30e   :  { %18276 = vmatmul.mubr.msk.f32.vlgmr.msra.gmra.mrb[2].mxu1 %vm131_vm2, %v18274_v54  ;;  %7189 = vmatpush1.msra.mxu0 %v20156_v27 }
 0x30f   :  { %7259 = vmatprep.subr.mxu1 %v20173_v53  ;;  %v7506_v28 = vpop.permute.xlu0 %7505  ;;  %7355 = vmatprep.subr.mxu0 %v7347_v23  ;;  %v7341_v3 = vpop.permute.xlu1 %7340  ;;  %v18277_v53 = vld [vmem:[%s22543_s1 + $0x140] sm:$0xff] }
 0x310   :  { %7260 = vmatpush1.msra.mxu1 %v20158_v36  ;;  %v7345_v8 = vsel %vm22975_vm12, %v7341_v3, %v7335_v49  ;;  %7252 = vmatprep.mubr.f32.mxu0 %v22830_v59  ;;  %v7342_v54 = vsel %vm22977_vm13, %v7339_v48, %v7341_v3  ;;  %v22978_v36 = vld [vmem:[#allocation59_spill] sm:$0xff]  ;;  %v22980_v48 = vld [vmem:[#allocation61_spill] sm:$0xff]  ;;  %vm22983_vm12 = vcmp.lt.s32.totalorder %v19128_v13, 120 }
 0x311   :  { %11410 = vrot.lane.b32.xlu0 %v20334_v61, %s18950_s5  ;;  %v7349_v27 = vmul.f32 %v7345_v8, %v22976_v45  ;;  %7323 = vmatprep.mubr.f32.mxu1 %v22830_v59  ;;  %v7346_v49 = vmul.f32 %v7344_v38, %v22978_v36  ;;  %v22979_v8 = vld [vmem:[#allocation60_spill] sm:$0xff]  ;;  %vm22986_vm13 = vmmov %vm22983_vm12 }
 0x312   :  { %11084 = vrot.lane.b32.xlu1 %v20406_v63, %s18948_s29  ;;  %v7348_v45 = vmul.f32 %v7342_v54, %v22979_v8 }
 0x313   :  { %v7669_v47 = vpop.permute.xlu0 %7668  ;;  %7426 = vmatprep.subr.mxu1 %v7349_v27  ;;  %v7504_v0 = vpop.permute.xlu1 %7503 }
 0x314   :  { %v7510_v23 = vsel %vm22739_vm15, %v7504_v0, %v7506_v28  ;;  %18278 = vmatmul.mubr.msk.f32.vlgmr.msra.gmra.mrb[2].mxu0 %vm131_vm2, %v18277_v53  ;;  %v7511_v36 = vsel %vm22739_vm15, %v7502_v20, %v7504_v0 }
 0x315   :  { %7356 = vmatpush1.msra.mxu0 %v7346_v49  ;;  %11414 = vrot.lane.b32.xlu0 %v20363_v62, %s18950_s5  ;;  %v7514_v3 = vmul.f32 %v7510_v23, %v22980_v48  ;;  %v22982_v23 = vld [vmem:[#allocation63_spill] sm:$0xff] }
 0x316   :  { %18279 = vmatmul.mubr.msk.f32.vlgmr.msra.gmra.mrb[2].mxu1 %vm131_vm2, %v18277_v53  ;;  %7419 = vmatprep.mubr.f32.mxu0 %v22830_v59  ;;  %v22981_v53 = vld [vmem:[#allocation62_spill] sm:$0xff] }
 0x317   :  { %7427 = vmatpush1.msra.mxu1 %v7348_v45  ;;  %v7673_v38 = vpop.permute.xlu0 %7672  ;;  %7522 = vmatprep.subr.mxu0 %v7514_v3  ;;  %v7508_v27 = vpop.permute.xlu1 %7507  ;;  %v18280_v45 = vld [vmem:[%s22543_s1 + $0x148] sm:$0xff]  ;;  %v7513_v3 = vmul.f32 %v7511_v36, %v22982_v23 }
 0x318   :  { %v7512_v54 = vsel %vm22739_vm15, %v7508_v27, %v7502_v20  ;;  %7490 = vmatprep.mubr.f32.mxu1 %v22830_v59  ;;  %11246 = vrot.lane.b32.xlu1 %v20378_v39, %s18949_s30  ;;  %v7509_v0 = vsel %vm22739_vm15, %v7506_v28, %v7508_v27  ;;  %v22985_v28 = vld [vmem:[#allocation67_spill] sm:$0xff]  ;;  %vm22988_vm15 = vmmov %vm22983_vm12 }
 0x319   :  { %11726 = vrot.lane.b32.xlu0 %v20334_v61, %s18951_s6  ;;  %v7516_v49 = vmul.f32 %v7512_v54, %v22981_v53  ;;  %v22984_v54 = vld [vmem:[#allocation64_spill] sm:$0xff] }
 0x31a   :  { %v7515_v53 = vmul.f32 %v7509_v0, %v22984_v54 }
 0x31b   :  { %7593 = vmatprep.subr.mxu1 %v7516_v49  ;;  %v7671_v20 = vpop.permute.xlu1 %7670  ;;  %v7836_v48 = vpop.permute.xlu0 %7835 }
 0x31c   :  { %v7677_v8 = vsel %vm22983_vm12, %v7671_v20, %v7673_v38  ;;  %18281 = vmatmul.mubr.msk.f32.vlgmr.msra.gmra.mrb[2].mxu0 %vm131_vm2, %v18280_v45  ;;  %11250 = vrot.lane.b32.xlu1 %v20406_v63, %s18949_s30  ;;  %v7678_v49 = vsel %vm22986_vm13, %v7669_v47, %v7671_v20  ;;  %v22989_v20 = vld [vmem:[#allocation65_spill] sm:$0xff] }
 0x31d   :  { %7523 = vmatpush1.msra.mxu0 %v7513_v3  ;;  %11730 = vrot.lane.b32.xlu0 %v20363_v62, %s18951_s6  ;;  %v7681_v27 = vmul.f32 %v7677_v8, %v22985_v28  ;;  %v22987_v8 = vld [vmem:[#allocation68_spill] sm:$0xff] }
 0x31e   :  { %18282 = vmatmul.mubr.msk.f32.vlgmr.msra.gmra.mrb[2].mxu1 %vm131_vm2, %v18280_v45  ;;  %7586 = vmatprep.mubr.f32.mxu0 %v22830_v59 }
 0x31f   :  { %7594 = vmatpush1.msra.mxu1 %v7515_v53  ;;  %7689 = vmatprep.subr.mxu0 %v7681_v27  ;;  %v7675_v36 = vpop.permute.xlu1 %7674  ;;  %v18283_v53 = vld [vmem:[%s22543_s1 + $0x150] sm:$0xff]  ;;  %v7680_v27 = vmul.f32 %v7678_v49, %v22989_v20 }
 0x320   :  { %v7679_v0 = vsel %vm22983_vm12, %v7675_v36, %v7669_v47  ;;  %7657 = vmatprep.mubr.f32.mxu1 %v22830_v59  ;;  %11412 = vrot.lane.b32.xlu1 %v20378_v39, %s18950_s5  ;;  %v7676_v3 = vsel %vm22988_vm15, %v7673_v38, %v7675_v36  ;;  %v7840_v47 = vpop.permute.xlu0 %7839  ;;  %vm23088_vm15 = vcmp.lt.s32.totalorder %v19128_v13, 7 }
 0x321   :  { %11892 = vrot.lane.b32.xlu0 %v20334_v61, %s18952_s11  ;;  %v7683_v45 = vmul.f32 %v7679_v0, %v22987_v8  ;;  %v22990_v0 = vld [vmem:[#allocation66_spill] sm:$0xff]  ;;  %vm23090_vm13 = vmmov %vm23088_vm15 }
 0x322   :  { %v7682_v8 = vmul.f32 %v7676_v3, %v22990_v0  ;;  %vm23094_vm12 = vmmov %vm23090_vm13 }
 0x323   :  { %7760 = vmatprep.subr.mxu1 %v7683_v45  ;;  %v7838_v54 = vpop.permute.xlu1 %7837 }
 0x324   :  { %v7844_v28 = vsel %vm3236_vm14, %v7838_v54, %v7840_v47  ;;  %18284 = vmatmul.mubr.msk.f32.vlgmr.msra.gmra.mrb[2].mxu0 %vm131_vm2, %v18283_v53  ;;  %11416 = vrot.lane.b32.xlu1 %v20406_v63, %s18950_s5  ;;  %v7845_v49 = vsel %vm3236_vm14, %v7836_v48, %v7838_v54  ;;  %v20860_v3 = vpop.permute.xlu0 %9443 }
 0x325   :  { %7690 = vmatpush1.msra.mxu0 %v7680_v27  ;;  %11896 = vrot.lane.b32.xlu0 %v20363_v62, %s18952_s11  ;;  %v7848_v38 = vmul.f32 %v7844_v28, %v19862_v12 }
 0x326   :  { %18285 = vmatmul.mubr.msk.f32.vlgmr.msra.gmra.mrb[2].mxu1 %vm131_vm2, %v18283_v53  ;;  %7753 = vmatprep.mubr.f32.mxu0 %v22830_v59  ;;  %v7847_v53 = vmul.f32 %v7845_v49, %v19854_v24  ;;  %v8158_v49 = vmul.f32 %v20299_v17, %v19908_v52 }
 0x327   :  { %7761 = vmatpush1.msra.mxu1 %v7682_v8  ;;  %7856 = vmatprep.subr.mxu0 %v7848_v38  ;;  %v7842_v36 = vpop.permute.xlu1 %7841  ;;  %v18286_v8 = vld [vmem:[%s22543_s1 + $0x158] sm:$0xff] }
 0x328   :  { %v7846_v45 = vsel %vm3236_vm14, %v7842_v36, %v7836_v48  ;;  %7824 = vmatprep.mubr.f32.mxu1 %v22830_v59  ;;  %11728 = vrot.lane.b32.xlu1 %v20378_v39, %s18951_s6  ;;  %v7843_v54 = vsel %vm3236_vm14, %v7840_v47, %v7842_v36  ;;  %v8003_v48 = vmul.f32 %v20339_v1, %v19872_v10  ;;  %v18289_v1 = vld [vmem:[%s22543_s1 + $0x160] sm:$0xff]  ;;  %v20881_v36 = vpop.permute.xlu0 %9447 }
 0x329   :  { %12058 = vrot.lane.b32.xlu0 %v20334_v61, %s18953_s14  ;;  %v7850_v28 = vmul.f32 %v7846_v45, %v19865_v57  ;;  %v7849_v27 = vmul.f32 %v7843_v54, %v19859_v2  ;;  %v8005_v47 = vmul.f32 %v20348_v44, %v19881_v46  ;;  %v8002_v44 = vmul.f32 %v20324_v25, %v19897_v6 }
 0x32a   :  { %v8160_v25 = vmul.f32 %v20307_v22, %v19905_v7  ;;  %v8159_v54 = vmul.f32 %v20303_v58, %v19925_v42  ;;  %v18295_v58 = vld [vmem:[%s22543_s1 + $0x170] sm:$0xff] }
 0x32b   :  { %7927 = vmatprep.subr.mxu1 %v7850_v28  ;;  %v20870_v38 = vpop.permute.xlu1 %9445  ;;  %v13776_v28 = vld [vmem:[%s22544_s2] sm:$0xff] }
 0x32c   :  { %18287 = vmatmul.mubr.msk.f32.vlgmr.msra.gmra.mrb[2].mxu0 %vm131_vm2, %v18286_v8  ;;  %11732 = vrot.lane.b32.xlu1 %v20406_v63, %s18951_s6  ;;  %v20901_v17 = vpop.permute.xlu0 %9426 }
 0x32d   :  { %7857 = vmatpush1.msra.mxu0 %v7847_v53  ;;  %12062 = vrot.lane.b32.xlu0 %v20363_v62, %s18953_s14 }
 0x32e   :  { %18288 = vmatmul.mubr.msk.f32.vlgmr.msra.gmra.mrb[2].mxu1 %vm131_vm2, %v18286_v8  ;;  %8011 = vmatprep.subr.mxu0 %v8003_v48  ;;  %v8313_v8 = vmul.f32 %v20382_v26, %v19933_v31  ;;  %v8315_v48 = vmul.f32 %v20391_v18, %v19936_v32  ;;  %v8312_v26 = vmul.f32 %v20367_v4, %v19956_v30 }
 0x32f   :  { %7928 = vmatpush1.msra.mxu1 %v7849_v27  ;;  %7920 = vmatprep.mubr.f32.mxu0 %v22830_v59  ;;  %v8468_v18 = vmul.f32 %v20423_v41, %v19964_v9  ;;  %v8470_v4 = vmul.f32 %v20432_v50, %v19967_v14  ;;  %v8623_v50 = vmul.f32 %v20462_v33, %v19992_v11  ;;  %v23024_v11 = vld [vmem:[#allocation113_spill] sm:$0xff]  ;;  %v23031_v14 = vld [vmem:[#allocation112_spill] sm:$0xff] }
 0x330   :  { %8082 = vmatprep.subr.mxu1 %v8005_v47  ;;  %7991 = vmatprep.mubr.f32.mxu1 %v22830_v59  ;;  %v20888_v45 = vpop.permute.xlu1 %9449  ;;  %v20919_v53 = vpop.permute.xlu0 %9430  ;;  %v8314_v47 = vmul.f32 %v20387_v21, %v19959_v19  ;;  %v18298_v21 = vld [vmem:[%s22543_s1 + $0x178] sm:$0xff]  ;;  %v23036_v9 = vld [vmem:[#allocation8_spill] sm:$0xff] }
 0x331   :  { %12224 = vrot.lane.b32.xlu0 %v20334_v61, %s18954_s7  ;;  %11894 = vrot.lane.b32.xlu1 %v20378_v39, %s18952_s11  ;;  %v8004_v61 = vmul.f32 %v20344_v34, %v19900_v40  ;;  %v18292_v34 = vld [vmem:[%s22543_s1 + $0x168] sm:$0xff] }
 0x334   :  { %18290 = vmatmul.mubr.msk.f32.vlgmr.msra.gmra.mrb[2].mxu0 %vm131_vm2, %v18289_v1  ;;  %v20909_v22 = vpop.permute.xlu1 %9428  ;;  %v20934_v27 = vpop.permute.xlu0 %9750 }
 0x335   :  { %8012 = vmatpush1.msra.mxu0 %v8002_v44  ;;  %12228 = vrot.lane.b32.xlu0 %v20363_v62, %s18954_s7  ;;  %v8157_v62 = vmul.f32 %v20289_v35, %v19928_v51  ;;  %v8467_v44 = vmul.f32 %v20410_v5, %v19983_v43  ;;  %v22991_v5 = vld [vmem:[#allocation78_spill] sm:$0xff] }
 0x336   :  { %18291 = vmatmul.mubr.msk.f32.vlgmr.msra.gmra.mrb[2].mxu1 %vm131_vm2, %v18289_v1  ;;  %8166 = vmatprep.subr.mxu0 %v8158_v49 }
 0x337   :  { %8083 = vmatpush1.msra.mxu1 %v8004_v61  ;;  %8075 = vmatprep.mubr.f32.mxu0 %v22830_v59  ;;  %v22992_v61 = vld [vmem:[#allocation97_spill] sm:$0xff] }
 0x338   :  { %8237 = vmatprep.subr.mxu1 %v8160_v25  ;;  %8146 = vmatprep.mubr.f32.mxu1 %v22830_v59  ;;  %v20927_v35 = vpop.permute.xlu1 %9432  ;;  %v20955_v41 = vpop.permute.xlu0 %9754  ;;  %v8625_v25 = vmul.f32 %v22992_v61, %v22991_v5  ;;  %v23001_v61 = vld [vmem:[#allocation83_spill] sm:$0xff] }
 0x339   :  { %13779 = vperm.xlu0 %18922, %v13776_v28   ;;  %11898 = vrot.lane.b32.xlu1 %v20406_v63, %s18952_s11  ;;  %v22993_v28 = vld [vmem:[#allocation79_spill] sm:$0xff] }
 0x33c   :  { %18293 = vmatmul.mubr.msk.f32.vlgmr.msra.gmra.mrb[2].mxu0 %vm131_vm2, %v18292_v34  ;;  %v20947_v1 = vpop.permute.xlu1 %9752  ;;  %v20973_v33 = vpop.permute.xlu0 %9916 }
 0x33d   :  { %8167 = vmatpush1.msra.mxu0 %v8157_v62  ;;  %8230 = vmatprep.mubr.f32.mxu0 %v22830_v59 }
 0x33e   :  { %18294 = vmatmul.mubr.msk.f32.vlgmr.msra.gmra.mrb[2].mxu1 %vm131_vm2, %v18292_v34  ;;  %8321 = vmatprep.subr.mxu0 %v8313_v8  ;;  %v22994_v34 = vld [vmem:[#allocation36_spill] sm:$0xff]  ;;  %v22995_v8 = vld [vmem:[#allocation81_spill] sm:$0xff] }
 0x33f   :  { %8238 = vmatpush1.msra.mxu1 %v8159_v54  ;;  %8301 = vmatprep.mubr.f32.mxu1 %v22830_v59  ;;  %v8622_v62 = vmul.f32 %v22994_v34, %v22993_v28  ;;  %v22996_v54 = vld [vmem:[#allocation99_spill] sm:$0xff]  ;;  %v23016_v28 = vld [vmem:[#allocation109_spill] sm:$0xff] }
 0x340   :  { %8392 = vmatprep.subr.mxu1 %v8315_v48  ;;  %12060 = vrot.lane.b32.xlu1 %v20378_v39, %s18953_s14  ;;  %v20962_v49 = vpop.permute.xlu1 %9756  ;;  %v8778_v48 = vmul.f32 %v22996_v54, %v22995_v8  ;;  %v23004_v54 = vld [vmem:[#allocation103_spill] sm:$0xff] }
 0x344   :  { %18296 = vmatmul.mubr.msk.f32.vlgmr.msra.gmra.mrb[2].mxu0 %vm131_vm2, %v18295_v58  ;;  %12064 = vrot.lane.b32.xlu1 %v20406_v63, %s18953_s14 }
 0x345   :  { %8322 = vmatpush1.msra.mxu0 %v8312_v26  ;;  %8385 = vmatprep.mubr.f32.mxu0 %v22830_v59  ;;  %v22998_v26 = vld [vmem:[#allocation40_spill] sm:$0xff] }
 0x346   :  { %18297 = vmatmul.mubr.msk.f32.vlgmr.msra.gmra.mrb[2].mxu1 %vm131_vm2, %v18295_v58  ;;  %8476 = vmatprep.subr.mxu0 %v8468_v18  ;;  %v22997_v58 = vld [vmem:[#allocation80_spill] sm:$0xff] }
 0x347   :  { %8393 = vmatpush1.msra.mxu1 %v8314_v47  ;;  %8456 = vmatprep.mubr.f32.mxu1 %v22830_v59  ;;  %v8624_v18 = vmul.f32 %v22998_v26, %v22997_v58  ;;  %v20988_v47 = vpop.permute.xlu0 %9920  ;;  %v23005_v26 = vld [vmem:[#allocation84_spill] sm:$0xff] }
 0x348   :  { %8547 = vmatprep.subr.mxu1 %v8470_v4  ;;  %12226 = vrot.lane.b32.xlu1 %v20378_v39, %s18954_s7  ;;  %v8469_v39 = vmul.f32 %v20428_v16, %v19986_v60  ;;  %v20978_v16 = vpop.permute.xlu1 %9918  ;;  %v22999_v4 = vld [vmem:[#allocation82_spill] sm:$0xff] }
 0x349   :  { %v23023_v60 = vld [vmem:[#allocation94_spill] sm:$0xff] }
 0x34a   :  { %v9245_v43 = vmul.f32 %v23024_v11, %v23023_v60  ;;  %v21070_v11 = vsel %vm99_vm0, %v20881_v36, %v20888_v45 }
 0x34b   :  { %23025 = vst [vmem:[#allocation63_spill] sm:$0xff] %v21070_v11 }
 0x34c   :  { %18299 = vmatmul.mubr.msk.f32.vlgmr.msra.gmra.mrb[2].mxu0 %vm131_vm2, %v18298_v21  ;;  %12230 = vrot.lane.b32.xlu1 %v20406_v63, %s18954_s7  ;;  %v18301_v63 = vld [vmem:[%s22543_s1 + $0x180] sm:$0xff] }
 0x34d   :  { %8477 = vmatpush1.msra.mxu0 %v8467_v44  ;;  %8540 = vmatprep.mubr.f32.mxu0 %v22830_v59 }
 0x34e   :  { %18300 = vmatmul.mubr.msk.f32.vlgmr.msra.gmra.mrb[2].mxu1 %vm131_vm2, %v18298_v21  ;;  %8631 = vmatprep.subr.mxu0 %v8623_v50  ;;  %v23000_v21 = vld [vmem:[#allocation101_spill] sm:$0xff]  ;;  %v20994_v50 = vpop.permute.xlu1 %9922 }
 0x34f   :  { %8548 = vmatpush1.msra.mxu1 %v8469_v39  ;;  %8611 = vmatprep.mubr.f32.mxu1 %v22830_v59  ;;  %v8780_v44 = vmul.f32 %v23000_v21, %v22999_v4  ;;  %v18304_v39 = vld [vmem:[%s22543_s1 + $0x188] sm:$0xff]  ;;  %v23008_v4 = vld [vmem:[#allocation105_spill] sm:$0xff] }
 0x350   :  { %8702 = vmatprep.subr.mxu1 %v8625_v25  ;;  %v23002_v25 = vld [vmem:[#allocation98_spill] sm:$0xff] }
 0x351   :  { %v8777_v34 = vmul.f32 %v23002_v25, %v23001_v61  ;;  %v23014_v61 = vld [vmem:[#allocation104_spill] sm:$0xff] }
 0x352   :  { %v21012_v25 = vpop.permute.xlu1 %10084 }
 0x354   :  { %18302 = vmatmul.mubr.msk.f32.vlgmr.msra.gmra.mrb[2].mxu0 %vm131_vm2, %v18301_v63 }
 0x355   :  { %8632 = vmatpush1.msra.mxu0 %v8622_v62  ;;  %8695 = vmatprep.mubr.f32.mxu0 %v22830_v59  ;;  %v21001_v62 = vpop.permute.xlu0 %10082 }
 0x356   :  { %18303 = vmatmul.mubr.msk.f32.vlgmr.msra.gmra.mrb[2].mxu1 %vm131_vm2, %v18301_v63  ;;  %8786 = vmatprep.subr.mxu0 %v8778_v48  ;;  %v23003_v63 = vld [vmem:[#allocation85_spill] sm:$0xff] }
 0x357   :  { %8703 = vmatpush1.msra.mxu1 %v8624_v18  ;;  %8766 = vmatprep.mubr.f32.mxu1 %v22830_v59  ;;  %v8933_v48 = vmul.f32 %v23004_v54, %v23003_v63  ;;  %v23006_v18 = vld [vmem:[#allocation100_spill] sm:$0xff]  ;;  %v18307_v54 = vld [vmem:[%s22543_s1 + $0x190] sm:$0xff] }
 0x358   :  { %8857 = vmatprep.subr.mxu1 %v8780_v44  ;;  %v8779_v21 = vmul.f32 %v23006_v18, %v23005_v26  ;;  %v23007_v44 = vld [vmem:[#allocation86_spill] sm:$0xff] }
 0x359   :  { %v8935_v58 = vmul.f32 %v23008_v4, %v23007_v44  ;;  %v21018_v18 = vpop.permute.xlu0 %10086  ;;  %v23010_v26 = vld [vmem:[#allocation102_spill] sm:$0xff]  ;;  %v21025_v44 = vpop.permute.xlu1 %10088 }
 0x35c   :  { %18305 = vmatmul.mubr.msk.f32.vlgmr.msra.gmra.mrb[2].mxu0 %vm131_vm2, %v18304_v39 }
 0x35d   :  { %8787 = vmatpush1.msra.mxu0 %v8777_v34  ;;  %8850 = vmatprep.mubr.f32.mxu0 %v22830_v59  ;;  %v23009_v34 = vld [vmem:[#allocation87_spill] sm:$0xff] }
 0x35e   :  { %18306 = vmatmul.mubr.msk.f32.vlgmr.msra.gmra.mrb[2].mxu1 %vm131_vm2, %v18304_v39  ;;  %8941 = vmatprep.subr.mxu0 %v8933_v48  ;;  %v8932_v63 = vmul.f32 %v23010_v26, %v23009_v34  ;;  %v23011_v39 = vld [vmem:[#allocation89_spill] sm:$0xff]  ;;  %v23012_v48 = vld [vmem:[#allocation107_spill] sm:$0xff]  ;;  %v21034_v26 = vpop.permute.xlu0 %10248 }
 0x35f   :  { %8858 = vmatpush1.msra.mxu1 %v8779_v21  ;;  %8921 = vmatprep.mubr.f32.mxu1 %v22830_v59  ;;  %v9088_v4 = vmul.f32 %v23012_v48, %v23011_v39  ;;  %v23013_v21 = vld [vmem:[#allocation88_spill] sm:$0xff]  ;;  %v18310_v48 = vld [vmem:[%s22543_s1 + $0x198] sm:$0xff] }
 0x360   :  { %9012 = vmatprep.subr.mxu1 %v8935_v58  ;;  %v8934_v8 = vmul.f32 %v23014_v61, %v23013_v21  ;;  %v23015_v58 = vld [vmem:[#allocation90_spill] sm:$0xff]  ;;  %v21039_v61 = vpop.permute.xlu1 %10250 }
 0x361   :  { %v9090_v5 = vmul.f32 %v23016_v28, %v23015_v58  ;;  %v23018_v21 = vld [vmem:[#allocation106_spill] sm:$0xff]  ;;  %v23022_v58 = vld [vmem:[#allocation108_spill] sm:$0xff] }
 0x364   :  { %18308 = vmatmul.mubr.msk.f32.vlgmr.msra.gmra.mrb[2].mxu0 %vm131_vm2, %v18307_v54 }
 0x365   :  { %8942 = vmatpush1.msra.mxu0 %v8932_v63  ;;  %9005 = vmatprep.mubr.f32.mxu0 %v22830_v59  ;;  %v23017_v63 = vld [vmem:[#allocation91_spill] sm:$0xff] }
 0x366   :  { %18309 = vmatmul.mubr.msk.f32.vlgmr.msra.gmra.mrb[2].mxu1 %vm131_vm2, %v18307_v54  ;;  %9096 = vmatprep.subr.mxu0 %v9088_v4  ;;  %v9087_v39 = vmul.f32 %v23018_v21, %v23017_v63  ;;  %v23019_v54 = vld [vmem:[#allocation93_spill] sm:$0xff]  ;;  %v23020_v4 = vld [vmem:[#allocation111_spill] sm:$0xff]  ;;  %v21058_v21 = vsel %vm99_vm0, %v20860_v3, %v20870_v38  ;;  %v23030_v63 = vld [vmem:[#allocation96_spill] sm:$0xff] }
 0x367   :  { %9013 = vmatpush1.msra.mxu1 %v8934_v8  ;;  %9076 = vmatprep.mubr.f32.mxu1 %v22830_v59  ;;  %v9243_v28 = vmul.f32 %v23020_v4, %v23019_v54  ;;  %v23021_v8 = vld [vmem:[#allocation92_spill] sm:$0xff]  ;;  %v23027_v4 = vld [vmem:[#allocation95_spill] sm:$0xff]  ;;  %v9244_v19 = vmul.f32 %v23031_v14, %v23030_v63  ;;  %v21097_v14 = vsel %vm58_vm1, %v20901_v17, %v20909_v22 }
 0x368   :  { %9167 = vmatprep.subr.mxu1 %v9090_v5  ;;  %v9089_v34 = vmul.f32 %v23022_v58, %v23021_v8  ;;  %v21049_v5 = vpop.permute.xlu0 %10252  ;;  %v18313_v58 = vld [vmem:[%s22543_s1 + $0x1a0] sm:$0xff]  ;;  %v21131_v63 = vsel %vm430_vm3, %v20934_v27, %v20947_v1 }
 0x36c   :  { %18311 = vmatmul.mubr.msk.f32.vlgmr.msra.gmra.mrb[2].mxu0 %vm131_vm2, %v18310_v48  ;;  %v21076_v8 = vpop.permute.xlu0 %10414 }
 0x36d   :  { %9097 = vmatpush1.msra.mxu0 %v9087_v39  ;;  %9160 = vmatprep.mubr.f32.mxu0 %v22830_v59  ;;  %v21061_v39 = vpop.permute.xlu1 %10254 }
 0x36e   :  { %18312 = vmatmul.mubr.msk.f32.vlgmr.msra.gmra.mrb[2].mxu1 %vm131_vm2, %v18310_v48  ;;  %9251 = vmatprep.subr.mxu0 %v9243_v28  ;;  %v23028_v28 = vld [vmem:[#allocation110_spill] sm:$0xff] }
 0x36f   :  { %9168 = vmatpush1.msra.mxu1 %v9089_v34  ;;  %9231 = vmatprep.mubr.f32.mxu1 %v22830_v59  ;;  %v23026_v34 = vld [vmem:[#allocation4_spill] sm:$0xff]  ;;  %v9242_v60 = vmul.f32 %v23028_v28, %v23027_v4  ;;  %v21089_v28 = vsel %vm99_vm0, %v20888_v45, %v20860_v3 }
 0x370   :  { %9322 = vmatprep.subr.mxu1 %v9245_v43  ;;  %v9456_v48 = vmul.f32 %v21058_v21, %v23026_v34  ;;  %v23029_v43 = vld [vmem:[#allocation3_spill] sm:$0xff]  ;;  %v18316_v3 = vld [vmem:[%s22543_s1 + $0x1a8] sm:$0xff]  ;;  %v21111_v45 = vpop.permute.xlu0 %10418 }
 0x371   :  { %v9458_v54 = vmul.f32 %v21070_v11, %v23029_v43  ;;  %v21091_v34 = vpop.permute.xlu1 %10416  ;;  %v23033_v43 = vld [vmem:[#allocation7_spill] sm:$0xff]  ;;  %v23039_v11 = vld [vmem:[#allocation14_spill] sm:$0xff] }
 0x374   :  { %18314 = vmatmul.mubr.msk.f32.vlgmr.msra.gmra.mrb[2].mxu0 %vm131_vm2, %v18313_v58  ;;  %v21164_v32 = vpop.permute.xlu0 %10580 }
 0x375   :  { %9252 = vmatpush1.msra.mxu0 %v9242_v60  ;;  %9315 = vmatprep.mubr.f32.mxu0 %v22830_v59  ;;  %v23032_v60 = vld [vmem:[#allocation5_spill] sm:$0xff] }
 0x376   :  { %18315 = vmatmul.mubr.msk.f32.vlgmr.msra.gmra.mrb[2].mxu1 %vm131_vm2, %v18313_v58  ;;  %9463 = vmatprep.subr.mxu0 %v9456_v48  ;;  %v9455_v58 = vmul.f32 %v21089_v28, %v23032_v60  ;;  %v21123_v48 = vsel %vm58_vm1, %v20927_v35, %v20901_v17  ;;  %v9439_v60 = vmul.f32 %v21097_v14, %v23033_v43  ;;  %v23035_v43 = vld [vmem:[#allocation6_spill] sm:$0xff] }
 0x377   :  { %9323 = vmatpush1.msra.mxu1 %v9244_v19  ;;  %9386 = vmatprep.mubr.f32.mxu1 %v22830_v59  ;;  %v21109_v19 = vsel %vm58_vm1, %v20919_v53, %v20927_v35  ;;  %v21142_v35 = vpop.permute.xlu1 %10420  ;;  %v9438_v30 = vmul.f32 %v21123_v48, %v23036_v9 }
 0x378   :  { %9534 = vmatprep.subr.mxu1 %v9458_v54  ;;  %v21117_v54 = vsel %vm99_vm0, %v20870_v38, %v20881_v36  ;;  %v21137_v38 = vsel %vm58_vm1, %v20909_v22, %v20919_v53  ;;  %v23034_v36 = vld [vmem:[#allocation10_spill] sm:$0xff]  ;;  %v18321_v22 = vld [vmem:[%s22543_s1 + $0x8] sm:$0xff]  ;;  %v21156_v53 = vsel %vm430_vm3, %v20955_v41, %v20962_v49 }
 0x379   :  { %v9441_v17 = vmul.f32 %v21109_v19, %v23034_v36  ;;  %v9457_v4 = vmul.f32 %v21117_v54, %v23035_v43  ;;  %v23037_v36 = vld [vmem:[#allocation11_spill] sm:$0xff]  ;;  %v23038_v43 = vld [vmem:[#allocation9_spill] sm:$0xff]  ;;  %v9765_v42 = vmul.f32 %v21156_v53, %v23039_v11  ;;  %v23045_v11 = vld [vmem:[#allocation18_spill] sm:$0xff] }
 0x37a   :  { %v9440_v9 = vmul.f32 %v21137_v38, %v23038_v43 }
 0x37c   :  { %18317 = vmatmul.mubr.msk.f32.vlgmr.msra.gmra.mrb[2].mxu0 %vm131_vm2, %v18316_v3 }
 0x37d   :  { %9464 = vmatpush1.msra.mxu0 %v9455_v58  ;;  %9527 = vmatprep.mubr.f32.mxu0 %v22830_v59  ;;  %v9763_v58 = vmul.f32 %v21131_v63, %v23037_v36 }
 0x37e   :  { %18318 = vmatmul.mubr.msk.f32.vlgmr.msra.gmra.mrb[2].mxu1 %vm131_vm2, %v18316_v3  ;;  %9608 = vmatprep.subr.mxu0 %v9439_v60  ;;  %v21177_v60 = vpop.permute.xlu1 %10582  ;;  %v21190_v3 = vsel %vm430_vm3, %v20947_v1, %v20955_v41  ;;  %v23044_v41 = vld [vmem:[#allocation13_spill] sm:$0xff] }
 0x37f   :  { %9535 = vmatpush1.msra.mxu1 %v9457_v4  ;;  %9598 = vmatprep.mubr.f32.mxu1 %v22830_v59  ;;  %v21175_v4 = vsel %vm430_vm3, %v20962_v49, %v20934_v27  ;;  %v23041_v27 = vld [vmem:[#allocation12_spill] sm:$0xff] }
 0x380   :  { %18322 = vmatmul.mubr.msk.f32.vlgmr.msra.gmra.mrb[4].mxu0 %vm131_vm2, %v18321_v22  ;;  %9679 = vmatprep.subr.mxu1 %v9441_v17  ;;  %v9762_v49 = vmul.f32 %v21175_v4, %v23041_v27  ;;  %v21201_v17 = vsel %vm620_vm4, %v20988_v47, %v20994_v50 }
 0x381   :  { %9609 = vmatpush1.msra.mxu0 %v9438_v30  ;;  %9672 = vmatprep.mubr.f32.mxu0 %v22830_v59  ;;  %v21184_v30 = vsel %vm620_vm4, %v20973_v33, %v20978_v16  ;;  %23042 = vst [vmem:[#allocation66_spill] sm:$0xff] %v21201_v17  ;;  %v9931_v27 = vmul.f32 %v21201_v17, %v23045_v11 }
 0x382   :  { %18323 = vmatmul.mubr.msk.f32.vlgmr.msra.gmra.mrb[4].mxu1 %vm131_vm2, %v18321_v22  ;;  %9770 = vmatprep.subr.mxu0 %v9763_v58  ;;  %23040 = vst [vmem:[#allocation65_spill] sm:$0xff] %v21184_v30  ;;  %v21203_v22 = vpop.permute.xlu0 %10584  ;;  %v23043_v58 = vld [vmem:[#allocation15_spill] sm:$0xff]  ;;  %v21212_v36 = vpop.permute.xlu1 %10586  ;;  %v21227_v11 = vsel %vm810_vm5, %v21001_v62, %v21012_v25 }
 0x383   :  { %9680 = vmatpush1.msra.mxu1 %v9440_v9  ;;  %9743 = vmatprep.mubr.f32.mxu1 %v22830_v59  ;;  %v9442_v9 = vld [vmem:[%s22543_s1] sm:$0xff]  ;;  %v9929_v1 = vmul.f32 %v21184_v30, %v23043_v58  ;;  %v21220_v58 = vsel %vm620_vm4, %v20994_v50, %v20973_v33  ;;  %23046 = vst [vmem:[#allocation97_spill] sm:$0xff] %v21227_v11  ;;  %v23047_v33 = vld [vmem:[#allocation16_spill] sm:$0xff] }
 0x384   :  { %9841 = vmatprep.subr.mxu1 %v9765_v42  ;;  %v9764_v42 = vmul.f32 %v21190_v3, %v23044_v41  ;;  %v9928_v50 = vmul.f32 %v21220_v58, %v23047_v33  ;;  %v23049_v41 = vld [vmem:[#allocation19_spill] sm:$0xff] }
 0x385   :  { %v10095_v43 = vmul.f32 %v21227_v11, %v23049_v41  ;;  %v21265_v41 = vsel %vm810_vm5, %v21025_v44, %v21001_v62  ;;  %v23053_v62 = vld [vmem:[#allocation20_spill] sm:$0xff] }
 0x386   :  { %v21250_v17 = vpop.permute.xlu1 %10748 }
 0x388   :  { %18324 = vmatmul.mubr.msk.f32.vlgmr.msra.gmra.mrb[4].mxu0 %vm131_vm2, %v9442_v9 }
 0x389   :  { %9771 = vmatpush1.msra.mxu0 %v9762_v49  ;;  %9834 = vmatprep.mubr.f32.mxu0 %v22830_v59  ;;  %v21229_v49 = vpop.permute.xlu0 %10746 }
 0x38a   :  { %18325 = vmatmul.mubr.msk.f32.vlgmr.msra.gmra.mrb[4].mxu1 %vm131_vm2, %v9442_v9  ;;  %9936 = vmatprep.subr.mxu0 %v9929_v1  ;;  %v21235_v9 = vsel %vm620_vm4, %v20978_v16, %v20988_v47  ;;  %v18326_v1 = vld [vmem:[%s22543_s1 + $0x10] sm:$0xff] }
 0x38b   :  { %9842 = vmatpush1.msra.mxu1 %v9764_v42  ;;  %9905 = vmatprep.mubr.f32.mxu1 %v22830_v59  ;;  %v21246_v42 = vsel %vm810_vm5, %v21018_v18, %v21025_v44  ;;  %v23050_v16 = vld [vmem:[#allocation17_spill] sm:$0xff]  ;;  %v10094_v44 = vmul.f32 %v21265_v41, %v23053_v62  ;;  %v23057_v62 = vld [vmem:[#allocation26_spill] sm:$0xff] }
 0x38c   :  { %10007 = vmatprep.subr.mxu1 %v9931_v27  ;;  %23048 = vst [vmem:[#allocation36_spill] sm:$0xff] %v21246_v42  ;;  %v9930_v47 = vmul.f32 %v21235_v9, %v23050_v16  ;;  %v23051_v27 = vld [vmem:[#allocation22_spill] sm:$0xff]  ;;  %v23055_v16 = vld [vmem:[#allocation23_spill] sm:$0xff] }
 0x38d   :  { %v10097_v33 = vmul.f32 %v21246_v42, %v23051_v27  ;;  %v21258_v30 = vpop.permute.xlu0 %10750  ;;  %v21280_v27 = vpop.permute.xlu1 %10752 }
 0x390   :  { %18327 = vmatmul.mubr.msk.f32.vlgmr.msra.gmra.mrb[4].mxu0 %vm131_vm2, %v18326_v1 }
 0x391   :  { %9937 = vmatpush1.msra.mxu0 %v9928_v50  ;;  %10000 = vmatprep.mubr.f32.mxu0 %v22830_v59  ;;  %v21272_v50 = vsel %vm999_vm6, %v21034_v26, %v21039_v61  ;;  %v21297_v42 = vpop.permute.xlu0 %10912 }
 0x392   :  { %18328 = vmatmul.mubr.msk.f32.vlgmr.msra.gmra.mrb[4].mxu1 %vm131_vm2, %v18326_v1  ;;  %10102 = vmatprep.subr.mxu0 %v10095_v43  ;;  %23052 = vst [vmem:[#allocation99_spill] sm:$0xff] %v21272_v50  ;;  %v21278_v1 = vsel %vm810_vm5, %v21012_v25, %v21018_v18  ;;  %v18329_v43 = vld [vmem:[%s22543_s1 + $0x18] sm:$0xff]  ;;  %v10261_v25 = vmul.f32 %v21272_v50, %v23055_v16  ;;  %v23056_v18 = vld [vmem:[#allocation21_spill] sm:$0xff] }
 0x393   :  { %10008 = vmatpush1.msra.mxu1 %v9930_v47  ;;  %10071 = vmatprep.mubr.f32.mxu1 %v22830_v59  ;;  %v21291_v47 = vsel %vm999_vm6, %v21049_v5, %v21061_v39  ;;  %v21308_v16 = vsel %vm999_vm6, %v21061_v39, %v21034_v26  ;;  %v23060_v26 = vld [vmem:[#allocation24_spill] sm:$0xff] }
 0x394   :  { %10173 = vmatprep.subr.mxu1 %v10097_v33  ;;  %23054 = vst [vmem:[#allocation40_spill] sm:$0xff] %v21291_v47  ;;  %v10096_v33 = vmul.f32 %v21278_v1, %v23056_v18  ;;  %v10263_v11 = vmul.f32 %v21291_v47, %v23057_v62  ;;  %23058 = vst [vmem:[#allocation101_spill] sm:$0xff] %v21308_v16  ;;  %v21310_v18 = vpop.permute.xlu1 %10914  ;;  %v10260_v39 = vmul.f32 %v21308_v16, %v23060_v26  ;;  %v23062_v47 = vld [vmem:[#allocation27_spill] sm:$0xff]  ;;  %v23064_v26 = vld [vmem:[#allocation30_spill] sm:$0xff] }
 0x395   :  { %v21336_v62 = vpop.permute.xlu0 %10916 }
 0x398   :  { %18330 = vmatmul.mubr.msk.f32.vlgmr.msra.gmra.mrb[4].mxu0 %vm131_vm2, %v18329_v43  ;;  %v21345_v16 = vpop.permute.xlu1 %10918 }
 0x399   :  { %10103 = vmatpush1.msra.mxu0 %v10094_v44  ;;  %10166 = vmatprep.mubr.f32.mxu0 %v22830_v59  ;;  %v21317_v44 = vsel %vm1189_vm7, %v21076_v8, %v21091_v34 }
 0x39a   :  { %18331 = vmatmul.mubr.msk.f32.vlgmr.msra.gmra.mrb[4].mxu1 %vm131_vm2, %v18329_v43  ;;  %10268 = vmatprep.subr.mxu0 %v10261_v25  ;;  %23059 = vst [vmem:[#allocation98_spill] sm:$0xff] %v21317_v44  ;;  %v21323_v43 = vsel %vm999_vm6, %v21039_v61, %v21049_v5  ;;  %v18332_v25 = vld [vmem:[%s22543_s1 + $0x20] sm:$0xff]  ;;  %v10427_v61 = vmul.f32 %v21317_v44, %v23062_v47  ;;  %v23063_v5 = vld [vmem:[#allocation25_spill] sm:$0xff] }
 0x39b   :  { %10174 = vmatpush1.msra.mxu1 %v10096_v33  ;;  %10237 = vmatprep.mubr.f32.mxu1 %v22830_v59  ;;  %v21334_v33 = vsel %vm1189_vm7, %v21111_v45, %v21142_v35  ;;  %v21353_v47 = vsel %vm1189_vm7, %v21142_v35, %v21076_v8  ;;  %v23067_v8 = vld [vmem:[#allocation28_spill] sm:$0xff] }
 0x39c   :  { %10339 = vmatprep.subr.mxu1 %v10263_v11  ;;  %23061 = vst [vmem:[#allocation103_spill] sm:$0xff] %v21334_v33  ;;  %v10262_v11 = vmul.f32 %v21323_v43, %v23063_v5  ;;  %v10429_v50 = vmul.f32 %v21334_v33, %v23064_v26  ;;  %23065 = vst [vmem:[#allocation100_spill] sm:$0xff] %v21353_v47  ;;  %v21360_v26 = vsel %vm1380_vm8, %v21164_v32, %v21177_v60  ;;  %v23069_v5 = vld [vmem:[#allocation31_spill] sm:$0xff]  ;;  %v21383_v44 = vpop.permute.xlu1 %11080 }
 0x39d   :  { %23066 = vst [vmem:[#allocation105_spill] sm:$0xff] %v21360_v26  ;;  %v10426_v35 = vmul.f32 %v21353_v47, %v23067_v8  ;;  %v10593_v33 = vmul.f32 %v21360_v26, %v23069_v5  ;;  %v21398_v5 = vsel %vm1380_vm8, %v21212_v36, %v21164_v32  ;;  %v23074_v32 = vld [vmem:[#allocation32_spill] sm:$0xff] }
 0x39e   :  { %23072 = vst [vmem:[#allocation107_spill] sm:$0xff] %v21398_v5 }
 0x3a0   :  { %18333 = vmatmul.mubr.msk.f32.vlgmr.msra.gmra.mrb[4].mxu0 %vm131_vm2, %v18332_v25 }
 0x3a1   :  { %10269 = vmatpush1.msra.mxu0 %v10260_v39  ;;  %10332 = vmatprep.mubr.f32.mxu0 %v22830_v59  ;;  %v21362_v39 = vpop.permute.xlu0 %11078 }
 0x3a2   :  { %18334 = vmatmul.mubr.msk.f32.vlgmr.msra.gmra.mrb[4].mxu1 %vm131_vm2, %v18332_v25  ;;  %10434 = vmatprep.subr.mxu0 %v10427_v61  ;;  %v21368_v25 = vsel %vm1189_vm7, %v21091_v34, %v21111_v45  ;;  %v18335_v61 = vld [vmem:[%s22543_s1 + $0x28] sm:$0xff]  ;;  %v23070_v34 = vld [vmem:[#allocation29_spill] sm:$0xff] }
 0x3a3   :  { %10340 = vmatpush1.msra.mxu1 %v10262_v11  ;;  %10403 = vmatprep.mubr.f32.mxu1 %v22830_v59  ;;  %v21379_v11 = vsel %vm1380_vm8, %v21203_v22, %v21212_v36  ;;  %v10428_v45 = vmul.f32 %v21368_v25, %v23070_v34  ;;  %v10592_v36 = vmul.f32 %v21398_v5, %v23074_v32  ;;  %v23076_v34 = vld [vmem:[#allocation35_spill] sm:$0xff]  ;;  %v23083_v5 = vld [vmem:[#allocation38_spill] sm:$0xff] }
 0x3a4   :  { %10505 = vmatprep.subr.mxu1 %v10429_v50  ;;  %23068 = vst [vmem:[#allocation102_spill] sm:$0xff] %v21379_v11  ;;  %v23071_v50 = vld [vmem:[#allocation34_spill] sm:$0xff]  ;;  %v23078_v32 = vld [vmem:[#allocation39_spill] sm:$0xff] }
 0x3a5   :  { %v10595_v8 = vmul.f32 %v21379_v11, %v23071_v50  ;;  %v21391_v47 = vpop.permute.xlu0 %11082  ;;  %v11085_v50 = vpop.permute.xlu1 %11084 }
 0x3a8   :  { %18336 = vmatmul.mubr.msk.f32.vlgmr.msra.gmra.mrb[4].mxu0 %vm131_vm2, %v18335_v61 }
 0x3a9   :  { %10435 = vmatpush1.msra.mxu0 %v10426_v35  ;;  %10498 = vmatprep.mubr.f32.mxu0 %v22830_v59  ;;  %v21405_v35 = vsel %vm1569_vm9, %v21229_v49, %v21250_v17 }
 0x3aa   :  { %18337 = vmatmul.mubr.msk.f32.vlgmr.msra.gmra.mrb[4].mxu1 %vm131_vm2, %v18335_v61  ;;  %10600 = vmatprep.subr.mxu0 %v10593_v33  ;;  %23073 = vst [vmem:[#allocation104_spill] sm:$0xff] %v21405_v35  ;;  %v21411_v61 = vsel %vm1380_vm8, %v21177_v60, %v21203_v22  ;;  %v18338_v33 = vld [vmem:[%s22543_s1 + $0x30] sm:$0xff]  ;;  %v10759_v11 = vmul.f32 %v21405_v35, %v23076_v34 }
 0x3ab   :  { %10506 = vmatpush1.msra.mxu1 %v10428_v45  ;;  %10569 = vmatprep.mubr.f32.mxu1 %v22830_v59  ;;  %v21422_v45 = vsel %vm1569_vm9, %v21258_v30, %v21280_v27  ;;  %v23077_v60 = vld [vmem:[#allocation33_spill] sm:$0xff]  ;;  %v21439_v34 = vsel %vm1569_vm9, %v21280_v27, %v21229_v49 }
 0x3ac   :  { %10671 = vmatprep.subr.mxu1 %v10595_v8  ;;  %23075 = vst [vmem:[#allocation109_spill] sm:$0xff] %v21422_v45  ;;  %v10594_v22 = vmul.f32 %v21411_v61, %v23077_v60  ;;  %v21428_v8 = vpop.permute.xlu0 %11244  ;;  %v10761_v26 = vmul.f32 %v21422_v45, %v23078_v32  ;;  %23079 = vst [vmem:[#allocation106_spill] sm:$0xff] %v21439_v34  ;;  %v21441_v60 = vpop.permute.xlu1 %11246  ;;  %v23081_v49 = vld [vmem:[#allocation37_spill] sm:$0xff] }
 0x3ad   :  { %v10758_v27 = vmul.f32 %v21439_v34, %v23081_v49  ;;  %v23082_v45 = vld [vmem:[#allocation41_spill] sm:$0xff]  ;;  %v10923_v49 = vsel %vm1759_vm10, %v21345_v16, %v21297_v42 }
 0x3b0   :  { %18339 = vmatmul.mubr.msk.f32.vlgmr.msra.gmra.mrb[4].mxu0 %vm131_vm2, %v18338_v33  ;;  %v11249_v32 = vpop.permute.xlu0 %11248 }
 0x3b1   :  { %10601 = vmatpush1.msra.mxu0 %v10592_v36  ;;  %10664 = vmatprep.mubr.f32.mxu0 %v22830_v59  ;;  %v10922_v36 = vsel %vm1759_vm10, %v21297_v42, %v21310_v18  ;;  %v18344_v42 = vld [vmem:[%s22543_s1 + $0x40] sm:$0xff] }
 0x3b2   :  { %18340 = vmatmul.mubr.msk.f32.vlgmr.msra.gmra.mrb[4].mxu1 %vm131_vm2, %v18338_v33  ;;  %10766 = vmatprep.subr.mxu0 %v10759_v11  ;;  %v21452_v33 = vsel %vm1569_vm9, %v21250_v17, %v21258_v30  ;;  %v18341_v11 = vld [vmem:[%s22543_s1 + $0x38] sm:$0xff]  ;;  %v10925_v35 = vmul.f32 %v10922_v36, %v23082_v45  ;;  %v11088_v36 = vsel %vm1949_vm11, %v21362_v39, %v21383_v44 }
 0x3b3   :  { %10672 = vmatpush1.msra.mxu1 %v10594_v22  ;;  %10735 = vmatprep.mubr.f32.mxu1 %v22830_v59  ;;  %23080 = vst [vmem:[#allocation111_spill] sm:$0xff] %v21452_v33  ;;  %v10920_v22 = vsel %vm1759_vm10, %v21336_v62, %v21345_v16  ;;  %v10760_v30 = vmul.f32 %v21452_v33, %v23083_v5  ;;  %v23086_v5 = vld [vmem:[#allocation43_spill] sm:$0xff]  ;;  %v23087_v33 = vld [vmem:[#allocation48_spill] sm:$0xff] }
 0x3b4   :  { %10837 = vmatprep.subr.mxu1 %v10761_v26  ;;  %v10927_v17 = vmul.f32 %v10920_v22, %v22960_v15  ;;  %v11251_v26 = vpop.permute.xlu1 %11250  ;;  %v11411_v22 = vpop.permute.xlu0 %11410  ;;  %v11086_v16 = vsel %vm1949_vm11, %v21391_v47, %v11085_v50 }
 0x3b8   :  { %18342 = vmatmul.mubr.msk.f32.vlgmr.msra.gmra.mrb[4].mxu0 %vm131_vm2, %v18341_v11  ;;  %v11413_v45 = vpop.permute.xlu1 %11412 }
 0x3b9   :  { %10767 = vmatpush1.msra.mxu0 %v10758_v27  ;;  %10830 = vmatprep.mubr.f32.mxu0 %v22830_v59  ;;  %v10921_v27 = vsel %vm1759_vm10, %v21310_v18, %v21336_v62  ;;  %v11093_v62 = vmul.f32 %v11086_v16, %v23087_v33  ;;  %v11415_v18 = vpop.permute.xlu0 %11414 }
 0x3ba   :  { %18343 = vmatmul.mubr.msk.f32.vlgmr.msra.gmra.mrb[4].mxu1 %vm131_vm2, %v18341_v11  ;;  %10932 = vmatprep.subr.mxu0 %v10925_v35  ;;  %v23084_v11 = vld [vmem:[#allocation42_spill] sm:$0xff]  ;;  %v23085_v35 = vld [vmem:[#allocation45_spill] sm:$0xff]  ;;  %v10926_v34 = vmul.f32 %v10921_v27, %v23086_v5  ;;  %v23093_v5 = vld [vmem:[#allocation52_spill] sm:$0xff] }
 0x3bb   :  { %10838 = vmatpush1.msra.mxu1 %v10760_v30  ;;  %10901 = vmatprep.mubr.f32.mxu1 %v22830_v59  ;;  %v10924_v15 = vmul.f32 %v10923_v49, %v23084_v11  ;;  %v11091_v30 = vmul.f32 %v11088_v36, %v23085_v35  ;;  %v11089_v49 = vsel %vm1949_vm11, %v11085_v50, %v21362_v39  ;;  %v23089_v27 = vld [vmem:[#allocation46_spill] sm:$0xff]  ;;  %v18347_v39 = vld [vmem:[%s22543_s1 + $0x48] sm:$0xff]  ;;  %v23091_v50 = vld [vmem:[#allocation49_spill] sm:$0xff] }
 0x3bc   :  { %11003 = vmatprep.subr.mxu1 %v10927_v17  ;;  %v11254_v17 = vsel %vm23088_vm15, %v21428_v8, %v21441_v60  ;;  %v11417_v36 = vpop.permute.xlu1 %11416  ;;  %vm23095_vm15 = vcmp.lt.s32.totalorder %v19128_v13, 1 }
 0x3bd   :  { %v11257_v16 = vmul.f32 %v11254_v17, %v23091_v50  ;;  %v11727_v35 = vpop.permute.xlu0 %11726 }
 0x3c0   :  { %18345 = vmatmul.mubr.msk.f32.vlgmr.msra.gmra.mrb[4].mxu0 %vm131_vm2, %v18344_v42 }
 0x3c1   :  { %10933 = vmatpush1.msra.mxu0 %v10924_v15  ;;  %10996 = vmatprep.mubr.f32.mxu0 %v22830_v59  ;;  %v11087_v15 = vsel %vm1949_vm11, %v21383_v44, %v21391_v47  ;;  %v11729_v44 = vpop.permute.xlu1 %11728 }
 0x3c2   :  { %18346 = vmatmul.mubr.msk.f32.vlgmr.msra.gmra.mrb[4].mxu1 %vm131_vm2, %v18344_v42  ;;  %11098 = vmatprep.subr.mxu0 %v11091_v30  ;;  %v11090_v42 = vmul.f32 %v11089_v49, %v23089_v27  ;;  %v23092_v30 = vld [vmem:[#allocation47_spill] sm:$0xff]  ;;  %v11420_v49 = vsel %vm23095_vm15, %v11411_v22, %v11413_v45 }
 0x3c3   :  { %11004 = vmatpush1.msra.mxu1 %v10926_v34  ;;  %11067 = vmatprep.mubr.f32.mxu1 %v22830_v59  ;;  %v11252_v34 = vsel %vm23090_vm13, %v11249_v32, %v11251_v26  ;;  %v11092_v33 = vmul.f32 %v11087_v15, %v23092_v30  ;;  %vm23096_vm13 = vmmov %vm23094_vm12  ;;  %v23097_v15 = vld [vmem:[#allocation50_spill] sm:$0xff] }
 0x3c4   :  { %11169 = vmatprep.subr.mxu1 %v11093_v62  ;;  %v11259_v47 = vmul.f32 %v11252_v34, %v23093_v5  ;;  %v11255_v62 = vsel %vm23094_vm12, %v11251_v26, %v21428_v8  ;;  %v11253_v17 = vsel %vm23096_vm13, %v21441_v60, %v11249_v32  ;;  %vm23098_vm12 = vmmov %vm23095_vm15  ;;  %v23099_v26 = vld [vmem:[#allocation53_spill] sm:$0xff]  ;;  %v23100_v5 = vld [vmem:[#allocation51_spill] sm:$0xff] }
 0x3c5   :  { %v11418_v8 = vsel %vm23098_vm12, %v11415_v18, %v11417_v36  ;;  %v11423_v34 = vmul.f32 %v11420_v49, %v23099_v26  ;;  %v11258_v50 = vmul.f32 %v11253_v17, %v23100_v5  ;;  %vm23101_vm15 = vmmov %vm23098_vm12 }
 0x3c6   :  { %v11425_v32 = vmul.f32 %v11418_v8, %v22971_v55  ;;  %v11421_v60 = vsel %vm23101_vm15, %v11417_v36, %v11411_v22  ;;  %vm23102_vm13 = vmmov %vm23098_vm12  ;;  %v18931_v36 = vld [vmem:[#allocation2 + $0x8] sm:$0xff]  ;;  %vm23103_vm12 = vcmp.lt.s32.totalorder %v19128_v13, 127  ;;  %v18356_v8 = vld [vmem:[%s22543_s1 + $0x60] sm:$0xff] }
 0x3c7   :  { %v11422_v17 = vmul.f32 %v11421_v60, %v22970_v37  ;;  %vm23104_vm15 = vmmov %vm23103_vm12  ;;  %v23113_v37 = vld [vmem:[#allocation62_spill] sm:$0xff] }
 0x3c8   :  { %18348 = vmatmul.mubr.msk.f32.vlgmr.msra.gmra.mrb[4].mxu0 %vm131_vm2, %v18347_v39 }
 0x3c9   :  { %11099 = vmatpush1.msra.mxu0 %v11090_v42  ;;  %11162 = vmatprep.mubr.f32.mxu0 %v22830_v59  ;;  %v11256_v42 = vmul.f32 %v11255_v62, %v23097_v15  ;;  %v11419_v62 = vsel %vm23102_vm13, %v11413_v45, %v11415_v18  ;;  %vm23106_vm13 = vmmov %vm23103_vm12 }
 0x3ca   :  { %18349 = vmatmul.mubr.msk.f32.vlgmr.msra.gmra.mrb[4].mxu1 %vm131_vm2, %v18347_v39  ;;  %11264 = vmatprep.subr.mxu0 %v11257_v16  ;;  %v18350_v39 = vld [vmem:[%s22543_s1 + $0x50] sm:$0xff]  ;;  %v11733_v16 = vpop.permute.xlu1 %11732 }
 0x3cb   :  { %11170 = vmatpush1.msra.mxu1 %v11092_v33  ;;  %11233 = vmatprep.mubr.f32.mxu1 %v22830_v59  ;;  %v11731_v33 = vpop.permute.xlu0 %11730 }
 0x3cc   :  { %11335 = vmatprep.subr.mxu1 %v11259_v47  ;;  %v11735_v18 = vsel %vm23103_vm12, %v11729_v44, %v11731_v33  ;;  %vm23107_vm12 = vcmp.lt.s32.totalorder %v19128_v13, 121 }
 0x3ce   :  { %v11895_v49 = vpop.permute.xlu1 %11894 }
 0x3cf   :  { %v11893_v47 = vpop.permute.xlu0 %11892 }
 0x3d0   :  { %18351 = vmatmul.mubr.msk.f32.vlgmr.msra.gmra.mrb[4].mxu0 %vm131_vm2, %v18350_v39 }
 0x3d1   :  { %11265 = vmatpush1.msra.mxu0 %v11256_v42  ;;  %11328 = vmatprep.mubr.f32.mxu0 %v22830_v59  ;;  %v18353_v42 = vld [vmem:[%s22543_s1 + $0x58] sm:$0xff] }
 0x3d2   :  { %18352 = vmatmul.mubr.msk.f32.vlgmr.msra.gmra.mrb[4].mxu1 %vm131_vm2, %v18350_v39  ;;  %11430 = vmatprep.subr.mxu0 %v11423_v34  ;;  %v11424_v39 = vmul.f32 %v11419_v62, %v22972_v56  ;;  %v11899_v45 = vpop.permute.xlu1 %11898  ;;  %v11737_v34 = vsel %vm23104_vm15, %v11733_v16, %v11727_v35  ;;  %v23105_v62 = vld [vmem:[#allocation58_spill] sm:$0xff]  ;;  %vm23108_vm15 = vmmov %vm23106_vm13  ;;  %v23112_v56 = vld [vmem:[#allocation60_spill] sm:$0xff] }
 0x3d3   :  { %11336 = vmatpush1.msra.mxu1 %v11258_v50  ;;  %11399 = vmatprep.mubr.f32.mxu1 %v22830_v59  ;;  %v11897_v22 = vpop.permute.xlu0 %11896  ;;  %v18932_v50 = vld [vmem:[#allocation2 + $0x18] sm:$0xff] }
 0x3d4   :  { %11501 = vmatprep.subr.mxu1 %v11425_v32  ;;  %v11739_v32 = vmul.f32 %v11735_v18, %v22974_v29  ;;  %v11901_v18 = vsel %vm23107_vm12, %v11895_v49, %v11897_v22 }
 0x3d7   :  { %v12059_v60 = vpop.permute.xlu0 %12058 }
 0x3d8   :  { %18354 = vmatmul.mubr.msk.f32.vlgmr.msra.gmra.mrb[4].mxu0 %vm131_vm2, %v18353_v42 }
 0x3d9   :  { %11431 = vmatpush1.msra.mxu0 %v11422_v17  ;;  %11494 = vmatprep.mubr.f32.mxu0 %v22830_v59  ;;  %v11741_v17 = vmul.f32 %v11737_v34, %v23105_v62  ;;  %v11734_v34 = vsel %vm23108_vm15, %v11731_v33, %v11733_v16  ;;  %v11902_v16 = vsel %vm23107_vm12, %v11893_v47, %v11895_v49  ;;  %vm23114_vm15 = vcmp.lt.s32.totalorder %v19128_v13, 120  ;;  %v23117_v49 = vld [vmem:[#allocation67_spill] sm:$0xff] }
 0x3da   :  { %18355 = vmatmul.mubr.msk.f32.vlgmr.msra.gmra.mrb[4].mxu1 %vm131_vm2, %v18353_v42  ;;  %11580 = vmatprep.subr.mxu0 %v18931_v36  ;;  %v12061_v42 = vpop.permute.xlu1 %12060  ;;  %v11736_v36 = vsel %vm23106_vm13, %v11727_v35, %v11729_v44  ;;  %v18359_v35 = vld [vmem:[%s22543_s1 + $0x68] sm:$0xff]  ;;  %vm23110_vm13 = vmmov %vm23107_vm12  ;;  %v11740_v55 = vmul.f32 %v11734_v34, %v23112_v56  ;;  %v11904_v34 = vmul.f32 %v11902_v16, %v22982_v23 }
 0x3db   :  { %11502 = vmatpush1.msra.mxu1 %v11424_v39  ;;  %11565 = vmatprep.mubr.f32.mxu1 %v22830_v59  ;;  %v18933_v39 = vld [vmem:[#allocation2] sm:$0xff]  ;;  %v11903_v44 = vsel %vm23110_vm13, %v11899_v45, %v11893_v47  ;;  %vm23115_vm13 = vmmov %vm23107_vm12  ;;  %v18362_v47 = vld [vmem:[%s22543_s1 + $0x70] sm:$0xff] }
 0x3dc   :  { %11651 = vmatprep.subr.mxu1 %v18932_v50  ;;  %v18934_v50 = vld [vmem:[#allocation2 + $0x10] sm:$0xff]  ;;  %v11907_v33 = vmul.f32 %v11903_v44, %v23113_v37  ;;  %vm23116_vm12 = vmmov %vm23114_vm15  ;;  %v23118_v44 = vld [vmem:[#allocation64_spill] sm:$0xff] }
 0x3dd   :  { %v23119_v37 = vld [vmem:[#allocation68_spill] sm:$0xff] }
 0x3de   :  { %v12065_v29 = vpop.permute.xlu1 %12064 }
 0x3e0   :  { %18357 = vmatmul.mubr.msk.f32.vlgmr.msra.gmra.mrb[4].mxu0 %vm131_vm2, %v18356_v8 }
 0x3e1   :  { %11581 = vmatpush1.msra.mxu0 %v18933_v39  ;;  %11644 = vmatprep.mubr.f32.mxu0 %v22830_v59  ;;  %v23109_v39 = vld [vmem:[#allocation59_spill] sm:$0xff] }
 0x3e2   :  { %18358 = vmatmul.mubr.msk.f32.vlgmr.msra.gmra.mrb[4].mxu1 %vm131_vm2, %v18356_v8  ;;  %11746 = vmatprep.subr.mxu0 %v11739_v32  ;;  %v11738_v62 = vmul.f32 %v11736_v36, %v23109_v39  ;;  %v12063_v8 = vpop.permute.xlu0 %12062  ;;  %v23111_v32 = vld [vmem:[#allocation61_spill] sm:$0xff] }
 0x3e3   :  { %11652 = vmatpush1.msra.mxu1 %v18934_v50  ;;  %11715 = vmatprep.mubr.f32.mxu1 %v22830_v59  ;;  %v11905_v50 = vmul.f32 %v11901_v18, %v23111_v32  ;;  %v11900_v18 = vsel %vm23115_vm13, %v11897_v22, %v11899_v45  ;;  %vm23121_vm13 = vmmov %vm23116_vm12 }
 0x3e4   :  { %11817 = vmatprep.subr.mxu1 %v11741_v17  ;;  %v12067_v17 = vsel %vm23114_vm15, %v12061_v42, %v12063_v8  ;;  %vm23120_vm15 = vmmov %vm23116_vm12 }
 0x3e5   :  { %v12068_v45 = vsel %vm23120_vm15, %v12059_v60, %v12061_v42  ;;  %vm23253_vm15 = vcmp.lt.s32.totalorder %v19128_v13, 121 }
 0x3e6   :  { %v12225_v36 = vpop.permute.xlu0 %12224 }
 0x3e8   :  { %18360 = vmatmul.mubr.msk.f32.vlgmr.msra.gmra.mrb[4].mxu0 %vm131_vm2, %v18359_v35 }
 0x3e9   :  { %11747 = vmatpush1.msra.mxu0 %v11738_v62  ;;  %11810 = vmatprep.mubr.f32.mxu0 %v22830_v59  ;;  %v12227_v62 = vpop.permute.xlu1 %12226 }
 0x3ea   :  { %18361 = vmatmul.mubr.msk.f32.vlgmr.msra.gmra.mrb[4].mxu1 %vm131_vm2, %v18359_v35  ;;  %11912 = vmatprep.subr.mxu0 %v11905_v50  ;;  %v12071_v35 = vmul.f32 %v12067_v17, %v23117_v49  ;;  %v11906_v50 = vmul.f32 %v11900_v18, %v23118_v44  ;;  %v12229_v22 = vpop.permute.xlu0 %12228  ;;  %v12066_v17 = vsel %vm23121_vm13, %v12063_v8, %v12065_v29  ;;  %vm23254_vm13 = vmmov %vm23253_vm15 }
 0x3eb   :  { %11818 = vmatpush1.msra.mxu1 %v11740_v55  ;;  %11881 = vmatprep.mubr.f32.mxu1 %v22830_v59  ;;  %v12069_v55 = vsel %vm23116_vm12, %v12065_v29, %v12059_v60  ;;  %v12233_v16 = vsel %vm3236_vm14, %v12227_v62, %v12229_v22  ;;  %v12070_v18 = vmul.f32 %v12068_v45, %v22989_v20  ;;  %v18365_v60 = vld [vmem:[%s22543_s1 + $0x78] sm:$0xff] }
 0x3ec   :  { %11983 = vmatprep.subr.mxu1 %v11907_v33  ;;  %v12073_v32 = vmul.f32 %v12069_v55, %v23119_v37  ;;  %v12234_v29 = vsel %vm3236_vm14, %v12225_v36, %v12227_v62  ;;  %v12393_v62 = vmul.f32 %v21123_v48, %v19881_v46  ;;  %v12545_v45 = vmul.f32 %v21117_v54, %v19908_v52 }
 0x3ed   :  { %v12231_v33 = vpop.permute.xlu1 %12230  ;;  %v12547_v48 = vmul.f32 %v21089_v28, %v19905_v7  ;;  %v12699_v54 = vmul.f32 %v21190_v3, %v19933_v31  ;;  %v23124_v28 = vld [vmem:[#allocation70_spill] sm:$0xff]  ;;  %v23125_v3 = vld [vmem:[#allocation71_spill] sm:$0xff] }
 0x3ee   :  { %v12235_v42 = vsel %vm3236_vm14, %v12231_v33, %v12225_v36  ;;  %v12232_v8 = vsel %vm3236_vm14, %v12229_v22, %v12231_v33  ;;  %v12391_v36 = vmul.f32 %v21137_v38, %v19872_v10  ;;  %v18371_v22 = vld [vmem:[%s22543_s1 + $0x88] sm:$0xff]  ;;  %v12390_v38 = vmul.f32 %v21097_v14, %v19897_v6  ;;  %v18374_v14 = vld [vmem:[%s22543_s1 + $0x90] sm:$0xff] }
 0x3ef   :  { %v12239_v55 = vmul.f32 %v12235_v42, %v19865_v57  ;;  %v12392_v33 = vmul.f32 %v21109_v19, %v19900_v40  ;;  %v12544_v19 = vmul.f32 %v21058_v21, %v19928_v51  ;;  %v18377_v21 = vld [vmem:[%s22543_s1 + $0x98] sm:$0xff]  ;;  %v12698_v42 = vmul.f32 %v21131_v63, %v23125_v3  ;;  %v18380_v63 = vld [vmem:[%s22543_s1 + $0xa0] sm:$0xff] }
 0x3f0   :  { %18363 = vmatmul.mubr.msk.f32.vlgmr.msra.gmra.mrb[4].mxu0 %vm131_vm2, %v18362_v47 }
 0x3f1   :  { %11913 = vmatpush1.msra.mxu0 %v11904_v34  ;;  %11976 = vmatprep.mubr.f32.mxu0 %v22830_v59  ;;  %v12237_v34 = vmul.f32 %v12233_v16, %v19862_v12  ;;  %v23122_v16 = vld [vmem:[#allocation69_spill] sm:$0xff] }
 0x3f2   :  { %18364 = vmatmul.mubr.msk.f32.vlgmr.msra.gmra.mrb[4].mxu1 %vm131_vm2, %v18362_v47  ;;  %12078 = vmatprep.subr.mxu0 %v12071_v35  ;;  %v12072_v47 = vmul.f32 %v12066_v17, %v22990_v0  ;;  %v18368_v35 = vld [vmem:[%s22543_s1 + $0x80] sm:$0xff] }
 0x3f3   :  { %11984 = vmatpush1.msra.mxu1 %v11906_v50  ;;  %12047 = vmatprep.mubr.f32.mxu1 %v22830_v59  ;;  %v12238_v50 = vmul.f32 %v12232_v8, %v19859_v2  ;;  %v23123_v17 = vld [vmem:[#allocation63_spill] sm:$0xff] }
 0x3f4   :  { %12149 = vmatprep.subr.mxu1 %v12073_v32  ;;  %v12236_v32 = vmul.f32 %v12234_v29, %v19854_v24 }
 0x3f8   :  { %18366 = vmatmul.mubr.msk.f32.vlgmr.msra.gmra.mrb[4].mxu0 %vm131_vm2, %v18365_v60 }
 0x3f9   :  { %12079 = vmatpush1.msra.mxu0 %v12070_v18  ;;  %12142 = vmatprep.mubr.f32.mxu0 %v22830_v59  ;;  %v12546_v18 = vmul.f32 %v23123_v17, %v23122_v16  ;;  %v23139_v17 = vld [vmem:[#allocation36_spill] sm:$0xff] }
 0x3fa   :  { %18367 = vmatmul.mubr.msk.f32.vlgmr.msra.gmra.mrb[4].mxu1 %vm131_vm2, %v18365_v60  ;;  %12244 = vmatprep.subr.mxu0 %v12237_v34  ;;  %v12701_v60 = vmul.f32 %v21175_v4, %v23124_v28  ;;  %v23126_v34 = vld [vmem:[#allocation73_spill] sm:$0xff]  ;;  %v23128_v4 = vld [vmem:[#allocation74_spill] sm:$0xff] }
 0x3fb   :  { %12150 = vmatpush1.msra.mxu1 %v12072_v47  ;;  %12213 = vmatprep.mubr.f32.mxu1 %v22830_v59  ;;  %v12853_v47 = vmul.f32 %v21235_v9, %v23126_v34  ;;  %v12855_v8 = vmul.f32 %v21220_v58, %v23128_v4  ;;  %v23129_v9 = vld [vmem:[#allocation75_spill] sm:$0xff]  ;;  %v23134_v58 = vld [vmem:[#allocation78_spill] sm:$0xff] }
 0x3fc   :  { %12315 = vmatprep.subr.mxu1 %v12239_v55  ;;  %v23127_v55 = vld [vmem:[#allocation72_spill] sm:$0xff] }
 0x3fd   :  { %v12700_v29 = vmul.f32 %v21156_v53, %v23127_v55 }
 0x400   :  { %18369 = vmatmul.mubr.msk.f32.vlgmr.msra.gmra.mrb[4].mxu0 %vm131_vm2, %v18368_v35 }
 0x401   :  { %12245 = vmatpush1.msra.mxu0 %v12236_v32  ;;  %12308 = vmatprep.mubr.f32.mxu0 %v22830_v59  ;;  %v23130_v32 = vld [vmem:[#allocation65_spill] sm:$0xff] }
 0x402   :  { %18370 = vmatmul.mubr.msk.f32.vlgmr.msra.gmra.mrb[4].mxu1 %vm131_vm2, %v18368_v35  ;;  %12398 = vmatprep.subr.mxu0 %v12391_v36  ;;  %v12852_v53 = vmul.f32 %v23130_v32, %v23129_v9  ;;  %v23131_v35 = vld [vmem:[#allocation77_spill] sm:$0xff]  ;;  %v23132_v36 = vld [vmem:[#allocation76_spill] sm:$0xff] }
 0x403   :  { %12316 = vmatpush1.msra.mxu1 %v12238_v50  ;;  %12379 = vmatprep.mubr.f32.mxu1 %v22830_v59  ;;  %v13007_v50 = vmul.f32 %v21278_v1, %v23131_v35  ;;  %v18383_v1 = vld [vmem:[%s22543_s1 + $0xa8] sm:$0xff] }
 0x404   :  { %12469 = vmatprep.subr.mxu1 %v12393_v62  ;;  %v23133_v62 = vld [vmem:[#allocation66_spill] sm:$0xff]  ;;  %v23145_v32 = vld [vmem:[#allocation84_spill] sm:$0xff] }
 0x408   :  { %18372 = vmatmul.mubr.msk.f32.vlgmr.msra.gmra.mrb[4].mxu0 %vm131_vm2, %v18371_v22 }
 0x409   :  { %12399 = vmatpush1.msra.mxu0 %v12390_v38  ;;  %12462 = vmatprep.mubr.f32.mxu0 %v22830_v59  ;;  %v13009_v38 = vmul.f32 %v21265_v41, %v23134_v58  ;;  %v23140_v41 = vld [vmem:[#allocation82_spill] sm:$0xff]  ;;  %v23178_v58 = vld [vmem:[#allocation12_spill] sm:$0xff] }
 0x40a   :  { %18373 = vmatmul.mubr.msk.f32.vlgmr.msra.gmra.mrb[4].mxu1 %vm131_vm2, %v18371_v22  ;;  %12552 = vmatprep.subr.mxu0 %v12545_v45  ;;  %v12854_v22 = vmul.f32 %v23133_v62, %v23132_v36  ;;  %v23135_v45 = vld [vmem:[#allocation79_spill] sm:$0xff]  ;;  %v23147_v62 = vld [vmem:[#allocation86_spill] sm:$0xff] }
 0x40b   :  { %12470 = vmatpush1.msra.mxu1 %v12392_v33  ;;  %12533 = vmatprep.mubr.f32.mxu1 %v22830_v59  ;;  %v23136_v33 = vld [vmem:[#allocation97_spill] sm:$0xff]  ;;  %v23179_v36 = vld [vmem:[#allocation14_spill] sm:$0xff] }
 0x40c   :  { %12623 = vmatprep.subr.mxu1 %v12547_v48  ;;  %v13006_v48 = vmul.f32 %v23136_v33, %v23135_v45  ;;  %v23150_v33 = vld [vmem:[#allocation98_spill] sm:$0xff] }
 0x410   :  { %18375 = vmatmul.mubr.msk.f32.vlgmr.msra.gmra.mrb[4].mxu0 %vm131_vm2, %v18374_v14 }
 0x411   :  { %12553 = vmatpush1.msra.mxu0 %v12544_v19  ;;  %12616 = vmatprep.mubr.f32.mxu0 %v22830_v59 }
 0x412   :  { %18376 = vmatmul.mubr.msk.f32.vlgmr.msra.gmra.mrb[4].mxu1 %vm131_vm2, %v18374_v14  ;;  %12706 = vmatprep.subr.mxu0 %v12699_v54  ;;  %v23137_v14 = vld [vmem:[#allocation81_spill] sm:$0xff]  ;;  %v23138_v54 = vld [vmem:[#allocation80_spill] sm:$0xff] }
 0x413   :  { %12624 = vmatpush1.msra.mxu1 %v12546_v18  ;;  %12687 = vmatprep.mubr.f32.mxu1 %v22830_v59  ;;  %v13161_v19 = vmul.f32 %v21323_v43, %v23137_v14  ;;  %v13008_v18 = vmul.f32 %v23139_v17, %v23138_v54  ;;  %v18386_v43 = vld [vmem:[%s22543_s1 + $0xb0] sm:$0xff] }
 0x414   :  { %12777 = vmatprep.subr.mxu1 %v12701_v60  ;;  %v23141_v60 = vld [vmem:[#allocation101_spill] sm:$0xff] }
 0x415   :  { %v23175_v14 = vld [vmem:[#allocation9_spill] sm:$0xff] }
 0x418   :  { %18378 = vmatmul.mubr.msk.f32.vlgmr.msra.gmra.mrb[4].mxu0 %vm131_vm2, %v18377_v21 }
 0x419   :  { %12707 = vmatpush1.msra.mxu0 %v12698_v42  ;;  %12770 = vmatprep.mubr.f32.mxu0 %v22830_v59  ;;  %v23142_v42 = vld [vmem:[#allocation83_spill] sm:$0xff] }
 0x41a   :  { %18379 = vmatmul.mubr.msk.f32.vlgmr.msra.gmra.mrb[4].mxu1 %vm131_vm2, %v18377_v21  ;;  %12860 = vmatprep.subr.mxu0 %v12853_v47  ;;  %v13163_v21 = vmul.f32 %v23141_v60, %v23140_v41  ;;  %v23143_v47 = vld [vmem:[#allocation99_spill] sm:$0xff]  ;;  %v23174_v41 = vld [vmem:[#allocation10_spill] sm:$0xff] }
 0x41b   :  { %12778 = vmatpush1.msra.mxu1 %v12700_v29  ;;  %12841 = vmatprep.mubr.f32.mxu1 %v22830_v59  ;;  %v13160_v29 = vmul.f32 %v23143_v47, %v23142_v42  ;;  %v23153_v60 = vld [vmem:[#allocation103_spill] sm:$0xff] }
 0x41c   :  { %12931 = vmatprep.subr.mxu1 %v12855_v8  ;;  %v23144_v8 = vld [vmem:[#allocation85_spill] sm:$0xff]  ;;  %v23155_v47 = vld [vmem:[#allocation107_spill] sm:$0xff] }
 0x420   :  { %18381 = vmatmul.mubr.msk.f32.vlgmr.msra.gmra.mrb[4].mxu0 %vm131_vm2, %v18380_v63 }
 0x421   :  { %12861 = vmatpush1.msra.mxu0 %v12852_v53  ;;  %12924 = vmatprep.mubr.f32.mxu0 %v22830_v59  ;;  %v23146_v53 = vld [vmem:[#allocation40_spill] sm:$0xff] }
 0x422   :  { %18382 = vmatmul.mubr.msk.f32.vlgmr.msra.gmra.mrb[4].mxu1 %vm131_vm2, %v18380_v63  ;;  %13014 = vmatprep.subr.mxu0 %v13007_v50  ;;  %v13315_v63 = vmul.f32 %v21368_v25, %v23144_v8  ;;  %v13162_v50 = vmul.f32 %v23146_v53, %v23145_v32  ;;  %v18389_v25 = vld [vmem:[%s22543_s1 + $0xb8] sm:$0xff]  ;;  %v23157_v53 = vld [vmem:[#allocation105_spill] sm:$0xff]  ;;  %v23170_v32 = vld [vmem:[#allocation3_spill] sm:$0xff] }
 0x423   :  { %12932 = vmatpush1.msra.mxu1 %v12854_v22  ;;  %12995 = vmatprep.mubr.f32.mxu1 %v22830_v59  ;;  %v23148_v22 = vld [vmem:[#allocation100_spill] sm:$0xff]  ;;  %v23171_v8 = vld [vmem:[#allocation6_spill] sm:$0xff] }
 0x424   :  { %13085 = vmatprep.subr.mxu1 %v13009_v38  ;;  %v13317_v38 = vmul.f32 %v23148_v22, %v23147_v62  ;;  %v23158_v22 = vld [vmem:[#allocation93_spill] sm:$0xff] }
 0x428   :  { %18384 = vmatmul.mubr.msk.f32.vlgmr.msra.gmra.mrb[4].mxu0 %vm131_vm2, %v18383_v1 }
 0x429   :  { %13015 = vmatpush1.msra.mxu0 %v13006_v48  ;;  %13078 = vmatprep.mubr.f32.mxu0 %v22830_v59 }
 0x42a   :  { %18385 = vmatmul.mubr.msk.f32.vlgmr.msra.gmra.mrb[4].mxu1 %vm131_vm2, %v18383_v1  ;;  %13168 = vmatprep.subr.mxu0 %v13161_v19  ;;  %v23149_v1 = vld [vmem:[#allocation87_spill] sm:$0xff]  ;;  %v23151_v19 = vld [vmem:[#allocation89_spill] sm:$0xff] }
 0x42b   :  { %13086 = vmatpush1.msra.mxu1 %v13008_v18  ;;  %13149 = vmatprep.mubr.f32.mxu1 %v22830_v59  ;;  %v13314_v48 = vmul.f32 %v23150_v33, %v23149_v1  ;;  %v13469_v17 = vmul.f32 %v21411_v61, %v23151_v19  ;;  %v23152_v18 = vld [vmem:[#allocation88_spill] sm:$0xff]  ;;  %v18392_v61 = vld [vmem:[%s22543_s1 + $0xc0] sm:$0xff] }
 0x42c   :  { %13239 = vmatprep.subr.mxu1 %v13163_v21  ;;  %v13316_v21 = vmul.f32 %v23153_v60, %v23152_v18  ;;  %v23160_v33 = vld [vmem:[#allocation92_spill] sm:$0xff]  ;;  %v23162_v60 = vld [vmem:[#allocation94_spill] sm:$0xff] }
 0x430   :  { %18387 = vmatmul.mubr.msk.f32.vlgmr.msra.gmra.mrb[4].mxu0 %vm131_vm2, %v18386_v43 }
 0x431   :  { %13169 = vmatpush1.msra.mxu0 %v13160_v29  ;;  %13232 = vmatprep.mubr.f32.mxu0 %v22830_v59 }
 0x432   :  { %18388 = vmatmul.mubr.msk.f32.vlgmr.msra.gmra.mrb[4].mxu1 %vm131_vm2, %v18386_v43  ;;  %13322 = vmatprep.subr.mxu0 %v13315_v63  ;;  %v23154_v43 = vld [vmem:[#allocation90_spill] sm:$0xff]  ;;  %v23156_v63 = vld [vmem:[#allocation91_spill] sm:$0xff] }
 0x433   :  { %13240 = vmatpush1.msra.mxu1 %v13162_v50  ;;  %13303 = vmatprep.mubr.f32.mxu1 %v22830_v59  ;;  %v13471_v29 = vmul.f32 %v23155_v47, %v23154_v43  ;;  %v13468_v50 = vmul.f32 %v23157_v53, %v23156_v63  ;;  %v23164_v53 = vld [vmem:[#allocation95_spill] sm:$0xff] }
 0x434   :  { %13393 = vmatprep.subr.mxu1 %v13317_v38  ;;  %v23159_v38 = vld [vmem:[#allocation111_spill] sm:$0xff] }
 0x438   :  { %18390 = vmatmul.mubr.msk.f32.vlgmr.msra.gmra.mrb[4].mxu0 %vm131_vm2, %v18389_v25 }
 0x439   :  { %13323 = vmatpush1.msra.mxu0 %v13314_v48  ;;  %13386 = vmatprep.mubr.f32.mxu0 %v22830_v59  ;;  %v23161_v48 = vld [vmem:[#allocation102_spill] sm:$0xff] }
 0x43a   :  { %18391 = vmatmul.mubr.msk.f32.vlgmr.msra.gmra.mrb[4].mxu1 %vm131_vm2, %v18389_v25  ;;  %13476 = vmatprep.subr.mxu0 %v13469_v17  ;;  %v13623_v25 = vmul.f32 %v23159_v38, %v23158_v22  ;;  %v13470_v17 = vmul.f32 %v23161_v48, %v23160_v33  ;;  %v23165_v38 = vld [vmem:[#allocation104_spill] sm:$0xff]  ;;  %v23167_v33 = vld [vmem:[#allocation109_spill] sm:$0xff] }
 0x43b   :  { %13394 = vmatpush1.msra.mxu1 %v13316_v21  ;;  %13457 = vmatprep.mubr.f32.mxu1 %v22830_v59  ;;  %v23163_v21 = vld [vmem:[#allocation106_spill] sm:$0xff]  ;;  %v13622_v48 = vmul.f32 %v23165_v38, %v23164_v53 }
 0x43c   :  { %13547 = vmatprep.subr.mxu1 %v13471_v29  ;;  %v13625_v47 = vmul.f32 %v23163_v21, %v23162_v60  ;;  %v18395_v29 = vld [vmem:[%s22543_s1 + $0xc8] sm:$0xff] }
 0x440   :  { %18393 = vmatmul.mubr.msk.f32.vlgmr.msra.gmra.mrb[4].mxu0 %vm131_vm2, %v18392_v61 }
 0x441   :  { %13477 = vmatpush1.msra.mxu0 %v13468_v50  ;;  %13540 = vmatprep.mubr.f32.mxu0 %v22830_v59  ;;  %v23166_v50 = vld [vmem:[#allocation96_spill] sm:$0xff] }
 0x442   :  { %18394 = vmatmul.mubr.msk.f32.vlgmr.msra.gmra.mrb[4].mxu1 %vm131_vm2, %v18392_v61  ;;  %13630 = vmatprep.subr.mxu0 %v13623_v25  ;;  %v13624_v61 = vmul.f32 %v23167_v33, %v23166_v50  ;;  %v18398_v25 = vld [vmem:[%s22543_s1 + $0xd0] sm:$0xff] }
 0x443   :  { %13548 = vmatpush1.msra.mxu1 %v13470_v17  ;;  %13611 = vmatprep.mubr.f32.mxu1 %v22830_v59 }
 0x444   :  { %13701 = vmatprep.subr.mxu1 %v13625_v47 }
 0x448   :  { %18396 = vmatmul.mubr.msk.f32.vlgmr.msra.gmra.mrb[4].mxu0 %vm131_vm2, %v18395_v29 }
 0x449   :  { %13631 = vmatpush1.msra.mxu0 %v13622_v48  ;;  %13694 = vmatprep.mubr.f32.mxu0 %v22830_v59 }
 0x44a   :  { %18397 = vmatmul.mubr.msk.f32.vlgmr.msra.gmra.mrb[4].mxu1 %vm131_vm2, %v18395_v29  ;;  %v13780_v29 = vpop.permute.xlu0 %13779 }
 0x44b   :  { %13702 = vmatpush1.msra.mxu1 %v13624_v61  ;;  %13765 = vmatprep.mubr.f32.mxu1 %v22830_v59 }
 0x44f   :  { %v21776_v17 = vpop.f32.mrb[2].mxu0 }
 0x450   :  { %v21778_v21 = vpop.f32.mrb[3].mxu0  ;;  %18399 = vmatmul.mubr.msk.f32.vlgmr.msra.gmra.mrb[4].mxu0 %vm131_vm2, %v18398_v25 }
 0x451   :  { %v21781_v47 = vpop.f32.mrb[2].mxu1  ;;  %13887 = vmatprep.mubr.f32.mxu0 %v22830_v59 }
 0x452   :  { %v21784_v33 = vpop.f32.mrb[3].mxu1  ;;  %18400 = vmatmul.mubr.msk.f32.vlgmr.msra.gmra.mrb[4].mxu1 %vm131_vm2, %v18398_v25 }
 0x453   :  { %13958 = vmatprep.mubr.f32.mxu1 %v22830_v59 }
 0x523   :  { %v13696_v38 = vpop.f32.mrb[4].mxu0 }
 0x524   :  { %v21788_v48 = vadd.f32 %v13780_v29, %v13696_v38  ;;  %v13698_v61 = vpop.f32.mrb[5].mxu0  ;;  %v18956_v38 = vmov 1  }
 0x525   :  { %v21790_v50 = vadd.f32 %v13780_v29, %v13698_v61  ;;  %v13767_v53 = vpop.f32.mrb[4].mxu1  ;;  %18923 = vset.pattern.permute.xlu1 %v18956_v38  ;;  %18924 = vset.pattern.permute.xlu0 %v18956_v38  ;;  %v23168_v61 = vld [vmem:[#allocation4_spill] sm:$0xff] }
 0x526   :  { %v13769_v60 = vpop.f32.mrb[5].mxu1  ;;  %13803 = vrot.lane.b32.xlu1 %v21788_v48, %s18938_s19  ;;  %v21796_v22 = vadd.f32 %v13780_v29, %v13767_v53 }
 0x527   :  { %13805 = vrot.lane.b32.xlu0 %v21790_v50, %s18938_s19  ;;  %v21798_v25 = vadd.f32 %v13780_v29, %v13769_v60 }
 0x52a   :  { %13807 = vrot.lane.b32.xlu1 %v21796_v22, %s18938_s19 }
 0x52b   :  { %13809 = vrot.lane.b32.xlu0 %v21798_v25, %s18938_s19 }
 0x52e   :  { %13786 = vrot.lane.b32.xlu1 %v21788_v48, %s18939_s20 }
 0x52f   :  { %13788 = vrot.lane.b32.xlu0 %v21790_v50, %s18939_s20 }
 0x532   :  { %13790 = vrot.lane.b32.xlu1 %v21796_v22, %s18939_s20 }
 0x533   :  { %13792 = vrot.lane.b32.xlu0 %v21798_v25, %s18939_s20 }
 0x536   :  { %14110 = vrot.lane.b32.xlu1 %v21788_v48, %s18940_s21 }
 0x537   :  { %14112 = vrot.lane.b32.xlu0 %v21790_v50, %s18940_s21 }
 0x53a   :  { %14114 = vrot.lane.b32.xlu1 %v21796_v22, %s18940_s21 }
 0x53b   :  { %14116 = vrot.lane.b32.xlu0 %v21798_v25, %s18940_s21 }
 0x53e   :  { %14276 = vrot.lane.b32.xlu1 %v21788_v48, %s18941_s22 }
 0x53f   :  { %14278 = vrot.lane.b32.xlu0 %v21790_v50, %s18941_s22 }
 0x542   :  { %14280 = vrot.lane.b32.xlu1 %v21796_v22, %s18941_s22 }
 0x543   :  { %14282 = vrot.lane.b32.xlu0 %v21798_v25, %s18941_s22 }
 0x546   :  { %14442 = vrot.lane.b32.xlu1 %v21788_v48, %s18942_s23 }
 0x547   :  { %14444 = vrot.lane.b32.xlu0 %v21790_v50, %s18942_s23 }
 0x54a   :  { %14446 = vrot.lane.b32.xlu1 %v21796_v22, %s18942_s23 }
 0x54b   :  { %14448 = vrot.lane.b32.xlu0 %v21798_v25, %s18942_s23 }
 0x54e   :  { %14608 = vrot.lane.b32.xlu1 %v21788_v48, %s18943_s24 }
 0x54f   :  { %14610 = vrot.lane.b32.xlu0 %v21790_v50, %s18943_s24 }
 0x552   :  { %14612 = vrot.lane.b32.xlu1 %v21796_v22, %s18943_s24 }
 0x553   :  { %14614 = vrot.lane.b32.xlu0 %v21798_v25, %s18943_s24 }
 0x556   :  { %14774 = vrot.lane.b32.xlu1 %v21788_v48, %s18944_s25 }
 0x557   :  { %14776 = vrot.lane.b32.xlu0 %v21790_v50, %s18944_s25 }
 0x55a   :  { %14778 = vrot.lane.b32.xlu1 %v21796_v22, %s18944_s25 }
 0x55b   :  { %14780 = vrot.lane.b32.xlu0 %v21798_v25, %s18944_s25 }
 0x55e   :  { %14940 = vrot.lane.b32.xlu1 %v21788_v48, %s18945_s26 }
 0x55f   :  { %14942 = vrot.lane.b32.xlu0 %v21790_v50, %s18945_s26 }
 0x562   :  { %14944 = vrot.lane.b32.xlu1 %v21796_v22, %s18945_s26 }
 0x563   :  { %14946 = vrot.lane.b32.xlu0 %v21798_v25, %s18945_s26 }
 0x566   :  { %15106 = vrot.lane.b32.xlu1 %v21788_v48, %s18946_s27 }
 0x567   :  { %15108 = vrot.lane.b32.xlu0 %v21790_v50, %s18946_s27 }
 0x56a   :  { %15110 = vrot.lane.b32.xlu1 %v21796_v22, %s18946_s27 }
 0x56b   :  { %15112 = vrot.lane.b32.xlu0 %v21798_v25, %s18946_s27 }
 0x56e   :  { %15272 = vrot.lane.b32.xlu1 %v21788_v48, %s18947_s28 }
 0x56f   :  { %15274 = vrot.lane.b32.xlu0 %v21790_v50, %s18947_s28 }
 0x572   :  { %15276 = vrot.lane.b32.xlu1 %v21796_v22, %s18947_s28 }
 0x573   :  { %15278 = vrot.lane.b32.xlu0 %v21798_v25, %s18947_s28 }
 0x576   :  { %15438 = vrot.lane.b32.xlu1 %v21788_v48, %s18948_s29 }
 0x577   :  { %15440 = vrot.lane.b32.xlu0 %v21790_v50, %s18948_s29 }
 0x57a   :  { %15442 = vrot.lane.b32.xlu1 %v21796_v22, %s18948_s29 }
 0x57b   :  { %15444 = vrot.lane.b32.xlu0 %v21798_v25, %s18948_s29 }
 0x57e   :  { %15604 = vrot.lane.b32.xlu1 %v21788_v48, %s18949_s30 }
 0x57f   :  { %15606 = vrot.lane.b32.xlu0 %v21790_v50, %s18949_s30 }
 0x582   :  { %15608 = vrot.lane.b32.xlu1 %v21796_v22, %s18949_s30 }
 0x583   :  { %15610 = vrot.lane.b32.xlu0 %v21798_v25, %s18949_s30 }
 0x586   :  { %15770 = vrot.lane.b32.xlu1 %v21788_v48, %s18950_s5 }
 0x587   :  { %15772 = vrot.lane.b32.xlu0 %v21790_v50, %s18950_s5 }
 0x58a   :  { %15774 = vrot.lane.b32.xlu1 %v21796_v22, %s18950_s5 }
 0x58b   :  { %15776 = vrot.lane.b32.xlu0 %v21798_v25, %s18950_s5 }
 0x58e   :  { %16086 = vrot.lane.b32.xlu1 %v21788_v48, %s18951_s6 }
 0x58f   :  { %16088 = vrot.lane.b32.xlu0 %v21790_v50, %s18951_s6 }
 0x592   :  { %16090 = vrot.lane.b32.xlu1 %v21796_v22, %s18951_s6 }
 0x593   :  { %16092 = vrot.lane.b32.xlu0 %v21798_v25, %s18951_s6 }
 0x596   :  { %16252 = vrot.lane.b32.xlu1 %v21788_v48, %s18952_s11 }
 0x597   :  { %16254 = vrot.lane.b32.xlu0 %v21790_v50, %s18952_s11 }
 0x598   :  { %v13804_v60 = vpop.permute.xlu1 %13803 }
 0x599   :  { %v13806_v53 = vpop.permute.xlu0 %13805 }
 0x59a   :  { %v21914_v29 = vsel %vm99_vm0, %v13804_v60, %v13806_v53  ;;  %16256 = vrot.lane.b32.xlu1 %v21796_v22, %s18952_s11 }
 0x59b   :  { %v13816_v38 = vmul.f32 %v21914_v29, %v23168_v61  ;;  %16258 = vrot.lane.b32.xlu0 %v21798_v25, %s18952_s11  ;;  %v23169_v61 = vld [vmem:[#allocation5_spill] sm:$0xff] }
 0x59c   :  { %v13808_v63 = vpop.permute.xlu1 %13807 }
 0x59d   :  { %v13810_v43 = vpop.permute.xlu0 %13809  ;;  %13823 = vmatprep.subr.mxu0 %v13816_v38  ;;  %v21924_v18 = vsel %vm99_vm0, %v13806_v53, %v13808_v63 }
 0x59e   :  { %v21928_v19 = vsel %vm99_vm0, %v13808_v63, %v13810_v43  ;;  %v21932_v1 = vsel %vm99_vm0, %v13810_v43, %v13804_v60  ;;  %16418 = vrot.lane.b32.xlu1 %v21788_v48, %s18953_s14  ;;  %v18402_v63 = vld [vmem:[%s22543_s1 + $0xe0] sm:$0xff]  ;;  %v13817_v43 = vmul.f32 %v21924_v18, %v23171_v8  ;;  %vm23234_vm0 = vcmp.lt.s32.totalorder %v19128_v13, 7 }
 0x59f   :  { %v13815_v62 = vmul.f32 %v21932_v1, %v23169_v61  ;;  %v13818_v38 = vmul.f32 %v21928_v19, %v23170_v32  ;;  %16420 = vrot.lane.b32.xlu0 %v21790_v50, %s18953_s14  ;;  %v23172_v32 = vld [vmem:[#allocation7_spill] sm:$0xff] }
 0x5a0   :  { %v13787_v53 = vpop.permute.xlu1 %13786 }
 0x5a1   :  { %v13789_v60 = vpop.permute.xlu0 %13788  ;;  %13824 = vmatpush1.msra.mxu0 %v13815_v62  ;;  %13894 = vmatprep.subr.mxu1 %v13818_v38 }
 0x5a2   :  { %v21949_v61 = vsel %vm58_vm1, %v13787_v53, %v13789_v60  ;;  %16422 = vrot.lane.b32.xlu1 %v21796_v22, %s18953_s14  ;;  %18403 = vmatmul.mubr.msk.f32.vlgmr.msra.gmra.mrb[6].mxu0 %vm131_vm2, %v18402_v63 }
 0x5a3   :  { %v13799_v42 = vmul.f32 %v21949_v61, %v23172_v32  ;;  %13895 = vmatpush1.msra.mxu1 %v13817_v43  ;;  %16424 = vrot.lane.b32.xlu0 %v21798_v25, %s18953_s14 }
 0x5a4   :  { %18404 = vmatmul.mubr.msk.f32.vlgmr.msra.gmra.mrb[6].mxu1 %vm131_vm2, %v18402_v63  ;;  %v13791_v8 = vpop.permute.xlu1 %13790  ;;  %14032 = vmatprep.mubr.f32.mxu0 %v22830_v59  ;;  %v23173_v63 = vld [vmem:[#allocation8_spill] sm:$0xff] }
 0x5a5   :  { %v13793_v62 = vpop.permute.xlu0 %13792  ;;  %13968 = vmatprep.subr.mxu0 %v13799_v42  ;;  %14103 = vmatprep.mubr.f32.mxu1 %v22830_v59  ;;  %v21963_v38 = vsel %vm58_vm1, %v13789_v60, %v13791_v8  ;;  %v18401_v60 = vld [vmem:[%s22543_s1 + $0xd8] sm:$0xff] }
 0x5a6   :  { %v21967_v32 = vsel %vm58_vm1, %v13791_v8, %v13793_v62  ;;  %v21971_v43 = vsel %vm58_vm1, %v13793_v62, %v13787_v53  ;;  %16584 = vrot.lane.b32.xlu1 %v21788_v48, %s18954_s7  ;;  %v13800_v53 = vmul.f32 %v21963_v38, %v23175_v14  ;;  %vm23236_vm1 = vmmov %vm23234_vm0 }
 0x5a7   :  { %v13798_v42 = vmul.f32 %v21971_v43, %v23173_v63  ;;  %v13801_v54 = vmul.f32 %v21967_v32, %v23174_v41  ;;  %16586 = vrot.lane.b32.xlu0 %v21790_v50, %s18954_s7  ;;  %v23176_v41 = vld [vmem:[#allocation11_spill] sm:$0xff] }
 0x5a8   :  { %v14111_v8 = vpop.permute.xlu1 %14110 }
 0x5a9   :  { %v14113_v62 = vpop.permute.xlu0 %14112  ;;  %13969 = vmatpush1.msra.mxu0 %v13798_v42  ;;  %14039 = vmatprep.subr.mxu1 %v13801_v54 }
 0x5aa   :  { %v21988_v63 = vsel %vm430_vm3, %v14111_v8, %v14113_v62  ;;  %16588 = vrot.lane.b32.xlu1 %v21796_v22, %s18954_s7  ;;  %18405 = vmatmul.mubr.msk.f32.vlgmr.msra.gmra.mrb[6].mxu0 %vm131_vm2, %v18401_v60 }
 0x5ab   :  { %v14123_v45 = vmul.f32 %v21988_v63, %v23176_v41  ;;  %14040 = vmatpush1.msra.mxu1 %v13800_v53  ;;  %16590 = vrot.lane.b32.xlu0 %v21798_v25, %s18954_s7 }
 0x5ac   :  { %18406 = vmatmul.mubr.msk.f32.vlgmr.msra.gmra.mrb[6].mxu1 %vm131_vm2, %v18401_v60  ;;  %v14115_v14 = vpop.permute.xlu1 %14114  ;;  %14194 = vmatprep.mubr.f32.mxu0 %v22830_v59  ;;  %v18935_v60 = vld [vmem:[%s22544_s2] sm:$0xff] }
 0x5ad   :  { %v22001_v54 = vsel %vm430_vm3, %v14113_v62, %v14115_v14  ;;  %v14117_v42 = vpop.permute.xlu0 %14116  ;;  %14130 = vmatprep.subr.mxu0 %v14123_v45  ;;  %14265 = vmatprep.mubr.f32.mxu1 %v22830_v59 }
 0x5ae   :  { %v22006_v41 = vsel %vm430_vm3, %v14115_v14, %v14117_v42  ;;  %v22010_v53 = vsel %vm430_vm3, %v14117_v42, %v14111_v8  ;;  %9398 = vperm.xlu1 %18923, %v18935_v60   ;;  %v18407_v14 = vld [vmem:[%s22543_s1 + $0xe8] sm:$0xff]  ;;  %v18936_v8 = vld [vmem:[%s22544_s2] sm:$0xff]  ;;  %v23180_v42 = vld [vmem:[#allocation13_spill] sm:$0xff] }
 0x5af   :  { %23177 = vst [vmem:[#allocation108_spill] sm:$0xff] %v22006_v41  ;;  %v14122_v62 = vmul.f32 %v22010_v53, %v23178_v58  ;;  %v14125_v45 = vmul.f32 %v22006_v41, %v23179_v36  ;;  %18137 = vperm.xlu0 %18924, %v18936_v8   ;;  %v14124_v35 = vmul.f32 %v22001_v54, %v23180_v42  ;;  %v23182_v36 = vld [vmem:[#allocation15_spill] sm:$0xff]  ;;  %vm23237_vm3 = vmmov %vm23234_vm0 }
 0x5b0   :  { %v14277_v9 = vpop.permute.xlu1 %14276 }
 0x5b1   :  { %v14279_v60 = vpop.permute.xlu0 %14278  ;;  %14131 = vmatpush1.msra.mxu0 %v14122_v62  ;;  %14201 = vmatprep.subr.mxu1 %v14125_v45 }
 0x5b2   :  { %v22029_v58 = vsel %vm620_vm4, %v14277_v9, %v14279_v60  ;;  %18408 = vmatmul.mubr.msk.f32.vlgmr.msra.gmra.mrb[6].mxu0 %vm131_vm2, %v18407_v14  ;;  %14202 = vmatpush1.msra.mxu1 %v14124_v35 }
 0x5b3   :  { %23181 = vst [vmem:[#allocation113_spill] sm:$0xff] %v22029_v58  ;;  %v14289_v4 = vmul.f32 %v22029_v58, %v23182_v36  ;;  %14360 = vmatprep.mubr.f32.mxu0 %v22830_v59  ;;  %v23186_v36 = vld [vmem:[#allocation16_spill] sm:$0xff]  ;;  %v23187_v58 = vld [vmem:[#allocation18_spill] sm:$0xff] }
 0x5b4   :  { %18409 = vmatmul.mubr.msk.f32.vlgmr.msra.gmra.mrb[6].mxu1 %vm131_vm2, %v18407_v14  ;;  %v14281_v8 = vpop.permute.xlu1 %14280 }
 0x5b5   :  { %v22038_v42 = vsel %vm620_vm4, %v14279_v60, %v14281_v8  ;;  %v14283_v62 = vpop.permute.xlu0 %14282  ;;  %14296 = vmatprep.subr.mxu0 %v14289_v4  ;;  %14431 = vmatprep.mubr.f32.mxu1 %v22830_v59  ;;  %v18410_v4 = vld [vmem:[%s22543_s1 + $0xf0] sm:$0xff] }
 0x5b6   :  { %23183 = vst [vmem:[#allocation110_spill] sm:$0xff] %v22038_v42  ;;  %v22043_v45 = vsel %vm620_vm4, %v14281_v8, %v14283_v62  ;;  %v22047_v35 = vsel %vm620_vm4, %v14283_v62, %v14277_v9  ;;  %v23188_v60 = vld [vmem:[#allocation17_spill] sm:$0xff]  ;;  %v23190_v62 = vld [vmem:[#allocation19_spill] sm:$0xff]  ;;  %vm23238_vm4 = vmmov %vm23234_vm0 }
 0x5b7   :  { %23184 = vst [vmem:[#allocation112_spill] sm:$0xff] %v22043_v45  ;;  %23185 = vst [vmem:[#allocation42_spill] sm:$0xff] %v22047_v35  ;;  %v14288_v14 = vmul.f32 %v22047_v35, %v23186_v36  ;;  %v14291_v41 = vmul.f32 %v22043_v45, %v23187_v58  ;;  %v14290_v55 = vmul.f32 %v22038_v42, %v23188_v60 }
 0x5b8   :  { %v14443_v34 = vpop.permute.xlu1 %14442 }
 0x5b9   :  { %v14445_v8 = vpop.permute.xlu0 %14444  ;;  %14297 = vmatpush1.msra.mxu0 %v14288_v14  ;;  %14367 = vmatprep.subr.mxu1 %v14291_v41 }
 0x5ba   :  { %v22060_v9 = vsel %vm810_vm5, %v14443_v34, %v14445_v8  ;;  %18411 = vmatmul.mubr.msk.f32.vlgmr.msra.gmra.mrb[6].mxu0 %vm131_vm2, %v18410_v4  ;;  %14368 = vmatpush1.msra.mxu1 %v14290_v55 }
 0x5bb   :  { %23189 = vst [vmem:[#allocation46_spill] sm:$0xff] %v22060_v9  ;;  %v14455_v58 = vmul.f32 %v22060_v9, %v23190_v62  ;;  %14526 = vmatprep.mubr.f32.mxu0 %v22830_v59  ;;  %v23194_v62 = vld [vmem:[#allocation20_spill] sm:$0xff]  ;;  %v23195_v9 = vld [vmem:[#allocation22_spill] sm:$0xff] }
 0x5bc   :  { %18412 = vmatmul.mubr.msk.f32.vlgmr.msra.gmra.mrb[6].mxu1 %vm131_vm2, %v18410_v4  ;;  %v14447_v36 = vpop.permute.xlu1 %14446 }
 0x5bd   :  { %v22069_v60 = vsel %vm810_vm5, %v14445_v8, %v14447_v36  ;;  %v14449_v41 = vpop.permute.xlu0 %14448  ;;  %14462 = vmatprep.subr.mxu0 %v14455_v58  ;;  %14597 = vmatprep.mubr.f32.mxu1 %v22830_v59  ;;  %v18413_v8 = vld [vmem:[%s22543_s1 + $0xf8] sm:$0xff]  ;;  %v23196_v58 = vld [vmem:[#allocation21_spill] sm:$0xff] }
 0x5be   :  { %23191 = vst [vmem:[#allocation47_spill] sm:$0xff] %v22069_v60  ;;  %v22074_v14 = vsel %vm810_vm5, %v14447_v36, %v14449_v41  ;;  %v22078_v55 = vsel %vm810_vm5, %v14449_v41, %v14443_v34  ;;  %v14456_v35 = vmul.f32 %v22069_v60, %v23196_v58  ;;  %v23198_v41 = vld [vmem:[#allocation23_spill] sm:$0xff]  ;;  %vm23240_vm5 = vcmp.lt.s32.totalorder %v19128_v13, 1 }
 0x5bf   :  { %23192 = vst [vmem:[#allocation50_spill] sm:$0xff] %v22074_v14  ;;  %23193 = vst [vmem:[#allocation53_spill] sm:$0xff] %v22078_v55  ;;  %v14454_v4 = vmul.f32 %v22078_v55, %v23194_v62  ;;  %v14457_v45 = vmul.f32 %v22074_v14, %v23195_v9 }
 0x5c0   :  { %v14609_v42 = vpop.permute.xlu1 %14608 }
 0x5c1   :  { %v14611_v36 = vpop.permute.xlu0 %14610  ;;  %14463 = vmatpush1.msra.mxu0 %v14454_v4  ;;  %14533 = vmatprep.subr.mxu1 %v14457_v45 }
 0x5c2   :  { %v22091_v34 = vsel %vm999_vm6, %v14609_v42, %v14611_v36  ;;  %18414 = vmatmul.mubr.msk.f32.vlgmr.msra.gmra.mrb[6].mxu0 %vm131_vm2, %v18413_v8  ;;  %14534 = vmatpush1.msra.mxu1 %v14456_v35 }
 0x5c3   :  { %23197 = vst [vmem:[#allocation51_spill] sm:$0xff] %v22091_v34  ;;  %v14621_v9 = vmul.f32 %v22091_v34, %v23198_v41  ;;  %14692 = vmatprep.mubr.f32.mxu0 %v22830_v59  ;;  %v23202_v41 = vld [vmem:[#allocation24_spill] sm:$0xff]  ;;  %v23203_v34 = vld [vmem:[#allocation26_spill] sm:$0xff] }
 0x5c4   :  { %18415 = vmatmul.mubr.msk.f32.vlgmr.msra.gmra.mrb[6].mxu1 %vm131_vm2, %v18413_v8  ;;  %v14613_v62 = vpop.permute.xlu1 %14612 }
 0x5c5   :  { %v22100_v58 = vsel %vm999_vm6, %v14611_v36, %v14613_v62  ;;  %v14615_v45 = vpop.permute.xlu0 %14614  ;;  %14628 = vmatprep.subr.mxu0 %v14621_v9  ;;  %14763 = vmatprep.mubr.f32.mxu1 %v22830_v59  ;;  %v18416_v36 = vld [vmem:[%s22543_s1 + $0x100] sm:$0xff]  ;;  %v23204_v9 = vld [vmem:[#allocation25_spill] sm:$0xff] }
 0x5c6   :  { %23199 = vst [vmem:[#allocation59_spill] sm:$0xff] %v22100_v58  ;;  %v22105_v4 = vsel %vm999_vm6, %v14613_v62, %v14615_v45  ;;  %v22109_v35 = vsel %vm999_vm6, %v14615_v45, %v14609_v42  ;;  %v14622_v55 = vmul.f32 %v22100_v58, %v23204_v9  ;;  %v23206_v45 = vld [vmem:[#allocation27_spill] sm:$0xff]  ;;  %vm23241_vm6 = vmmov %vm23240_vm5 }
 0x5c7   :  { %23200 = vst [vmem:[#allocation60_spill] sm:$0xff] %v22105_v4  ;;  %23201 = vst [vmem:[#allocation67_spill] sm:$0xff] %v22109_v35  ;;  %v14620_v8 = vmul.f32 %v22109_v35, %v23202_v41  ;;  %v14623_v14 = vmul.f32 %v22105_v4, %v23203_v34 }
 0x5c8   :  { %v14775_v60 = vpop.permute.xlu1 %14774 }
 0x5c9   :  { %v14777_v62 = vpop.permute.xlu0 %14776  ;;  %14629 = vmatpush1.msra.mxu0 %v14620_v8  ;;  %14699 = vmatprep.subr.mxu1 %v14623_v14 }
 0x5ca   :  { %v22122_v42 = vsel %vm1189_vm7, %v14775_v60, %v14777_v62  ;;  %18417 = vmatmul.mubr.msk.f32.vlgmr.msra.gmra.mrb[6].mxu0 %vm131_vm2, %v18416_v36  ;;  %14700 = vmatpush1.msra.mxu1 %v14622_v55 }
 0x5cb   :  { %23205 = vst [vmem:[#allocation64_spill] sm:$0xff] %v22122_v42  ;;  %v14787_v34 = vmul.f32 %v22122_v42, %v23206_v45  ;;  %14858 = vmatprep.mubr.f32.mxu0 %v22830_v59  ;;  %v23210_v45 = vld [vmem:[#allocation28_spill] sm:$0xff]  ;;  %v23211_v42 = vld [vmem:[#allocation30_spill] sm:$0xff] }
 0x5cc   :  { %18418 = vmatmul.mubr.msk.f32.vlgmr.msra.gmra.mrb[6].mxu1 %vm131_vm2, %v18416_v36  ;;  %v14779_v41 = vpop.permute.xlu1 %14778 }
 0x5cd   :  { %v22131_v9 = vsel %vm1189_vm7, %v14777_v62, %v14779_v41  ;;  %v14781_v14 = vpop.permute.xlu0 %14780  ;;  %14794 = vmatprep.subr.mxu0 %v14787_v34  ;;  %14929 = vmatprep.mubr.f32.mxu1 %v22830_v59  ;;  %v18419_v62 = vld [vmem:[%s22543_s1 + $0x108] sm:$0xff]  ;;  %v23212_v34 = vld [vmem:[#allocation29_spill] sm:$0xff] }
 0x5ce   :  { %23207 = vst [vmem:[#allocation68_spill] sm:$0xff] %v22131_v9  ;;  %v22136_v8 = vsel %vm1189_vm7, %v14779_v41, %v14781_v14  ;;  %v22140_v55 = vsel %vm1189_vm7, %v14781_v14, %v14775_v60  ;;  %v14788_v35 = vmul.f32 %v22131_v9, %v23212_v34  ;;  %v23214_v14 = vld [vmem:[#allocation31_spill] sm:$0xff]  ;;  %vm23242_vm7 = vmmov %vm23240_vm5 }
 0x5cf   :  { %23208 = vst [vmem:[#allocation69_spill] sm:$0xff] %v22136_v8  ;;  %23209 = vst [vmem:[#allocation63_spill] sm:$0xff] %v22140_v55  ;;  %v14786_v36 = vmul.f32 %v22140_v55, %v23210_v45  ;;  %v14789_v4 = vmul.f32 %v22136_v8, %v23211_v42 }
 0x5d0   :  { %v14941_v58 = vpop.permute.xlu1 %14940 }
 0x5d1   :  { %v14943_v41 = vpop.permute.xlu0 %14942  ;;  %14795 = vmatpush1.msra.mxu0 %v14786_v36  ;;  %14865 = vmatprep.subr.mxu1 %v14789_v4 }
 0x5d2   :  { %v22153_v60 = vsel %vm1380_vm8, %v14941_v58, %v14943_v41  ;;  %18420 = vmatmul.mubr.msk.f32.vlgmr.msra.gmra.mrb[6].mxu0 %vm131_vm2, %v18419_v62  ;;  %14866 = vmatpush1.msra.mxu1 %v14788_v35 }
 0x5d3   :  { %23213 = vst [vmem:[#allocation70_spill] sm:$0xff] %v22153_v60  ;;  %v14953_v42 = vmul.f32 %v22153_v60, %v23214_v14  ;;  %15024 = vmatprep.mubr.f32.mxu0 %v22830_v59  ;;  %v23218_v14 = vld [vmem:[#allocation32_spill] sm:$0xff]  ;;  %v23219_v60 = vld [vmem:[#allocation34_spill] sm:$0xff] }
 0x5d4   :  { %18421 = vmatmul.mubr.msk.f32.vlgmr.msra.gmra.mrb[6].mxu1 %vm131_vm2, %v18419_v62  ;;  %v14945_v45 = vpop.permute.xlu1 %14944 }
 0x5d5   :  { %v22162_v34 = vsel %vm1380_vm8, %v14943_v41, %v14945_v45  ;;  %v14947_v4 = vpop.permute.xlu0 %14946  ;;  %14960 = vmatprep.subr.mxu0 %v14953_v42  ;;  %15095 = vmatprep.mubr.f32.mxu1 %v22830_v59  ;;  %v18422_v41 = vld [vmem:[%s22543_s1 + $0x110] sm:$0xff] }
 0x5d6   :  { %23215 = vst [vmem:[#allocation71_spill] sm:$0xff] %v22162_v34  ;;  %v22167_v36 = vsel %vm1380_vm8, %v14945_v45, %v14947_v4  ;;  %v22171_v35 = vsel %vm1380_vm8, %v14947_v4, %v14941_v58  ;;  %v23220_v42 = vld [vmem:[#allocation33_spill] sm:$0xff]  ;;  %v23222_v4 = vld [vmem:[#allocation35_spill] sm:$0xff]  ;;  %vm23243_vm8 = vmmov %vm23240_vm5 }
 0x5d7   :  { %23216 = vst [vmem:[#allocation65_spill] sm:$0xff] %v22167_v36  ;;  %23217 = vst [vmem:[#allocation66_spill] sm:$0xff] %v22171_v35  ;;  %v14952_v62 = vmul.f32 %v22171_v35, %v23218_v14  ;;  %v14955_v8 = vmul.f32 %v22167_v36, %v23219_v60  ;;  %v14954_v55 = vmul.f32 %v22162_v34, %v23220_v42 }
 0x5d8   :  { %v15107_v9 = vpop.permute.xlu1 %15106 }
 0x5d9   :  { %v15109_v45 = vpop.permute.xlu0 %15108  ;;  %14961 = vmatpush1.msra.mxu0 %v14952_v62  ;;  %15031 = vmatprep.subr.mxu1 %v14955_v8 }
 0x5da   :  { %v22184_v58 = vsel %vm1569_vm9, %v15107_v9, %v15109_v45  ;;  %18423 = vmatmul.mubr.msk.f32.vlgmr.msra.gmra.mrb[6].mxu0 %vm131_vm2, %v18422_v41  ;;  %15032 = vmatpush1.msra.mxu1 %v14954_v55 }
 0x5db   :  { %23221 = vst [vmem:[#allocation97_spill] sm:$0xff] %v22184_v58  ;;  %v15119_v60 = vmul.f32 %v22184_v58, %v23222_v4  ;;  %15190 = vmatprep.mubr.f32.mxu0 %v22830_v59  ;;  %v23226_v4 = vld [vmem:[#allocation37_spill] sm:$0xff]  ;;  %v23227_v58 = vld [vmem:[#allocation39_spill] sm:$0xff] }
 0x5dc   :  { %18424 = vmatmul.mubr.msk.f32.vlgmr.msra.gmra.mrb[6].mxu1 %vm131_vm2, %v18422_v41  ;;  %v15111_v14 = vpop.permute.xlu1 %15110 }
 0x5dd   :  { %v22193_v42 = vsel %vm1569_vm9, %v15109_v45, %v15111_v14  ;;  %v15113_v8 = vpop.permute.xlu0 %15112  ;;  %15126 = vmatprep.subr.mxu0 %v15119_v60  ;;  %15261 = vmatprep.mubr.f32.mxu1 %v22830_v59  ;;  %v18425_v45 = vld [vmem:[%s22543_s1 + $0x118] sm:$0xff] }
 0x5de   :  { %23223 = vst [vmem:[#allocation36_spill] sm:$0xff] %v22193_v42  ;;  %v22198_v62 = vsel %vm1569_vm9, %v15111_v14, %v15113_v8  ;;  %v22202_v55 = vsel %vm1569_vm9, %v15113_v8, %v15107_v9  ;;  %v23228_v60 = vld [vmem:[#allocation38_spill] sm:$0xff]  ;;  %v23229_v8 = vld [vmem:[#allocation41_spill] sm:$0xff]  ;;  %vm23247_vm9 = vcmp.lt.s32.totalorder %v19128_v13, 127 }
 0x5df   :  { %23224 = vst [vmem:[#allocation101_spill] sm:$0xff] %v22198_v62  ;;  %23225 = vst [vmem:[#allocation99_spill] sm:$0xff] %v22202_v55  ;;  %v15118_v41 = vmul.f32 %v22202_v55, %v23226_v4  ;;  %v15121_v36 = vmul.f32 %v22198_v62, %v23227_v58  ;;  %v15120_v35 = vmul.f32 %v22193_v42, %v23228_v60  ;;  %v23231_v55 = vld [vmem:[#allocation43_spill] sm:$0xff] }
 0x5e0   :  { %v15273_v34 = vpop.permute.xlu1 %15272  ;;  %vm23252_vm12 = vmmov %vm23247_vm9 }
 0x5e1   :  { %v15275_v14 = vpop.permute.xlu0 %15274  ;;  %15127 = vmatpush1.msra.mxu0 %v15118_v41  ;;  %15197 = vmatprep.subr.mxu1 %v15121_v36 }
 0x5e2   :  { %v15282_v9 = vsel %vm1759_vm10, %v15273_v34, %v15275_v14  ;;  %18426 = vmatmul.mubr.msk.f32.vlgmr.msra.gmra.mrb[6].mxu0 %vm131_vm2, %v18425_v45  ;;  %15198 = vmatpush1.msra.mxu1 %v15120_v35 }
 0x5e3   :  { %v15285_v4 = vmul.f32 %v15282_v9, %v23229_v8  ;;  %15356 = vmatprep.mubr.f32.mxu0 %v22830_v59  ;;  %v23230_v9 = vld [vmem:[#allocation44_spill] sm:$0xff] }
 0x5e4   :  { %18427 = vmatmul.mubr.msk.f32.vlgmr.msra.gmra.mrb[6].mxu1 %vm131_vm2, %v18425_v45  ;;  %v15277_v58 = vpop.permute.xlu1 %15276  ;;  %v18428_v45 = vld [vmem:[%s22543_s1 + $0x120] sm:$0xff] }
 0x5e5   :  { %v15281_v60 = vsel %vm1759_vm10, %v15275_v14, %v15277_v58  ;;  %v15279_v62 = vpop.permute.xlu0 %15278  ;;  %15292 = vmatprep.subr.mxu0 %v15285_v4  ;;  %15427 = vmatprep.mubr.f32.mxu1 %v22830_v59 }
 0x5e6   :  { %v15280_v36 = vsel %vm1759_vm10, %v15277_v58, %v15279_v62  ;;  %v15283_v35 = vsel %vm1759_vm10, %v15279_v62, %v15273_v34  ;;  %v15286_v14 = vmul.f32 %v15281_v60, %v23231_v55  ;;  %v23232_v34 = vld [vmem:[#allocation45_spill] sm:$0xff]  ;;  %vm23248_vm10 = vmmov %vm23247_vm9 }
 0x5e7   :  { %v15284_v41 = vmul.f32 %v15283_v35, %v23084_v11  ;;  %v15287_v8 = vmul.f32 %v15280_v36, %v23230_v9  ;;  %v23233_v9 = vld [vmem:[#allocation48_spill] sm:$0xff] }
 0x5e8   :  { %v15439_v42 = vpop.permute.xlu1 %15438 }
 0x5e9   :  { %v15441_v4 = vpop.permute.xlu0 %15440  ;;  %15293 = vmatpush1.msra.mxu0 %v15284_v41  ;;  %15363 = vmatprep.subr.mxu1 %v15287_v8 }
 0x5ea   :  { %v15448_v58 = vsel %vm1949_vm11, %v15439_v42, %v15441_v4  ;;  %18429 = vmatmul.mubr.msk.f32.vlgmr.msra.gmra.mrb[6].mxu0 %vm131_vm2, %v18428_v45  ;;  %15364 = vmatpush1.msra.mxu1 %v15286_v14 }
 0x5eb   :  { %v15451_v11 = vmul.f32 %v15448_v58, %v23232_v34  ;;  %15522 = vmatprep.mubr.f32.mxu0 %v22830_v59 }
 0x5ec   :  { %18430 = vmatmul.mubr.msk.f32.vlgmr.msra.gmra.mrb[6].mxu1 %vm131_vm2, %v18428_v45  ;;  %v15443_v62 = vpop.permute.xlu1 %15442  ;;  %v18431_v45 = vld [vmem:[%s22543_s1 + $0x128] sm:$0xff] }
 0x5ed   :  { %v15447_v55 = vsel %vm1949_vm11, %v15441_v4, %v15443_v62  ;;  %v15445_v60 = vpop.permute.xlu0 %15444  ;;  %15458 = vmatprep.subr.mxu0 %v15451_v11  ;;  %15593 = vmatprep.mubr.f32.mxu1 %v22830_v59 }
 0x5ee   :  { %v15446_v36 = vsel %vm1949_vm11, %v15443_v62, %v15445_v60  ;;  %v15449_v35 = vsel %vm1949_vm11, %v15445_v60, %v15439_v42  ;;  %v15452_v14 = vmul.f32 %v15447_v55, %v23092_v30  ;;  %v23235_v42 = vld [vmem:[#allocation49_spill] sm:$0xff]  ;;  %vm23250_vm11 = vmmov %vm23247_vm9 }
 0x5ef   :  { %v15450_v41 = vmul.f32 %v15449_v35, %v23089_v27  ;;  %v15453_v8 = vmul.f32 %v15446_v36, %v23233_v9  ;;  %v23239_v35 = vld [vmem:[#allocation52_spill] sm:$0xff]  ;;  %v18434_v9 = vld [vmem:[%s22543_s1 + $0x130] sm:$0xff] }
 0x5f0   :  { %v15605_v4 = vpop.permute.xlu1 %15604 }
 0x5f1   :  { %v15607_v58 = vpop.permute.xlu0 %15606  ;;  %15459 = vmatpush1.msra.mxu0 %v15450_v41  ;;  %15529 = vmatprep.subr.mxu1 %v15453_v8 }
 0x5f2   :  { %v15614_v34 = vsel %vm23234_vm0, %v15605_v4, %v15607_v58  ;;  %18432 = vmatmul.mubr.msk.f32.vlgmr.msra.gmra.mrb[6].mxu0 %vm131_vm2, %v18431_v45  ;;  %15530 = vmatpush1.msra.mxu1 %v15452_v14  ;;  %vm23256_vm0 = vmmov %vm23254_vm13 }
 0x5f3   :  { %v15617_v27 = vmul.f32 %v15614_v34, %v23235_v42  ;;  %15688 = vmatprep.mubr.f32.mxu0 %v22830_v59 }
 0x5f4   :  { %18433 = vmatmul.mubr.msk.f32.vlgmr.msra.gmra.mrb[6].mxu1 %vm131_vm2, %v18431_v45  ;;  %v15609_v11 = vpop.permute.xlu1 %15608 }
 0x5f5   :  { %v15613_v30 = vsel %vm23236_vm1, %v15607_v58, %v15609_v11  ;;  %v15611_v62 = vpop.permute.xlu0 %15610  ;;  %15624 = vmatprep.subr.mxu0 %v15617_v27  ;;  %15759 = vmatprep.mubr.f32.mxu1 %v22830_v59  ;;  %vm23258_vm1 = vmmov %vm23256_vm0 }
 0x5f6   :  { %v15612_v55 = vsel %vm23237_vm3, %v15609_v11, %v15611_v62  ;;  %v15615_v60 = vsel %vm23238_vm4, %v15611_v62, %v15605_v4  ;;  %v15618_v8 = vmul.f32 %v15613_v30, %v23100_v5  ;;  %v23244_v11 = vld [vmem:[#allocation54_spill] sm:$0xff]  ;;  %v23245_v30 = vld [vmem:[#allocation56_spill] sm:$0xff]  ;;  %vm23259_vm3 = vcmp.lt.s32.totalorder %v19128_v13, 120  ;;  %v18452_v13 = vld [vmem:[%s22543_s1 + $0x160] sm:$0xff] }
 0x5f7   :  { %v15616_v36 = vmul.f32 %v15615_v60, %v23097_v15  ;;  %v15619_v41 = vmul.f32 %v15612_v55, %v23239_v35  ;;  %v18437_v55 = vld [vmem:[%s22543_s1 + $0x138] sm:$0xff]  ;;  %v23246_v60 = vld [vmem:[#allocation55_spill] sm:$0xff]  ;;  %vm23260_vm4 = vmmov %vm23259_vm3 }
 0x5f8   :  { %v15771_v45 = vpop.permute.xlu1 %15770 }
 0x5f9   :  { %v15773_v14 = vpop.permute.xlu0 %15772  ;;  %15625 = vmatpush1.msra.mxu0 %v15616_v36  ;;  %15695 = vmatprep.subr.mxu1 %v15619_v41 }
 0x5fa   :  { %v15780_v58 = vsel %vm23240_vm5, %v15771_v45, %v15773_v14  ;;  %18435 = vmatmul.mubr.msk.f32.vlgmr.msra.gmra.mrb[6].mxu0 %vm131_vm2, %v18434_v9  ;;  %15696 = vmatpush1.msra.mxu1 %v15618_v8  ;;  %vm23261_vm5 = vmmov %vm23259_vm3 }
 0x5fb   :  { %v15783_v15 = vmul.f32 %v15780_v58, %v23099_v26  ;;  %15854 = vmatprep.mubr.f32.mxu0 %v22830_v59  ;;  %v23249_v58 = vld [vmem:[#allocation57_spill] sm:$0xff] }
 0x5fc   :  { %18436 = vmatmul.mubr.msk.f32.vlgmr.msra.gmra.mrb[6].mxu1 %vm131_vm2, %v18434_v9  ;;  %v15775_v4 = vpop.permute.xlu1 %15774 }
 0x5fd   :  { %v15779_v5 = vsel %vm23241_vm6, %v15773_v14, %v15775_v4  ;;  %v15777_v34 = vpop.permute.xlu0 %15776  ;;  %15790 = vmatprep.subr.mxu0 %v15783_v15  ;;  %15925 = vmatprep.mubr.f32.mxu1 %v22830_v59  ;;  %vm23262_vm6 = vmmov %vm23259_vm3 }
 0x5fe   :  { %v15778_v42 = vsel %vm23242_vm7, %v15775_v4, %v15777_v34  ;;  %v15781_v27 = vsel %vm23243_vm8, %v15777_v34, %v15771_v45  ;;  %v15784_v36 = vmul.f32 %v15779_v5, %v23246_v60  ;;  %v23257_v60 = vld [vmem:[#allocation62_spill] sm:$0xff] }
 0x5ff   :  { %v15782_v26 = vmul.f32 %v15781_v27, %v23244_v11  ;;  %v15785_v62 = vmul.f32 %v15778_v42, %v23245_v30 }
 0x600   :  { %v16087_v35 = vpop.permute.xlu1 %16086 }
 0x601   :  { %v16089_v41 = vpop.permute.xlu0 %16088  ;;  %15791 = vmatpush1.msra.mxu0 %v15782_v26  ;;  %15861 = vmatprep.subr.mxu1 %v15785_v62  ;;  %v23255_v62 = vld [vmem:[#allocation61_spill] sm:$0xff] }
 0x602   :  { %18438 = vmatmul.mubr.msk.f32.vlgmr.msra.gmra.mrb[6].mxu0 %vm131_vm2, %v18437_v55  ;;  %15862 = vmatpush1.msra.mxu1 %v15784_v36  ;;  %v16096_v14 = vsel %vm23248_vm10, %v16087_v35, %v16089_v41 }
 0x603   :  { %15940 = vmatprep.subr.mxu0 %v21790_v50  ;;  %16011 = vmatprep.subr.mxu1 %v21798_v25  ;;  %v16098_v34 = vmul.f32 %v16096_v14, %v23109_v39 }
 0x604   :  { %18439 = vmatmul.mubr.msk.f32.vlgmr.msra.gmra.mrb[6].mxu1 %vm131_vm2, %v18437_v55  ;;  %15941 = vmatpush1.msra.mxu0 %v21788_v48  ;;  %v16091_v9 = vpop.permute.xlu1 %16090  ;;  %v23251_v48 = vld [vmem:[#allocation58_spill] sm:$0xff] }
 0x605   :  { %16012 = vmatpush1.msra.mxu1 %v21796_v22  ;;  %v16095_v8 = vsel %vm23247_vm9, %v16089_v41, %v16091_v9  ;;  %v16093_v45 = vpop.permute.xlu0 %16092  ;;  %16004 = vmatprep.mubr.f32.mxu0 %v22830_v59  ;;  %v18440_v22 = vld [vmem:[%s22543_s1 + $0x140] sm:$0xff] }
 0x606   :  { %v16099_v50 = vmul.f32 %v16095_v8, %v23249_v58  ;;  %v16097_v25 = vsel %vm23250_vm11, %v16093_v45, %v16087_v35  ;;  %16075 = vmatprep.mubr.f32.mxu1 %v22830_v59  ;;  %v16094_v4 = vsel %vm23252_vm12, %v16091_v9, %v16093_v45  ;;  %v18443_v35 = vld [vmem:[%s22543_s1 + $0x148] sm:$0xff] }
 0x607   :  { %v16101_v15 = vmul.f32 %v16097_v25, %v23251_v48  ;;  %v16100_v27 = vmul.f32 %v16094_v4, %v23112_v56 }
 0x608   :  { %16106 = vmatprep.subr.mxu0 %v16099_v50  ;;  %v16253_v5 = vpop.permute.xlu1 %16252 }
 0x609   :  { %v16255_v42 = vpop.permute.xlu0 %16254  ;;  %16177 = vmatprep.subr.mxu1 %v16101_v15 }
 0x60a   :  { %18441 = vmatmul.mubr.msk.f32.vlgmr.msra.gmra.mrb[6].mxu0 %vm131_vm2, %v18440_v22  ;;  %v16262_v39 = vsel %vm23254_vm13, %v16253_v5, %v16255_v42 }
 0x60b   :  { %16107 = vmatpush1.msra.mxu0 %v16098_v34  ;;  %16170 = vmatprep.mubr.f32.mxu0 %v22830_v59  ;;  %v16264_v8 = vmul.f32 %v16262_v39, %v22982_v23  ;;  %v18449_v39 = vld [vmem:[%s22543_s1 + $0x158] sm:$0xff] }
 0x60c   :  { %18442 = vmatmul.mubr.msk.f32.vlgmr.msra.gmra.mrb[6].mxu1 %vm131_vm2, %v18440_v22  ;;  %v16257_v11 = vpop.permute.xlu1 %16256  ;;  %v18446_v22 = vld [vmem:[%s22543_s1 + $0x150] sm:$0xff] }
 0x60d   :  { %16178 = vmatpush1.msra.mxu1 %v16100_v27  ;;  %v16261_v26 = vsel %vm23253_vm15, %v16255_v42, %v16257_v11  ;;  %v16259_v30 = vpop.permute.xlu0 %16258  ;;  %16241 = vmatprep.mubr.f32.mxu1 %v22830_v59 }
 0x60e   :  { %v16265_v55 = vmul.f32 %v16261_v26, %v23255_v62  ;;  %v16263_v56 = vsel %vm23256_vm0, %v16259_v30, %v16253_v5  ;;  %v16260_v41 = vsel %vm23258_vm1, %v16257_v11, %v16259_v30 }
 0x60f   :  { %v16267_v36 = vmul.f32 %v16263_v56, %v23257_v60  ;;  %v16266_v14 = vmul.f32 %v16260_v41, %v23118_v44  ;;  %v16751_v56 = vmul.f32 %v21963_v38, %v19872_v10  ;;  %v16752_v10 = vmul.f32 %v21967_v32, %v19900_v40  ;;  %v23267_v32 = vld [vmem:[#allocation74_spill] sm:$0xff] }
 0x610   :  { %16272 = vmatprep.subr.mxu0 %v16265_v55  ;;  %v16419_v9 = vpop.permute.xlu1 %16418 }
 0x611   :  { %v16421_v45 = vpop.permute.xlu0 %16420  ;;  %16343 = vmatprep.subr.mxu1 %v16267_v36  ;;  %v23271_v36 = vld [vmem:[#allocation77_spill] sm:$0xff] }
 0x612   :  { %18444 = vmatmul.mubr.msk.f32.vlgmr.msra.gmra.mrb[6].mxu0 %vm131_vm2, %v18443_v35  ;;  %v16428_v23 = vsel %vm23260_vm4, %v16419_v9, %v16421_v45 }
 0x613   :  { %16273 = vmatpush1.msra.mxu0 %v16264_v8  ;;  %16336 = vmatprep.mubr.f32.mxu0 %v22830_v59  ;;  %v16430_v34 = vmul.f32 %v16428_v23, %v22989_v20  ;;  %v23274_v8 = vld [vmem:[#allocation112_spill] sm:$0xff]  ;;  %v23277_v23 = vld [vmem:[#allocation79_spill] sm:$0xff] }
 0x614   :  { %18445 = vmatmul.mubr.msk.f32.vlgmr.msra.gmra.mrb[6].mxu1 %vm131_vm2, %v18443_v35  ;;  %v16423_v58 = vpop.permute.xlu1 %16422  ;;  %v23272_v35 = vld [vmem:[#allocation47_spill] sm:$0xff] }
 0x615   :  { %16344 = vmatpush1.msra.mxu1 %v16266_v14  ;;  %v16427_v50 = vsel %vm23259_vm3, %v16421_v45, %v16423_v58  ;;  %v16425_v25 = vpop.permute.xlu0 %16424  ;;  %16407 = vmatprep.mubr.f32.mxu1 %v22830_v59  ;;  %v17367_v41 = vmul.f32 %v23272_v35, %v23271_v36  ;;  %v23275_v14 = vld [vmem:[#allocation78_spill] sm:$0xff]  ;;  %v23310_v36 = vld [vmem:[#allocation97_spill] sm:$0xff] }
 0x616   :  { %v16431_v48 = vmul.f32 %v16427_v50, %v23117_v49  ;;  %v16429_v44 = vsel %vm23261_vm5, %v16425_v25, %v16419_v9  ;;  %v16426_v4 = vsel %vm23262_vm6, %v16423_v58, %v16425_v25  ;;  %v23273_v9 = vld [vmem:[#allocation76_spill] sm:$0xff]  ;;  %v23276_v58 = vld [vmem:[#allocation53_spill] sm:$0xff]  ;;  %v18464_v25 = vld [vmem:[%s22543_s1 + $0x180] sm:$0xff] }
 0x617   :  { %v16433_v15 = vmul.f32 %v16429_v44, %v23119_v37  ;;  %v16432_v49 = vmul.f32 %v16426_v4, %v22990_v0  ;;  %v17214_v45 = vmul.f32 %v23274_v8, %v23273_v9  ;;  %v17369_v50 = vmul.f32 %v23276_v58, %v23275_v14  ;;  %v23312_v9 = vld [vmem:[#allocation101_spill] sm:$0xff] }
 0x618   :  { %16438 = vmatprep.subr.mxu0 %v16431_v48  ;;  %v16585_v5 = vpop.permute.xlu1 %16584  ;;  %v23278_v48 = vld [vmem:[#allocation46_spill] sm:$0xff] }
 0x619   :  { %v16587_v42 = vpop.permute.xlu0 %16586  ;;  %16509 = vmatprep.subr.mxu1 %v16433_v15  ;;  %v17366_v44 = vmul.f32 %v23278_v48, %v23277_v23  ;;  %v23279_v15 = vld [vmem:[#allocation81_spill] sm:$0xff] }
 0x61a   :  { %18447 = vmatmul.mubr.msk.f32.vlgmr.msra.gmra.mrb[6].mxu0 %vm131_vm2, %v18446_v22  ;;  %v16594_v20 = vsel %vm3236_vm14, %v16585_v5, %v16587_v42 }
 0x61b   :  { %16439 = vmatpush1.msra.mxu0 %v16430_v34  ;;  %16502 = vmatprep.mubr.f32.mxu0 %v22830_v59  ;;  %v16596_v55 = vmul.f32 %v16594_v20, %v19854_v24  ;;  %v16750_v24 = vmul.f32 %v21949_v61, %v19897_v6  ;;  %v23282_v34 = vld [vmem:[#allocation50_spill] sm:$0xff]  ;;  %v23285_v20 = vld [vmem:[#allocation83_spill] sm:$0xff] }
 0x61c   :  { %18448 = vmatmul.mubr.msk.f32.vlgmr.msra.gmra.mrb[6].mxu1 %vm131_vm2, %v18446_v22  ;;  %v16589_v37 = vpop.permute.xlu1 %16588  ;;  %v23280_v22 = vld [vmem:[#allocation59_spill] sm:$0xff] }
 0x61d   :  { %16510 = vmatpush1.msra.mxu1 %v16432_v49  ;;  %v16593_v27 = vsel %vm3236_vm14, %v16587_v42, %v16589_v37  ;;  %v16591_v11 = vpop.permute.xlu0 %16590  ;;  %16573 = vmatprep.mubr.f32.mxu1 %v22830_v59  ;;  %v17521_v4 = vmul.f32 %v23280_v22, %v23279_v15  ;;  %v23283_v49 = vld [vmem:[#allocation82_spill] sm:$0xff] }
 0x61e   :  { %v16597_v26 = vmul.f32 %v16593_v27, %v19862_v12  ;;  %v16595_v0 = vsel %vm3236_vm14, %v16591_v11, %v16585_v5  ;;  %v16592_v62 = vsel %vm3236_vm14, %v16589_v37, %v16591_v11  ;;  %v23281_v5 = vld [vmem:[#allocation80_spill] sm:$0xff]  ;;  %v23284_v37 = vld [vmem:[#allocation67_spill] sm:$0xff] }
 0x61f   :  { %v16599_v30 = vmul.f32 %v16595_v0, %v19865_v57  ;;  %v16598_v12 = vmul.f32 %v16592_v62, %v19859_v2  ;;  %v16753_v57 = vmul.f32 %v21971_v43, %v19881_v46  ;;  %v16905_v2 = vmul.f32 %v21924_v18, %v19908_v52  ;;  %v23268_v43 = vld [vmem:[#allocation42_spill] sm:$0xff]  ;;  %v18467_v11 = vld [vmem:[%s22543_s1 + $0x188] sm:$0xff] }
 0x620   :  { %16604 = vmatprep.subr.mxu0 %v16597_v26  ;;  %v16907_v46 = vmul.f32 %v21932_v1, %v19905_v7  ;;  %v18455_v7 = vld [vmem:[%s22543_s1 + $0x168] sm:$0xff]  ;;  %v16904_v1 = vmul.f32 %v21914_v29, %v19928_v51  ;;  %v18458_v51 = vld [vmem:[%s22543_s1 + $0x170] sm:$0xff]  ;;  %v17368_v42 = vmul.f32 %v23282_v34, %v23281_v5  ;;  %v17523_v27 = vmul.f32 %v23284_v37, %v23283_v49  ;;  %v23286_v26 = vld [vmem:[#allocation51_spill] sm:$0xff] }
 0x621   :  { %16675 = vmatprep.subr.mxu1 %v16599_v30  ;;  %v23266_v29 = vld [vmem:[#allocation108_spill] sm:$0xff]  ;;  %v17520_v0 = vmul.f32 %v23286_v26, %v23285_v20  ;;  %v23287_v30 = vld [vmem:[#allocation85_spill] sm:$0xff] }
 0x622   :  { %18450 = vmatmul.mubr.msk.f32.vlgmr.msra.gmra.mrb[6].mxu0 %vm131_vm2, %v18449_v39 }
 0x623   :  { %16605 = vmatpush1.msra.mxu0 %v16596_v55  ;;  %16668 = vmatprep.mubr.f32.mxu0 %v22830_v59  ;;  %v23289_v55 = vld [vmem:[#allocation84_spill] sm:$0xff] }
 0x624   :  { %18451 = vmatmul.mubr.msk.f32.vlgmr.msra.gmra.mrb[6].mxu1 %vm131_vm2, %v18449_v39  ;;  %16758 = vmatprep.subr.mxu0 %v16751_v56  ;;  %v23288_v39 = vld [vmem:[#allocation68_spill] sm:$0xff] }
 0x625   :  { %16676 = vmatpush1.msra.mxu1 %v16598_v12  ;;  %16739 = vmatprep.mubr.f32.mxu1 %v22830_v59  ;;  %v17675_v62 = vmul.f32 %v23288_v39, %v23287_v30  ;;  %v23290_v56 = vld [vmem:[#allocation60_spill] sm:$0xff] }
 0x626   :  { %16829 = vmatprep.subr.mxu1 %v16753_v57  ;;  %v17522_v12 = vmul.f32 %v23290_v56, %v23289_v55  ;;  %v23291_v57 = vld [vmem:[#allocation86_spill] sm:$0xff] }
 0x62a   :  { %18453 = vmatmul.mubr.msk.f32.vlgmr.msra.gmra.mrb[6].mxu0 %vm131_vm2, %v18452_v13 }
 0x62b   :  { %16759 = vmatpush1.msra.mxu0 %v16750_v24  ;;  %16822 = vmatprep.mubr.f32.mxu0 %v22830_v59 }
 0x62c   :  { %18454 = vmatmul.mubr.msk.f32.vlgmr.msra.gmra.mrb[6].mxu1 %vm131_vm2, %v18452_v13  ;;  %16912 = vmatprep.subr.mxu0 %v16905_v2  ;;  %v23292_v13 = vld [vmem:[#allocation63_spill] sm:$0xff]  ;;  %v18470_v2 = vld [vmem:[%s22543_s1 + $0x190] sm:$0xff] }
 0x62d   :  { %16830 = vmatpush1.msra.mxu1 %v16752_v10  ;;  %v9399_v38 = vpop.permute.xlu1 %9398  ;;  %16893 = vmatprep.mubr.f32.mxu1 %v22830_v59  ;;  %v17677_v24 = vmul.f32 %v23292_v13, %v23291_v57  ;;  %v23293_v10 = vld [vmem:[#allocation87_spill] sm:$0xff] }
 0x62e   :  { %16983 = vmatprep.subr.mxu1 %v16907_v46  ;;  %v9401_v6 = vadd.f32 %v9399_v38, %v21776_v17  ;;  %v9402_v52 = vadd.f32 %v9399_v38, %v21778_v21  ;;  %v9403_v40 = vadd.f32 %v9399_v38, %v21781_v47  ;;  %v9404_v18 = vadd.f32 %v9399_v38, %v21784_v33  ;;  %v23294_v46 = vld [vmem:[#allocation64_spill] sm:$0xff]  ;;  %v18138_v14 = vpop.permute.xlu0 %18137 }
 0x62f   :  { %v17059_v17 = vmul.f32 %v22001_v54, %v19933_v31  ;;  %v16906_v21 = vmul.f32 %v21928_v19, %v23122_v16  ;;  %v17061_v47 = vmul.f32 %v22010_v53, %v23124_v28  ;;  %v17058_v31 = vmul.f32 %v21988_v63, %v23125_v3  ;;  %v23263_v16 = vld [vmem:[#allocation73_spill] sm:$0xff]  ;;  %v23264_v19 = vld [vmem:[#allocation110_spill] sm:$0xff]  ;;  %v23265_v28 = vld [vmem:[#allocation72_spill] sm:$0xff] }
 0x630   :  { %9405 = vst [vmem:[%s22545_s4] sm:$0xff] %v9401_v6  ;;  %9406 = vst [vmem:[%s22545_s4 + $0x8] sm:$0xff] %v9402_v52  ;;  %v17213_v33 = vmul.f32 %v23264_v19, %v23263_v16  ;;  %v17060_v61 = vmul.f32 %v23266_v29, %v23265_v28  ;;  %v17215_v54 = vmul.f32 %v23268_v43, %v23267_v32  ;;  %v18461_v3 = vld [vmem:[%s22543_s1 + $0x178] sm:$0xff]  ;;  %v23269_v63 = vld [vmem:[#allocation75_spill] sm:$0xff] }
 0x631   :  { %9407 = vst [vmem:[%s22545_s4 + $0x10] sm:$0xff] %v9403_v40  ;;  %9408 = vst [vmem:[%s22545_s4 + $0x18] sm:$0xff] %v9404_v18  ;;  %v23270_v53 = vld [vmem:[#allocation113_spill] sm:$0xff]  ;;  %v17674_v38 = vmul.f32 %v23294_v46, %v23293_v10  ;;  %v23296_v52 = vld [vmem:[#allocation71_spill] sm:$0xff] }
 0x632   :  { %18456 = vmatmul.mubr.msk.f32.vlgmr.msra.gmra.mrb[6].mxu0 %vm131_vm2, %v18455_v7  ;;  %v17212_v60 = vmul.f32 %v23270_v53, %v23269_v63  ;;  %v23295_v6 = vld [vmem:[#allocation89_spill] sm:$0xff]  ;;  %v23297_v18 = vld [vmem:[#allocation88_spill] sm:$0xff]  ;;  %v23302_v16 = vld [vmem:[#allocation70_spill] sm:$0xff] }
 0x633   :  { %16913 = vmatpush1.msra.mxu0 %v16904_v1  ;;  %16976 = vmatprep.mubr.f32.mxu0 %v22830_v59  ;;  %v17829_v40 = vmul.f32 %v23296_v52, %v23295_v6  ;;  %v23304_v28 = vld [vmem:[#allocation36_spill] sm:$0xff]  ;;  %v23306_v32 = vld [vmem:[#allocation65_spill] sm:$0xff]  ;;  %v18476_v53 = vld [vmem:[%s22543_s1 + $0x1a0] sm:$0xff] }
 0x634   :  { %18457 = vmatmul.mubr.msk.f32.vlgmr.msra.gmra.mrb[6].mxu1 %vm131_vm2, %v18455_v7  ;;  %17066 = vmatprep.subr.mxu0 %v17059_v17  ;;  %v23298_v7 = vld [vmem:[#allocation69_spill] sm:$0xff]  ;;  %v23299_v17 = vld [vmem:[#allocation90_spill] sm:$0xff] }
 0x635   :  { %16984 = vmatpush1.msra.mxu1 %v16906_v21  ;;  %17047 = vmatprep.mubr.f32.mxu1 %v22830_v59  ;;  %v17676_v1 = vmul.f32 %v23298_v7, %v23297_v18  ;;  %v23300_v21 = vld [vmem:[#allocation66_spill] sm:$0xff] }
 0x636   :  { %17137 = vmatprep.subr.mxu1 %v17061_v47  ;;  %v17831_v47 = vmul.f32 %v23300_v21, %v23299_v17 }
 0x63a   :  { %18459 = vmatmul.mubr.msk.f32.vlgmr.msra.gmra.mrb[6].mxu0 %vm131_vm2, %v18458_v51 }
 0x63b   :  { %17067 = vmatpush1.msra.mxu0 %v17058_v31  ;;  %17130 = vmatprep.mubr.f32.mxu0 %v22830_v59  ;;  %v23301_v31 = vld [vmem:[#allocation91_spill] sm:$0xff] }
 0x63c   :  { %18460 = vmatmul.mubr.msk.f32.vlgmr.msra.gmra.mrb[6].mxu1 %vm131_vm2, %v18458_v51  ;;  %17220 = vmatprep.subr.mxu0 %v17213_v33  ;;  %v18473_v51 = vld [vmem:[%s22543_s1 + $0x198] sm:$0xff]  ;;  %v17828_v19 = vmul.f32 %v23302_v16, %v23301_v31  ;;  %v23303_v33 = vld [vmem:[#allocation93_spill] sm:$0xff] }
 0x63d   :  { %17138 = vmatpush1.msra.mxu1 %v17060_v61  ;;  %17201 = vmatprep.mubr.f32.mxu1 %v22830_v59  ;;  %v17983_v29 = vmul.f32 %v23304_v28, %v23303_v33  ;;  %v23305_v61 = vld [vmem:[#allocation92_spill] sm:$0xff] }
 0x63e   :  { %17291 = vmatprep.subr.mxu1 %v17215_v54  ;;  %v17830_v43 = vmul.f32 %v23306_v32, %v23305_v61  ;;  %v23307_v54 = vld [vmem:[#allocation94_spill] sm:$0xff] }
 0x642   :  { %18462 = vmatmul.mubr.msk.f32.vlgmr.msra.gmra.mrb[6].mxu0 %vm131_vm2, %v18461_v3 }
 0x643   :  { %17221 = vmatpush1.msra.mxu0 %v17212_v60  ;;  %17284 = vmatprep.mubr.f32.mxu0 %v22830_v59  ;;  %v23309_v60 = vld [vmem:[#allocation95_spill] sm:$0xff] }
 0x644   :  { %18463 = vmatmul.mubr.msk.f32.vlgmr.msra.gmra.mrb[6].mxu1 %vm131_vm2, %v18461_v3  ;;  %17374 = vmatprep.subr.mxu0 %v17367_v41  ;;  %v23308_v3 = vld [vmem:[#allocation99_spill] sm:$0xff]  ;;  %v17982_v35 = vmul.f32 %v23310_v36, %v23309_v60  ;;  %v23311_v41 = vld [vmem:[#allocation96_spill] sm:$0xff] }
 0x645   :  { %17292 = vmatpush1.msra.mxu1 %v17214_v45  ;;  %17355 = vmatprep.mubr.f32.mxu1 %v22830_v59  ;;  %v17985_v63 = vmul.f32 %v23308_v3, %v23307_v54  ;;  %v17984_v8 = vmul.f32 %v23312_v9, %v23311_v41  ;;  %v18479_v45 = vld [vmem:[%s22543_s1 + $0x1a8] sm:$0xff] }
 0x646   :  { %17445 = vmatprep.subr.mxu1 %v17369_v50 }
 0x64a   :  { %18465 = vmatmul.mubr.msk.f32.vlgmr.msra.gmra.mrb[6].mxu0 %vm131_vm2, %v18464_v25 }
 0x64b   :  { %17375 = vmatpush1.msra.mxu0 %v17366_v44  ;;  %17438 = vmatprep.mubr.f32.mxu0 %v22830_v59 }
 0x64c   :  { %18466 = vmatmul.mubr.msk.f32.vlgmr.msra.gmra.mrb[6].mxu1 %vm131_vm2, %v18464_v25  ;;  %17528 = vmatprep.subr.mxu0 %v17521_v4 }
 0x64d   :  { %17446 = vmatpush1.msra.mxu1 %v17368_v42  ;;  %17509 = vmatprep.mubr.f32.mxu1 %v22830_v59 }
 0x64e   :  { %17599 = vmatprep.subr.mxu1 %v17523_v27 }
 0x652   :  { %18468 = vmatmul.mubr.msk.f32.vlgmr.msra.gmra.mrb[6].mxu0 %vm131_vm2, %v18467_v11 }
 0x653   :  { %17529 = vmatpush1.msra.mxu0 %v17520_v0  ;;  %17592 = vmatprep.mubr.f32.mxu0 %v22830_v59 }
 0x654   :  { %18469 = vmatmul.mubr.msk.f32.vlgmr.msra.gmra.mrb[6].mxu1 %vm131_vm2, %v18467_v11  ;;  %17682 = vmatprep.subr.mxu0 %v17675_v62 }
 0x655   :  { %17600 = vmatpush1.msra.mxu1 %v17522_v12  ;;  %17663 = vmatprep.mubr.f32.mxu1 %v22830_v59 }
 0x656   :  { %17753 = vmatprep.subr.mxu1 %v17677_v24 }
 0x65a   :  { %18471 = vmatmul.mubr.msk.f32.vlgmr.msra.gmra.mrb[6].mxu0 %vm131_vm2, %v18470_v2 }
 0x65b   :  { %17683 = vmatpush1.msra.mxu0 %v17674_v38  ;;  %17746 = vmatprep.mubr.f32.mxu0 %v22830_v59 }
 0x65c   :  { %18472 = vmatmul.mubr.msk.f32.vlgmr.msra.gmra.mrb[6].mxu1 %vm131_vm2, %v18470_v2  ;;  %17836 = vmatprep.subr.mxu0 %v17829_v40 }
 0x65d   :  { %17754 = vmatpush1.msra.mxu1 %v17676_v1  ;;  %17817 = vmatprep.mubr.f32.mxu1 %v22830_v59 }
 0x65e   :  { %17907 = vmatprep.subr.mxu1 %v17831_v47 }
 0x662   :  { %18474 = vmatmul.mubr.msk.f32.vlgmr.msra.gmra.mrb[6].mxu0 %vm131_vm2, %v18473_v51 }
 0x663   :  { %17837 = vmatpush1.msra.mxu0 %v17828_v19  ;;  %17900 = vmatprep.mubr.f32.mxu0 %v22830_v59 }
 0x664   :  { %18475 = vmatmul.mubr.msk.f32.vlgmr.msra.gmra.mrb[6].mxu1 %vm131_vm2, %v18473_v51  ;;  %17990 = vmatprep.subr.mxu0 %v17983_v29 }
 0x665   :  { %17908 = vmatpush1.msra.mxu1 %v17830_v43  ;;  %17971 = vmatprep.mubr.f32.mxu1 %v22830_v59 }
 0x666   :  { %18061 = vmatprep.subr.mxu1 %v17985_v63 }
 0x66a   :  { %18477 = vmatmul.mubr.msk.f32.vlgmr.msra.gmra.mrb[6].mxu0 %vm131_vm2, %v18476_v53 }
 0x66b   :  { %17991 = vmatpush1.msra.mxu0 %v17982_v35  ;;  %18054 = vmatprep.mubr.f32.mxu0 %v22830_v59 }
 0x66c   :  { %18478 = vmatmul.mubr.msk.f32.vlgmr.msra.gmra.mrb[6].mxu1 %vm131_vm2, %v18476_v53 }
 0x66d   :  { %18062 = vmatpush1.msra.mxu1 %v17984_v8  ;;  %18125 = vmatprep.mubr.f32.mxu1 %v22830_v59 }
 0x672   :  { %18480 = vmatmul.mubr.msk.f32.vlgmr.msra.gmra.mrb[6].mxu0 %vm131_vm2, %v18479_v45 }
 0x674   :  { %18481 = vmatmul.mubr.msk.f32.vlgmr.msra.gmra.mrb[6].mxu1 %vm131_vm2, %v18479_v45 }
 0x745   :  { %v18056_v58 = vpop.f32.mrb[6].mxu0 }
 0x746   :  { %v18140_v50 = vadd.f32 %v18138_v14, %v18056_v58  ;;  %v18058_v25 = vpop.f32.mrb[7].mxu0 }
 0x747   :  { %v18141_v23 = vadd.f32 %v18138_v14, %v18058_v25  ;;  %v18127_v48 = vpop.f32.mrb[6].mxu1 }
 0x748   :  { %18482 = vst [vmem:[%s22545_s4 + $0x20] sm:$0xff] %v18140_v50  ;;  %v18142_v44 = vadd.f32 %v18138_v14, %v18127_v48  ;;  %v18129_v59 = vpop.f32.mrb[7].mxu1 }
 0x749   :  { %18483 = vst [vmem:[%s22545_s4 + $0x28] sm:$0xff] %v18141_v23  ;;  %v18143_v15 = vadd.f32 %v18138_v14, %v18129_v59 }
 0x74a   :  { %18484 = vst [vmem:[%s22545_s4 + $0x30] sm:$0xff] %v18142_v44 }
 0x74b   :  { %18485 = vst [vmem:[%s22545_s4 + $0x38] sm:$0xff] %v18143_v15 }

</bundles_post_ra>
